<compile_context>
chip_gen: v5e
topology: v5e:2x2
jax: 0.10.0
libtpu: 0.0.40
codegen_flags: <defaults>
</compile_context>

<pallas_src>
import jax
import jax.numpy as jnp
from jax.experimental import pallas as pl
from jax.experimental.pallas import tpu as pltpu

IN_FEATURES = 256 * 6 * 6   # 9216 (already a multiple of 128)
HIDDEN = 200
OUT_FEATURES = 74

HIDDEN_P = 256              # lane-padded hidden width
OUT_P = 128                 # lane-padded output width
TB_MAX = 256                # max batch tile (bf16 working set ~15 MiB -> fits all gens)


def _round_up(v, m):
    return ((v + m - 1) // m) * m


def _ceil_div(a, b):
    return -(-a // b)


def _ann_kernel(x_ref, w1_ref, b1_ref, w2_ref, b2_ref, o_ref):
    # fc1: full K=9216 contraction for this batch tile (bf16 MXU, f32 acc)
    h = jnp.dot(x_ref[...], w1_ref[...], preferred_element_type=jnp.float32)
    h = jnp.maximum(h + b1_ref[...], 0.0)          # bias + ReLU (padded cols stay 0)
    # fc2 fused in the same step (bf16 operands again for the native MXU path)
    out = jnp.dot(h.astype(w2_ref.dtype), w2_ref[...],
                  preferred_element_type=jnp.float32)
    o_ref[...] = (out + b2_ref[...]).astype(o_ref.dtype)


def prepare_params(w1, b1, w2, b2):
    """One-time (setup-path) padding + bf16 cast of the weights.

    w1: (9216, 200), b1: (200,), w2: (200, 74), b2: (74,) -- float32,
    stored (in, out).  Biases stay f32 (they are added after f32 accumulation).
    """
    w1p = jnp.pad(w1, ((0, 0), (0, HIDDEN_P - HIDDEN))).astype(jnp.bfloat16)          # (9216, 256)
    b1p = jnp.pad(b1, (0, HIDDEN_P - HIDDEN)).reshape(1, HIDDEN_P).astype(jnp.float32)
    w2p = jnp.pad(w2, ((0, HIDDEN_P - HIDDEN),
                       (0, OUT_P - OUT_FEATURES))).astype(jnp.bfloat16)               # (256, 128)
    b2p = jnp.pad(b2, (0, OUT_P - OUT_FEATURES)).reshape(1, OUT_P).astype(jnp.float32)
    return w1p, b1p, w2p, b2p


def ann_classifier_forward(x, w1p, b1p, w2p, b2p):
    """x: (B, 256, 6, 6) float32 (NCHW). Params from prepare_params. Returns (B, 74) f32."""
    B = x.shape[0]
    x2d = x.reshape(B, IN_FEATURES).astype(jnp.bfloat16)   # torch .view(-1, 9216) + bf16 cast

    # --- batch tiling ---
    # >= 2 grid steps so v7x's two TensorCores both get work, and TB chosen to
    # tile B tightly (minimal dead rows) instead of always padding to TB_MAX.
    n_b = max(2, _ceil_div(B, TB_MAX))
    TB = _round_up(_ceil_div(B, n_b), 8)        # multiple of 8 (f32/bf16 sublanes)
    B_pad = n_b * TB
    if B_pad != B:
        x2d = jnp.pad(x2d, ((0, B_pad - B), (0, 0)))

    out_p = pl.pallas_call(
        _ann_kernel,
        out_shape=jax.ShapeDtypeStruct((B_pad, OUT_P), jnp.float32),
        grid_spec=pltpu.PrefetchScalarGridSpec(
            num_scalar_prefetch=0,
            grid=(n_b,),
            in_specs=[
                # x batch tiles stream through the pipeline (double-buffered).
                pl.BlockSpec((TB, IN_FEATURES), lambda i: (i, 0)),
                # Weights/biases: constant index_map -> DMA'd once, resident in
                # VMEM; single-buffer them to free the never-used second buffer.
                pl.BlockSpec((IN_FEATURES, HIDDEN_P), lambda i: (0, 0),
                             pipeline_mode=pl.Buffered(1)),
                pl.BlockSpec((1, HIDDEN_P), lambda i: (0, 0),
                             pipeline_mode=pl.Buffered(1)),
                pl.BlockSpec((HIDDEN_P, OUT_P), lambda i: (0, 0),
                             pipeline_mode=pl.Buffered(1)),
                pl.BlockSpec((1, OUT_P), lambda i: (0, 0),
                             pipeline_mode=pl.Buffered(1)),
            ],
            out_specs=pl.BlockSpec((TB, OUT_P), lambda i: (i, 0)),
        ),
        compiler_params=pltpu.CompilerParams(
            dimension_semantics=("parallel",),
            vmem_limit_bytes=48 * 1024 * 1024,
        ),
    )(x2d, w1p, b1p, w2p, b2p)

    return out_p[:B, :OUT_FEATURES]


def _init_params(key):
    # Deterministic synthetic init; shapes match nn.Linear(9216, 200), nn.Linear(200, 74),
    # stored (in, out) (i.e. already transposed relative to PyTorch's (out, in)).
    k1, k2, k3, k4 = jax.random.split(key, 4)
    s1 = 1.0 / jnp.sqrt(jnp.float32(IN_FEATURES))
    s2 = 1.0 / jnp.sqrt(jnp.float32(HIDDEN))
    w1 = jax.random.uniform(k1, (IN_FEATURES, HIDDEN), jnp.float32, -s1, s1)
    b1 = jax.random.uniform(k2, (HIDDEN,), jnp.float32, -s1, s1)
    w2 = jax.random.uniform(k3, (HIDDEN, OUT_FEATURES), jnp.float32, -s2, s2)
    b2 = jax.random.uniform(k4, (OUT_FEATURES,), jnp.float32, -s2, s2)
    return w1, b1, w2, b2


if __name__ == "__main__":
    key = jax.random.PRNGKey(0)
    kx, kp = jax.random.split(key)

    B = 2
    x = jax.random.normal(kx, (B, 256, 6, 6), jnp.float32)   # NCHW like PyTorch
    w1, b1, w2, b2 = _init_params(kp)

    # Padding/cast done ONCE, outside the per-call hot path.
    params = prepare_params(w1, b1, w2, b2)

    out = ann_classifier_forward(x, *params)
    out = jax.block_until_ready(out)
    assert out.shape == (B, OUT_FEATURES)

    # Reference with the same bf16-cast operands and f32 accumulation.
    x2d = x.reshape(B, IN_FEATURES)
    xb = x2d.astype(jnp.bfloat16).astype(jnp.float32)
    w1b = w1.astype(jnp.bfloat16).astype(jnp.float32)
    w2b = w2.astype(jnp.bfloat16).astype(jnp.float32)
    h_ref = jnp.maximum(xb @ w1b + b1, 0.0)
    ref = h_ref.astype(jnp.bfloat16).astype(jnp.float32) @ w2b + b2
    assert jnp.allclose(out, ref, atol=1e-2, rtol=1e-2), float(jnp.max(jnp.abs(out - ref)))

    print("KERNEL_OK")
</pallas_src>

<mosaic_0001>
module attributes {stable_mosaic.version = 11 : i64} {
  func.func @_ann_kernel(%arg0: i32, %arg1: memref<8x9216xbf16, #tpu.memory_space<vmem>>, %arg2: memref<9216x256xbf16, #tpu.memory_space<vmem>>, %arg3: memref<1x256xf32, #tpu.memory_space<vmem>>, %arg4: memref<256x128xbf16, #tpu.memory_space<vmem>>, %arg5: memref<1x128xf32, #tpu.memory_space<vmem>>, %arg6: memref<8x128xf32, #tpu.memory_space<vmem>>) attributes {dimension_semantics = [#tpu.dimension_semantics<parallel>], iteration_bounds = array<i64: 2>, scalar_prefetch = 0 : i64, scratch_operands = 0 : i64, tpu.core_type = #tpu.core_type<tc>, window_params = [{transform_indices = @transform_0, window_bounds = array<i64: 8, 9216>}, {pipeline_mode = #tpu.pipeline_mode<synchronous>, transform_indices = @transform_1, window_bounds = array<i64: 9216, 256>}, {pipeline_mode = #tpu.pipeline_mode<synchronous>, transform_indices = @transform_2, window_bounds = array<i64: 1, 256>}, {pipeline_mode = #tpu.pipeline_mode<synchronous>, transform_indices = @transform_3, window_bounds = array<i64: 256, 128>}, {pipeline_mode = #tpu.pipeline_mode<synchronous>, transform_indices = @transform_4, window_bounds = array<i64: 1, 128>}, {transform_indices = @transform_5, window_bounds = array<i64: 8, 128>}]} {
    %c0 = arith.constant 0 : index
    %c0_0 = arith.constant 0 : index
    %0 = vector.load %arg1[%c0, %c0_0] : memref<8x9216xbf16, #tpu.memory_space<vmem>>, vector<8x9216xbf16>
    %c0_1 = arith.constant 0 : index
    %c0_2 = arith.constant 0 : index
    %1 = vector.load %arg2[%c0_1, %c0_2] : memref<9216x256xbf16, #tpu.memory_space<vmem>>, vector<9216x256xbf16>
    %cst = arith.constant dense<0.000000e+00> : vector<8x256xf32>
    %2 = tpu.matmul %0, %1, %cst {dimension_numbers = #tpu.dot_dimension_numbers<[1], [0], [0], [1], [0, 0, 1, 1], [], []>} : vector<8x9216xbf16>, vector<9216x256xbf16>, vector<8x256xf32> -> vector<8x256xf32>
    %c0_3 = arith.constant 0 : index
    %c0_4 = arith.constant 0 : index
    %3 = vector.load %arg3[%c0_3, %c0_4] : memref<1x256xf32, #tpu.memory_space<vmem>>, vector<1x256xf32>
    %4 = vector.broadcast %3 : vector<1x256xf32> to vector<8x256xf32>
    %5 = arith.addf %2, %4 : vector<8x256xf32>
    %cst_5 = arith.constant 0.000000e+00 : f32
    %6 = vector.broadcast %cst_5 : f32 to vector<8x256xf32>
    %7 = arith.maximumf %5, %6 : vector<8x256xf32>
    %8 = arith.truncf %7 : vector<8x256xf32> to vector<8x256xbf16>
    %c0_6 = arith.constant 0 : index
    %c0_7 = arith.constant 0 : index
    %9 = vector.load %arg4[%c0_6, %c0_7] : memref<256x128xbf16, #tpu.memory_space<vmem>>, vector<256x128xbf16>
    %cst_8 = arith.constant dense<0.000000e+00> : vector<8x128xf32>
    %10 = tpu.matmul %8, %9, %cst_8 {dimension_numbers = #tpu.dot_dimension_numbers<[1], [0], [0], [1], [0, 0, 1, 1], [], []>} : vector<8x256xbf16>, vector<256x128xbf16>, vector<8x128xf32> -> vector<8x128xf32>
    %c0_9 = arith.constant 0 : index
    %c0_10 = arith.constant 0 : index
    %11 = vector.load %arg5[%c0_9, %c0_10] : memref<1x128xf32, #tpu.memory_space<vmem>>, vector<1x128xf32>
    %12 = vector.broadcast %11 : vector<1x128xf32> to vector<8x128xf32>
    %13 = arith.addf %10, %12 : vector<8x128xf32>
    %c0_11 = arith.constant 0 : index
    %c0_12 = arith.constant 0 : index
    %14 = vector.load %arg6[%c0_11, %c0_12] : memref<8x128xf32, #tpu.memory_space<vmem>>, vector<8x128xf32>
    tpu.vector_store %arg6[%c0_11, %c0_12], %13 {strides = array<i32>} : memref<8x128xf32, #tpu.memory_space<vmem>>, vector<8x128xf32>,
    return
  }
  func.func @transform_0(%arg0: i32) -> (i32, i32) {
    %c0_i32 = arith.constant 0 : i32
    %c0_i32_0 = arith.constant 0 : i32
    return %arg0, %c0_i32 : i32, i32
  }
  func.func @transform_1(%arg0: i32) -> (i32, i32) {
    %c0_i32 = arith.constant 0 : i32
    %c0_i32_0 = arith.constant 0 : i32
    %c0_i32_1 = arith.constant 0 : i32
    return %c0_i32, %c0_i32_0 : i32, i32
  }
  func.func @transform_2(%arg0: i32) -> (i32, i32) {
    %c0_i32 = arith.constant 0 : i32
    %c0_i32_0 = arith.constant 0 : i32
    %c0_i32_1 = arith.constant 0 : i32
    return %c0_i32, %c0_i32_0 : i32, i32
  }
  func.func @transform_3(%arg0: i32) -> (i32, i32) {
    %c0_i32 = arith.constant 0 : i32
    %c0_i32_0 = arith.constant 0 : i32
    %c0_i32_1 = arith.constant 0 : i32
    return %c0_i32, %c0_i32_0 : i32, i32
  }
  func.func @transform_4(%arg0: i32) -> (i32, i32) {
    %c0_i32 = arith.constant 0 : i32
    %c0_i32_0 = arith.constant 0 : i32
    %c0_i32_1 = arith.constant 0 : i32
    return %c0_i32, %c0_i32_0 : i32, i32
  }
  func.func @transform_5(%arg0: i32) -> (i32, i32) {
    %c0_i32 = arith.constant 0 : i32
    %c0_i32_0 = arith.constant 0 : i32
    return %arg0, %c0_i32 : i32, i32
  }
}

</mosaic_0001>

<bundles_post_ra>
// kernel: tpu_custom_call.1
= control target key start
LH: loop header
LB: loop body
LE: loop exit
PB: predicated region body
PF: predicated region fallthrough
CT: control target
= control target key end

     0   :  { %s16466_s0 = inlined_call_operand.hbm [shape: bf16[16,9216], index: 0, kind: input, shape index: {}]   ;;  %s16467_s1 = inlined_call_operand.hbm [shape: bf16[9216,256], index: 1, kind: input, shape index: {}]   ;;  %s16468_s2 = inlined_call_operand.hbm [shape: f32[1,256], index: 2, kind: input, shape index: {}]   ;;  %s16469_s3 = inlined_call_operand.hbm [shape: bf16[256,128], index: 3, kind: input, shape index: {}]   ;;  %s16470_s4 = inlined_call_operand.hbm [shape: f32[1,128], index: 4, kind: input, shape index: {}]   ;;  %s16471_s5 = inlined_call_operand.hbm [shape: f32[16,128], index: 5, kind: output, shape index: {}]  }
   0x1   :  { %16512 = sst [smem:[#allocation56_spill]] %s16467_s1 }
   0x2   :  { %10 = vsyncpa [#allocation3], 0 }
   0x3   :  { %12 = vsyncpa [#allocation3 + $0x1], 0 }
   0x4   :  { %13 = vsyncpa [#allocation6], 0 }
   0x5   :  { %14 = vsyncpa [#allocation9], 0 }
   0x6   :  { %15 = vsyncpa [#allocation4], 0 }
   0x7   :  { %17 = vsyncpa [#allocation4 + $0x1], 0  ;;  %s15888_s18 = smov 0   ;;  %s15890_s19 = smov 0  }
   0x8   :  { %s15892_s20 = smov 0   ;;  %s15894_s21 = smov 0  }
   0x9 LB: > { %s16513_s1 = sld [smem:[#allocation56_spill]]  ;;  %s15912_s25 = sadd.s32 4294967295, %s15848_s21   ;;  %s15848_s21 = sphi %s15894_s21, %s16604_s21   ;;  %s15844_s20 = sphi %s15892_s20, %s16603_s20   ;;  %s15840_s19 = sphi %s15890_s19, %s16602_s19   ;;  %s15836_s18 = sphi %s15888_s18, %s16601_s18  }
   0xa   : > { %p9671_p0 = scmp.ge.s32.totalorder %s15848_s21, 1  ;;  %p44_p1 = scmp.eq.s32.totalorder %s15912_s25, 0 }
   0xb   : > { %p164_p2 = scmp.lt.s32.totalorder %s15848_s21, 3  ;;  %s15850_s27 = smov [#allocation5]  }
   0xc   : > { %s177_s28 = sshll.u32 %s15850_s27, 4  ;;  %s201_s6 = sshll.u32 %s16469_s3, 4  ;;  %s178_s28 = int_to_ptr.vmem [resolvable:$true] %s177_s28  ;;  %s202_s6 = int_to_ptr.hbm [resolvable:$true] %s201_s6 }
   0xd   : > { %p15917_p3 = pnand %p9671_p0, %p164_p2  ;;  %s15851_s8 = smov [#allocation8]  }
   0xe   : > { %s203_s9 = sshll.u32 %s15851_s8, 4  ;;  %s15852_s10 = smov 128   ;;  %s204_s9 = int_to_ptr.vmem [resolvable:$true] %s203_s9 }
   0xf   : > { %s175_s24 = sshll.u32 %s16513_s1, 4  ;;  %p15551_p4 = pneg %p15917_p3  ;;  %s176_s24 = int_to_ptr.hbm [resolvable:$true] %s175_s24 }
  0x10   : > { %s15853_s11 = smov 8   ;;  %s15854_s12 = smov 64  }
  0x11   : > { %p15929_p6 = pnand %p15551_p4, %p44_p1  ;;  %s15855_s13 = smov 4  }
  0x12   : > { %s190_s16 = sshll.u32 %s16468_s2, 4  ;;  %s15856_s17 = smov [#allocation7]   ;;  %s191_s16 = int_to_ptr.hbm [resolvable:$true] %s190_s16 }
  0x13   : > { %15554 = dma.hbm_to_vmem [thread:$0]  (!%p15929_p6), %s176_s24, 147456, %s178_s28, [#allocation6], %s15852_s10, %s15852_s10, %s15853_s11  }
  0x14   : > { %15560 = dma.hbm_to_vmem [thread:$0]  (!%p15929_p6), %s202_s6, 2048, %s204_s9, [#allocation9], %s15854_s12, %s15854_s12, %s15855_s13  }
  0x15   : > { %s192_s22 = sshll.u32 %s15856_s17, 4  ;;  %s216_s27 = sshll.u32 %s16470_s4, 4  ;;  %s193_s22 = int_to_ptr.vmem [resolvable:$true] %s192_s22  ;;  %s217_s27 = int_to_ptr.hbm [resolvable:$true] %s216_s27 }
  0x16   : > { %15557 = dma.hbm_to_vmem [thread:$0]  (!%p15929_p6), %s191_s16, 32, %s193_s22, [#allocation6]  }
  0x17   : > { %s15857_s28 = smov [#allocation10]   ;;  %s9670_s30 = sadd.s32 4294967294, %s15848_s21  }
  0x18   : > { %s218_s29 = sshll.u32 %s15857_s28, 4  ;;  %s15949_s6 = sadd.s32 1, %s15848_s21   ;;  %s219_s29 = int_to_ptr.vmem [resolvable:$true] %s218_s29 }
  0x19   : > { %15563 = dma.hbm_to_vmem [thread:$0]  (!%p15929_p6), %s217_s27, 16, %s219_s29, [#allocation9]  }
  0x1a   : > { %s27_s8 = ssub.s32 %s15848_s21, %s15949_s6  ;;  %s30_s9 = sadd.s32 1, %s15844_s20 }
  0x1b   : > { %p28_p7 = scmp.eq.s32.totalorder %s27_s8, 0  ;;  %p37_p8 = scmp.ne.s32.totalorder %s15844_s20, %s15840_s19 }
  0x1c   : > { %p38_p9 = scmp.eq.s32.totalorder %s15848_s21, 0  ;;  %p43_p10 = scmp.ne.s32.totalorder %s15840_s19, %s15836_s18 }
  0x1d   : > { %s15960_s10 = scalar_select %p28_p7, %s15844_s20, %s30_s9  }
  0x1e   : > { %p39_p11 = por %p38_p9, %p37_p8  ;;  %p15964_p12 = por %p44_p1, %p43_p10 }
  0x1f   : > { %p151_p13 = scmp.eq.s32.totalorder %s15912_s25, 1  ;;  %p157_p0 = scmp.eq.s32.totalorder %s9670_s30, 1 }
  0x20   : > { %p15576_p2 = scmp.lt.s32.totalorder %s15848_s21, 2  ;;  %s229_s7 = sand.u32 1, %s15844_s20  }
  0x21   : > { %p15971_p4 = por %p151_p13, %p37_p8  ;;  %p15975_p6 = por %p157_p0, %p43_p10 }
  0x22   : > { %s15528_s14 = smul.u32 288, %s229_s7  ;;  %p15980_p7 = pnand %p15576_p2, %p39_p11 }
  0x23   : > { %s15529_s15 = smul.u32 288, %s15848_s21  ;;  %s230_s29 = scalar_lea.sflag [#allocation3], %s229_s7 }
  0x24   : > { %s233_s24 = scalar_lea.vmem [#allocation2], %s15528_s14  ;;  %p15748_p9 = pneg %p15980_p7 }
  0x25   : > { %s238_s23 = scalar_lea.hbm %s16466_s0, %s15529_s15  ;;  %s242_s27 = sshll.u32 %s233_s24, 4  ;;  %s243_s27 = int_to_ptr.vmem [resolvable:$true] %s242_s27 }
  0x26   : > { %s240_s28 = sshll.u32 %s238_s23, 4  ;;  %s15751_s17 = scalar_lea.hbm %s16466_s0, 576  ;;  %s241_s28 = int_to_ptr.hbm [resolvable:$true] %s240_s28 }
  0x27   : > { %s15744_s30 = sshra.s32 %s241_s28, 4  ;;  %s15745_s30 = int_to_ptr.hbm [resolvable:$true] %s15744_s30 }
  0x28   : > { %s15746_s8 = scalar_lea.hbm %s15745_s30, 288  ;;  %p15752_p13 = scmp.lt.s32.totalorder %s15745_s30, %s16466_s0 }
  0x29   : > { %p15747_p8 = scmp.ne.s32.totalorder %s15745_s30, %s15746_s8  ;;  %p15753_p0 = scmp.lt.s32.totalorder %s15751_s17, %s15746_s8 }
  0x2b   : > { %p15749_p10 = pnand %p15748_p9, %p15747_p8  ;;  %p15754_p2 = por %p15753_p0, %p15752_p13 }
  0x2d   : > { %p15750_p11 = pneg %p15749_p10 }
  0x2f   : > { %p15755_p5 = pnand %p15754_p2, %p15750_p11 }
  0x31   : > { %15758 = shalt.err (!%p15755_p5)
}
  0x32   : > { %15567 = dma.hbm_to_vmem [thread:$0]  (!%p15980_p7), %s241_s28, 4608, %s243_s27, %s230_s29  }
  0x33   : > { %251 = sbr.rel (%p15917_p3) target bundleno = 1495 (0x5d7), region = 40 }
  0x38   : > { %s16000_s7 = sand.u32 1, %s15840_s19  }
  0x39   : > { %s15530_s1 = smul.u32 288, %s16000_s7  ;;  %s254_s14 = scalar_lea.sflag [#allocation3], %s16000_s7 }
  0x3b   : > { %s16004_s23 = scalar_lea.vmem [#allocation2], %s15530_s1 }
  0x3c   : > { %15819 = dma.done.wait (%p15964_p12), %s254_s14, 4608  }
  0x3d   : > { %15821 = vsyncadd (%p15964_p12), %s254_s14, 4294962688 }
  0x3e   : > { %15823 = dma.done.wait (%p44_p1), [#allocation6], 147488  }
  0x3f   : > { %15825 = vsyncadd (%p44_p1), [#allocation6], 4294819808 }
  0x40   : > { %15827 = dma.done.wait (%p44_p1), [#allocation9], 2064  }
  0x41   : > { %15829 = vsyncadd (%p44_p1), [#allocation9], 4294965232  ;;  %v9742_v0 = vld [vmem:[#allocation5 + $0x70] sm:$0xf]  ;;  %v14375_v1 = vld [vmem:[#allocation5 + $0x74] sm:$0xf0] }
  0x42   : > { %v9806_v2 = vld [vmem:[#allocation5 + $0xf0] sm:$0xf]  ;;  %v9743_v3 = vor.u32 %v14375_v1, %v9742_v0  ;;  %v14391_v4 = vld [vmem:[#allocation5 + $0xf4] sm:$0xf0]  ;;  %v9734_v11 = vld [vmem:[#allocation5 + $0x60] sm:$0xf] }
  0x43   : > { %v9870_v5 = vld [vmem:[#allocation5 + $0x170] sm:$0xf]  ;;  %v14407_v6 = vld [vmem:[#allocation5 + $0x174] sm:$0xf0]  ;;  %v9807_v7 = vor.u32 %v14391_v4, %v9806_v2  ;;  %v14373_v13 = vld [vmem:[#allocation5 + $0x64] sm:$0xf0] }
  0x44   : > { %v9871_v8 = vor.u32 %v14407_v6, %v9870_v5  ;;  %v9934_v9 = vld [vmem:[#allocation5 + $0x1f0] sm:$0xf]  ;;  %v14423_v10 = vld [vmem:[#allocation5 + $0x1f4] sm:$0xf0]  ;;  %7511 = vmatpush.bf16.msra.mxu0 %v9743_v3  ;;  %v9798_v14 = vld [vmem:[#allocation5 + $0xe0] sm:$0xf]  ;;  %v9735_v16 = vor.u32 %v14373_v13, %v9734_v11 }
  0x45   : > { %v9935_v12 = vor.u32 %v14423_v10, %v9934_v9  ;;  %v14389_v15 = vld [vmem:[#allocation5 + $0xe4] sm:$0xf0]  ;;  %7524 = vmatpush.bf16.msra.mxu1 %v9807_v7  ;;  %v9862_v18 = vld [vmem:[#allocation5 + $0x160] sm:$0xf]  ;;  %v9726_v23 = vld [vmem:[#allocation5 + $0x50] sm:$0xf] }
  0x46   : > { %7537 = vmatpush.bf16.msra.mxu2 %v9871_v8  ;;  %v9799_v17 = vor.u32 %v14389_v15, %v9798_v14  ;;  %v14405_v19 = vld [vmem:[#allocation5 + $0x164] sm:$0xf0]  ;;  %v9926_v20 = vld [vmem:[#allocation5 + $0x1e0] sm:$0xf]  ;;  %v14371_v24 = vld [vmem:[#allocation5 + $0x54] sm:$0xf0] }
  0x47   : > { %7550 = vmatpush.bf16.msra.mxu3 %v9935_v12  ;;  %v9863_v21 = vor.u32 %v14405_v19, %v9862_v18  ;;  %v14421_v22 = vld [vmem:[#allocation5 + $0x1e4] sm:$0xf0]  ;;  %v9790_v26 = vld [vmem:[#allocation5 + $0xd0] sm:$0xf]  ;;  %v14387_v27 = vld [vmem:[#allocation5 + $0xd4] sm:$0xf0]  ;;  %v9727_v29 = vor.u32 %v14371_v24, %v9726_v23 }
  0x48   : > { %v9927_v25 = vor.u32 %v14421_v22, %v9926_v20  ;;  %v9854_v28 = vld [vmem:[#allocation5 + $0x150] sm:$0xf]  ;;  %7512 = vmatpush.bf16.msra.mxu0 %v9735_v16  ;;  %v14403_v30 = vld [vmem:[#allocation5 + $0x154] sm:$0xf0]  ;;  %v9791_v33 = vor.u32 %v14387_v27, %v9790_v26  ;;  %v9718_v35 = vld [vmem:[#allocation5 + $0x40] sm:$0xf] }
  0x49   : > { %v9918_v31 = vld [vmem:[#allocation5 + $0x1d0] sm:$0xf]  ;;  %v14419_v32 = vld [vmem:[#allocation5 + $0x1d4] sm:$0xf0]  ;;  %7525 = vmatpush.bf16.msra.mxu1 %v9799_v17  ;;  %v9855_v34 = vor.u32 %v14403_v30, %v9854_v28  ;;  %v14369_v36 = vld [vmem:[#allocation5 + $0x44] sm:$0xf0] }
  0x4a   : > { %7538 = vmatpush.bf16.msra.mxu2 %v9863_v21  ;;  %v9782_v37 = vld [vmem:[#allocation5 + $0xc0] sm:$0xf]  ;;  %v9919_v38 = vor.u32 %v14419_v32, %v9918_v31  ;;  %v14385_v39 = vld [vmem:[#allocation5 + $0xc4] sm:$0xf0]  ;;  %v9719_v44 = vor.u32 %v14369_v36, %v9718_v35  ;;  %v9710_v47 = vld [vmem:[#allocation5 + $0x30] sm:$0xf] }
  0x4b   : > { %7551 = vmatpush.bf16.msra.mxu3 %v9927_v25  ;;  %v9846_v40 = vld [vmem:[#allocation5 + $0x140] sm:$0xf]  ;;  %v14401_v41 = vld [vmem:[#allocation5 + $0x144] sm:$0xf0]  ;;  %v9783_v45 = vor.u32 %v14385_v39, %v9782_v37  ;;  %v14367_v48 = vld [vmem:[#allocation5 + $0x34] sm:$0xf0] }
  0x4c   : > { %v9910_v42 = vld [vmem:[#allocation5 + $0x1c0] sm:$0xf]  ;;  %v14417_v43 = vld [vmem:[#allocation5 + $0x1c4] sm:$0xf0]  ;;  %7513 = vmatpush.bf16.msra.mxu0 %v9727_v29  ;;  %v9847_v46 = vor.u32 %v14401_v41, %v9846_v40  ;;  %v9774_v49 = vld [vmem:[#allocation5 + $0xb0] sm:$0xf]  ;;  %v9711_v56 = vor.u32 %v14367_v48, %v9710_v47 }
  0x4d   : > { %7526 = vmatpush.bf16.msra.mxu1 %v9791_v33  ;;  %v9911_v50 = vor.u32 %v14417_v43, %v9910_v42  ;;  %v14383_v51 = vld [vmem:[#allocation5 + $0xb4] sm:$0xf0]  ;;  %v9838_v52 = vld [vmem:[#allocation5 + $0x130] sm:$0xf]  ;;  %v9702_v59 = vld [vmem:[#allocation5 + $0x20] sm:$0xf] }
  0x4e   : > { %7539 = vmatpush.bf16.msra.mxu2 %v9855_v34  ;;  %v14399_v53 = vld [vmem:[#allocation5 + $0x134] sm:$0xf0]  ;;  %v9902_v54 = vld [vmem:[#allocation5 + $0x1b0] sm:$0xf]  ;;  %v9775_v57 = vor.u32 %v14383_v51, %v9774_v49  ;;  %v14365_v60 = vld [vmem:[#allocation5 + $0x24] sm:$0xf0] }
  0x4f   : > { %7552 = vmatpush.bf16.msra.mxu3 %v9919_v38  ;;  %v14415_v55 = vld [vmem:[#allocation5 + $0x1b4] sm:$0xf0]  ;;  %v9839_v58 = vor.u32 %v14399_v53, %v9838_v52  ;;  %v9766_v61 = vld [vmem:[#allocation5 + $0xa0] sm:$0xf]  ;;  %v14381_v63 = vld [vmem:[#allocation5 + $0xa4] sm:$0xf0]  ;;  %v9703_v4 = vor.u32 %v14365_v60, %v9702_v59 }
  0x50   : > { %7514 = vmatpush.bf16.msra.mxu0 %v9719_v44  ;;  %v9903_v62 = vor.u32 %v14415_v55, %v9902_v54  ;;  %v9830_v0 = vld [vmem:[#allocation5 + $0x120] sm:$0xf]  ;;  %v14397_v1 = vld [vmem:[#allocation5 + $0x124] sm:$0xf0]  ;;  %v9767_v5 = vor.u32 %v14381_v63, %v9766_v61  ;;  %v9694_v7 = vld [vmem:[#allocation5 + $0x10] sm:$0xf] }
  0x51   : > { %7527 = vmatpush.bf16.msra.mxu1 %v9783_v45  ;;  %v9894_v2 = vld [vmem:[#allocation5 + $0x1a0] sm:$0xf]  ;;  %v14413_v3 = vld [vmem:[#allocation5 + $0x1a4] sm:$0xf0]  ;;  %v9831_v6 = vor.u32 %v14397_v1, %v9830_v0  ;;  %v14363_v8 = vld [vmem:[#allocation5 + $0x14] sm:$0xf0] }
  0x52   : > { %7540 = vmatpush.bf16.msra.mxu2 %v9847_v46  ;;  %v9758_v9 = vld [vmem:[#allocation5 + $0x90] sm:$0xf]  ;;  %v9895_v10 = vor.u32 %v14413_v3, %v9894_v2  ;;  %v14379_v11 = vld [vmem:[#allocation5 + $0x94] sm:$0xf0]  ;;  %v9695_v16 = vor.u32 %v14363_v8, %v9694_v7  ;;  %v9686_v17 = vld [vmem:[#allocation5] sm:$0xf] }
  0x53   : > { %7553 = vmatpush.bf16.msra.mxu3 %v9911_v50  ;;  %v9822_v12 = vld [vmem:[#allocation5 + $0x110] sm:$0xf]  ;;  %v14395_v13 = vld [vmem:[#allocation5 + $0x114] sm:$0xf0]  ;;  %v14361_v18 = vld [vmem:[#allocation5 + $0x4] sm:$0xf0]  ;;  %v9759_v19 = vor.u32 %v14379_v11, %v9758_v9 }
  0x54   : > { %7515 = vmatpush.bf16.msra.mxu0 %v9711_v56  ;;  %v9886_v14 = vld [vmem:[#allocation5 + $0x190] sm:$0xf]  ;;  %v14411_v15 = vld [vmem:[#allocation5 + $0x194] sm:$0xf0]  ;;  %v9823_v20 = vor.u32 %v14395_v13, %v9822_v12  ;;  %v9750_v21 = vld [vmem:[#allocation5 + $0x80] sm:$0xf]  ;;  %v9687_v31 = vor.u32 %v14361_v18, %v9686_v17 }
  0x55   : > { %7528 = vmatpush.bf16.msra.mxu1 %v9775_v57  ;;  %v14377_v22 = vld [vmem:[#allocation5 + $0x84] sm:$0xf0]  ;;  %v9814_v23 = vld [vmem:[#allocation5 + $0x100] sm:$0xf]  ;;  %v9887_v24 = vor.u32 %v14411_v15, %v9886_v14  ;;  %v9998_v28 = vld [vmem:[#allocation5 + $0x270] sm:$0xf] }
  0x56   : > { %7541 = vmatpush.bf16.msra.mxu2 %v9839_v58  ;;  %v14393_v25 = vld [vmem:[#allocation5 + $0x104] sm:$0xf0]  ;;  %v9878_v26 = vld [vmem:[#allocation5 + $0x180] sm:$0xf]  ;;  %v14439_v29 = vld [vmem:[#allocation5 + $0x274] sm:$0xf0]  ;;  %v9751_v35 = vor.u32 %v14377_v22, %v9750_v21 }
  0x57   : > { %7554 = vmatpush.bf16.msra.mxu3 %v9903_v62  ;;  %v14409_v27 = vld [vmem:[#allocation5 + $0x184] sm:$0xf0]  ;;  %v10062_v30 = vld [vmem:[#allocation5 + $0x2f0] sm:$0xf]  ;;  %v14455_v32 = vld [vmem:[#allocation5 + $0x2f4] sm:$0xf0]  ;;  %v9815_v36 = vor.u32 %v14393_v25, %v9814_v23  ;;  %v9999_v40 = vor.u32 %v14439_v29, %v9998_v28 }
  0x58   : > { %7516 = vmatpush.bf16.msra.mxu0 %v9703_v4  ;;  %v10126_v33 = vld [vmem:[#allocation5 + $0x370] sm:$0xf]  ;;  %v14471_v34 = vld [vmem:[#allocation5 + $0x374] sm:$0xf0]  ;;  %v9879_v39 = vor.u32 %v14409_v27, %v9878_v26  ;;  %v10063_v41 = vor.u32 %v14455_v32, %v10062_v30  ;;  %v9990_v43 = vld [vmem:[#allocation5 + $0x260] sm:$0xf] }
  0x59   : > { %7529 = vmatpush.bf16.msra.mxu1 %v9767_v5  ;;  %v10190_v37 = vld [vmem:[#allocation5 + $0x3f0] sm:$0xf]  ;;  %v14487_v38 = vld [vmem:[#allocation5 + $0x3f4] sm:$0xf0]  ;;  %v10127_v42 = vor.u32 %v14471_v34, %v10126_v33  ;;  %v14437_v44 = vld [vmem:[#allocation5 + $0x264] sm:$0xf0] }
  0x5a   : > { %7542 = vmatpush.bf16.msra.mxu2 %v9831_v6  ;;  %v10054_v45 = vld [vmem:[#allocation5 + $0x2e0] sm:$0xf]  ;;  %v10191_v46 = vor.u32 %v14487_v38, %v10190_v37  ;;  %v14453_v47 = vld [vmem:[#allocation5 + $0x2e4] sm:$0xf0]  ;;  %v9991_v52 = vor.u32 %v14437_v44, %v9990_v43  ;;  %v9982_v53 = vld [vmem:[#allocation5 + $0x250] sm:$0xf] }
  0x5b   : > { %7555 = vmatpush.bf16.msra.mxu3 %v9895_v10  ;;  %v10118_v48 = vld [vmem:[#allocation5 + $0x360] sm:$0xf]  ;;  %v14469_v49 = vld [vmem:[#allocation5 + $0x364] sm:$0xf0]  ;;  %v10055_v54 = vor.u32 %v14453_v47, %v10054_v45  ;;  %v14435_v56 = vld [vmem:[#allocation5 + $0x254] sm:$0xf0] }
  0x5c   : > { %7517 = vmatpush.bf16.msra.mxu0 %v9695_v16  ;;  %v10182_v50 = vld [vmem:[#allocation5 + $0x3e0] sm:$0xf]  ;;  %v14485_v51 = vld [vmem:[#allocation5 + $0x3e4] sm:$0xf0]  ;;  %v10119_v55 = vor.u32 %v14469_v49, %v10118_v48  ;;  %v10046_v57 = vld [vmem:[#allocation5 + $0x2d0] sm:$0xf]  ;;  %v9983_v0 = vor.u32 %v14435_v56, %v9982_v53 }
  0x5d   : > { %7530 = vmatpush.bf16.msra.mxu1 %v9759_v19  ;;  %v14451_v58 = vld [vmem:[#allocation5 + $0x2d4] sm:$0xf0]  ;;  %v10183_v59 = vor.u32 %v14485_v51, %v10182_v50  ;;  %v10110_v60 = vld [vmem:[#allocation5 + $0x350] sm:$0xf]  ;;  %v306_v2 = vld [vmem:[%s16004_s23 + $0x8] sm:$0xff]  ;;  %s14357_s26 = sshll.u32 %s15912_s25, 3 }
  0x5e   : > { %7543 = vmatpush.bf16.msra.mxu2 %v9823_v20  ;;  %v14467_v61 = vld [vmem:[#allocation5 + $0x354] sm:$0xf0]  ;;  %v10174_v62 = vld [vmem:[#allocation5 + $0x3d0] sm:$0xf]  ;;  %v10047_v1 = vor.u32 %v14451_v58, %v10046_v57  ;;  %v305_v3 = vld [vmem:[%s16004_s23] sm:$0xff]  ;;  %v1537_v8 = vunpack.c.l.b16 %v306_v2  ;;  %v1538_v10 = vunpack.c.h.b16 %v306_v2  ;;  %s9683_s11 = sshll.u32 %s16000_s7, 3  ;;  %s9557_s27 = scalar_lea.hbm %s16471_s5, %s14357_s26 }
  0x5f   : > { %7556 = vmatpush.bf16.msra.mxu3 %v9887_v24  ;;  %v14483_v63 = vld [vmem:[#allocation5 + $0x3d4] sm:$0xf0]  ;;  %v10111_v4 = vor.u32 %v14467_v61, %v10110_v60  ;;  %v9974_v5 = vld [vmem:[#allocation5 + $0x240] sm:$0xf]  ;;  %v14433_v6 = vld [vmem:[#allocation5 + $0x244] sm:$0xf0]  ;;  %v1535_v9 = vunpack.c.l.b16 %v305_v3  ;;  %v1536_v15 = vunpack.c.h.b16 %v305_v3 }
  0x60   : > { %7518 = vmatpush.bf16.msra.mxu0 %v9687_v31  ;;  %v10038_v7 = vld [vmem:[#allocation5 + $0x2c0] sm:$0xf]  ;;  %v10175_v11 = vor.u32 %v14483_v63, %v10174_v62  ;;  %v14449_v12 = vld [vmem:[#allocation5 + $0x2c4] sm:$0xf0]  ;;  %v16020_v18 = vpack.c.b16 %v1537_v8, %v1537_v8  ;;  %v16024_v20 = vpack.c.b16 %v1538_v10, %v1538_v10  ;;  %v9975_v21 = vor.u32 %v14433_v6, %v9974_v5  ;;  %v9966_v25 = vld [vmem:[#allocation5 + $0x230] sm:$0xf] }
  0x61   : > { %7531 = vmatpush.bf16.msra.mxu1 %v9751_v35  ;;  %v10102_v13 = vld [vmem:[#allocation5 + $0x340] sm:$0xf]  ;;  %v14465_v14 = vld [vmem:[#allocation5 + $0x344] sm:$0xf0]  ;;  %v16022_v19 = vpack.c.b16 %v1535_v9, %v1535_v9  ;;  %v16026_v22 = vpack.c.b16 %v1536_v15, %v1536_v15  ;;  %v10039_v23 = vor.u32 %v14449_v12, %v10038_v7  ;;  %v14431_v26 = vld [vmem:[#allocation5 + $0x234] sm:$0xf0] }
  0x62   : > { %7544 = vmatpush.bf16.msra.mxu2 %v9815_v36  ;;  %v10166_v16 = vld [vmem:[#allocation5 + $0x3c0] sm:$0xf]  ;;  %v14481_v17 = vld [vmem:[#allocation5 + $0x3c4] sm:$0xf0]  ;;  %v10103_v24 = vor.u32 %v14465_v14, %v10102_v13  ;;  %v10030_v27 = vld [vmem:[#allocation5 + $0x2b0] sm:$0xf]  ;;  %v9967_v34 = vor.u32 %v14431_v26, %v9966_v25 }
  0x63   : > { %7557 = vmatpush.bf16.msra.mxu3 %v9879_v39  ;;  %v10167_v28 = vor.u32 %v14481_v17, %v10166_v16  ;;  %v14447_v29 = vld [vmem:[#allocation5 + $0x2b4] sm:$0xf0]  ;;  %v10094_v30 = vld [vmem:[#allocation5 + $0x330] sm:$0xf]  ;;  %7519 = vmatmul.bf16.vlgmr.msra.gmra.mxu0 %v16022_v19  ;;  %v9958_v37 = vld [vmem:[#allocation5 + $0x220] sm:$0xf] }
  0x64   : > { %7563 = vmatpush.bf16.msrb.mxu0 %v9999_v40  ;;  %v14463_v31 = vld [vmem:[#allocation5 + $0x334] sm:$0xf0]  ;;  %v10158_v32 = vld [vmem:[#allocation5 + $0x3b0] sm:$0xf]  ;;  %7532 = vmatmul.bf16.vlgmr.msra.gmra.mxu1 %v16026_v22  ;;  %v10031_v35 = vor.u32 %v14447_v29, %v10030_v27  ;;  %v14429_v38 = vld [vmem:[#allocation5 + $0x224] sm:$0xf0] }
  0x65   : > { %7576 = vmatpush.bf16.msrb.mxu1 %v10063_v41  ;;  %7545 = vmatmul.bf16.vlgmr.msra.gmra.mxu2 %v16020_v18  ;;  %v14479_v33 = vld [vmem:[#allocation5 + $0x3b4] sm:$0xf0]  ;;  %v10095_v36 = vor.u32 %v14463_v31, %v10094_v30  ;;  %v10022_v39 = vld [vmem:[#allocation5 + $0x2a0] sm:$0xf]  ;;  %v14445_v41 = vld [vmem:[#allocation5 + $0x2a4] sm:$0xf0] }
  0x66   : > { %7589 = vmatpush.bf16.msrb.mxu2 %v10127_v42  ;;  %7558 = vmatmul.bf16.vlgmr.msra.gmra.mxu3 %v16024_v20  ;;  %v10159_v40 = vor.u32 %v14479_v33, %v10158_v32  ;;  %v10086_v42 = vld [vmem:[#allocation5 + $0x320] sm:$0xf]  ;;  %v14461_v43 = vld [vmem:[#allocation5 + $0x324] sm:$0xf0]  ;;  %v10023_v47 = vor.u32 %v14445_v41, %v10022_v39  ;;  %v9950_v49 = vld [vmem:[#allocation5 + $0x210] sm:$0xf] }
  0x67   : > { %7602 = vmatpush.bf16.msrb.mxu3 %v10191_v46  ;;  %v10150_v44 = vld [vmem:[#allocation5 + $0x3a0] sm:$0xf]  ;;  %v14477_v45 = vld [vmem:[#allocation5 + $0x3a4] sm:$0xf0]  ;;  %v9959_v46 = vor.u32 %v14429_v38, %v9958_v37  ;;  %v10087_v48 = vor.u32 %v14461_v43, %v10086_v42  ;;  %v14427_v50 = vld [vmem:[#allocation5 + $0x214] sm:$0xf0] }
  0x68   : > { %7564 = vmatpush.bf16.msrb.mxu0 %v9991_v52  ;;  %v10014_v51 = vld [vmem:[#allocation5 + $0x290] sm:$0xf]  ;;  %v10151_v52 = vor.u32 %v14477_v45, %v10150_v44  ;;  %v14443_v53 = vld [vmem:[#allocation5 + $0x294] sm:$0xf0]  ;;  %v9942_v58 = vld [vmem:[#allocation5 + $0x200] sm:$0xf] }
  0x69   : > { %7577 = vmatpush.bf16.msrb.mxu1 %v10055_v54  ;;  %v10078_v54 = vld [vmem:[#allocation5 + $0x310] sm:$0xf]  ;;  %v14475_v57 = vld [vmem:[#allocation5 + $0x394] sm:$0xf0]  ;;  %v14425_v60 = vld [vmem:[#allocation5 + $0x204] sm:$0xf0]  ;;  %v10015_v63 = vor.u32 %v14443_v53, %v10014_v51 }
  0x6a   : > { %7590 = vmatpush.bf16.msrb.mxu2 %v10119_v55  ;;  %v14459_v55 = vld [vmem:[#allocation5 + $0x314] sm:$0xf0]  ;;  %v10142_v56 = vld [vmem:[#allocation5 + $0x390] sm:$0xf]  ;;  %v10006_v61 = vld [vmem:[#allocation5 + $0x280] sm:$0xf] }
  0x6b   : > { %7603 = vmatpush.bf16.msrb.mxu3 %v10183_v59  ;;  %v9951_v59 = vor.u32 %v14427_v50, %v9950_v49  ;;  %v14441_v62 = vld [vmem:[#allocation5 + $0x284] sm:$0xf0]  ;;  %v308_v3 = vld [vmem:[%s16004_s23 + $0x18] sm:$0xff]  ;;  %v10134_v5 = vld [vmem:[#allocation5 + $0x380] sm:$0xf]  ;;  %s304_s28 = scalar_lea.vmem [#allocation11], %s9683_s11 }
  0x6c   : > { %7565 = vmatpush.bf16.msrb.mxu0 %v9983_v0  ;;  %v10079_v0 = vor.u32 %v14459_v55, %v10078_v54  ;;  %v14457_v2 = vld [vmem:[#allocation5 + $0x304] sm:$0xf0]  ;;  %v307_v7 = vld [vmem:[%s16004_s23 + $0x10] sm:$0xff]  ;;  %v14503_v9 = vld [vmem:[#allocation5 + $0x474] sm:$0xf0]  ;;  %v1541_v15 = vunpack.c.l.b16 %v308_v3  ;;  %v10007_v16 = vor.u32 %v14441_v62, %v10006_v61  ;;  %v1542_v25 = vunpack.c.h.b16 %v308_v3  ;;  %s9559_s29 = sshll.u32 %s304_s28, 4  ;;  %s9560_s29 = int_to_ptr.vmem [resolvable:$true] %s9559_s29 }
  0x6d   : > { %7578 = vmatpush.bf16.msrb.mxu1 %v10047_v1  ;;  %v10070_v1 = vld [vmem:[#allocation5 + $0x300] sm:$0xf]  ;;  %v14473_v6 = vld [vmem:[#allocation5 + $0x384] sm:$0xf0]  ;;  %v10254_v8 = vld [vmem:[#allocation5 + $0x470] sm:$0xf] }
  0x6e   : > { %7591 = vmatpush.bf16.msrb.mxu2 %v10111_v4  ;;  %v10143_v4 = vor.u32 %v14475_v57, %v10142_v56  ;;  %v10318_v10 = vld [vmem:[#allocation5 + $0x4f0] sm:$0xf]  ;;  %v14519_v12 = vld [vmem:[#allocation5 + $0x4f4] sm:$0xf0]  ;;  %v10071_v17 = vor.u32 %v14457_v2, %v10070_v1  ;;  %v10135_v26 = vor.u32 %v14473_v6, %v10134_v5  ;;  %v10255_v27 = vor.u32 %v14503_v9, %v10254_v8  ;;  %v10246_v31 = vld [vmem:[#allocation5 + $0x460] sm:$0xf] }
  0x6f   : > { %7604 = vmatpush.bf16.msrb.mxu3 %v10175_v11  ;;  %v9943_v11 = vor.u32 %v14425_v60, %v9942_v58  ;;  %v10382_v13 = vld [vmem:[#allocation5 + $0x570] sm:$0xf]  ;;  %v14535_v14 = vld [vmem:[#allocation5 + $0x574] sm:$0xf0]  ;;  %v10319_v29 = vor.u32 %v14519_v12, %v10318_v10  ;;  %v14501_v32 = vld [vmem:[#allocation5 + $0x464] sm:$0xf0]  ;;  %v16034_v38 = vpack.c.b16 %v1541_v15, %v1541_v15  ;;  %v16038_v42 = vpack.c.b16 %v1542_v25, %v1542_v25 }
  0x70   : > { %7566 = vmatpush.bf16.msrb.mxu0 %v9975_v21  ;;  %v10446_v21 = vld [vmem:[#allocation5 + $0x5f0] sm:$0xf]  ;;  %v10383_v30 = vor.u32 %v14535_v14, %v10382_v13  ;;  %v10310_v33 = vld [vmem:[#allocation5 + $0x4e0] sm:$0xf]  ;;  %v14533_v37 = vld [vmem:[#allocation5 + $0x564] sm:$0xf0]  ;;  %v10247_v43 = vor.u32 %v14501_v32, %v10246_v31 }
  0x71   : > { %7579 = vmatpush.bf16.msrb.mxu1 %v10039_v23  ;;  %v14551_v23 = vld [vmem:[#allocation5 + $0x5f4] sm:$0xf0]  ;;  %v10438_v39 = vld [vmem:[#allocation5 + $0x5e0] sm:$0xf]  ;;  %v10302_v49 = vld [vmem:[#allocation5 + $0x4d0] sm:$0xf] }
  0x72   : > { %7592 = vmatpush.bf16.msrb.mxu2 %v10103_v24  ;;  %v1539_v24 = vunpack.c.l.b16 %v307_v7  ;;  %v14515_v51 = vld [vmem:[#allocation5 + $0x4d4] sm:$0xf0]  ;;  %v10430_v54 = vld [vmem:[#allocation5 + $0x5d0] sm:$0xf]  ;;  %v14497_v60 = vld [vmem:[#allocation5 + $0x444] sm:$0xf0] }
  0x73   : > { %7605 = vmatpush.bf16.msrb.mxu3 %v10167_v28  ;;  %v1540_v28 = vunpack.c.h.b16 %v307_v7  ;;  %v14531_v53 = vld [vmem:[#allocation5 + $0x554] sm:$0xf0]  ;;  %v10303_v57 = vor.u32 %v14515_v51, %v10302_v49  ;;  %v10294_v61 = vld [vmem:[#allocation5 + $0x4c0] sm:$0xf]  ;;  %v14529_v1 = vld [vmem:[#allocation5 + $0x544] sm:$0xf0] }
  0x74   : > { %7567 = vmatpush.bf16.msrb.mxu0 %v9967_v34  ;;  %v10447_v34 = vor.u32 %v14551_v23, %v10446_v21  ;;  %v16036_v41 = vpack.c.b16 %v1539_v24, %v1539_v24  ;;  %v14547_v55 = vld [vmem:[#allocation5 + $0x5d4] sm:$0xf0]  ;;  %v10422_v2 = vld [vmem:[#allocation5 + $0x5c0] sm:$0xf]  ;;  %v14545_v3 = vld [vmem:[#allocation5 + $0x5c4] sm:$0xf0] }
  0x75   : > { %7580 = vmatpush.bf16.msrb.mxu1 %v10031_v35  ;;  %v14517_v35 = vld [vmem:[#allocation5 + $0x4e4] sm:$0xf0]  ;;  %v16040_v44 = vpack.c.b16 %v1540_v28, %v1540_v28  ;;  %v10431_v62 = vor.u32 %v14547_v55, %v10430_v54  ;;  %v10222_v7 = vld [vmem:[#allocation5 + $0x430] sm:$0xf]  ;;  %v14495_v8 = vld [vmem:[#allocation5 + $0x434] sm:$0xf0]  ;;  %v10423_v10 = vor.u32 %v14545_v3, %v10422_v2 }
  0x76   : > { %7593 = vmatpush.bf16.msrb.mxu2 %v10095_v36  ;;  %v10374_v36 = vld [vmem:[#allocation5 + $0x560] sm:$0xf]  ;;  %v10311_v45 = vor.u32 %v14517_v35, %v10310_v33  ;;  %v10286_v9 = vld [vmem:[#allocation5 + $0x4b0] sm:$0xf]  ;;  %v14527_v13 = vld [vmem:[#allocation5 + $0x534] sm:$0xf0] }
  0x77   : > { %7606 = vmatpush.bf16.msrb.mxu3 %v10159_v40  ;;  %v14549_v40 = vld [vmem:[#allocation5 + $0x5e4] sm:$0xf0]  ;;  %v10350_v12 = vld [vmem:[#allocation5 + $0x530] sm:$0xf]  ;;  %v14543_v15 = vld [vmem:[#allocation5 + $0x5b4] sm:$0xf0] }
  0x78   : > { %7568 = vmatpush.bf16.msrb.mxu0 %v9959_v46  ;;  %v10375_v46 = vor.u32 %v14533_v37, %v10374_v36  ;;  %v10439_v50 = vor.u32 %v14549_v40, %v10438_v39  ;;  %v10414_v14 = vld [vmem:[#allocation5 + $0x5b0] sm:$0xf]  ;;  %v10351_v21 = vor.u32 %v14527_v13, %v10350_v12  ;;  %v10214_v23 = vld [vmem:[#allocation5 + $0x420] sm:$0xf]  ;;  %v14493_v24 = vld [vmem:[#allocation5 + $0x424] sm:$0xf0] }
  0x79   : > { %7581 = vmatpush.bf16.msrb.mxu1 %v10023_v47  ;;  %v10238_v47 = vld [vmem:[#allocation5 + $0x450] sm:$0xf]  ;;  %v10278_v25 = vld [vmem:[#allocation5 + $0x4a0] sm:$0xf]  ;;  %v14541_v31 = vld [vmem:[#allocation5 + $0x5a4] sm:$0xf0]  ;;  %v10215_v32 = vor.u32 %v14493_v24, %v10214_v23 }
  0x7a   : > { %7594 = vmatpush.bf16.msrb.mxu2 %v10087_v48  ;;  %v14499_v48 = vld [vmem:[#allocation5 + $0x454] sm:$0xf0]  ;;  %v10342_v28 = vld [vmem:[#allocation5 + $0x520] sm:$0xf]  ;;  %v10206_v33 = vld [vmem:[#allocation5 + $0x410] sm:$0xf] }
  0x7b   : > { %7607 = vmatpush.bf16.msrb.mxu3 %v10151_v52  ;;  %v10366_v52 = vld [vmem:[#allocation5 + $0x550] sm:$0xf]  ;;  %v10239_v56 = vor.u32 %v14499_v48, %v10238_v47  ;;  %v14491_v36 = vld [vmem:[#allocation5 + $0x414] sm:$0xf0]  ;;  %v10198_v48 = vld [vmem:[#allocation5 + $0x400] sm:$0xf] }
  0x7c   : > { %7569 = vmatpush.bf16.msrb.mxu0 %v9951_v59  ;;  %v10367_v58 = vor.u32 %v14531_v53, %v10366_v52  ;;  %v10230_v59 = vld [vmem:[#allocation5 + $0x440] sm:$0xf]  ;;  %v10270_v37 = vld [vmem:[#allocation5 + $0x490] sm:$0xf]  ;;  %v14507_v39 = vld [vmem:[#allocation5 + $0x494] sm:$0xf0]  ;;  %v10207_v49 = vor.u32 %v14491_v36, %v10206_v33 }
  0x7d   : > { %7582 = vmatpush.bf16.msrb.mxu1 %v10015_v63  ;;  %v14513_v63 = vld [vmem:[#allocation5 + $0x4c4] sm:$0xf0]  ;;  %v14539_v47 = vld [vmem:[#allocation5 + $0x594] sm:$0xf0]  ;;  %v10262_v51 = vld [vmem:[#allocation5 + $0x480] sm:$0xf]  ;;  %v10271_v53 = vor.u32 %v14507_v39, %v10270_v37 }
  0x7e   : > { %7595 = vmatpush.bf16.msrb.mxu2 %v10079_v0  ;;  %v10358_v0 = vld [vmem:[#allocation5 + $0x540] sm:$0xf]  ;;  %v10295_v5 = vor.u32 %v14513_v63, %v10294_v61  ;;  %v14505_v52 = vld [vmem:[#allocation5 + $0x484] sm:$0xf0]  ;;  %v14567_v63 = vld [vmem:[#allocation5 + $0x674] sm:$0xf0] }
  0x7f   : > { %7608 = vmatpush.bf16.msrb.mxu3 %v10143_v4  ;;  %v10231_v4 = vor.u32 %v14497_v60, %v10230_v59  ;;  %v10359_v6 = vor.u32 %v14529_v1, %v10358_v0  ;;  %v10326_v55 = vld [vmem:[#allocation5 + $0x500] sm:$0xf]  ;;  %v14537_v60 = vld [vmem:[#allocation5 + $0x584] sm:$0xf0]  ;;  %v10574_v0 = vld [vmem:[#allocation5 + $0x6f0] sm:$0xf] }
  0x80   : > { %7570 = vmatpush.bf16.msrb.mxu0 %v9943_v11  ;;  %v14511_v11 = vld [vmem:[#allocation5 + $0x4b4] sm:$0xf0]  ;;  %v10390_v59 = vld [vmem:[#allocation5 + $0x580] sm:$0xf]  ;;  %v310_v61 = vld [vmem:[%s16004_s23 + $0x28] sm:$0xff]  ;;  %s9561_s30 = sshll.u32 %s9557_s27, 4  ;;  %s9562_s30 = int_to_ptr.hbm [resolvable:$true] %s9561_s30 }
  0x81   : > { %7583 = vmatpush.bf16.msrb.mxu1 %v10007_v16  ;;  %v10223_v16 = vor.u32 %v14495_v8, %v10222_v7  ;;  %v14583_v2 = vld [vmem:[#allocation5 + $0x6f4] sm:$0xf0]  ;;  %v10638_v3 = vld [vmem:[#allocation5 + $0x770] sm:$0xf]  ;;  %v10391_v12 = vor.u32 %v14537_v60, %v10390_v59  ;;  %v10566_v23 = vld [vmem:[#allocation5 + $0x6e0] sm:$0xf] }
  0x82   : > { %7596 = vmatpush.bf16.msrb.mxu2 %v10071_v17  ;;  %v10287_v17 = vor.u32 %v14511_v11, %v10286_v9  ;;  %v10702_v8 = vld [vmem:[#allocation5 + $0x7f0] sm:$0xf]  ;;  %v14615_v9 = vld [vmem:[#allocation5 + $0x7f4] sm:$0xf0]  ;;  %v14593_v59 = vld [vmem:[#allocation5 + $0x744] sm:$0xf0] }
  0x83   : > { %7609 = vmatpush.bf16.msrb.mxu3 %v10135_v26  ;;  %7571 = vmatmul.bf16.vlgmr.msrb.gmra.mxu0 %v16036_v41  ;;  %v10415_v26 = vor.u32 %v14543_v15, %v10414_v14  ;;  %v1546_v14 = vunpack.c.h.b16 %v310_v61  ;;  %v10575_v15 = vor.u32 %v14583_v2, %v10574_v0  ;;  %v10703_v24 = vor.u32 %v14615_v9, %v10702_v8  ;;  %v10494_v37 = vld [vmem:[#allocation5 + $0x650] sm:$0xf]  ;;  %v14563_v39 = vld [vmem:[#allocation5 + $0x654] sm:$0xf0]  ;;  %v10678_v60 = vld [vmem:[#allocation5 + $0x7c0] sm:$0xf] }
  0x84   : > { %7615 = vmatpush.bf16.msra.mxu0 %v10255_v27  ;;  %7584 = vmatmul.bf16.vlgmr.msrb.gmra.mxu1 %v16040_v44  ;;  %v14509_v27 = vld [vmem:[#allocation5 + $0x4a4] sm:$0xf0]  ;;  %v14559_v2 = vld [vmem:[#allocation5 + $0x634] sm:$0xf0]  ;;  %v10670_v8 = vld [vmem:[#allocation5 + $0x7b0] sm:$0xf] }
  0x85   : > { %7628 = vmatpush.bf16.msra.mxu1 %v10319_v29  ;;  %7597 = vmatmul.bf16.vlgmr.msrb.gmra.mxu2 %v16034_v38  ;;  %v14525_v29 = vld [vmem:[#allocation5 + $0x524] sm:$0xf0]  ;;  %v16054_v33 = vpack.c.b16 %v1546_v14, %v1546_v14  ;;  %v14607_v9 = vld [vmem:[#allocation5 + $0x7b4] sm:$0xf0]  ;;  %s9547_s8 = scalar_lea.sflag [#allocation4], %s16000_s7  ;;  %s15788_s9 = sshra.s32 %s9562_s30, 4  ;;  %s15789_s9 = int_to_ptr.hbm [resolvable:$true] %s15788_s9 }
  0x86   : > { %7641 = vmatpush.bf16.msra.mxu2 %v10383_v30  ;;  %7610 = vmatmul.bf16.vlgmr.msrb.gmra.mxu3 %v16038_v42  ;;  %v10406_v30 = vld [vmem:[#allocation5 + $0x5a0] sm:$0xf]  ;;  %v10343_v35 = vor.u32 %v14525_v29, %v10342_v28  ;;  %v14597_v28 = vld [vmem:[#allocation5 + $0x764] sm:$0xf0]  ;;  %s15790_s25 = scalar_lea.hbm %s15789_s9, 8  ;;  %s15794_s15 = scalar_lea.hbm %s16471_s5, 16 }
  0x87   : > { %7654 = vmatpush.bf16.msra.mxu3 %v10447_v34  ;;  %v10279_v34 = vor.u32 %v14509_v27, %v10278_v25  ;;  %v10407_v40 = vor.u32 %v14541_v31, %v10406_v30  ;;  %v10630_v27 = vld [vmem:[#allocation5 + $0x760] sm:$0xf]  ;;  %v14557_v14 = vld [vmem:[#allocation5 + $0x624] sm:$0xf0]  ;;  %p15791_p1 = scmp.ne.s32.totalorder %s15789_s9, %s15790_s25  ;;  %p15795_p12 = scmp.lt.s32.totalorder %s15789_s9, %s16471_s5 }
  0x88   : > { %7616 = vmatpush.bf16.msra.mxu0 %v10247_v43  ;;  %v10334_v43 = vld [vmem:[#allocation5 + $0x510] sm:$0xf]  ;;  %v10694_v31 = vld [vmem:[#allocation5 + $0x7e0] sm:$0xf]  ;;  %v10631_v36 = vor.u32 %v14597_v28, %v10630_v27  ;;  %p15796_p7 = scmp.lt.s32.totalorder %s15794_s15, %s15790_s25 }
  0x89   : > { %7629 = vmatpush.bf16.msra.mxu1 %v10311_v45  ;;  %v14523_v45 = vld [vmem:[#allocation5 + $0x514] sm:$0xf0]  ;;  %p15792_p3 = pnand %p15791_p1, %p15971_p4 }
  0x8a   : > { %7642 = vmatpush.bf16.msra.mxu2 %v10375_v46  ;;  %v10398_v46 = vld [vmem:[#allocation5 + $0x590] sm:$0xf]  ;;  %v10335_v54 = vor.u32 %v14523_v45, %v10334_v43  ;;  %v14579_v45 = vld [vmem:[#allocation5 + $0x6d4] sm:$0xf0]  ;;  %p15797_p8 = por %p15796_p7, %p15795_p12 }
  0x8b   : > { %7655 = vmatpush.bf16.msra.mxu3 %v10439_v50  ;;  %v14489_v50 = vld [vmem:[#allocation5 + $0x404] sm:$0xf0]  ;;  %p15793_p5 = pneg %p15792_p3 }
  0x8c   : > { %7617 = vmatpush.bf16.msra.mxu0 %v10239_v56  ;;  %v14521_v56 = vld [vmem:[#allocation5 + $0x504] sm:$0xf0]  ;;  %v10199_v1 = vor.u32 %v14489_v50, %v10198_v48  ;;  %v10686_v48 = vld [vmem:[#allocation5 + $0x7d0] sm:$0xf]  ;;  %v10495_v50 = vor.u32 %v14563_v39, %v10494_v37  ;;  %v14571_v37 = vld [vmem:[#allocation5 + $0x694] sm:$0xf0] }
  0x8d   : > { %7630 = vmatpush.bf16.msra.mxu1 %v10303_v57  ;;  %v309_v57 = vld [vmem:[%s16004_s23 + $0x20] sm:$0xff]  ;;  %v10327_v7 = vor.u32 %v14521_v56, %v10326_v55  ;;  %v10590_v39 = vld [vmem:[#allocation5 + $0x710] sm:$0xf]  ;;  %p15798_p9 = pnand %p15797_p8, %p15793_p5 }
  0x8e   : > { %7643 = vmatpush.bf16.msra.mxu2 %v10367_v58  ;;  %v10399_v58 = vor.u32 %v14539_v47, %v10398_v46  ;;  %v1544_v11 = vunpack.c.h.b16 %v309_v57  ;;  %v10622_v46 = vld [vmem:[#allocation5 + $0x750] sm:$0xf]  ;;  %v14595_v47 = vld [vmem:[#allocation5 + $0x754] sm:$0xf0]  ;;  %v10550_v55 = vld [vmem:[#allocation5 + $0x6c0] sm:$0xf] }
  0x8f   : > { %7656 = vmatpush.bf16.msra.mxu3 %v10431_v62  ;;  %v10510_v62 = vld [vmem:[#allocation5 + $0x670] sm:$0xf] }
  0x90   : > { %7618 = vmatpush.bf16.msra.mxu0 %v10231_v4  ;;  %v14599_v4 = vld [vmem:[#allocation5 + $0x774] sm:$0xf0]  ;;  %v10511_v13 = vor.u32 %v14567_v63, %v10510_v62  ;;  %v16052_v30 = vpack.c.b16 %v1544_v11, %v1544_v11 }
  0x91   : > { %7631 = vmatpush.bf16.msra.mxu1 %v10295_v5  ;;  %v1543_v5 = vunpack.c.l.b16 %v309_v57  ;;  %v14577_v57 = vld [vmem:[#allocation5 + $0x6c4] sm:$0xf0] }
  0x92   : > { %7644 = vmatpush.bf16.msra.mxu2 %v10359_v6  ;;  %v10263_v6 = vor.u32 %v14505_v52, %v10262_v51  ;;  %v10623_v52 = vor.u32 %v14595_v47, %v10622_v46  ;;  %v10551_v63 = vor.u32 %v14577_v57, %v10550_v55  ;;  %v10454_v46 = vld [vmem:[#allocation5 + $0x600] sm:$0xf]  ;;  %v311_v55 = vld [vmem:[%s16004_s23 + $0x30] sm:$0xff] }
  0x93   : > { %7657 = vmatpush.bf16.msra.mxu3 %v10423_v10  ;;  %v1545_v10 = vunpack.c.l.b16 %v310_v61  ;;  %v16048_v25 = vpack.c.b16 %v1543_v5, %v1543_v5  ;;  %v14609_v61 = vld [vmem:[#allocation5 + $0x7c4] sm:$0xf0]  ;;  %v14575_v5 = vld [vmem:[#allocation5 + $0x6b4] sm:$0xf0]  ;;  %v10646_v57 = vld [vmem:[#allocation5 + $0x780] sm:$0xf] }
  0x94   : > { %7619 = vmatpush.bf16.msra.mxu0 %v10223_v16  ;;  %v10639_v16 = vor.u32 %v14599_v4, %v10638_v3  ;;  %v10542_v3 = vld [vmem:[#allocation5 + $0x6b0] sm:$0xf]  ;;  %v10679_v4 = vor.u32 %v14609_v61, %v10678_v60  ;;  %v14631_v61 = vld [vmem:[#allocation5 + $0x874] sm:$0xf0] }
  0x95   : > { %7632 = vmatpush.bf16.msra.mxu1 %v10287_v17  ;;  %v10502_v17 = vld [vmem:[#allocation5 + $0x660] sm:$0xf]  ;;  %v16050_v29 = vpack.c.b16 %v1545_v10, %v1545_v10  ;;  %v10543_v11 = vor.u32 %v14575_v5, %v10542_v3  ;;  %v10766_v60 = vld [vmem:[#allocation5 + $0x870] sm:$0xf]  ;;  %v1547_v3 = vunpack.c.l.b16 %v311_v55 }
  0x96   : > { %7645 = vmatpush.bf16.msra.mxu2 %v10351_v21  ;;  %v14565_v21 = vld [vmem:[#allocation5 + $0x664] sm:$0xf0] }
  0x97   : > { %7658 = vmatpush.bf16.msra.mxu3 %v10415_v26  ;;  %v14581_v26 = vld [vmem:[#allocation5 + $0x6e4] sm:$0xf0] }
  0x98   : > { %7620 = vmatpush.bf16.msra.mxu0 %v10215_v32  ;;  %v14613_v32 = vld [vmem:[#allocation5 + $0x7e4] sm:$0xf0] }
  0x99   : > { %7633 = vmatpush.bf16.msra.mxu1 %v10279_v34  ;;  %v10503_v34 = vor.u32 %v14565_v21, %v10502_v17  ;;  %v10695_v43 = vor.u32 %v14613_v32, %v10694_v31  ;;  %v14573_v17 = vld [vmem:[#allocation5 + $0x6a4] sm:$0xf0]  ;;  %v10598_v21 = vld [vmem:[#allocation5 + $0x720] sm:$0xf]  ;;  %v10462_v32 = vld [vmem:[#allocation5 + $0x610] sm:$0xf] }
  0x9a   : > { %7646 = vmatpush.bf16.msra.mxu2 %v10343_v35  ;;  %v10567_v35 = vor.u32 %v14581_v26, %v10566_v23  ;;  %v14589_v23 = vld [vmem:[#allocation5 + $0x724] sm:$0xf0] }
  0x9b   : > { %7659 = vmatpush.bf16.msra.mxu3 %v10407_v40  ;;  %v10558_v40 = vld [vmem:[#allocation5 + $0x6d0] sm:$0xf]  ;;  %v14605_v26 = vld [vmem:[#allocation5 + $0x7a4] sm:$0xf0]  ;;  %v10599_v31 = vor.u32 %v14589_v23, %v10598_v21  ;;  %v16062_v23 = vpack.c.b16 %v1547_v3, %v1547_v3 }
  0x9c   : > { %7621 = vmatpush.bf16.msra.mxu0 %v10207_v49  ;;  %v14611_v49 = vld [vmem:[#allocation5 + $0x7d4] sm:$0xf0]  ;;  %v10559_v51 = vor.u32 %v14579_v45, %v10558_v40  ;;  %v10734_v3 = vld [vmem:[#allocation5 + $0x830] sm:$0xf] }
  0x9d   : > { %7634 = vmatpush.bf16.msra.mxu1 %v10271_v53  ;;  %v10486_v53 = vld [vmem:[#allocation5 + $0x640] sm:$0xf]  ;;  %v10687_v56 = vor.u32 %v14611_v49, %v10686_v48  ;;  %v14587_v40 = vld [vmem:[#allocation5 + $0x714] sm:$0xf0]  ;;  %v14553_v48 = vld [vmem:[#allocation5 + $0x604] sm:$0xf0] }
  0x9e   : > { %7647 = vmatpush.bf16.msra.mxu2 %v10335_v54  ;;  %v14561_v54 = vld [vmem:[#allocation5 + $0x644] sm:$0xf0]  ;;  %v14603_v45 = vld [vmem:[#allocation5 + $0x794] sm:$0xf0]  ;;  %v10518_v49 = vld [vmem:[#allocation5 + $0x680] sm:$0xf] }
  0x9f   : > { %7660 = vmatpush.bf16.msra.mxu3 %v10399_v58  ;;  %v10614_v58 = vld [vmem:[#allocation5 + $0x740] sm:$0xf]  ;;  %v10487_v62 = vor.u32 %v14561_v54, %v10486_v53  ;;  %v14585_v54 = vld [vmem:[#allocation5 + $0x704] sm:$0xf0] }
  0xa0   : > { %7622 = vmatpush.bf16.msra.mxu0 %v10199_v1  ;;  %v10615_v0 = vor.u32 %v14593_v59, %v10614_v58  ;;  %v10478_v1 = vld [vmem:[#allocation5 + $0x630] sm:$0xf]  ;;  %v10582_v53 = vld [vmem:[#allocation5 + $0x700] sm:$0xf]  ;;  %v14601_v58 = vld [vmem:[#allocation5 + $0x784] sm:$0xf0] }
  0xa1   : > { %7635 = vmatpush.bf16.msra.mxu1 %v10263_v6  ;;  %v10606_v6 = vld [vmem:[#allocation5 + $0x730] sm:$0xf]  ;;  %v10479_v10 = vor.u32 %v14559_v2, %v10478_v1  ;;  %v312_v59 = vld [vmem:[%s16004_s23 + $0x38] sm:$0xff]  ;;  %v10583_v5 = vor.u32 %v14585_v54, %v10582_v53 }
  0xa2   : > { %7648 = vmatpush.bf16.msra.mxu2 %v10327_v7  ;;  %v14591_v7 = vld [vmem:[#allocation5 + $0x734] sm:$0xf0]  ;;  %v10894_v1 = vld [vmem:[#allocation5 + $0x970] sm:$0xf] }
  0xa3   : > { %7661 = vmatpush.bf16.msra.mxu3 %v10391_v12  ;;  %7623 = vmatmul.bf16.vlgmr.msra.gmra.mxu0 %v16048_v25  ;;  %v10607_v12 = vor.u32 %v14591_v7, %v10606_v6  ;;  %v14663_v2 = vld [vmem:[#allocation5 + $0x974] sm:$0xf0]  ;;  %v10958_v6 = vld [vmem:[#allocation5 + $0x9f0] sm:$0xf] }
  0xa4   : > { %7667 = vmatpush.bf16.msrb.mxu0 %v10511_v13  ;;  %7636 = vmatmul.bf16.vlgmr.msra.gmra.mxu1 %v16052_v30  ;;  %v10470_v13 = vld [vmem:[#allocation5 + $0x620] sm:$0xf]  ;;  %v14679_v7 = vld [vmem:[#allocation5 + $0x9f4] sm:$0xf0] }
  0xa5   : > { %7680 = vmatpush.bf16.msrb.mxu1 %v10575_v15  ;;  %7649 = vmatmul.bf16.vlgmr.msra.gmra.mxu2 %v16050_v29  ;;  %v10534_v15 = vld [vmem:[#allocation5 + $0x6a0] sm:$0xf]  ;;  %v10471_v27 = vor.u32 %v14557_v14, %v10470_v13  ;;  %v10895_v14 = vor.u32 %v14663_v2, %v10894_v1  ;;  %v10959_v21 = vor.u32 %v14679_v7, %v10958_v6  ;;  %v14639_v7 = vld [vmem:[#allocation5 + $0x8b4] sm:$0xf0] }
  0xa6   : > { %7693 = vmatpush.bf16.msrb.mxu2 %v10639_v16  ;;  %7662 = vmatmul.bf16.vlgmr.msra.gmra.mxu3 %v16054_v33  ;;  %v10671_v16 = vor.u32 %v14607_v9, %v10670_v8  ;;  %v10535_v28 = vor.u32 %v14573_v17, %v10534_v15  ;;  %v1549_v8 = vunpack.c.l.b16 %v312_v59  ;;  %v1548_v9 = vunpack.c.h.b16 %v311_v55  ;;  %v10758_v15 = vld [vmem:[#allocation5 + $0x860] sm:$0xf] }
  0xa7   : > { %7706 = vmatpush.bf16.msrb.mxu3 %v10703_v24  ;;  %v10662_v24 = vld [vmem:[#allocation5 + $0x7a0] sm:$0xf] }
  0xa8   : > { %7668 = vmatpush.bf16.msrb.mxu0 %v10503_v34  ;;  %v14555_v34 = vld [vmem:[#allocation5 + $0x614] sm:$0xf0]  ;;  %v10822_v17 = vld [vmem:[#allocation5 + $0x8e0] sm:$0xf] }
  0xa9   : > { %7681 = vmatpush.bf16.msrb.mxu1 %v10567_v35  ;;  %v10526_v35 = vld [vmem:[#allocation5 + $0x690] sm:$0xf]  ;;  %v10463_v47 = vor.u32 %v14555_v34, %v10462_v32  ;;  %v10950_v32 = vld [vmem:[#allocation5 + $0x9e0] sm:$0xf]  ;;  %v14677_v34 = vld [vmem:[#allocation5 + $0x9e4] sm:$0xf0] }
  0xaa   : > { %7694 = vmatpush.bf16.msrb.mxu2 %v10631_v36  ;;  %v10663_v36 = vor.u32 %v14605_v26, %v10662_v24  ;;  %v14645_v24 = vld [vmem:[#allocation5 + $0x8e4] sm:$0xf0]  ;;  %v10886_v26 = vld [vmem:[#allocation5 + $0x960] sm:$0xf] }
  0xab   : > { %7707 = vmatpush.bf16.msrb.mxu3 %v10695_v43  ;;  %v10654_v43 = vld [vmem:[#allocation5 + $0x790] sm:$0xf]  ;;  %v10742_v55 = vld [vmem:[#allocation5 + $0x840] sm:$0xf] }
  0xac   : > { %7669 = vmatpush.bf16.msrb.mxu0 %v10495_v50  ;;  %v14569_v50 = vld [vmem:[#allocation5 + $0x684] sm:$0xf0] }
  0xad   : > { %7682 = vmatpush.bf16.msrb.mxu1 %v10559_v51  ;;  %v10527_v51 = vor.u32 %v14571_v37, %v10526_v35  ;;  %v10823_v37 = vor.u32 %v14645_v24, %v10822_v17  ;;  %v10790_v17 = vld [vmem:[#allocation5 + $0x8a0] sm:$0xf]  ;;  %v14637_v24 = vld [vmem:[#allocation5 + $0x8a4] sm:$0xf0] }
  0xae   : > { %7695 = vmatpush.bf16.msrb.mxu2 %v10623_v52  ;;  %v10591_v52 = vor.u32 %v14587_v40, %v10590_v39  ;;  %v10750_v40 = vld [vmem:[#allocation5 + $0x850] sm:$0xf] }
  0xaf   : > { %7708 = vmatpush.bf16.msrb.mxu3 %v10687_v56  ;;  %v10655_v56 = vor.u32 %v14603_v45, %v10654_v43  ;;  %v14627_v43 = vld [vmem:[#allocation5 + $0x854] sm:$0xf0]  ;;  %v10814_v45 = vld [vmem:[#allocation5 + $0x8d0] sm:$0xf] }
  0xb0   : > { %7670 = vmatpush.bf16.msrb.mxu0 %v10487_v62  ;;  %v10830_v62 = vld [vmem:[#allocation5 + $0x8f0] sm:$0xf] }
  0xb1   : > { %7683 = vmatpush.bf16.msrb.mxu1 %v10551_v63  ;;  %v10455_v63 = vor.u32 %v14553_v48, %v10454_v46  ;;  %v10951_v46 = vor.u32 %v14677_v34, %v10950_v32  ;;  %v10878_v48 = vld [vmem:[#allocation5 + $0x950] sm:$0xf]  ;;  %v10918_v32 = vld [vmem:[#allocation5 + $0x9a0] sm:$0xf]  ;;  %v14669_v34 = vld [vmem:[#allocation5 + $0x9a4] sm:$0xf0] }
  0xb2   : > { %7696 = vmatpush.bf16.msrb.mxu2 %v10615_v0  ;;  %v14647_v0 = vld [vmem:[#allocation5 + $0x8f4] sm:$0xf0] }
  0xb3   : > { %7709 = vmatpush.bf16.msrb.mxu3 %v10679_v4  ;;  %v10519_v4 = vor.u32 %v14569_v50, %v10518_v49  ;;  %v10831_v13 = vor.u32 %v14647_v0, %v10830_v62  ;;  %v14659_v49 = vld [vmem:[#allocation5 + $0x954] sm:$0xf0]  ;;  %v10942_v50 = vld [vmem:[#allocation5 + $0x9d0] sm:$0xf]  ;;  %v10934_v62 = vld [vmem:[#allocation5 + $0x9c0] sm:$0xf] }
  0xb4   : > { %7671 = vmatpush.bf16.msrb.mxu0 %v10479_v10  ;;  %v10647_v10 = vor.u32 %v14601_v58, %v10646_v57  ;;  %v10879_v54 = vor.u32 %v14659_v49, %v10878_v48  ;;  %v10806_v57 = vld [vmem:[#allocation5 + $0x8c0] sm:$0xf]  ;;  %v10846_v48 = vld [vmem:[#allocation5 + $0x910] sm:$0xf]  ;;  %v14651_v49 = vld [vmem:[#allocation5 + $0x914] sm:$0xf0] }
  0xb5   : > { %7684 = vmatpush.bf16.msrb.mxu1 %v10543_v11  ;;  %v10767_v11 = vor.u32 %v14631_v61, %v10766_v60  ;;  %v10870_v60 = vld [vmem:[#allocation5 + $0x940] sm:$0xf]  ;;  %v14657_v61 = vld [vmem:[#allocation5 + $0x944] sm:$0xf0] }
  0xb6   : > { %7697 = vmatpush.bf16.msrb.mxu2 %v10607_v12  ;;  %v1550_v12 = vunpack.c.h.b16 %v312_v59  ;;  %v14641_v59 = vld [vmem:[#allocation5 + $0x8c4] sm:$0xf0]  ;;  %v10871_v2 = vor.u32 %v14657_v61, %v10870_v60  ;;  %v313_v61 = vld [vmem:[%s16004_s23 + $0x40] sm:$0xff] }
  0xb7   : > { %7710 = vmatpush.bf16.msrb.mxu3 %v10671_v16  ;;  %v14629_v16 = vld [vmem:[#allocation5 + $0x864] sm:$0xf0]  ;;  %v10807_v1 = vor.u32 %v14641_v59, %v10806_v57  ;;  %v10838_v59 = vld [vmem:[#allocation5 + $0x900] sm:$0xf] }
  0xb8   : > { %7672 = vmatpush.bf16.msrb.mxu0 %v10471_v27  ;;  %v14661_v27 = vld [vmem:[#allocation5 + $0x964] sm:$0xf0]  ;;  %v16068_v35 = vpack.c.b16 %v1550_v12, %v1550_v12 }
  0xb9   : > { %7685 = vmatpush.bf16.msrb.mxu1 %v10535_v28  ;;  %v16064_v28 = vpack.c.b16 %v1549_v8, %v1549_v8  ;;  %v10887_v39 = vor.u32 %v14661_v27, %v10886_v26  ;;  %v10862_v8 = vld [vmem:[#allocation5 + $0x930] sm:$0xf]  ;;  %v10854_v26 = vld [vmem:[#allocation5 + $0x920] sm:$0xf]  ;;  %v14653_v27 = vld [vmem:[#allocation5 + $0x924] sm:$0xf0] }
  0xba   : > { %7698 = vmatpush.bf16.msrb.mxu2 %v10599_v31  ;;  %v16066_v31 = vpack.c.b16 %v1548_v9, %v1548_v9  ;;  %v14655_v9 = vld [vmem:[#allocation5 + $0x934] sm:$0xf0]  ;;  %v14649_v60 = vld [vmem:[#allocation5 + $0x904] sm:$0xf0] }
  0xbb   : > { %7711 = vmatpush.bf16.msrb.mxu3 %v10663_v36  ;;  %v10759_v36 = vor.u32 %v14629_v16, %v10758_v15  ;;  %v10726_v15 = vld [vmem:[#allocation5 + $0x820] sm:$0xf]  ;;  %v14621_v16 = vld [vmem:[#allocation5 + $0x824] sm:$0xf0] }
  0xbc   : > { %7673 = vmatpush.bf16.msrb.mxu0 %v10463_v47  ;;  %v14643_v47 = vld [vmem:[#allocation5 + $0x8d4] sm:$0xf0] }
  0xbd   : > { %7686 = vmatpush.bf16.msrb.mxu1 %v10527_v51  ;;  %v14675_v51 = vld [vmem:[#allocation5 + $0x9d4] sm:$0xf0]  ;;  %v10815_v53 = vor.u32 %v14643_v47, %v10814_v45  ;;  %v10782_v45 = vld [vmem:[#allocation5 + $0x890] sm:$0xf] }
  0xbe   : > { %7699 = vmatpush.bf16.msrb.mxu2 %v10591_v52  ;;  %v10751_v52 = vor.u32 %v14627_v43, %v10750_v40  ;;  %v10943_v58 = vor.u32 %v14675_v51, %v10942_v50  ;;  %v10718_v40 = vld [vmem:[#allocation5 + $0x810] sm:$0xf]  ;;  %v14619_v43 = vld [vmem:[#allocation5 + $0x814] sm:$0xf0] }
  0xbf   : > { %7712 = vmatpush.bf16.msrb.mxu3 %v10655_v56  ;;  %v14625_v56 = vld [vmem:[#allocation5 + $0x844] sm:$0xf0]  ;;  %v14635_v47 = vld [vmem:[#allocation5 + $0x894] sm:$0xf0]  ;;  %v10910_v50 = vld [vmem:[#allocation5 + $0x990] sm:$0xf] }
  0xc0   : > { %7674 = vmatpush.bf16.msrb.mxu0 %v10455_v63  ;;  %v14673_v63 = vld [vmem:[#allocation5 + $0x9c4] sm:$0xf0]  ;;  %v10743_v0 = vor.u32 %v14625_v56, %v10742_v55  ;;  %v14667_v51 = vld [vmem:[#allocation5 + $0x994] sm:$0xf0]  ;;  %v10774_v55 = vld [vmem:[#allocation5 + $0x880] sm:$0xf]  ;;  %v10783_v57 = vor.u32 %v14635_v47, %v10782_v45 }
  0xc1   : > { %7687 = vmatpush.bf16.msrb.mxu1 %v10519_v4  ;;  %v14623_v4 = vld [vmem:[#allocation5 + $0x834] sm:$0xf0]  ;;  %v10935_v6 = vor.u32 %v14673_v63, %v10934_v62  ;;  %v14633_v56 = vld [vmem:[#allocation5 + $0x884] sm:$0xf0]  ;;  %v10911_v62 = vor.u32 %v14667_v51, %v10910_v50  ;;  %v10902_v63 = vld [vmem:[#allocation5 + $0x980] sm:$0xf] }
  0xc2   : > { %7700 = vmatpush.bf16.msrb.mxu2 %v10583_v5  ;;  %v10798_v5 = vld [vmem:[#allocation5 + $0x8b0] sm:$0xf]  ;;  %v10735_v12 = vor.u32 %v14623_v4, %v10734_v3  ;;  %v14695_v3 = vld [vmem:[#allocation5 + $0xa74] sm:$0xf0]  ;;  %v11206_v47 = vld [vmem:[#allocation5 + $0xbe0] sm:$0xf] }
  0xc3   : > { %7713 = vmatpush.bf16.msrb.mxu3 %v10647_v10  ;;  %7675 = vmatmul.bf16.vlgmr.msrb.gmra.mxu0 %v16062_v23  ;;  %v10926_v10 = vld [vmem:[#allocation5 + $0x9b0] sm:$0xf] }
  0xc4   : > { %7719 = vmatpush.bf16.msra.mxu0 %v10767_v11  ;;  %7688 = vmatmul.bf16.vlgmr.msrb.gmra.mxu1 %v16066_v31  ;;  %v14671_v11 = vld [vmem:[#allocation5 + $0x9b4] sm:$0xf0]  ;;  %v11086_v4 = vld [vmem:[#allocation5 + $0xaf0] sm:$0xf] }
  0xc5   : > { %7732 = vmatpush.bf16.msra.mxu1 %v10831_v13  ;;  %7701 = vmatmul.bf16.vlgmr.msrb.gmra.mxu2 %v16064_v28  ;;  %v10799_v13 = vor.u32 %v14639_v7, %v10798_v5  ;;  %v11150_v7 = vld [vmem:[#allocation5 + $0xb70] sm:$0xf] }
  0xc6   : > { %7745 = vmatpush.bf16.msra.mxu2 %v10895_v14  ;;  %7714 = vmatmul.bf16.vlgmr.msrb.gmra.mxu3 %v16068_v35  ;;  %v10863_v14 = vor.u32 %v14655_v9, %v10862_v8  ;;  %v14727_v8 = vld [vmem:[#allocation5 + $0xb74] sm:$0xf0]  ;;  %v1551_v9 = vunpack.c.l.b16 %v313_v61 }
  0xc7   : > { %7758 = vmatpush.bf16.msra.mxu3 %v10959_v21  ;;  %v10927_v21 = vor.u32 %v14671_v11, %v10926_v10  ;;  %v10775_v10 = vor.u32 %v14633_v56, %v10774_v55  ;;  %v10839_v11 = vor.u32 %v14649_v60, %v10838_v59  ;;  %v11070_v55 = vld [vmem:[#allocation5 + $0xad0] sm:$0xf]  ;;  %v14723_v59 = vld [vmem:[#allocation5 + $0xb54] sm:$0xf0] }
  0xc8   : > { %7720 = vmatpush.bf16.msra.mxu0 %v10759_v36  ;;  %v10727_v36 = vor.u32 %v14621_v16, %v10726_v15  ;;  %v1552_v15 = vunpack.c.h.b16 %v313_v61  ;;  %v11198_v60 = vld [vmem:[#allocation5 + $0xbd0] sm:$0xf]  ;;  %v14739_v61 = vld [vmem:[#allocation5 + $0xbd4] sm:$0xf0] }
  0xc9   : > { %7733 = vmatpush.bf16.msra.mxu1 %v10823_v37  ;;  %v10791_v37 = vor.u32 %v14637_v24, %v10790_v17 }
  0xca   : > { %7746 = vmatpush.bf16.msra.mxu2 %v10887_v39  ;;  %v10855_v39 = vor.u32 %v14653_v27, %v10854_v26  ;;  %v11151_v26 = vor.u32 %v14727_v8, %v11150_v7  ;;  %v11014_v27 = vld [vmem:[#allocation5 + $0xa60] sm:$0xf]  ;;  %v14721_v7 = vld [vmem:[#allocation5 + $0xb44] sm:$0xf0] }
  0xcb   : > { %7759 = vmatpush.bf16.msra.mxu3 %v10951_v46  ;;  %v10919_v46 = vor.u32 %v14669_v34, %v10918_v32  ;;  %v14693_v32 = vld [vmem:[#allocation5 + $0xa64] sm:$0xf0]  ;;  %v11078_v34 = vld [vmem:[#allocation5 + $0xae0] sm:$0xf] }
  0xcc   : > { %7721 = vmatpush.bf16.msra.mxu0 %v10751_v52  ;;  %v10710_v52 = vld [vmem:[#allocation5 + $0x800] sm:$0xf]  ;;  %v11015_v50 = vor.u32 %v14693_v32, %v11014_v27  ;;  %v11182_v27 = vld [vmem:[#allocation5 + $0xbb0] sm:$0xf]  ;;  %v14735_v32 = vld [vmem:[#allocation5 + $0xbb4] sm:$0xf0] }
  0xcd   : > { %7734 = vmatpush.bf16.msra.mxu1 %v10815_v53  ;;  %v10719_v53 = vor.u32 %v14619_v43, %v10718_v40  ;;  %v11142_v40 = vld [vmem:[#allocation5 + $0xb60] sm:$0xf]  ;;  %v14725_v43 = vld [vmem:[#allocation5 + $0xb64] sm:$0xf0] }
  0xce   : > { %7747 = vmatpush.bf16.msra.mxu2 %v10879_v54  ;;  %v14617_v54 = vld [vmem:[#allocation5 + $0x804] sm:$0xf0]  ;;  %v11190_v8 = vld [vmem:[#allocation5 + $0xbc0] sm:$0xf] }
  0xcf   : > { %7760 = vmatpush.bf16.msra.mxu3 %v10943_v58  ;;  %v10847_v58 = vor.u32 %v14651_v49, %v10846_v48  ;;  %v10711_v5 = vor.u32 %v14617_v54, %v10710_v52  ;;  %v14741_v48 = vld [vmem:[#allocation5 + $0xbe4] sm:$0xf0]  ;;  %v11143_v52 = vor.u32 %v14725_v43, %v11142_v40  ;;  %v14691_v54 = vld [vmem:[#allocation5 + $0xa54] sm:$0xf0] }
  0xd0   : > { %7722 = vmatpush.bf16.msra.mxu0 %v10743_v0  ;;  %v14665_v0 = vld [vmem:[#allocation5 + $0x984] sm:$0xf0]  ;;  %v11207_v56 = vor.u32 %v14741_v48, %v11206_v47  ;;  %v11046_v47 = vld [vmem:[#allocation5 + $0xaa0] sm:$0xf] }
  0xd1   : > { %7735 = vmatpush.bf16.msra.mxu1 %v10807_v1  ;;  %v314_v1 = vld [vmem:[%s16004_s23 + $0x48] sm:$0xff]  ;;  %v10903_v16 = vor.u32 %v14665_v0, %v10902_v63 }
  0xd2   : > { %7748 = vmatpush.bf16.msra.mxu2 %v10871_v2  ;;  %v11022_v2 = vld [vmem:[#allocation5 + $0xa70] sm:$0xf]  ;;  %v14685_v43 = vld [vmem:[#allocation5 + $0xa24] sm:$0xf0] }
  0xd3   : > { %7761 = vmatpush.bf16.msra.mxu3 %v10935_v6  ;;  %v14711_v6 = vld [vmem:[#allocation5 + $0xaf4] sm:$0xf0]  ;;  %v11023_v17 = vor.u32 %v14695_v3, %v11022_v2  ;;  %v14689_v2 = vld [vmem:[#allocation5 + $0xa44] sm:$0xf0]  ;;  %v11062_v3 = vld [vmem:[#allocation5 + $0xac0] sm:$0xf] }
  0xd4   : > { %7723 = vmatpush.bf16.msra.mxu0 %v10735_v12  ;;  %v11214_v12 = vld [vmem:[#allocation5 + $0xbf0] sm:$0xf]  ;;  %v11087_v24 = vor.u32 %v14711_v6, %v11086_v4  ;;  %v11199_v4 = vor.u32 %v14739_v61, %v11198_v60  ;;  %v11126_v6 = vld [vmem:[#allocation5 + $0xb40] sm:$0xf]  ;;  %v14683_v61 = vld [vmem:[#allocation5 + $0xa14] sm:$0xf0] }
  0xd5   : > { %7736 = vmatpush.bf16.msra.mxu1 %v10799_v13  ;;  %v14743_v13 = vld [vmem:[#allocation5 + $0xbf4] sm:$0xf0]  ;;  %v10974_v60 = vld [vmem:[#allocation5 + $0xa10] sm:$0xf] }
  0xd6   : > { %7749 = vmatpush.bf16.msra.mxu2 %v10863_v14  ;;  %v1553_v14 = vunpack.c.l.b16 %v314_v1 }
  0xd7   : > { %7762 = vmatpush.bf16.msra.mxu3 %v10927_v21  ;;  %v1554_v21 = vunpack.c.h.b16 %v314_v1  ;;  %v10998_v1 = vld [vmem:[#allocation5 + $0xa40] sm:$0xf] }
  0xd8   : > { %7724 = vmatpush.bf16.msra.mxu0 %v10727_v36  ;;  %v11215_v36 = vor.u32 %v14743_v13, %v11214_v12  ;;  %v16078_v45 = vpack.c.b16 %v1553_v14, %v1553_v14  ;;  %v11127_v13 = vor.u32 %v14721_v7, %v11126_v6  ;;  %v14687_v14 = vld [vmem:[#allocation5 + $0xa34] sm:$0xf0]  ;;  %v10966_v7 = vld [vmem:[#allocation5 + $0xa00] sm:$0xf] }
  0xd9   : > { %7737 = vmatpush.bf16.msra.mxu1 %v10791_v37  ;;  %v16076_v37 = vpack.c.b16 %v1551_v9, %v1551_v9  ;;  %v16082_v49 = vpack.c.b16 %v1554_v21, %v1554_v21  ;;  %v14737_v9 = vld [vmem:[#allocation5 + $0xbc4] sm:$0xf0]  ;;  %v11118_v21 = vld [vmem:[#allocation5 + $0xb30] sm:$0xf]  ;;  %v14731_v6 = vld [vmem:[#allocation5 + $0xb94] sm:$0xf0] }
  0xda   : > { %7750 = vmatpush.bf16.msra.mxu2 %v10855_v39  ;;  %v14709_v39 = vld [vmem:[#allocation5 + $0xae4] sm:$0xf0] }
  0xdb   : > { %7763 = vmatpush.bf16.msra.mxu3 %v10919_v46  ;;  %v16080_v46 = vpack.c.b16 %v1552_v15, %v1552_v15  ;;  %v11079_v51 = vor.u32 %v14709_v39, %v11078_v34  ;;  %v11054_v15 = vld [vmem:[#allocation5 + $0xab0] sm:$0xf] }
  0xdc   : > { %7725 = vmatpush.bf16.msra.mxu0 %v10719_v53  ;;  %v11006_v53 = vld [vmem:[#allocation5 + $0xa50] sm:$0xf] }
  0xdd   : > { %7738 = vmatpush.bf16.msra.mxu1 %v10783_v57  ;;  %v14707_v57 = vld [vmem:[#allocation5 + $0xad4] sm:$0xf0] }
  0xde   : > { %7751 = vmatpush.bf16.msra.mxu2 %v10847_v58  ;;  %v11134_v58 = vld [vmem:[#allocation5 + $0xb50] sm:$0xf]  ;;  %v11071_v63 = vor.u32 %v14707_v57, %v11070_v55  ;;  %v14733_v55 = vld [vmem:[#allocation5 + $0xba4] sm:$0xf0] }
  0xdf   : > { %7764 = vmatpush.bf16.msra.mxu3 %v10911_v62  ;;  %v11007_v62 = vor.u32 %v14691_v54, %v11006_v53  ;;  %v11135_v0 = vor.u32 %v14723_v59, %v11134_v58  ;;  %v14717_v53 = vld [vmem:[#allocation5 + $0xb24] sm:$0xf0]  ;;  %v11174_v54 = vld [vmem:[#allocation5 + $0xba0] sm:$0xf] }
  0xe0   : > { %7726 = vmatpush.bf16.msra.mxu0 %v10711_v5  ;;  %v14705_v5 = vld [vmem:[#allocation5 + $0xac4] sm:$0xf0]  ;;  %v7520_v57 = vpop.f32.mrf.mxu0 }
  0xe1   : > { %7739 = vmatpush.bf16.msra.mxu1 %v10775_v10  ;;  %v10999_v10 = vor.u32 %v14689_v2, %v10998_v1  ;;  %v11063_v12 = vor.u32 %v14705_v5, %v11062_v3  ;;  %v11175_v1 = vor.u32 %v14733_v55, %v11174_v54  ;;  %v14699_v2 = vld [vmem:[#allocation5 + $0xa94] sm:$0xf0]  ;;  %v11102_v3 = vld [vmem:[#allocation5 + $0xb10] sm:$0xf] }
  0xe2   : > { %7752 = vmatpush.bf16.msra.mxu2 %v10839_v11  ;;  %v10990_v11 = vld [vmem:[#allocation5 + $0xa30] sm:$0xf] }
  0xe3   : > { %7765 = vmatpush.bf16.msra.mxu3 %v10903_v16  ;;  %7727 = vmatmul.bf16.vlgmr.msra.gmra.mxu0 %v16076_v37  ;;  %v14703_v16 = vld [vmem:[#allocation5 + $0xab4] sm:$0xf0]  ;;  %v10991_v34 = vor.u32 %v14687_v14, %v10990_v11  ;;  %v11166_v5 = vld [vmem:[#allocation5 + $0xb90] sm:$0xf]  ;;  %v11030_v11 = vld [vmem:[#allocation5 + $0xa80] sm:$0xf] }
  0xe4   : > { %7771 = vmatpush.bf16.msrb.mxu0 %v11023_v17  ;;  %7740 = vmatmul.bf16.vlgmr.msra.gmra.mxu1 %v16080_v46  ;;  %v11191_v17 = vor.u32 %v14737_v9, %v11190_v8  ;;  %v11055_v39 = vor.u32 %v14703_v16, %v11054_v15  ;;  %v10975_v9 = vor.u32 %v14683_v61, %v10974_v60  ;;  %v11094_v15 = vld [vmem:[#allocation5 + $0xb00] sm:$0xf]  ;;  %v14713_v16 = vld [vmem:[#allocation5 + $0xb04] sm:$0xf0] }
  0xe5   : > { %7784 = vmatpush.bf16.msrb.mxu1 %v11087_v24  ;;  %7753 = vmatmul.bf16.vlgmr.msra.gmra.mxu2 %v16078_v45  ;;  %v14719_v24 = vld [vmem:[#allocation5 + $0xb34] sm:$0xf0] }
  0xe6   : > { %7797 = vmatpush.bf16.msrb.mxu2 %v11151_v26  ;;  %7766 = vmatmul.bf16.vlgmr.msra.gmra.mxu3 %v16082_v49  ;;  %v1493_v26 = vld [vmem:[#allocation7] sm:$0x3]  ;;  %v11119_v40 = vor.u32 %v14719_v24, %v11118_v21  ;;  %v11167_v24 = vor.u32 %v14731_v6, %v11166_v5 }
  0xe7   : > { %7810 = vmatpush.bf16.msrb.mxu3 %v11215_v36  ;;  %v10982_v36 = vld [vmem:[#allocation5 + $0xa20] sm:$0xf]  ;;  %v1495_v48 = vperm.slane %v1493_v26, 0 }
  0xe8   : > { %7772 = vmatpush.bf16.msrb.mxu0 %v11015_v50  ;;  %v11183_v50 = vor.u32 %v14735_v32, %v11182_v27  ;;  %v7546_v21 = vpop.f32.mrf.mxu2  ;;  %v11158_v26 = vld [vmem:[#allocation5 + $0xb80] sm:$0xf]  ;;  %v14729_v27 = vld [vmem:[#allocation5 + $0xb84] sm:$0xf0]  ;;  %v316_v32 = vld [vmem:[%s16004_s23 + $0x58] sm:$0xff]  ;;  %v7522_v54 = vpop.f32.mrf.mxu0 }
  0xe9   : > { %7785 = vmatpush.bf16.msrb.mxu1 %v11079_v51  ;;  %v14701_v51 = vld [vmem:[#allocation5 + $0xaa4] sm:$0xf0]  ;;  %v11334_v5 = vld [vmem:[#allocation5 + $0xce0] sm:$0xf] }
  0xea   : > { %7798 = vmatpush.bf16.msrb.mxu2 %v11143_v52  ;;  %v11110_v52 = vld [vmem:[#allocation5 + $0xb20] sm:$0xf]  ;;  %v11047_v58 = vor.u32 %v14701_v51, %v11046_v47  ;;  %v14791_v51 = vld [vmem:[#allocation5 + $0xd74] sm:$0xf0] }
  0xeb   : > { %7811 = vmatpush.bf16.msrb.mxu3 %v11207_v56  ;;  %v10983_v56 = vor.u32 %v14685_v43, %v10982_v36  ;;  %v11111_v59 = vor.u32 %v14717_v53, %v11110_v52  ;;  %v7559_v36 = vpop.f32.mrf.mxu3  ;;  %v11342_v43 = vld [vmem:[#allocation5 + $0xcf0] sm:$0xf]  ;;  %v11254_v54 = vld [vmem:[#allocation5 + $0xc40] sm:$0xf] }
  0xec   : > { %7773 = vmatpush.bf16.msrb.mxu0 %v11007_v62  ;;  %v11038_v62 = vld [vmem:[#allocation5 + $0xa90] sm:$0xf] }
  0xed   : > { %7786 = vmatpush.bf16.msrb.mxu1 %v11071_v63  ;;  %v7521_v63 = vadd.f32 %v7520_v57, %v1495_v48  ;;  %v14775_v48 = vld [vmem:[#allocation5 + $0xcf4] sm:$0xf0]  ;;  %v11470_v57 = vld [vmem:[#allocation5 + $0xdf0] sm:$0xf] }
  0xee   : > { %7799 = vmatpush.bf16.msrb.mxu2 %v11135_v0  ;;  %v7533_v0 = vpop.f32.mrf.mxu1 }
  0xef   : > { %7812 = vmatpush.bf16.msrb.mxu3 %v11199_v4  ;;  %v14715_v4 = vld [vmem:[#allocation5 + $0xb14] sm:$0xf0]  ;;  %v7534_v8 = vadd.f32 %v7533_v0, %v7521_v63  ;;  %v1558_v0 = vunpack.c.h.b16 %v316_v32 }
  0xf0   : > { %7774 = vmatpush.bf16.msrb.mxu0 %v10999_v10  ;;  %v14681_v10 = vld [vmem:[#allocation5 + $0xa04] sm:$0xf0]  ;;  %v11103_v14 = vor.u32 %v14715_v4, %v11102_v3  ;;  %v11270_v3 = vld [vmem:[#allocation5 + $0xc60] sm:$0xf] }
  0xf1   : > { %7787 = vmatpush.bf16.msrb.mxu1 %v11063_v12  ;;  %v14697_v12 = vld [vmem:[#allocation5 + $0xa84] sm:$0xf0]  ;;  %v10967_v47 = vor.u32 %v14681_v10, %v10966_v7 }
  0xf2   : > { %7800 = vmatpush.bf16.msrb.mxu2 %v11127_v13  ;;  %v11039_v13 = vor.u32 %v14699_v2, %v11038_v62  ;;  %v11031_v55 = vor.u32 %v14697_v12, %v11030_v11  ;;  %v11159_v62 = vor.u32 %v14729_v27, %v11158_v26  ;;  %v14757_v4 = vld [vmem:[#allocation5 + $0xc64] sm:$0xf0]  ;;  %v11262_v27 = vld [vmem:[#allocation5 + $0xc50] sm:$0xf] }
  0xf3   : > { %7813 = vmatpush.bf16.msrb.mxu3 %v11191_v17  ;;  %v315_v17 = vld [vmem:[%s16004_s23 + $0x50] sm:$0xff]  ;;  %v14789_v10 = vld [vmem:[#allocation5 + $0xd64] sm:$0xf0] }
  0xf4   : > { %7775 = vmatpush.bf16.msrb.mxu0 %v10991_v34  ;;  %v7547_v34 = vadd.f32 %v7546_v21, %v7534_v8  ;;  %v1555_v52 = vunpack.c.l.b16 %v315_v17  ;;  %v1556_v60 = vunpack.c.h.b16 %v315_v17  ;;  %v14773_v8 = vld [vmem:[#allocation5 + $0xce4] sm:$0xf0]  ;;  %v11271_v17 = vor.u32 %v14757_v4, %v11270_v3  ;;  %v7561_v21 = vpop.f32.mrf.mxu3  ;;  %v11246_v3 = vld [vmem:[#allocation5 + $0xc30] sm:$0xf]  ;;  %v14751_v4 = vld [vmem:[#allocation5 + $0xc34] sm:$0xf0] }
  0xf5   : > { %7788 = vmatpush.bf16.msrb.mxu1 %v11055_v39  ;;  %v11278_v39 = vld [vmem:[#allocation5 + $0xc70] sm:$0xf] }
  0xf6   : > { %7801 = vmatpush.bf16.msrb.mxu2 %v11119_v40  ;;  %v14759_v40 = vld [vmem:[#allocation5 + $0xc74] sm:$0xf0]  ;;  %v16090_v53 = vadd.f32 %v7559_v36, %v7547_v34  ;;  %v7535_v61 = vpop.f32.mrf.mxu1  ;;  %v16092_v7 = vpack.c.b16 %v1555_v52, %v1555_v52  ;;  %v16096_v12 = vpack.c.b16 %v1556_v60, %v1556_v60  ;;  %v11326_v34 = vld [vmem:[#allocation5 + $0xcd0] sm:$0xf]  ;;  %v14785_v60 = vld [vmem:[#allocation5 + $0xd44] sm:$0xf0] }
  0xf7   : > { %7814 = vmatpush.bf16.msrb.mxu3 %v11183_v50  ;;  %v11406_v50 = vld [vmem:[#allocation5 + $0xd70] sm:$0xf]  ;;  %v11279_v63 = vor.u32 %v14759_v40, %v11278_v39  ;;  %v14771_v39 = vld [vmem:[#allocation5 + $0xcd4] sm:$0xf0]  ;;  %v11446_v61 = vld [vmem:[#allocation5 + $0xdc0] sm:$0xf] }
  0xf8   : > { %7776 = vmatpush.bf16.msrb.mxu0 %v10983_v56  ;;  %v11095_v56 = vor.u32 %v14713_v16, %v11094_v15  ;;  %v11407_v2 = vor.u32 %v14791_v51, %v11406_v50  ;;  %v7548_v15 = vpop.f32.mrf.mxu2  ;;  %v16098_v16 = vpack.c.b16 %v1558_v0, %v1558_v0  ;;  %v11390_v40 = vld [vmem:[#allocation5 + $0xd50] sm:$0xf]  ;;  %v11327_v51 = vor.u32 %v14771_v39, %v11326_v34  ;;  %v14749_v34 = vld [vmem:[#allocation5 + $0xc24] sm:$0xf0] }
  0xf9   : > { %7789 = vmatpush.bf16.msrb.mxu1 %v11047_v58  ;;  %v14807_v58 = vld [vmem:[#allocation5 + $0xdf4] sm:$0xf0]  ;;  %v11438_v15 = vld [vmem:[#allocation5 + $0xdb0] sm:$0xf] }
  0xfa   : > { %7802 = vmatpush.bf16.msrb.mxu2 %v11111_v59  ;;  %v1557_v59 = vunpack.c.l.b16 %v316_v32  ;;  %v11471_v6 = vor.u32 %v14807_v58, %v11470_v57  ;;  %v14755_v32 = vld [vmem:[#allocation5 + $0xc54] sm:$0xf0]  ;;  %v14769_v58 = vld [vmem:[#allocation5 + $0xcc4] sm:$0xf0] }
  0xfb   : > { %7815 = vmatpush.bf16.msrb.mxu3 %v11175_v1  ;;  %v11343_v1 = vor.u32 %v14775_v48, %v11342_v43  ;;  %v14787_v43 = vld [vmem:[#allocation5 + $0xd54] sm:$0xf0]  ;;  %v11263_v50 = vor.u32 %v14755_v32, %v11262_v27  ;;  %v11238_v32 = vld [vmem:[#allocation5 + $0xc20] sm:$0xf] }
  0xfc   : > { %7777 = vmatpush.bf16.msrb.mxu0 %v10975_v9  ;;  %v11398_v9 = vld [vmem:[#allocation5 + $0xd60] sm:$0xf]  ;;  %v16094_v11 = vpack.c.b16 %v1557_v59, %v1557_v59  ;;  %v14803_v48 = vld [vmem:[#allocation5 + $0xdd4] sm:$0xf0]  ;;  %v11391_v52 = vor.u32 %v14787_v43, %v11390_v40  ;;  %v14765_v40 = vld [vmem:[#allocation5 + $0xca4] sm:$0xf0] }
  0xfd   : > { %7790 = vmatpush.bf16.msrb.mxu1 %v11039_v13  ;;  %v11462_v13 = vld [vmem:[#allocation5 + $0xde0] sm:$0xf]  ;;  %v11399_v26 = vor.u32 %v14789_v10, %v11398_v9  ;;  %v14767_v10 = vld [vmem:[#allocation5 + $0xcb4] sm:$0xf0] }
  0xfe   : > { %7803 = vmatpush.bf16.msrb.mxu2 %v11103_v14  ;;  %v14805_v14 = vld [vmem:[#allocation5 + $0xde4] sm:$0xf0]  ;;  %v11382_v59 = vld [vmem:[#allocation5 + $0xd40] sm:$0xf] }
  0xff   : > { %7816 = vmatpush.bf16.msrb.mxu3 %v11167_v24  ;;  %v11335_v24 = vor.u32 %v14773_v8, %v11334_v5  ;;  %v11463_v36 = vor.u32 %v14805_v14, %v11462_v13  ;;  %v11310_v5 = vld [vmem:[#allocation5 + $0xcb0] sm:$0xf]  ;;  %v14783_v14 = vld [vmem:[#allocation5 + $0xd34] sm:$0xf0]  ;;  %v11366_v43 = vld [vmem:[#allocation5 + $0xd20] sm:$0xf] }
 0x100   : > { %7778 = vmatpush.bf16.msrb.mxu0 %v10967_v47  ;;  %v11454_v47 = vld [vmem:[#allocation5 + $0xdd0] sm:$0xf]  ;;  %v7572_v0 = vpop.f32.mrf.mxu0 }
 0x101   : > { %7791 = vmatpush.bf16.msrb.mxu1 %v11031_v55  ;;  %v14753_v55 = vld [vmem:[#allocation5 + $0xc44] sm:$0xf0]  ;;  %v11455_v57 = vor.u32 %v14803_v48, %v11454_v47  ;;  %v7585_v8 = vpop.f32.mrf.mxu1  ;;  %v11374_v13 = vld [vmem:[#allocation5 + $0xd30] sm:$0xf] }
 0x102   : > { %7804 = vmatpush.bf16.msrb.mxu2 %v11095_v56  ;;  %v11318_v56 = vld [vmem:[#allocation5 + $0xcc0] sm:$0xf]  ;;  %v11375_v27 = vor.u32 %v14783_v14, %v11374_v13  ;;  %v14781_v47 = vld [vmem:[#allocation5 + $0xd24] sm:$0xf0] }
 0x103   : > { %7817 = vmatpush.bf16.msrb.mxu3 %v11159_v62  ;;  %7779 = vmatmul.bf16.vlgmr.msrb.gmra.mxu0 %v16092_v7  ;;  %v14801_v62 = vld [vmem:[#allocation5 + $0xdc4] sm:$0xf0] }
 0x104   : > { %7823 = vmatpush.bf16.msra.mxu0 %v11279_v63  ;;  %7792 = vmatmul.bf16.vlgmr.msrb.gmra.mxu1 %v16096_v12  ;;  %v11255_v63 = vor.u32 %v14753_v55, %v11254_v54  ;;  %v11447_v9 = vor.u32 %v14801_v62, %v11446_v61  ;;  %v11239_v54 = vor.u32 %v14749_v34, %v11238_v32  ;;  %v11294_v61 = vld [vmem:[#allocation5 + $0xc90] sm:$0xf]  ;;  %v14793_v32 = vld [vmem:[#allocation5 + $0xd84] sm:$0xf0] }
 0x105   : > { %7836 = vmatpush.bf16.msra.mxu1 %v11343_v1  ;;  %7805 = vmatmul.bf16.vlgmr.msrb.gmra.mxu2 %v16094_v11  ;;  %v11319_v1 = vor.u32 %v14769_v58, %v11318_v56  ;;  %v11367_v58 = vor.u32 %v14781_v47, %v11366_v43  ;;  %v318_v34 = vld [vmem:[%s16004_s23 + $0x68] sm:$0xff]  ;;  %v14839_v47 = vld [vmem:[#allocation5 + $0xef4] sm:$0xf0] }
 0x106   : > { %7849 = vmatpush.bf16.msra.mxu2 %v11407_v2  ;;  %7818 = vmatmul.bf16.vlgmr.msrb.gmra.mxu3 %v16098_v16  ;;  %v11383_v2 = vor.u32 %v14785_v60, %v11382_v59  ;;  %v11230_v59 = vld [vmem:[#allocation5 + $0xc10] sm:$0xf]  ;;  %v14747_v60 = vld [vmem:[#allocation5 + $0xc14] sm:$0xf0] }
 0x107   : > { %7862 = vmatpush.bf16.msra.mxu3 %v11471_v6  ;;  %v7573_v6 = vadd.f32 %v7572_v0, %v16090_v53  ;;  %v14763_v0 = vld [vmem:[#allocation5 + $0xc94] sm:$0xf0] }
 0x108   : > { %7824 = vmatpush.bf16.msra.mxu0 %v11271_v17  ;;  %v14799_v17 = vld [vmem:[#allocation5 + $0xdb4] sm:$0xf0]  ;;  %v7598_v39 = vpop.f32.mrf.mxu2  ;;  %v7574_v56 = vpop.f32.mrf.mxu0  ;;  %v11295_v13 = vor.u32 %v14763_v0, %v11294_v61 }
 0x109   : > { %7837 = vmatpush.bf16.msra.mxu1 %v11335_v24  ;;  %v7586_v21 = vadd.f32 %v7585_v8, %v7573_v6  ;;  %v11247_v24 = vor.u32 %v14751_v4, %v11246_v3  ;;  %v11439_v53 = vor.u32 %v14799_v17, %v11438_v15  ;;  %v7587_v62 = vpop.f32.mrf.mxu1  ;;  %v11422_v3 = vld [vmem:[#allocation5 + $0xd90] sm:$0xf]  ;;  %v14795_v4 = vld [vmem:[#allocation5 + $0xd94] sm:$0xf0]  ;;  %v11231_v6 = vor.u32 %v14747_v60, %v11230_v59  ;;  %v14745_v8 = vld [vmem:[#allocation5 + $0xc04] sm:$0xf0] }
 0x10a   : > { %7850 = vmatpush.bf16.msra.mxu2 %v11399_v26  ;;  %v11311_v26 = vor.u32 %v14767_v10, %v11310_v5  ;;  %v11222_v5 = vld [vmem:[#allocation5 + $0xc00] sm:$0xf]  ;;  %v14761_v10 = vld [vmem:[#allocation5 + $0xc84] sm:$0xf0]  ;;  %v11726_v56 = vld [vmem:[#allocation5 + $0xff0] sm:$0xf]  ;;  %v1562_v62 = vunpack.c.h.b16 %v318_v34 }
 0x10b   : > { %7863 = vmatpush.bf16.msra.mxu3 %v11463_v36  ;;  %v11302_v36 = vld [vmem:[#allocation5 + $0xca0] sm:$0xf]  ;;  %v7599_v48 = vadd.f32 %v7598_v39, %v7586_v21  ;;  %v14777_v17 = vld [vmem:[#allocation5 + $0xd04] sm:$0xf0]  ;;  %v11534_v39 = vld [vmem:[#allocation5 + $0xe70] sm:$0xf]  ;;  %v11223_v43 = vor.u32 %v14745_v8, %v11222_v5 }
 0x10c   : > { %7825 = vmatpush.bf16.msra.mxu0 %v11263_v50  ;;  %v7611_v50 = vpop.f32.mrf.mxu3  ;;  %v11350_v15 = vld [vmem:[#allocation5 + $0xd00] sm:$0xf] }
 0x10d   : > { %7838 = vmatpush.bf16.msra.mxu1 %v11327_v51  ;;  %v11430_v51 = vld [vmem:[#allocation5 + $0xda0] sm:$0xf]  ;;  %v16105_v55 = vadd.f32 %v7611_v50, %v7599_v48  ;;  %v11662_v48 = vld [vmem:[#allocation5 + $0xf70] sm:$0xf]  ;;  %v14855_v50 = vld [vmem:[#allocation5 + $0xf74] sm:$0xf0] }
 0x10e   : > { %7851 = vmatpush.bf16.msra.mxu2 %v11391_v52  ;;  %v14797_v52 = vld [vmem:[#allocation5 + $0xda4] sm:$0xf0]  ;;  %v317_v21 = vld [vmem:[%s16004_s23 + $0x60] sm:$0xff]  ;;  %v11663_v0 = vor.u32 %v14855_v50, %v11662_v48 }
 0x10f   : > { %7864 = vmatpush.bf16.msra.mxu3 %v11455_v57  ;;  %v11303_v57 = vor.u32 %v14765_v40, %v11302_v36  ;;  %v11598_v40 = vld [vmem:[#allocation5 + $0xef0] sm:$0xf]  ;;  %v1560_v59 = vunpack.c.h.b16 %v317_v21  ;;  %v11654_v8 = vld [vmem:[#allocation5 + $0xf60] sm:$0xf] }
 0x110   : > { %7826 = vmatpush.bf16.msra.mxu0 %v11255_v63  ;;  %v11431_v63 = vor.u32 %v14797_v52, %v11430_v51  ;;  %v1559_v51 = vunpack.c.l.b16 %v317_v21 }
 0x111   : > { %7839 = vmatpush.bf16.msra.mxu1 %v11319_v1  ;;  %v11358_v1 = vld [vmem:[#allocation5 + $0xd10] sm:$0xf] }
 0x112   : > { %7852 = vmatpush.bf16.msra.mxu2 %v11383_v2  ;;  %v14779_v2 = vld [vmem:[#allocation5 + $0xd14] sm:$0xf0]  ;;  %v16109_v5 = vpack.c.b16 %v1559_v51, %v1559_v51 }
 0x113   : > { %7865 = vmatpush.bf16.msra.mxu3 %v11447_v9  ;;  %v11286_v9 = vld [vmem:[#allocation5 + $0xc80] sm:$0xf]  ;;  %v11359_v14 = vor.u32 %v14779_v2, %v11358_v1  ;;  %v14821_v2 = vld [vmem:[#allocation5 + $0xe64] sm:$0xf0] }
 0x114   : > { %7827 = vmatpush.bf16.msra.mxu0 %v11247_v24  ;;  %v7600_v24 = vpop.f32.mrf.mxu2  ;;  %v7613_v36 = vpop.f32.mrf.mxu3  ;;  %v11287_v52 = vor.u32 %v14761_v10, %v11286_v9  ;;  %v11526_v1 = vld [vmem:[#allocation5 + $0xe60] sm:$0xf]  ;;  %v14853_v9 = vld [vmem:[#allocation5 + $0xf64] sm:$0xf0] }
 0x115   : > { %7840 = vmatpush.bf16.msra.mxu1 %v11311_v26  ;;  %v11423_v26 = vor.u32 %v14795_v4, %v11422_v3  ;;  %v11590_v3 = vld [vmem:[#allocation5 + $0xee0] sm:$0xf]  ;;  %v11527_v21 = vor.u32 %v14821_v2, %v11526_v1 }
 0x116   : > { %7853 = vmatpush.bf16.msra.mxu2 %v11375_v27  ;;  %v11414_v27 = vld [vmem:[#allocation5 + $0xd80] sm:$0xf] }
 0x117   : > { %7866 = vmatpush.bf16.msra.mxu3 %v11439_v53  ;;  %v14823_v53 = vld [vmem:[#allocation5 + $0xe74] sm:$0xf0]  ;;  %v11415_v60 = vor.u32 %v14793_v32, %v11414_v27  ;;  %v11518_v27 = vld [vmem:[#allocation5 + $0xe50] sm:$0xf] }
 0x118   : > { %7828 = vmatpush.bf16.msra.mxu0 %v11239_v54  ;;  %v11351_v54 = vor.u32 %v14777_v17, %v11350_v15  ;;  %v11535_v61 = vor.u32 %v14823_v53, %v11534_v39  ;;  %v14869_v15 = vld [vmem:[#allocation5 + $0xfe4] sm:$0xf0]  ;;  %v16115_v17 = vpack.c.b16 %v1562_v62, %v1562_v62  ;;  %v14819_v32 = vld [vmem:[#allocation5 + $0xe54] sm:$0xf0]  ;;  %v11646_v53 = vld [vmem:[#allocation5 + $0xf50] sm:$0xf] }
 0x119   : > { %7841 = vmatpush.bf16.msra.mxu1 %v11303_v57  ;;  %v14871_v57 = vld [vmem:[#allocation5 + $0xff4] sm:$0xf0]  ;;  %v11519_v48 = vor.u32 %v14819_v32, %v11518_v27  ;;  %v11702_v62 = vld [vmem:[#allocation5 + $0xfc0] sm:$0xf]  ;;  %v11694_v27 = vld [vmem:[#allocation5 + $0xfb0] sm:$0xf] }
 0x11a   : > { %7854 = vmatpush.bf16.msra.mxu2 %v11367_v58  ;;  %v1561_v58 = vunpack.c.l.b16 %v318_v34  ;;  %v11727_v4 = vor.u32 %v14871_v57, %v11726_v56  ;;  %v11582_v34 = vld [vmem:[#allocation5 + $0xed0] sm:$0xf]  ;;  %v14835_v39 = vld [vmem:[#allocation5 + $0xed4] sm:$0xf0]  ;;  %v11574_v56 = vld [vmem:[#allocation5 + $0xec0] sm:$0xf] }
 0x11b   : > { %7867 = vmatpush.bf16.msra.mxu3 %v11431_v63  ;;  %v11599_v63 = vor.u32 %v14839_v47, %v11598_v40  ;;  %v14851_v40 = vld [vmem:[#allocation5 + $0xf54] sm:$0xf0]  ;;  %v11583_v50 = vor.u32 %v14835_v39, %v11582_v34  ;;  %v11494_v39 = vld [vmem:[#allocation5 + $0xe20] sm:$0xf] }
 0x11c   : > { %7829 = vmatpush.bf16.msra.mxu0 %v11231_v6  ;;  %v14837_v6 = vld [vmem:[#allocation5 + $0xee4] sm:$0xf0]  ;;  %v16111_v10 = vpack.c.b16 %v1561_v58, %v1561_v58  ;;  %v14867_v47 = vld [vmem:[#allocation5 + $0xfd4] sm:$0xf0]  ;;  %v11647_v51 = vor.u32 %v14851_v40, %v11646_v53  ;;  %v11558_v40 = vld [vmem:[#allocation5 + $0xea0] sm:$0xf] }
 0x11d   : > { %7842 = vmatpush.bf16.msra.mxu1 %v11295_v13  ;;  %v16113_v13 = vpack.c.b16 %v1560_v59, %v1560_v59  ;;  %v11591_v24 = vor.u32 %v14837_v6, %v11590_v3  ;;  %v14833_v58 = vld [vmem:[#allocation5 + $0xec4] sm:$0xf0]  ;;  %v11638_v59 = vld [vmem:[#allocation5 + $0xf40] sm:$0xf]  ;;  %v11502_v6 = vld [vmem:[#allocation5 + $0xe30] sm:$0xf] }
 0x11e   : > { %7855 = vmatpush.bf16.msra.mxu2 %v11359_v14  ;;  %v11718_v14 = vld [vmem:[#allocation5 + $0xfe0] sm:$0xf]  ;;  %v11575_v3 = vor.u32 %v14833_v58, %v11574_v56  ;;  %v14863_v32 = vld [vmem:[#allocation5 + $0xfb4] sm:$0xf0]  ;;  %v14813_v53 = vld [vmem:[#allocation5 + $0xe24] sm:$0xf0] }
 0x11f   : > { %7868 = vmatpush.bf16.msra.mxu3 %v11423_v26  ;;  %v11655_v26 = vor.u32 %v14853_v9, %v11654_v8  ;;  %v11719_v36 = vor.u32 %v14869_v15, %v11718_v14  ;;  %v14815_v8 = vld [vmem:[#allocation5 + $0xe34] sm:$0xf0]  ;;  %v11566_v9 = vld [vmem:[#allocation5 + $0xeb0] sm:$0xf]  ;;  %v11686_v56 = vld [vmem:[#allocation5 + $0xfa0] sm:$0xf] }
 0x120   : > { %7830 = vmatpush.bf16.msra.mxu0 %v11223_v43  ;;  %v11710_v43 = vld [vmem:[#allocation5 + $0xfd0] sm:$0xf]  ;;  %v11503_v34 = vor.u32 %v14815_v8, %v11502_v6  ;;  %v14843_v8 = vld [vmem:[#allocation5 + $0xf14] sm:$0xf0] }
 0x121   : > { %7843 = vmatpush.bf16.msra.mxu1 %v11287_v52  ;;  %v11510_v52 = vld [vmem:[#allocation5 + $0xe40] sm:$0xf]  ;;  %v11711_v57 = vor.u32 %v14867_v47, %v11710_v43  ;;  %v7637_v2 = vpop.f32.mrf.mxu1  ;;  %v11695_v43 = vor.u32 %v14863_v32, %v11694_v27  ;;  %v11614_v6 = vld [vmem:[#allocation5 + $0xf10] sm:$0xf]  ;;  %v14825_v27 = vld [vmem:[#allocation5 + $0xe84] sm:$0xf0] }
 0x122   : > { %7856 = vmatpush.bf16.msra.mxu2 %v11351_v54  ;;  %v14817_v54 = vld [vmem:[#allocation5 + $0xe44] sm:$0xf0] }
 0x123   : > { %7869 = vmatpush.bf16.msra.mxu3 %v11415_v60  ;;  %7831 = vmatmul.bf16.vlgmr.msra.gmra.mxu0 %v16109_v5  ;;  %v14849_v60 = vld [vmem:[#allocation5 + $0xf44] sm:$0xf0]  ;;  %v11511_v1 = vor.u32 %v14817_v54, %v11510_v52 }
 0x124   : > { %7875 = vmatpush.bf16.msrb.mxu0 %v11535_v61  ;;  %7844 = vmatmul.bf16.vlgmr.msra.gmra.mxu1 %v16113_v13  ;;  %v7624_v61 = vpop.f32.mrf.mxu0 }
 0x125   : > { %7888 = vmatpush.bf16.msrb.mxu1 %v11599_v63  ;;  %7857 = vmatmul.bf16.vlgmr.msra.gmra.mxu2 %v16111_v10  ;;  %v14865_v63 = vld [vmem:[#allocation5 + $0xfc4] sm:$0xf0] }
 0x126   : > { %7901 = vmatpush.bf16.msrb.mxu2 %v11663_v0  ;;  %7870 = vmatmul.bf16.vlgmr.msra.gmra.mxu3 %v16115_v17  ;;  %v7625_v0 = vadd.f32 %v7624_v61, %v16105_v55  ;;  %v11703_v14 = vor.u32 %v14865_v63, %v11702_v62 }
 0x127   : > { %7914 = vmatpush.bf16.msrb.mxu3 %v11727_v4  ;;  %v11639_v4 = vor.u32 %v14849_v60, %v11638_v59  ;;  %v11495_v59 = vor.u32 %v14813_v53, %v11494_v39  ;;  %v319_v39 = vld [vmem:[%s16004_s23 + $0x70] sm:$0xff] }
 0x128   : > { %7876 = vmatpush.bf16.msrb.mxu0 %v11527_v21  ;;  %v7638_v15 = vadd.f32 %v7637_v2, %v7625_v0  ;;  %v14831_v21 = vld [vmem:[#allocation5 + $0xeb4] sm:$0xf0]  ;;  %v7650_v47 = vpop.f32.mrf.mxu2  ;;  %v11486_v0 = vld [vmem:[#allocation5 + $0xe10] sm:$0xf] }
 0x129   : > { %7889 = vmatpush.bf16.msrb.mxu1 %v11591_v24  ;;  %v11630_v24 = vld [vmem:[#allocation5 + $0xf30] sm:$0xf]  ;;  %v11567_v55 = vor.u32 %v14831_v21, %v11566_v9  ;;  %v7663_v54 = vpop.f32.mrf.mxu3  ;;  %v7639_v60 = vpop.f32.mrf.mxu1 }
 0x12a   : > { %7902 = vmatpush.bf16.msrb.mxu2 %v11655_v26  ;;  %v14847_v26 = vld [vmem:[#allocation5 + $0xf34] sm:$0xf0]  ;;  %v7651_v52 = vadd.f32 %v7650_v47, %v7638_v15  ;;  %v11550_v2 = vld [vmem:[#allocation5 + $0xe90] sm:$0xf]  ;;  %v11478_v15 = vld [vmem:[#allocation5 + $0xe00] sm:$0xf]  ;;  %v1563_v60 = vunpack.c.l.b16 %v319_v39 }
 0x12b   : > { %7915 = vmatpush.bf16.msrb.mxu3 %v11719_v36  ;;  %v11631_v36 = vor.u32 %v14847_v26, %v11630_v24  ;;  %v11678_v9 = vld [vmem:[#allocation5 + $0xf90] sm:$0xf]  ;;  %v14809_v24 = vld [vmem:[#allocation5 + $0xe04] sm:$0xf0]  ;;  %v11542_v26 = vld [vmem:[#allocation5 + $0xe80] sm:$0xf] }
 0x12c   : > { %7877 = vmatpush.bf16.msrb.mxu0 %v11519_v48  ;;  %v14829_v48 = vld [vmem:[#allocation5 + $0xea4] sm:$0xf0]  ;;  %v7626_v58 = vpop.f32.mrf.mxu0  ;;  %v16122_v61 = vadd.f32 %v7663_v54, %v7651_v52  ;;  %v320_v47 = vld [vmem:[%s16004_s23 + $0x78] sm:$0xff]  ;;  %v11854_v52 = vld [vmem:[#allocation5 + $0x10f0] sm:$0xf] }
 0x12d   : > { %7890 = vmatpush.bf16.msrb.mxu1 %v11583_v50  ;;  %v11622_v50 = vld [vmem:[#allocation5 + $0xf20] sm:$0xf]  ;;  %v11559_v62 = vor.u32 %v14829_v48, %v11558_v40  ;;  %v11918_v58 = vld [vmem:[#allocation5 + $0x1170] sm:$0xf] }
 0x12e   : > { %7903 = vmatpush.bf16.msrb.mxu2 %v11647_v51  ;;  %v14845_v51 = vld [vmem:[#allocation5 + $0xf24] sm:$0xf0]  ;;  %v11670_v40 = vld [vmem:[#allocation5 + $0xf80] sm:$0xf] }
 0x12f   : > { %7916 = vmatpush.bf16.msrb.mxu3 %v11711_v57  ;;  %v14861_v57 = vld [vmem:[#allocation5 + $0xfa4] sm:$0xf0]  ;;  %v11623_v63 = vor.u32 %v14845_v51, %v11622_v50  ;;  %v11790_v50 = vld [vmem:[#allocation5 + $0x1070] sm:$0xf]  ;;  %v14887_v51 = vld [vmem:[#allocation5 + $0x1074] sm:$0xf0] }
 0x130   : > { %7878 = vmatpush.bf16.msrb.mxu0 %v11511_v1  ;;  %v14811_v1 = vld [vmem:[#allocation5 + $0xe14] sm:$0xf0]  ;;  %v7652_v48 = vpop.f32.mrf.mxu2 }
 0x131   : > { %7891 = vmatpush.bf16.msrb.mxu1 %v11575_v3  ;;  %v11687_v3 = vor.u32 %v14861_v57, %v11686_v56  ;;  %v11487_v21 = vor.u32 %v14811_v1, %v11486_v0  ;;  %v7665_v54 = vpop.f32.mrf.mxu3  ;;  %v11479_v56 = vor.u32 %v14809_v24, %v11478_v15  ;;  %v14903_v57 = vld [vmem:[#allocation5 + $0x10f4] sm:$0xf0]  ;;  %v11982_v0 = vld [vmem:[#allocation5 + $0x11f0] sm:$0xf]  ;;  %v14885_v15 = vld [vmem:[#allocation5 + $0x1064] sm:$0xf0] }
 0x132   : > { %7904 = vmatpush.bf16.msrb.mxu2 %v11639_v4  ;;  %v14827_v4 = vld [vmem:[#allocation5 + $0xe94] sm:$0xf0]  ;;  %v11846_v24 = vld [vmem:[#allocation5 + $0x10e0] sm:$0xf]  ;;  %v16126_v54 = vpack.c.b16 %v1563_v60, %v1563_v60  ;;  %v11966_v60 = vld [vmem:[#allocation5 + $0x11d0] sm:$0xf] }
 0x133   : > { %7917 = vmatpush.bf16.msrb.mxu3 %v11703_v14  ;;  %v14859_v14 = vld [vmem:[#allocation5 + $0xf94] sm:$0xf0]  ;;  %v11551_v32 = vor.u32 %v14827_v4, %v11550_v2  ;;  %v1565_v2 = vunpack.c.l.b16 %v320_v47 }
 0x134   : > { %7879 = vmatpush.bf16.msrb.mxu0 %v11503_v34  ;;  %v11615_v34 = vor.u32 %v14843_v8, %v11614_v6  ;;  %v11679_v53 = vor.u32 %v14859_v14, %v11678_v9  ;;  %v14935_v1 = vld [vmem:[#allocation5 + $0x11f4] sm:$0xf0]  ;;  %v11791_v6 = vor.u32 %v14887_v51, %v11790_v50  ;;  %v1566_v8 = vunpack.c.h.b16 %v320_v47  ;;  %16520 = vst [vmem:[#allocation16_spill] sm:$0xff] %v16126_v54  ;;  %v11774_v50 = vld [vmem:[#allocation5 + $0x1050] sm:$0xf] }
 0x135   : > { %7892 = vmatpush.bf16.msrb.mxu1 %v11567_v55  ;;  %v11606_v55 = vld [vmem:[#allocation5 + $0xf00] sm:$0xf]  ;;  %v11855_v9 = vor.u32 %v14903_v57, %v11854_v52  ;;  %v11983_v48 = vor.u32 %v14935_v1, %v11982_v0  ;;  %v14883_v51 = vld [vmem:[#allocation5 + $0x1054] sm:$0xf0]  ;;  %v11838_v52 = vld [vmem:[#allocation5 + $0x10d0] sm:$0xf] }
 0x136   : > { %7905 = vmatpush.bf16.msrb.mxu2 %v11631_v36  ;;  %v14841_v36 = vld [vmem:[#allocation5 + $0xf04] sm:$0xf0]  ;;  %v14899_v57 = vld [vmem:[#allocation5 + $0x10d4] sm:$0xf0] }
 0x137   : > { %7918 = vmatpush.bf16.msrb.mxu3 %v11695_v43  ;;  %v14857_v43 = vld [vmem:[#allocation5 + $0xf84] sm:$0xf0]  ;;  %v11839_v0 = vor.u32 %v14899_v57, %v11838_v52  ;;  %v11886_v52 = vld [vmem:[#allocation5 + $0x1130] sm:$0xf] }
 0x138   : > { %7880 = vmatpush.bf16.msrb.mxu0 %v11495_v59  ;;  %v14919_v59 = vld [vmem:[#allocation5 + $0x1174] sm:$0xf0]  ;;  %v11671_v4 = vor.u32 %v14857_v43, %v11670_v40  ;;  %v11950_v57 = vld [vmem:[#allocation5 + $0x11b0] sm:$0xf] }
 0x139   : > { %7893 = vmatpush.bf16.msrb.mxu1 %v11559_v62  ;;  %v11543_v62 = vor.u32 %v14825_v27, %v11542_v26  ;;  %v11919_v14 = vor.u32 %v14919_v59, %v11918_v58  ;;  %v11910_v26 = vld [vmem:[#allocation5 + $0x1160] sm:$0xf]  ;;  %v14917_v27 = vld [vmem:[#allocation5 + $0x1164] sm:$0xf0]  ;;  %v11902_v58 = vld [vmem:[#allocation5 + $0x1150] sm:$0xf] }
 0x13a   : > { %7906 = vmatpush.bf16.msrb.mxu2 %v11623_v63  ;;  %v11607_v63 = vor.u32 %v14841_v36, %v11606_v55  ;;  %v11974_v36 = vld [vmem:[#allocation5 + $0x11e0] sm:$0xf]  ;;  %v11911_v47 = vor.u32 %v14917_v27, %v11910_v26  ;;  %v14915_v59 = vld [vmem:[#allocation5 + $0x1154] sm:$0xf0] }
 0x13b   : > { %7919 = vmatpush.bf16.msrb.mxu3 %v11687_v3  ;;  %v1564_v3 = vunpack.c.h.b16 %v319_v39  ;;  %v14933_v39 = vld [vmem:[#allocation5 + $0x11e4] sm:$0xf0]  ;;  %v11903_v1 = vor.u32 %v14915_v59, %v11902_v58  ;;  %v14927_v58 = vld [vmem:[#allocation5 + $0x11b4] sm:$0xf0] }
 0x13c   : > { %7881 = vmatpush.bf16.msrb.mxu0 %v11487_v21  ;;  %v11782_v21 = vld [vmem:[#allocation5 + $0x1060] sm:$0xf] }
 0x13d   : > { %7894 = vmatpush.bf16.msrb.mxu1 %v11551_v32  ;;  %v14901_v32 = vld [vmem:[#allocation5 + $0x10e4] sm:$0xf0]  ;;  %v16130_v55 = vpack.c.b16 %v1564_v3, %v1564_v3  ;;  %v11783_v40 = vor.u32 %v14885_v15, %v11782_v21  ;;  %v11958_v15 = vld [vmem:[#allocation5 + $0x11c0] sm:$0xf] }
 0x13e   : > { %7907 = vmatpush.bf16.msrb.mxu2 %v11615_v34  ;;  %v16128_v34 = vpack.c.b16 %v1565_v2, %v1565_v2  ;;  %v11847_v43 = vor.u32 %v14901_v32, %v11846_v24  ;;  %v11766_v2 = vld [vmem:[#allocation5 + $0x1040] sm:$0xf]  ;;  %v14881_v3 = vld [vmem:[#allocation5 + $0x1044] sm:$0xf0] }
 0x13f   : > { %7920 = vmatpush.bf16.msrb.mxu3 %v11679_v53  ;;  %16522 = vst [vmem:[#allocation18_spill] sm:$0xff] %v16130_v55  ;;  %v16132_v53 = vpack.c.b16 %v1566_v8, %v1566_v8  ;;  %v14897_v8 = vld [vmem:[#allocation5 + $0x10c4] sm:$0xf0]  ;;  %v11767_v32 = vor.u32 %v14881_v3, %v11766_v2 }
 0x140   : > { %7882 = vmatpush.bf16.msrb.mxu0 %v11479_v56  ;;  %16521 = vst [vmem:[#allocation17_spill] sm:$0xff] %v16128_v34  ;;  %v11975_v56 = vor.u32 %v14933_v39, %v11974_v36  ;;  %v7676_v21 = vpop.f32.mrf.mxu0  ;;  %v14929_v24 = vld [vmem:[#allocation5 + $0x11c4] sm:$0xf0]  ;;  %v11758_v39 = vld [vmem:[#allocation5 + $0x1030] sm:$0xf] }
 0x141   : > { %7895 = vmatpush.bf16.msrb.mxu1 %v11543_v62  ;;  %16523 = vst [vmem:[#allocation19_spill] sm:$0xff] %v16132_v53  ;;  %v14931_v62 = vld [vmem:[#allocation5 + $0x11d4] sm:$0xf0]  ;;  %v7689_v26 = vpop.f32.mrf.mxu1  ;;  %v14893_v3 = vld [vmem:[#allocation5 + $0x10a4] sm:$0xf0] }
 0x142   : > { %7908 = vmatpush.bf16.msrb.mxu2 %v11607_v63  ;;  %v11775_v63 = vor.u32 %v14883_v51, %v11774_v50  ;;  %v14895_v51 = vld [vmem:[#allocation5 + $0x10b4] sm:$0xf0] }
 0x143   : > { %7921 = vmatpush.bf16.msrb.mxu3 %v11671_v4  ;;  %7883 = vmatmul.bf16.vlgmr.msrb.gmra.mxu0 %v16126_v54  ;;  %v11830_v4 = vld [vmem:[#allocation5 + $0x10c0] sm:$0xf] }
 0x144   : > { %7927 = vmatpush.bf16.msra.mxu0 %v11791_v6  ;;  %7896 = vmatmul.bf16.vlgmr.msrb.gmra.mxu1 %v16130_v55  ;;  %v11967_v6 = vor.u32 %v14931_v62, %v11966_v60  ;;  %v11831_v27 = vor.u32 %v14897_v8, %v11830_v4  ;;  %v11750_v62 = vld [vmem:[#allocation5 + $0x1020] sm:$0xf] }
 0x145   : > { %7940 = vmatpush.bf16.msra.mxu1 %v11855_v9  ;;  %7909 = vmatmul.bf16.vlgmr.msrb.gmra.mxu2 %v16128_v34  ;;  %v11894_v9 = vld [vmem:[#allocation5 + $0x1140] sm:$0xf] }
 0x146   : > { %7953 = vmatpush.bf16.msra.mxu2 %v11919_v14  ;;  %7922 = vmatmul.bf16.vlgmr.msrb.gmra.mxu3 %v16132_v53  ;;  %v14913_v14 = vld [vmem:[#allocation5 + $0x1144] sm:$0xf0]  ;;  %v11878_v4 = vld [vmem:[#allocation5 + $0x1120] sm:$0xf] }
 0x147   : > { %7966 = vmatpush.bf16.msra.mxu3 %v11983_v48  ;;  %v7677_v48 = vadd.f32 %v7676_v21, %v16122_v61  ;;  %v11895_v36 = vor.u32 %v14913_v14, %v11894_v9  ;;  %v11942_v14 = vld [vmem:[#allocation5 + $0x11a0] sm:$0xf]  ;;  %v14925_v21 = vld [vmem:[#allocation5 + $0x11a4] sm:$0xf0] }
 0x148   : > { %7928 = vmatpush.bf16.msra.mxu0 %v11783_v40  ;;  %v14879_v40 = vld [vmem:[#allocation5 + $0x1034] sm:$0xf0]  ;;  %v7702_v2 = vpop.f32.mrf.mxu2 }
 0x149   : > { %7941 = vmatpush.bf16.msra.mxu1 %v11847_v43  ;;  %v11822_v43 = vld [vmem:[#allocation5 + $0x10b0] sm:$0xf]  ;;  %v7690_v50 = vadd.f32 %v7689_v26, %v7677_v48  ;;  %v11759_v59 = vor.u32 %v14879_v40, %v11758_v39  ;;  %v7715_v9 = vpop.f32.mrf.mxu3  ;;  %v7691_v48 = vpop.f32.mrf.mxu1  ;;  %v14875_v39 = vld [vmem:[#allocation5 + $0x1014] sm:$0xf0] }
 0x14a   : > { %7954 = vmatpush.bf16.msra.mxu2 %v11911_v47  ;;  %v11959_v47 = vor.u32 %v14929_v24, %v11958_v15  ;;  %v11823_v61 = vor.u32 %v14895_v51, %v11822_v43  ;;  %v7678_v15 = vpop.f32.mrf.mxu0  ;;  %v11806_v40 = vld [vmem:[#allocation5 + $0x1090] sm:$0xf]  ;;  %v11943_v43 = vor.u32 %v14925_v21, %v11942_v14  ;;  %v14907_v51 = vld [vmem:[#allocation5 + $0x1114] sm:$0xf0] }
 0x14b   : > { %7967 = vmatpush.bf16.msra.mxu3 %v11975_v56  ;;  %v14911_v56 = vld [vmem:[#allocation5 + $0x1134] sm:$0xf0]  ;;  %v7703_v8 = vadd.f32 %v7702_v2, %v7690_v50  ;;  %v11870_v50 = vld [vmem:[#allocation5 + $0x1110] sm:$0xf]  ;;  %v321_v2 = vld [vmem:[%s16004_s23 + $0x80] sm:$0xff] }
 0x14c   : > { %7929 = vmatpush.bf16.msra.mxu0 %v11775_v63  ;;  %v11887_v60 = vor.u32 %v14911_v56, %v11886_v52  ;;  %v14877_v63 = vld [vmem:[#allocation5 + $0x1024] sm:$0xf0]  ;;  %v11934_v52 = vld [vmem:[#allocation5 + $0x1190] sm:$0xf]  ;;  %v14923_v56 = vld [vmem:[#allocation5 + $0x1194] sm:$0xf0] }
 0x14d   : > { %7942 = vmatpush.bf16.msra.mxu1 %v11839_v0  ;;  %v11814_v0 = vld [vmem:[#allocation5 + $0x10a0] sm:$0xf]  ;;  %v11751_v24 = vor.u32 %v14877_v63, %v11750_v62  ;;  %v11871_v63 = vor.u32 %v14907_v51, %v11870_v50  ;;  %v12046_v14 = vld [vmem:[#allocation5 + $0x1270] sm:$0xf]  ;;  %v14951_v21 = vld [vmem:[#allocation5 + $0x1274] sm:$0xf0] }
 0x14e   : > { %7955 = vmatpush.bf16.msra.mxu2 %v11903_v1  ;;  %v11951_v1 = vor.u32 %v14927_v58, %v11950_v57  ;;  %v11815_v26 = vor.u32 %v14893_v3, %v11814_v0  ;;  %v11734_v57 = vld [vmem:[#allocation5 + $0x1000] sm:$0xf]  ;;  %v11935_v3 = vor.u32 %v14923_v56, %v11934_v52  ;;  %v12110_v15 = vld [vmem:[#allocation5 + $0x12f0] sm:$0xf]  ;;  %v14999_v50 = vld [vmem:[#allocation5 + $0x13f4] sm:$0xf0]  ;;  %v1568_v52 = vunpack.c.h.b16 %v321_v2 }
 0x14f   : > { %7968 = vmatpush.bf16.msra.mxu3 %v11967_v6  ;;  %v14909_v6 = vld [vmem:[#allocation5 + $0x1124] sm:$0xf0]  ;;  %v11862_v0 = vld [vmem:[#allocation5 + $0x1100] sm:$0xf] }
 0x150   : > { %7930 = vmatpush.bf16.msra.mxu0 %v11767_v32  ;;  %v16139_v32 = vadd.f32 %v7715_v9, %v7703_v8  ;;  %v322_v8 = vld [vmem:[%s16004_s23 + $0x88] sm:$0xff]  ;;  %v7704_v9 = vpop.f32.mrf.mxu2 }
 0x151   : > { %7943 = vmatpush.bf16.msra.mxu1 %v11831_v27  ;;  %v11879_v27 = vor.u32 %v14909_v6, %v11878_v4  ;;  %v11926_v4 = vld [vmem:[#allocation5 + $0x1180] sm:$0xf]  ;;  %v14921_v6 = vld [vmem:[#allocation5 + $0x1184] sm:$0xf0]  ;;  %v1569_v51 = vunpack.c.l.b16 %v322_v8  ;;  %v12047_v9 = vor.u32 %v14951_v21, %v12046_v14  ;;  %v1570_v53 = vunpack.c.h.b16 %v322_v8  ;;  %v12030_v14 = vld [vmem:[#allocation5 + $0x1250] sm:$0xf] }
 0x152   : > { %7956 = vmatpush.bf16.msra.mxu2 %v11895_v36  ;;  %v11742_v36 = vld [vmem:[#allocation5 + $0x1010] sm:$0xf]  ;;  %v11927_v56 = vor.u32 %v14921_v6, %v11926_v4  ;;  %v14947_v21 = vld [vmem:[#allocation5 + $0x1254] sm:$0xf0] }
 0x153   : > { %7969 = vmatpush.bf16.msra.mxu3 %v11959_v47  ;;  %v14891_v47 = vld [vmem:[#allocation5 + $0x1094] sm:$0xf0]  ;;  %v11743_v58 = vor.u32 %v14875_v39, %v11742_v36  ;;  %v1567_v39 = vunpack.c.l.b16 %v321_v2  ;;  %v14997_v2 = vld [vmem:[#allocation5 + $0x13e4] sm:$0xf0] }
 0x154   : > { %7931 = vmatpush.bf16.msra.mxu0 %v11759_v59  ;;  %v14873_v59 = vld [vmem:[#allocation5 + $0x1004] sm:$0xf0]  ;;  %v11807_v62 = vor.u32 %v14891_v47, %v11806_v40  ;;  %v14967_v36 = vld [vmem:[#allocation5 + $0x12f4] sm:$0xf0] }
 0x155   : > { %7944 = vmatpush.bf16.msra.mxu1 %v11823_v61  ;;  %v11798_v61 = vld [vmem:[#allocation5 + $0x1080] sm:$0xf]  ;;  %v11735_v48 = vor.u32 %v14873_v59, %v11734_v57  ;;  %v12111_v55 = vor.u32 %v14967_v36, %v12110_v15  ;;  %v14949_v57 = vld [vmem:[#allocation5 + $0x1264] sm:$0xf0]  ;;  %v16143_v54 = vpack.c.b16 %v1567_v39, %v1567_v39  ;;  %v12094_v15 = vld [vmem:[#allocation5 + $0x12d0] sm:$0xf] }
 0x156   : > { %7957 = vmatpush.bf16.msra.mxu2 %v11887_v60  ;;  %v14889_v60 = vld [vmem:[#allocation5 + $0x1084] sm:$0xf0]  ;;  %v12102_v59 = vld [vmem:[#allocation5 + $0x12e0] sm:$0xf]  ;;  %v14963_v36 = vld [vmem:[#allocation5 + $0x12d4] sm:$0xf0] }
 0x157   : > { %7970 = vmatpush.bf16.msra.mxu3 %v11951_v1  ;;  %v14905_v1 = vld [vmem:[#allocation5 + $0x1104] sm:$0xf0]  ;;  %v11799_v40 = vor.u32 %v14889_v60, %v11798_v61  ;;  %16524 = vst [vmem:[#allocation20_spill] sm:$0xff] %v16143_v54  ;;  %v12166_v61 = vld [vmem:[#allocation5 + $0x1360] sm:$0xf] }
 0x158   : > { %7932 = vmatpush.bf16.msra.mxu0 %v11751_v24  ;;  %v7717_v24 = vpop.f32.mrf.mxu3  ;;  %v11863_v47 = vor.u32 %v14905_v1, %v11862_v0  ;;  %v14981_v60 = vld [vmem:[#allocation5 + $0x1364] sm:$0xf0]  ;;  %v16147_v0 = vpack.c.b16 %v1568_v52, %v1568_v52  ;;  %v12230_v1 = vld [vmem:[#allocation5 + $0x13e0] sm:$0xf]  ;;  %v14995_v39 = vld [vmem:[#allocation5 + $0x13d4] sm:$0xf0] }
 0x159   : > { %7945 = vmatpush.bf16.msra.mxu1 %v11815_v26  ;;  %v12174_v26 = vld [vmem:[#allocation5 + $0x1370] sm:$0xf]  ;;  %v12167_v8 = vor.u32 %v14981_v60, %v12166_v61  ;;  %v14961_v52 = vld [vmem:[#allocation5 + $0x12c4] sm:$0xf0] }
 0x15a   : > { %7958 = vmatpush.bf16.msra.mxu2 %v11879_v27  ;;  %v14983_v27 = vld [vmem:[#allocation5 + $0x1374] sm:$0xf0]  ;;  %16526 = vst [vmem:[#allocation22_spill] sm:$0xff] %v16147_v0 }
 0x15b   : > { %7971 = vmatpush.bf16.msra.mxu3 %v11943_v43  ;;  %v12238_v43 = vld [vmem:[#allocation5 + $0x13f0] sm:$0xf]  ;;  %v12175_v24 = vor.u32 %v14983_v27, %v12174_v26  ;;  %v14979_v27 = vld [vmem:[#allocation5 + $0x1354] sm:$0xf0] }
 0x15c   : > { %7933 = vmatpush.bf16.msra.mxu0 %v11743_v58  ;;  %v12038_v58 = vld [vmem:[#allocation5 + $0x1260] sm:$0xf]  ;;  %v12239_v34 = vor.u32 %v14999_v50, %v12238_v43  ;;  %v12158_v26 = vld [vmem:[#allocation5 + $0x1350] sm:$0xf]  ;;  %v14945_v43 = vld [vmem:[#allocation5 + $0x1244] sm:$0xf0] }
 0x15d   : > { %7946 = vmatpush.bf16.msra.mxu1 %v11807_v62  ;;  %v14965_v62 = vld [vmem:[#allocation5 + $0x12e4] sm:$0xf0]  ;;  %v12039_v4 = vor.u32 %v14949_v57, %v12038_v58  ;;  %v12086_v50 = vld [vmem:[#allocation5 + $0x12c0] sm:$0xf] }
 0x15e   : > { %7959 = vmatpush.bf16.msra.mxu2 %v11871_v63  ;;  %v16145_v63 = vpack.c.b16 %v1569_v51, %v1569_v51  ;;  %v12103_v6 = vor.u32 %v14965_v62, %v12102_v59  ;;  %v12214_v58 = vld [vmem:[#allocation5 + $0x13c0] sm:$0xf]  ;;  %v14993_v57 = vld [vmem:[#allocation5 + $0x13c4] sm:$0xf0]  ;;  %v12087_v60 = vor.u32 %v14961_v52, %v12086_v50 }
 0x15f   : > { %7972 = vmatpush.bf16.msra.mxu3 %v11935_v3  ;;  %v16149_v3 = vpack.c.b16 %v1570_v53, %v1570_v53  ;;  %v12222_v53 = vld [vmem:[#allocation5 + $0x13d0] sm:$0xf]  ;;  %v12134_v50 = vld [vmem:[#allocation5 + $0x1320] sm:$0xf] }
 0x160   : > { %7934 = vmatpush.bf16.msra.mxu0 %v11735_v48  ;;  %16525 = vst [vmem:[#allocation21_spill] sm:$0xff] %v16145_v63  ;;  %v12231_v48 = vor.u32 %v14997_v2, %v12230_v1  ;;  %v12223_v51 = vor.u32 %v14995_v39, %v12222_v53  ;;  %v12014_v2 = vld [vmem:[#allocation5 + $0x1230] sm:$0xf]  ;;  %v12006_v39 = vld [vmem:[#allocation5 + $0x1220] sm:$0xf] }
 0x161   : > { %7947 = vmatpush.bf16.msra.mxu1 %v11799_v40  ;;  %16527 = vst [vmem:[#allocation23_spill] sm:$0xff] %v16149_v3  ;;  %v12095_v40 = vor.u32 %v14963_v36, %v12094_v15  ;;  %v7741_v61 = vpop.f32.mrf.mxu1  ;;  %v12142_v15 = vld [vmem:[#allocation5 + $0x1330] sm:$0xf] }
 0x162   : > { %7960 = vmatpush.bf16.msra.mxu2 %v11863_v47  ;;  %v12022_v47 = vld [vmem:[#allocation5 + $0x1240] sm:$0xf]  ;;  %v12206_v36 = vld [vmem:[#allocation5 + $0x13b0] sm:$0xf] }
 0x163   : > { %7973 = vmatpush.bf16.msra.mxu3 %v11927_v56  ;;  %7935 = vmatmul.bf16.vlgmr.msra.gmra.mxu0 %v16143_v54  ;;  %v12150_v56 = vld [vmem:[#allocation5 + $0x1340] sm:$0xf]  ;;  %v12023_v62 = vor.u32 %v14945_v43, %v12022_v47  ;;  %v14957_v43 = vld [vmem:[#allocation5 + $0x12a4] sm:$0xf0] }
 0x164   : > { %7979 = vmatpush.bf16.msrb.mxu0 %v12047_v9  ;;  %7948 = vmatmul.bf16.vlgmr.msra.gmra.mxu1 %v16147_v0  ;;  %v14977_v9 = vld [vmem:[#allocation5 + $0x1344] sm:$0xf0] }
 0x165   : > { %7992 = vmatpush.bf16.msrb.mxu1 %v12111_v55  ;;  %7961 = vmatmul.bf16.vlgmr.msra.gmra.mxu2 %v16145_v63  ;;  %v12031_v55 = vor.u32 %v14947_v21, %v12030_v14  ;;  %v12151_v1 = vor.u32 %v14977_v9, %v12150_v56  ;;  %v14959_v21 = vld [vmem:[#allocation5 + $0x12b4] sm:$0xf0]  ;;  %v12198_v9 = vld [vmem:[#allocation5 + $0x13a0] sm:$0xf] }
 0x166   : > { %8005 = vmatpush.bf16.msrb.mxu2 %v12175_v24  ;;  %7974 = vmatmul.bf16.vlgmr.msra.gmra.mxu3 %v16149_v3  ;;  %v7728_v24 = vpop.f32.mrf.mxu0 }
 0x167   : > { %8018 = vmatpush.bf16.msrb.mxu3 %v12239_v34  ;;  %v12159_v34 = vor.u32 %v14979_v27, %v12158_v26  ;;  %v7729_v59 = vadd.f32 %v7728_v24, %v16139_v32  ;;  %v14991_v26 = vld [vmem:[#allocation5 + $0x13b4] sm:$0xf0]  ;;  %v14989_v24 = vld [vmem:[#allocation5 + $0x13a4] sm:$0xf0] }
 0x168   : > { %7980 = vmatpush.bf16.msrb.mxu0 %v12039_v4  ;;  %v14943_v4 = vld [vmem:[#allocation5 + $0x1234] sm:$0xf0]  ;;  %v7754_v47 = vpop.f32.mrf.mxu2 }
 0x169   : > { %7993 = vmatpush.bf16.msrb.mxu1 %v12103_v6  ;;  %v12078_v6 = vld [vmem:[#allocation5 + $0x12b0] sm:$0xf]  ;;  %v7742_v14 = vadd.f32 %v7741_v61, %v7729_v59  ;;  %v12015_v27 = vor.u32 %v14943_v4, %v12014_v2  ;;  %v7767_v56 = vpop.f32.mrf.mxu3  ;;  %v7743_v59 = vpop.f32.mrf.mxu1  ;;  %v14939_v2 = vld [vmem:[#allocation5 + $0x1214] sm:$0xf0] }
 0x16a   : > { %8006 = vmatpush.bf16.msrb.mxu2 %v12167_v8  ;;  %v12215_v8 = vor.u32 %v14993_v57, %v12214_v58  ;;  %v12079_v32 = vor.u32 %v14959_v21, %v12078_v6  ;;  %v12062_v4 = vld [vmem:[#allocation5 + $0x1290] sm:$0xf]  ;;  %v12199_v6 = vor.u32 %v14989_v24, %v12198_v9  ;;  %v14971_v21 = vld [vmem:[#allocation5 + $0x1314] sm:$0xf0] }
 0x16b   : > { %8019 = vmatpush.bf16.msrb.mxu3 %v12231_v48  ;;  %v14975_v48 = vld [vmem:[#allocation5 + $0x1334] sm:$0xf0]  ;;  %v7755_v52 = vadd.f32 %v7754_v47, %v7742_v14  ;;  %v12126_v14 = vld [vmem:[#allocation5 + $0x1310] sm:$0xf] }
 0x16c   : > { %7981 = vmatpush.bf16.msrb.mxu0 %v12031_v55  ;;  %v12143_v53 = vor.u32 %v14975_v48, %v12142_v15  ;;  %v14941_v55 = vld [vmem:[#allocation5 + $0x1224] sm:$0xf0]  ;;  %v12190_v15 = vld [vmem:[#allocation5 + $0x1390] sm:$0xf]  ;;  %v14987_v48 = vld [vmem:[#allocation5 + $0x1394] sm:$0xf0] }
 0x16d   : > { %7994 = vmatpush.bf16.msrb.mxu1 %v12095_v40  ;;  %v12070_v40 = vld [vmem:[#allocation5 + $0x12a0] sm:$0xf]  ;;  %v12007_v57 = vor.u32 %v14941_v55, %v12006_v39  ;;  %v12127_v55 = vor.u32 %v14971_v21, %v12126_v14  ;;  %v323_v47 = vld [vmem:[%s16004_s23 + $0x90] sm:$0xff]  ;;  %v15015_v24 = vld [vmem:[#allocation5 + $0x1474] sm:$0xf0] }
 0x16e   : > { %8007 = vmatpush.bf16.msrb.mxu2 %v12159_v34  ;;  %v12207_v34 = vor.u32 %v14991_v26, %v12206_v36  ;;  %v7730_v58 = vpop.f32.mrf.mxu0  ;;  %v12071_v61 = vor.u32 %v14957_v43, %v12070_v40  ;;  %v11990_v36 = vld [vmem:[#allocation5 + $0x1200] sm:$0xf]  ;;  %v12191_v43 = vor.u32 %v14987_v48, %v12190_v15  ;;  %v12302_v9 = vld [vmem:[#allocation5 + $0x1470] sm:$0xf]  ;;  %v15063_v14 = vld [vmem:[#allocation5 + $0x15f4] sm:$0xf0]  ;;  %v1572_v15 = vunpack.c.h.b16 %v323_v47 }
 0x16f   : > { %8020 = vmatpush.bf16.msrb.mxu3 %v12223_v51  ;;  %v14973_v51 = vld [vmem:[#allocation5 + $0x1324] sm:$0xf0]  ;;  %v12118_v40 = vld [vmem:[#allocation5 + $0x1300] sm:$0xf]  ;;  %v12366_v58 = vld [vmem:[#allocation5 + $0x14f0] sm:$0xf] }
 0x170   : > { %7982 = vmatpush.bf16.msrb.mxu0 %v12023_v62  ;;  %v16156_v62 = vadd.f32 %v7767_v56, %v7755_v52  ;;  %v324_v52 = vld [vmem:[%s16004_s23 + $0x98] sm:$0xff]  ;;  %v7756_v56 = vpop.f32.mrf.mxu2 }
 0x171   : > { %7995 = vmatpush.bf16.msrb.mxu1 %v12087_v60  ;;  %v12135_v60 = vor.u32 %v14973_v51, %v12134_v50  ;;  %v12182_v50 = vld [vmem:[#allocation5 + $0x1380] sm:$0xf]  ;;  %v14985_v51 = vld [vmem:[#allocation5 + $0x1384] sm:$0xf0]  ;;  %v1573_v21 = vunpack.c.l.b16 %v324_v52  ;;  %v12303_v56 = vor.u32 %v15015_v24, %v12302_v9  ;;  %v1574_v3 = vunpack.c.h.b16 %v324_v52  ;;  %v12286_v9 = vld [vmem:[#allocation5 + $0x1450] sm:$0xf] }
 0x172   : > { %8008 = vmatpush.bf16.msrb.mxu2 %v12151_v1  ;;  %v11998_v1 = vld [vmem:[#allocation5 + $0x1210] sm:$0xf]  ;;  %v12183_v48 = vor.u32 %v14985_v51, %v12182_v50  ;;  %v15011_v24 = vld [vmem:[#allocation5 + $0x1454] sm:$0xf0] }
 0x173   : > { %8021 = vmatpush.bf16.msrb.mxu3 %v12215_v8  ;;  %v14955_v8 = vld [vmem:[#allocation5 + $0x1294] sm:$0xf0]  ;;  %v11999_v26 = vor.u32 %v14939_v2, %v11998_v1  ;;  %v1571_v2 = vunpack.c.l.b16 %v323_v47  ;;  %v15061_v47 = vld [vmem:[#allocation5 + $0x15e4] sm:$0xf0] }
 0x174   : > { %7983 = vmatpush.bf16.msrb.mxu0 %v12015_v27  ;;  %v14937_v27 = vld [vmem:[#allocation5 + $0x1204] sm:$0xf0]  ;;  %v12063_v39 = vor.u32 %v14955_v8, %v12062_v4  ;;  %v15031_v1 = vld [vmem:[#allocation5 + $0x14f4] sm:$0xf0] }
 0x175   : > { %7996 = vmatpush.bf16.msrb.mxu1 %v12079_v32  ;;  %v12054_v32 = vld [vmem:[#allocation5 + $0x1280] sm:$0xf]  ;;  %v11991_v59 = vor.u32 %v14937_v27, %v11990_v36  ;;  %v12367_v0 = vor.u32 %v15031_v1, %v12366_v58  ;;  %v15013_v36 = vld [vmem:[#allocation5 + $0x1464] sm:$0xf0]  ;;  %v16160_v54 = vpack.c.b16 %v1571_v2, %v1571_v2  ;;  %v12350_v58 = vld [vmem:[#allocation5 + $0x14d0] sm:$0xf] }
 0x176   : > { %8009 = vmatpush.bf16.msrb.mxu2 %v12143_v53  ;;  %v14953_v53 = vld [vmem:[#allocation5 + $0x1284] sm:$0xf0]  ;;  %v12358_v27 = vld [vmem:[#allocation5 + $0x14e0] sm:$0xf]  ;;  %v15027_v1 = vld [vmem:[#allocation5 + $0x14d4] sm:$0xf0] }
 0x177   : > { %8022 = vmatpush.bf16.msrb.mxu3 %v12207_v34  ;;  %v14969_v34 = vld [vmem:[#allocation5 + $0x1304] sm:$0xf0]  ;;  %v12055_v4 = vor.u32 %v14953_v53, %v12054_v32  ;;  %16528 = vst [vmem:[#allocation24_spill] sm:$0xff] %v16160_v54  ;;  %v12422_v32 = vld [vmem:[#allocation5 + $0x1560] sm:$0xf] }
 0x178   : > { %7984 = vmatpush.bf16.msrb.mxu0 %v12007_v57  ;;  %v7769_v57 = vpop.f32.mrf.mxu3  ;;  %v12119_v8 = vor.u32 %v14969_v34, %v12118_v40  ;;  %v15045_v53 = vld [vmem:[#allocation5 + $0x1564] sm:$0xf0]  ;;  %v16164_v40 = vpack.c.b16 %v1572_v15, %v1572_v15  ;;  %v12486_v34 = vld [vmem:[#allocation5 + $0x15e0] sm:$0xf]  ;;  %v15059_v2 = vld [vmem:[#allocation5 + $0x15d4] sm:$0xf0] }
 0x179   : > { %7997 = vmatpush.bf16.msrb.mxu1 %v12071_v61  ;;  %v12430_v61 = vld [vmem:[#allocation5 + $0x1570] sm:$0xf]  ;;  %v12423_v52 = vor.u32 %v15045_v53, %v12422_v32  ;;  %v15025_v15 = vld [vmem:[#allocation5 + $0x14c4] sm:$0xf0] }
 0x17a   : > { %8010 = vmatpush.bf16.msrb.mxu2 %v12135_v60  ;;  %v15047_v60 = vld [vmem:[#allocation5 + $0x1574] sm:$0xf0]  ;;  %16530 = vst [vmem:[#allocation26_spill] sm:$0xff] %v16164_v40 }
 0x17b   : > { %8023 = vmatpush.bf16.msrb.mxu3 %v12199_v6  ;;  %v12494_v6 = vld [vmem:[#allocation5 + $0x15f0] sm:$0xf]  ;;  %v12431_v57 = vor.u32 %v15047_v60, %v12430_v61  ;;  %v15043_v60 = vld [vmem:[#allocation5 + $0x1554] sm:$0xf0] }
 0x17c   : > { %7985 = vmatpush.bf16.msrb.mxu0 %v11999_v26  ;;  %v12294_v26 = vld [vmem:[#allocation5 + $0x1460] sm:$0xf]  ;;  %v12495_v63 = vor.u32 %v15063_v14, %v12494_v6  ;;  %v12414_v61 = vld [vmem:[#allocation5 + $0x1550] sm:$0xf]  ;;  %v15009_v6 = vld [vmem:[#allocation5 + $0x1444] sm:$0xf0] }
 0x17d   : > { %7998 = vmatpush.bf16.msrb.mxu1 %v12063_v39  ;;  %v15029_v39 = vld [vmem:[#allocation5 + $0x14e4] sm:$0xf0]  ;;  %v12295_v50 = vor.u32 %v15013_v36, %v12294_v26  ;;  %v12342_v14 = vld [vmem:[#allocation5 + $0x14c0] sm:$0xf] }
 0x17e   : > { %8011 = vmatpush.bf16.msrb.mxu2 %v12127_v55  ;;  %v16162_v55 = vpack.c.b16 %v1573_v21, %v1573_v21  ;;  %v12359_v51 = vor.u32 %v15029_v39, %v12358_v27  ;;  %v12470_v26 = vld [vmem:[#allocation5 + $0x15c0] sm:$0xf]  ;;  %v15057_v36 = vld [vmem:[#allocation5 + $0x15c4] sm:$0xf0]  ;;  %v12343_v53 = vor.u32 %v15025_v15, %v12342_v14 }
 0x17f   : > { %8024 = vmatpush.bf16.msrb.mxu3 %v12191_v43  ;;  %v16166_v43 = vpack.c.b16 %v1574_v3, %v1574_v3  ;;  %v12478_v3 = vld [vmem:[#allocation5 + $0x15d0] sm:$0xf]  ;;  %v12390_v14 = vld [vmem:[#allocation5 + $0x1520] sm:$0xf] }
 0x180   : > { %7986 = vmatpush.bf16.msrb.mxu0 %v11991_v59  ;;  %16529 = vst [vmem:[#allocation25_spill] sm:$0xff] %v16162_v55  ;;  %v12487_v59 = vor.u32 %v15061_v47, %v12486_v34  ;;  %v12479_v21 = vor.u32 %v15059_v2, %v12478_v3  ;;  %v12270_v47 = vld [vmem:[#allocation5 + $0x1430] sm:$0xf]  ;;  %v12262_v2 = vld [vmem:[#allocation5 + $0x1420] sm:$0xf] }
 0x181   : > { %7999 = vmatpush.bf16.msrb.mxu1 %v12055_v4  ;;  %16531 = vst [vmem:[#allocation27_spill] sm:$0xff] %v16166_v43  ;;  %v12351_v4 = vor.u32 %v15027_v1, %v12350_v58  ;;  %v7793_v32 = vpop.f32.mrf.mxu1  ;;  %v12398_v58 = vld [vmem:[#allocation5 + $0x1530] sm:$0xf] }
 0x182   : > { %8012 = vmatpush.bf16.msrb.mxu2 %v12119_v8  ;;  %v12278_v8 = vld [vmem:[#allocation5 + $0x1440] sm:$0xf]  ;;  %v12462_v1 = vld [vmem:[#allocation5 + $0x15b0] sm:$0xf] }
 0x183   : > { %8025 = vmatpush.bf16.msrb.mxu3 %v12183_v48  ;;  %7987 = vmatmul.bf16.vlgmr.msrb.gmra.mxu0 %v16160_v54  ;;  %v12406_v48 = vld [vmem:[#allocation5 + $0x1540] sm:$0xf]  ;;  %v12279_v39 = vor.u32 %v15009_v6, %v12278_v8  ;;  %v15021_v6 = vld [vmem:[#allocation5 + $0x14a4] sm:$0xf0] }
 0x184   : > { %8031 = vmatpush.bf16.msra.mxu0 %v12303_v56  ;;  %8000 = vmatmul.bf16.vlgmr.msrb.gmra.mxu1 %v16164_v40  ;;  %v15041_v56 = vld [vmem:[#allocation5 + $0x1544] sm:$0xf0] }
 0x185   : > { %8044 = vmatpush.bf16.msra.mxu1 %v12367_v0  ;;  %8013 = vmatmul.bf16.vlgmr.msrb.gmra.mxu2 %v16162_v55  ;;  %v12287_v0 = vor.u32 %v15011_v24, %v12286_v9  ;;  %v12407_v34 = vor.u32 %v15041_v56, %v12406_v48  ;;  %v15023_v24 = vld [vmem:[#allocation5 + $0x14b4] sm:$0xf0]  ;;  %v12454_v56 = vld [vmem:[#allocation5 + $0x15a0] sm:$0xf] }
 0x186   : > { %8057 = vmatpush.bf16.msra.mxu2 %v12431_v57  ;;  %8026 = vmatmul.bf16.vlgmr.msrb.gmra.mxu3 %v16166_v43  ;;  %v7780_v57 = vpop.f32.mrf.mxu0 }
 0x187   : > { %8070 = vmatpush.bf16.msra.mxu3 %v12495_v63  ;;  %v12415_v63 = vor.u32 %v15043_v60, %v12414_v61  ;;  %v7781_v27 = vadd.f32 %v7780_v57, %v16156_v62  ;;  %v15055_v61 = vld [vmem:[#allocation5 + $0x15b4] sm:$0xf0]  ;;  %v15053_v57 = vld [vmem:[#allocation5 + $0x15a4] sm:$0xf0] }
 0x188   : > { %8032 = vmatpush.bf16.msra.mxu0 %v12295_v50  ;;  %v15007_v50 = vld [vmem:[#allocation5 + $0x1434] sm:$0xf0]  ;;  %v7806_v8 = vpop.f32.mrf.mxu2 }
 0x189   : > { %8045 = vmatpush.bf16.msra.mxu1 %v12359_v51  ;;  %v12334_v51 = vld [vmem:[#allocation5 + $0x14b0] sm:$0xf]  ;;  %v7794_v9 = vadd.f32 %v7793_v32, %v7781_v27  ;;  %v12271_v60 = vor.u32 %v15007_v50, %v12270_v47  ;;  %v7819_v48 = vpop.f32.mrf.mxu3  ;;  %v7795_v27 = vpop.f32.mrf.mxu1  ;;  %v15003_v47 = vld [vmem:[#allocation5 + $0x1414] sm:$0xf0] }
 0x18a   : > { %8058 = vmatpush.bf16.msra.mxu2 %v12423_v52  ;;  %v12471_v52 = vor.u32 %v15057_v36, %v12470_v26  ;;  %v12335_v62 = vor.u32 %v15023_v24, %v12334_v51  ;;  %v12318_v50 = vld [vmem:[#allocation5 + $0x1490] sm:$0xf]  ;;  %v12455_v51 = vor.u32 %v15053_v57, %v12454_v56  ;;  %v15035_v24 = vld [vmem:[#allocation5 + $0x1514] sm:$0xf0] }
 0x18b   : > { %8071 = vmatpush.bf16.msra.mxu3 %v12487_v59  ;;  %v15039_v59 = vld [vmem:[#allocation5 + $0x1534] sm:$0xf0]  ;;  %v7807_v15 = vadd.f32 %v7806_v8, %v7794_v9  ;;  %v12382_v9 = vld [vmem:[#allocation5 + $0x1510] sm:$0xf]  ;;  %v325_v8 = vld [vmem:[%s16004_s23 + $0xa0] sm:$0xff] }
 0x18c   : > { %8033 = vmatpush.bf16.msra.mxu0 %v12287_v0  ;;  %v12399_v3 = vor.u32 %v15039_v59, %v12398_v58  ;;  %v15005_v0 = vld [vmem:[#allocation5 + $0x1424] sm:$0xf0]  ;;  %v12446_v58 = vld [vmem:[#allocation5 + $0x1590] sm:$0xf]  ;;  %v15051_v59 = vld [vmem:[#allocation5 + $0x1594] sm:$0xf0] }
 0x18d   : > { %8046 = vmatpush.bf16.msra.mxu1 %v12351_v4  ;;  %v12326_v4 = vld [vmem:[#allocation5 + $0x14a0] sm:$0xf]  ;;  %v12263_v36 = vor.u32 %v15005_v0, %v12262_v2  ;;  %v12383_v0 = vor.u32 %v15035_v24, %v12382_v9  ;;  %v12558_v56 = vld [vmem:[#allocation5 + $0x1670] sm:$0xf]  ;;  %v15079_v57 = vld [vmem:[#allocation5 + $0x1674] sm:$0xf0] }
 0x18e   : > { %8059 = vmatpush.bf16.msra.mxu2 %v12415_v63  ;;  %v12463_v63 = vor.u32 %v15055_v61, %v12462_v1  ;;  %v7782_v26 = vpop.f32.mrf.mxu0  ;;  %v12327_v32 = vor.u32 %v15021_v6, %v12326_v4  ;;  %v12246_v1 = vld [vmem:[#allocation5 + $0x1400] sm:$0xf]  ;;  %v12447_v6 = vor.u32 %v15051_v59, %v12446_v58  ;;  %v15127_v9 = vld [vmem:[#allocation5 + $0x17f4] sm:$0xf0]  ;;  %v1576_v58 = vunpack.c.h.b16 %v325_v8 }
 0x18f   : > { %8072 = vmatpush.bf16.msra.mxu3 %v12479_v21  ;;  %v15037_v21 = vld [vmem:[#allocation5 + $0x1524] sm:$0xf0]  ;;  %v12374_v4 = vld [vmem:[#allocation5 + $0x1500] sm:$0xf]  ;;  %v12622_v26 = vld [vmem:[#allocation5 + $0x16f0] sm:$0xf] }
 0x190   : > { %8034 = vmatpush.bf16.msra.mxu0 %v12279_v39  ;;  %v16173_v39 = vadd.f32 %v7819_v48, %v7807_v15  ;;  %v326_v15 = vld [vmem:[%s16004_s23 + $0xa8] sm:$0xff]  ;;  %v7808_v48 = vpop.f32.mrf.mxu2 }
 0x191   : > { %8047 = vmatpush.bf16.msra.mxu1 %v12343_v53  ;;  %v12391_v53 = vor.u32 %v15037_v21, %v12390_v14  ;;  %v12438_v14 = vld [vmem:[#allocation5 + $0x1580] sm:$0xf]  ;;  %v15049_v21 = vld [vmem:[#allocation5 + $0x1584] sm:$0xf0]  ;;  %v1577_v24 = vunpack.c.l.b16 %v326_v15  ;;  %v12559_v48 = vor.u32 %v15079_v57, %v12558_v56  ;;  %v1578_v43 = vunpack.c.h.b16 %v326_v15  ;;  %v12542_v56 = vld [vmem:[#allocation5 + $0x1650] sm:$0xf] }
 0x192   : > { %8060 = vmatpush.bf16.msra.mxu2 %v12407_v34  ;;  %v12254_v34 = vld [vmem:[#allocation5 + $0x1410] sm:$0xf]  ;;  %v12439_v59 = vor.u32 %v15049_v21, %v12438_v14  ;;  %v15075_v57 = vld [vmem:[#allocation5 + $0x1654] sm:$0xf0] }
 0x193   : > { %8073 = vmatpush.bf16.msra.mxu3 %v12471_v52  ;;  %v15019_v52 = vld [vmem:[#allocation5 + $0x1494] sm:$0xf0]  ;;  %v12255_v61 = vor.u32 %v15003_v47, %v12254_v34  ;;  %v1575_v47 = vunpack.c.l.b16 %v325_v8  ;;  %v15125_v8 = vld [vmem:[#allocation5 + $0x17e4] sm:$0xf0] }
 0x194   : > { %8035 = vmatpush.bf16.msra.mxu0 %v12271_v60  ;;  %v15001_v60 = vld [vmem:[#allocation5 + $0x1404] sm:$0xf0]  ;;  %v12319_v2 = vor.u32 %v15019_v52, %v12318_v50  ;;  %v15095_v34 = vld [vmem:[#allocation5 + $0x16f4] sm:$0xf0] }
 0x195   : > { %8048 = vmatpush.bf16.msra.mxu1 %v12335_v62  ;;  %v12310_v62 = vld [vmem:[#allocation5 + $0x1480] sm:$0xf]  ;;  %v12247_v27 = vor.u32 %v15001_v60, %v12246_v1  ;;  %v12623_v40 = vor.u32 %v15095_v34, %v12622_v26  ;;  %v15077_v1 = vld [vmem:[#allocation5 + $0x1664] sm:$0xf0]  ;;  %v16177_v54 = vpack.c.b16 %v1575_v47, %v1575_v47  ;;  %v12606_v26 = vld [vmem:[#allocation5 + $0x16d0] sm:$0xf] }
 0x196   : > { %8061 = vmatpush.bf16.msra.mxu2 %v12399_v3  ;;  %v15017_v3 = vld [vmem:[#allocation5 + $0x1484] sm:$0xf0]  ;;  %v12614_v60 = vld [vmem:[#allocation5 + $0x16e0] sm:$0xf]  ;;  %v15091_v34 = vld [vmem:[#allocation5 + $0x16d4] sm:$0xf0] }
 0x197   : > { %8074 = vmatpush.bf16.msra.mxu3 %v12463_v63  ;;  %v15033_v63 = vld [vmem:[#allocation5 + $0x1504] sm:$0xf0]  ;;  %v12311_v50 = vor.u32 %v15017_v3, %v12310_v62  ;;  %16532 = vst [vmem:[#allocation28_spill] sm:$0xff] %v16177_v54  ;;  %v12678_v62 = vld [vmem:[#allocation5 + $0x1760] sm:$0xf] }
 0x198   : > { %8036 = vmatpush.bf16.msra.mxu0 %v12263_v36  ;;  %v7821_v36 = vpop.f32.mrf.mxu3  ;;  %v12375_v52 = vor.u32 %v15033_v63, %v12374_v4  ;;  %v15109_v3 = vld [vmem:[#allocation5 + $0x1764] sm:$0xf0]  ;;  %v16181_v4 = vpack.c.b16 %v1576_v58, %v1576_v58  ;;  %v12742_v63 = vld [vmem:[#allocation5 + $0x17e0] sm:$0xf]  ;;  %v15123_v47 = vld [vmem:[#allocation5 + $0x17d4] sm:$0xf0] }
 0x199   : > { %8049 = vmatpush.bf16.msra.mxu1 %v12327_v32  ;;  %v12686_v32 = vld [vmem:[#allocation5 + $0x1770] sm:$0xf]  ;;  %v12679_v15 = vor.u32 %v15109_v3, %v12678_v62  ;;  %v15089_v58 = vld [vmem:[#allocation5 + $0x16c4] sm:$0xf0] }
 0x19a   : > { %8062 = vmatpush.bf16.msra.mxu2 %v12391_v53  ;;  %v15111_v53 = vld [vmem:[#allocation5 + $0x1774] sm:$0xf0]  ;;  %16534 = vst [vmem:[#allocation30_spill] sm:$0xff] %v16181_v4 }
 0x19b   : > { %8075 = vmatpush.bf16.msra.mxu3 %v12455_v51  ;;  %v12750_v51 = vld [vmem:[#allocation5 + $0x17f0] sm:$0xf]  ;;  %v12687_v36 = vor.u32 %v15111_v53, %v12686_v32  ;;  %v15107_v53 = vld [vmem:[#allocation5 + $0x1754] sm:$0xf0] }
 0x19c   : > { %8037 = vmatpush.bf16.msra.mxu0 %v12255_v61  ;;  %v12550_v61 = vld [vmem:[#allocation5 + $0x1660] sm:$0xf]  ;;  %v12751_v55 = vor.u32 %v15127_v9, %v12750_v51  ;;  %v12670_v32 = vld [vmem:[#allocation5 + $0x1750] sm:$0xf]  ;;  %v15073_v51 = vld [vmem:[#allocation5 + $0x1644] sm:$0xf0] }
 0x19d   : > { %8050 = vmatpush.bf16.msra.mxu1 %v12319_v2  ;;  %v15093_v2 = vld [vmem:[#allocation5 + $0x16e4] sm:$0xf0]  ;;  %v12551_v14 = vor.u32 %v15077_v1, %v12550_v61  ;;  %v12598_v9 = vld [vmem:[#allocation5 + $0x16c0] sm:$0xf] }
 0x19e   : > { %8063 = vmatpush.bf16.msra.mxu2 %v12383_v0  ;;  %v16179_v0 = vpack.c.b16 %v1577_v24, %v1577_v24  ;;  %v12615_v21 = vor.u32 %v15093_v2, %v12614_v60  ;;  %v12726_v61 = vld [vmem:[#allocation5 + $0x17c0] sm:$0xf]  ;;  %v15121_v1 = vld [vmem:[#allocation5 + $0x17c4] sm:$0xf0]  ;;  %v12599_v3 = vor.u32 %v15089_v58, %v12598_v9 }
 0x19f   : > { %8076 = vmatpush.bf16.msra.mxu3 %v12447_v6  ;;  %v16183_v6 = vpack.c.b16 %v1578_v43, %v1578_v43  ;;  %v12734_v43 = vld [vmem:[#allocation5 + $0x17d0] sm:$0xf]  ;;  %v12646_v9 = vld [vmem:[#allocation5 + $0x1720] sm:$0xf] }
 0x1a0   : > { %8038 = vmatpush.bf16.msra.mxu0 %v12247_v27  ;;  %16533 = vst [vmem:[#allocation29_spill] sm:$0xff] %v16179_v0  ;;  %v12743_v27 = vor.u32 %v15125_v8, %v12742_v63  ;;  %v12735_v24 = vor.u32 %v15123_v47, %v12734_v43  ;;  %v12526_v8 = vld [vmem:[#allocation5 + $0x1630] sm:$0xf]  ;;  %v12518_v47 = vld [vmem:[#allocation5 + $0x1620] sm:$0xf] }
 0x1a1   : > { %8051 = vmatpush.bf16.msra.mxu1 %v12311_v50  ;;  %16535 = vst [vmem:[#allocation31_spill] sm:$0xff] %v16183_v6  ;;  %v12607_v50 = vor.u32 %v15091_v34, %v12606_v26  ;;  %v7845_v62 = vpop.f32.mrf.mxu1  ;;  %v12654_v26 = vld [vmem:[#allocation5 + $0x1730] sm:$0xf] }
 0x1a2   : > { %8064 = vmatpush.bf16.msra.mxu2 %v12375_v52  ;;  %v12534_v52 = vld [vmem:[#allocation5 + $0x1640] sm:$0xf]  ;;  %v12718_v34 = vld [vmem:[#allocation5 + $0x17b0] sm:$0xf] }
 0x1a3   : > { %8077 = vmatpush.bf16.msra.mxu3 %v12439_v59  ;;  %8039 = vmatmul.bf16.vlgmr.msra.gmra.mxu0 %v16177_v54  ;;  %v12662_v59 = vld [vmem:[#allocation5 + $0x1740] sm:$0xf]  ;;  %v12535_v2 = vor.u32 %v15073_v51, %v12534_v52  ;;  %v15085_v51 = vld [vmem:[#allocation5 + $0x16a4] sm:$0xf0] }
 0x1a4   : > { %8083 = vmatpush.bf16.msrb.mxu0 %v12559_v48  ;;  %8052 = vmatmul.bf16.vlgmr.msra.gmra.mxu1 %v16181_v4  ;;  %v15105_v48 = vld [vmem:[#allocation5 + $0x1744] sm:$0xf0] }
 0x1a5   : > { %8096 = vmatpush.bf16.msrb.mxu1 %v12623_v40  ;;  %8065 = vmatmul.bf16.vlgmr.msra.gmra.mxu2 %v16179_v0  ;;  %v12543_v40 = vor.u32 %v15075_v57, %v12542_v56  ;;  %v12663_v63 = vor.u32 %v15105_v48, %v12662_v59  ;;  %v15087_v57 = vld [vmem:[#allocation5 + $0x16b4] sm:$0xf0]  ;;  %v12710_v48 = vld [vmem:[#allocation5 + $0x17a0] sm:$0xf] }
 0x1a6   : > { %8109 = vmatpush.bf16.msrb.mxu2 %v12687_v36  ;;  %8078 = vmatmul.bf16.vlgmr.msra.gmra.mxu3 %v16183_v6  ;;  %v7832_v36 = vpop.f32.mrf.mxu0 }
 0x1a7   : > { %8122 = vmatpush.bf16.msrb.mxu3 %v12751_v55  ;;  %v12671_v55 = vor.u32 %v15107_v53, %v12670_v32  ;;  %v7833_v60 = vadd.f32 %v7832_v36, %v16173_v39  ;;  %v15119_v32 = vld [vmem:[#allocation5 + $0x17b4] sm:$0xf0]  ;;  %v15117_v36 = vld [vmem:[#allocation5 + $0x17a4] sm:$0xf0] }
 0x1a8   : > { %8084 = vmatpush.bf16.msrb.mxu0 %v12551_v14  ;;  %v15071_v14 = vld [vmem:[#allocation5 + $0x1634] sm:$0xf0]  ;;  %v7858_v52 = vpop.f32.mrf.mxu2 }
 0x1a9   : > { %8097 = vmatpush.bf16.msrb.mxu1 %v12615_v21  ;;  %v12590_v21 = vld [vmem:[#allocation5 + $0x16b0] sm:$0xf]  ;;  %v7846_v56 = vadd.f32 %v7845_v62, %v7833_v60  ;;  %v12527_v53 = vor.u32 %v15071_v14, %v12526_v8  ;;  %v7871_v59 = vpop.f32.mrf.mxu3  ;;  %v7847_v60 = vpop.f32.mrf.mxu1  ;;  %v15067_v8 = vld [vmem:[#allocation5 + $0x1614] sm:$0xf0] }
 0x1aa   : > { %8110 = vmatpush.bf16.msrb.mxu2 %v12679_v15  ;;  %v12727_v15 = vor.u32 %v15121_v1, %v12726_v61  ;;  %v12591_v39 = vor.u32 %v15087_v57, %v12590_v21  ;;  %v12574_v14 = vld [vmem:[#allocation5 + $0x1690] sm:$0xf]  ;;  %v12711_v21 = vor.u32 %v15117_v36, %v12710_v48  ;;  %v15099_v57 = vld [vmem:[#allocation5 + $0x1714] sm:$0xf0] }
 0x1ab   : > { %8123 = vmatpush.bf16.msrb.mxu3 %v12743_v27  ;;  %v15103_v27 = vld [vmem:[#allocation5 + $0x1734] sm:$0xf0]  ;;  %v7859_v58 = vadd.f32 %v7858_v52, %v7846_v56  ;;  %v12638_v56 = vld [vmem:[#allocation5 + $0x1710] sm:$0xf] }
 0x1ac   : > { %8085 = vmatpush.bf16.msrb.mxu0 %v12543_v40  ;;  %v12655_v43 = vor.u32 %v15103_v27, %v12654_v26  ;;  %v15069_v40 = vld [vmem:[#allocation5 + $0x1624] sm:$0xf0]  ;;  %v12702_v26 = vld [vmem:[#allocation5 + $0x1790] sm:$0xf]  ;;  %v15115_v27 = vld [vmem:[#allocation5 + $0x1794] sm:$0xf0] }
 0x1ad   : > { %8098 = vmatpush.bf16.msrb.mxu1 %v12607_v50  ;;  %v12582_v50 = vld [vmem:[#allocation5 + $0x16a0] sm:$0xf]  ;;  %v12519_v1 = vor.u32 %v15069_v40, %v12518_v47  ;;  %v12639_v40 = vor.u32 %v15099_v57, %v12638_v56  ;;  %v327_v52 = vld [vmem:[%s16004_s23 + $0xb0] sm:$0xff]  ;;  %v15143_v36 = vld [vmem:[#allocation5 + $0x1874] sm:$0xf0] }
 0x1ae   : > { %8111 = vmatpush.bf16.msrb.mxu2 %v12671_v55  ;;  %v12719_v55 = vor.u32 %v15119_v32, %v12718_v34  ;;  %v7834_v61 = vpop.f32.mrf.mxu0  ;;  %v12583_v62 = vor.u32 %v15085_v51, %v12582_v50  ;;  %v12502_v34 = vld [vmem:[#allocation5 + $0x1600] sm:$0xf]  ;;  %v12703_v51 = vor.u32 %v15115_v27, %v12702_v26  ;;  %v12814_v48 = vld [vmem:[#allocation5 + $0x1870] sm:$0xf]  ;;  %v15191_v56 = vld [vmem:[#allocation5 + $0x19f4] sm:$0xf0]  ;;  %v1580_v26 = vunpack.c.h.b16 %v327_v52 }
 0x1af   : > { %8124 = vmatpush.bf16.msrb.mxu3 %v12735_v24  ;;  %v15101_v24 = vld [vmem:[#allocation5 + $0x1724] sm:$0xf0]  ;;  %v12630_v50 = vld [vmem:[#allocation5 + $0x1700] sm:$0xf]  ;;  %v12878_v61 = vld [vmem:[#allocation5 + $0x18f0] sm:$0xf] }
 0x1b0   : > { %8086 = vmatpush.bf16.msrb.mxu0 %v12535_v2  ;;  %v16190_v2 = vadd.f32 %v7871_v59, %v7859_v58  ;;  %v328_v58 = vld [vmem:[%s16004_s23 + $0xb8] sm:$0xff]  ;;  %v7860_v59 = vpop.f32.mrf.mxu2 }
 0x1b1   : > { %8099 = vmatpush.bf16.msrb.mxu1 %v12599_v3  ;;  %v12647_v3 = vor.u32 %v15101_v24, %v12646_v9  ;;  %v12694_v9 = vld [vmem:[#allocation5 + $0x1780] sm:$0xf]  ;;  %v15113_v24 = vld [vmem:[#allocation5 + $0x1784] sm:$0xf0]  ;;  %v1581_v57 = vunpack.c.l.b16 %v328_v58  ;;  %v12815_v59 = vor.u32 %v15143_v36, %v12814_v48  ;;  %v1582_v6 = vunpack.c.h.b16 %v328_v58  ;;  %v12798_v48 = vld [vmem:[#allocation5 + $0x1850] sm:$0xf] }
 0x1b2   : > { %8112 = vmatpush.bf16.msrb.mxu2 %v12663_v63  ;;  %v12510_v63 = vld [vmem:[#allocation5 + $0x1610] sm:$0xf]  ;;  %v12695_v27 = vor.u32 %v15113_v24, %v12694_v9  ;;  %v15139_v36 = vld [vmem:[#allocation5 + $0x1854] sm:$0xf0] }
 0x1b3   : > { %8125 = vmatpush.bf16.msrb.mxu3 %v12727_v15  ;;  %v15083_v15 = vld [vmem:[#allocation5 + $0x1694] sm:$0xf0]  ;;  %v12511_v32 = vor.u32 %v15067_v8, %v12510_v63  ;;  %v1579_v8 = vunpack.c.l.b16 %v327_v52  ;;  %v15189_v52 = vld [vmem:[#allocation5 + $0x19e4] sm:$0xf0] }
 0x1b4   : > { %8087 = vmatpush.bf16.msrb.mxu0 %v12527_v53  ;;  %v15065_v53 = vld [vmem:[#allocation5 + $0x1604] sm:$0xf0]  ;;  %v12575_v47 = vor.u32 %v15083_v15, %v12574_v14  ;;  %v15159_v63 = vld [vmem:[#allocation5 + $0x18f4] sm:$0xf0] }
 0x1b5   : > { %8100 = vmatpush.bf16.msrb.mxu1 %v12591_v39  ;;  %v12566_v39 = vld [vmem:[#allocation5 + $0x1680] sm:$0xf]  ;;  %v12503_v60 = vor.u32 %v15065_v53, %v12502_v34  ;;  %v12879_v4 = vor.u32 %v15159_v63, %v12878_v61  ;;  %v15141_v34 = vld [vmem:[#allocation5 + $0x1864] sm:$0xf0]  ;;  %v16194_v54 = vpack.c.b16 %v1579_v8, %v1579_v8  ;;  %v12862_v61 = vld [vmem:[#allocation5 + $0x18d0] sm:$0xf] }
 0x1b6   : > { %8113 = vmatpush.bf16.msrb.mxu2 %v12655_v43  ;;  %v15081_v43 = vld [vmem:[#allocation5 + $0x1684] sm:$0xf0]  ;;  %v12870_v53 = vld [vmem:[#allocation5 + $0x18e0] sm:$0xf]  ;;  %v15155_v63 = vld [vmem:[#allocation5 + $0x18d4] sm:$0xf0] }
 0x1b7   : > { %8126 = vmatpush.bf16.msrb.mxu3 %v12719_v55  ;;  %v15097_v55 = vld [vmem:[#allocation5 + $0x1704] sm:$0xf0]  ;;  %v12567_v14 = vor.u32 %v15081_v43, %v12566_v39  ;;  %16536 = vst [vmem:[#allocation32_spill] sm:$0xff] %v16194_v54  ;;  %v12934_v39 = vld [vmem:[#allocation5 + $0x1960] sm:$0xf] }
 0x1b8   : > { %8088 = vmatpush.bf16.msrb.mxu0 %v12519_v1  ;;  %v7873_v1 = vpop.f32.mrf.mxu3  ;;  %v12631_v15 = vor.u32 %v15097_v55, %v12630_v50  ;;  %v15173_v43 = vld [vmem:[#allocation5 + $0x1964] sm:$0xf0]  ;;  %v16198_v50 = vpack.c.b16 %v1580_v26, %v1580_v26  ;;  %v12998_v55 = vld [vmem:[#allocation5 + $0x19e0] sm:$0xf]  ;;  %v15187_v8 = vld [vmem:[#allocation5 + $0x19d4] sm:$0xf0] }
 0x1b9   : > { %8101 = vmatpush.bf16.msrb.mxu1 %v12583_v62  ;;  %v12942_v62 = vld [vmem:[#allocation5 + $0x1970] sm:$0xf]  ;;  %v12935_v58 = vor.u32 %v15173_v43, %v12934_v39  ;;  %v15153_v26 = vld [vmem:[#allocation5 + $0x18c4] sm:$0xf0] }
 0x1ba   : > { %8114 = vmatpush.bf16.msrb.mxu2 %v12647_v3  ;;  %v15175_v3 = vld [vmem:[#allocation5 + $0x1974] sm:$0xf0]  ;;  %16538 = vst [vmem:[#allocation34_spill] sm:$0xff] %v16198_v50 }
 0x1bb   : > { %8127 = vmatpush.bf16.msrb.mxu3 %v12711_v21  ;;  %v13006_v21 = vld [vmem:[#allocation5 + $0x19f0] sm:$0xf]  ;;  %v12943_v1 = vor.u32 %v15175_v3, %v12942_v62  ;;  %v15171_v3 = vld [vmem:[#allocation5 + $0x1954] sm:$0xf0] }
 0x1bc   : > { %8089 = vmatpush.bf16.msrb.mxu0 %v12511_v32  ;;  %v12806_v32 = vld [vmem:[#allocation5 + $0x1860] sm:$0xf]  ;;  %v13007_v0 = vor.u32 %v15191_v56, %v13006_v21  ;;  %v12926_v62 = vld [vmem:[#allocation5 + $0x1950] sm:$0xf]  ;;  %v15137_v21 = vld [vmem:[#allocation5 + $0x1844] sm:$0xf0] }
 0x1bd   : > { %8102 = vmatpush.bf16.msrb.mxu1 %v12575_v47  ;;  %v15157_v47 = vld [vmem:[#allocation5 + $0x18e4] sm:$0xf0]  ;;  %v12807_v9 = vor.u32 %v15141_v34, %v12806_v32  ;;  %v12854_v56 = vld [vmem:[#allocation5 + $0x18c0] sm:$0xf] }
 0x1be   : > { %8115 = vmatpush.bf16.msrb.mxu2 %v12639_v40  ;;  %v16196_v40 = vpack.c.b16 %v1581_v57, %v1581_v57  ;;  %v12871_v24 = vor.u32 %v15157_v47, %v12870_v53  ;;  %v12982_v32 = vld [vmem:[#allocation5 + $0x19c0] sm:$0xf]  ;;  %v15185_v34 = vld [vmem:[#allocation5 + $0x19c4] sm:$0xf0]  ;;  %v12855_v43 = vor.u32 %v15153_v26, %v12854_v56 }
 0x1bf   : > { %8128 = vmatpush.bf16.msrb.mxu3 %v12703_v51  ;;  %v16200_v51 = vpack.c.b16 %v1582_v6, %v1582_v6  ;;  %v12990_v6 = vld [vmem:[#allocation5 + $0x19d0] sm:$0xf]  ;;  %v12902_v56 = vld [vmem:[#allocation5 + $0x1920] sm:$0xf] }
 0x1c0   : > { %8090 = vmatpush.bf16.msrb.mxu0 %v12503_v60  ;;  %16537 = vst [vmem:[#allocation33_spill] sm:$0xff] %v16196_v40  ;;  %v12999_v60 = vor.u32 %v15189_v52, %v12998_v55  ;;  %v12991_v57 = vor.u32 %v15187_v8, %v12990_v6  ;;  %v12782_v52 = vld [vmem:[#allocation5 + $0x1830] sm:$0xf]  ;;  %v12774_v8 = vld [vmem:[#allocation5 + $0x1820] sm:$0xf] }
 0x1c1   : > { %8103 = vmatpush.bf16.msrb.mxu1 %v12567_v14  ;;  %16539 = vst [vmem:[#allocation35_spill] sm:$0xff] %v16200_v51  ;;  %v12863_v14 = vor.u32 %v15155_v63, %v12862_v61  ;;  %v7897_v39 = vpop.f32.mrf.mxu1  ;;  %v12910_v61 = vld [vmem:[#allocation5 + $0x1930] sm:$0xf] }
 0x1c2   : > { %8116 = vmatpush.bf16.msrb.mxu2 %v12631_v15  ;;  %v12790_v15 = vld [vmem:[#allocation5 + $0x1840] sm:$0xf]  ;;  %v12974_v63 = vld [vmem:[#allocation5 + $0x19b0] sm:$0xf] }
 0x1c3   : > { %8129 = vmatpush.bf16.msrb.mxu3 %v12695_v27  ;;  %8091 = vmatmul.bf16.vlgmr.msrb.gmra.mxu0 %v16194_v54  ;;  %v12918_v27 = vld [vmem:[#allocation5 + $0x1940] sm:$0xf]  ;;  %v12791_v47 = vor.u32 %v15137_v21, %v12790_v15  ;;  %v15149_v21 = vld [vmem:[#allocation5 + $0x18a4] sm:$0xf0] }
 0x1c4   : > { %8135 = vmatpush.bf16.msra.mxu0 %v12815_v59  ;;  %8104 = vmatmul.bf16.vlgmr.msrb.gmra.mxu1 %v16198_v50  ;;  %v15169_v59 = vld [vmem:[#allocation5 + $0x1944] sm:$0xf0] }
 0x1c5   : > { %8148 = vmatpush.bf16.msra.mxu1 %v12879_v4  ;;  %8117 = vmatmul.bf16.vlgmr.msrb.gmra.mxu2 %v16196_v40  ;;  %v12799_v4 = vor.u32 %v15139_v36, %v12798_v48  ;;  %v12919_v55 = vor.u32 %v15169_v59, %v12918_v27  ;;  %v15151_v36 = vld [vmem:[#allocation5 + $0x18b4] sm:$0xf0]  ;;  %v12966_v59 = vld [vmem:[#allocation5 + $0x19a0] sm:$0xf] }
 0x1c6   : > { %8161 = vmatpush.bf16.msra.mxu2 %v12943_v1  ;;  %8130 = vmatmul.bf16.vlgmr.msrb.gmra.mxu3 %v16200_v51  ;;  %v7884_v1 = vpop.f32.mrf.mxu0 }
 0x1c7   : > { %8174 = vmatpush.bf16.msra.mxu3 %v13007_v0  ;;  %v12927_v0 = vor.u32 %v15171_v3, %v12926_v62  ;;  %v7885_v53 = vadd.f32 %v7884_v1, %v16190_v2  ;;  %v15183_v62 = vld [vmem:[#allocation5 + $0x19b4] sm:$0xf0]  ;;  %v15181_v1 = vld [vmem:[#allocation5 + $0x19a4] sm:$0xf0] }
 0x1c8   : > { %8136 = vmatpush.bf16.msra.mxu0 %v12807_v9  ;;  %v15135_v9 = vld [vmem:[#allocation5 + $0x1834] sm:$0xf0]  ;;  %v7910_v15 = vpop.f32.mrf.mxu2 }
 0x1c9   : > { %8149 = vmatpush.bf16.msra.mxu1 %v12871_v24  ;;  %v12846_v24 = vld [vmem:[#allocation5 + $0x18b0] sm:$0xf]  ;;  %v7898_v48 = vadd.f32 %v7897_v39, %v7885_v53  ;;  %v12783_v3 = vor.u32 %v15135_v9, %v12782_v52  ;;  %v7923_v27 = vpop.f32.mrf.mxu3  ;;  %v7899_v53 = vpop.f32.mrf.mxu1  ;;  %v15131_v52 = vld [vmem:[#allocation5 + $0x1814] sm:$0xf0] }
 0x1ca   : > { %8162 = vmatpush.bf16.msra.mxu2 %v12935_v58  ;;  %v12983_v58 = vor.u32 %v15185_v34, %v12982_v32  ;;  %v12847_v2 = vor.u32 %v15151_v36, %v12846_v24  ;;  %v12830_v9 = vld [vmem:[#allocation5 + $0x1890] sm:$0xf]  ;;  %v12967_v24 = vor.u32 %v15181_v1, %v12966_v59  ;;  %v15163_v36 = vld [vmem:[#allocation5 + $0x1914] sm:$0xf0] }
 0x1cb   : > { %8175 = vmatpush.bf16.msra.mxu3 %v12999_v60  ;;  %v15167_v60 = vld [vmem:[#allocation5 + $0x1934] sm:$0xf0]  ;;  %v7911_v26 = vadd.f32 %v7910_v15, %v7898_v48  ;;  %v12894_v48 = vld [vmem:[#allocation5 + $0x1910] sm:$0xf]  ;;  %v329_v15 = vld [vmem:[%s16004_s23 + $0xc0] sm:$0xff] }
 0x1cc   : > { %8137 = vmatpush.bf16.msra.mxu0 %v12799_v4  ;;  %v12911_v6 = vor.u32 %v15167_v60, %v12910_v61  ;;  %v15133_v4 = vld [vmem:[#allocation5 + $0x1824] sm:$0xf0]  ;;  %v12958_v61 = vld [vmem:[#allocation5 + $0x1990] sm:$0xf]  ;;  %v15179_v60 = vld [vmem:[#allocation5 + $0x1994] sm:$0xf0] }
 0x1cd   : > { %8150 = vmatpush.bf16.msra.mxu1 %v12863_v14  ;;  %v12838_v14 = vld [vmem:[#allocation5 + $0x18a0] sm:$0xf]  ;;  %v12775_v34 = vor.u32 %v15133_v4, %v12774_v8  ;;  %v12895_v4 = vor.u32 %v15163_v36, %v12894_v48  ;;  %v13070_v59 = vld [vmem:[#allocation5 + $0x1a70] sm:$0xf]  ;;  %v15207_v1 = vld [vmem:[#allocation5 + $0x1a74] sm:$0xf0] }
 0x1ce   : > { %8163 = vmatpush.bf16.msra.mxu2 %v12927_v0  ;;  %v12975_v0 = vor.u32 %v15183_v62, %v12974_v63  ;;  %v7886_v32 = vpop.f32.mrf.mxu0  ;;  %v12839_v39 = vor.u32 %v15149_v21, %v12838_v14  ;;  %v12758_v63 = vld [vmem:[#allocation5 + $0x1800] sm:$0xf]  ;;  %v12959_v21 = vor.u32 %v15179_v60, %v12958_v61  ;;  %v15255_v48 = vld [vmem:[#allocation5 + $0x1bf4] sm:$0xf0]  ;;  %v1584_v61 = vunpack.c.h.b16 %v329_v15 }
 0x1cf   : > { %8176 = vmatpush.bf16.msra.mxu3 %v12991_v57  ;;  %v15165_v57 = vld [vmem:[#allocation5 + $0x1924] sm:$0xf0]  ;;  %v12886_v14 = vld [vmem:[#allocation5 + $0x1900] sm:$0xf]  ;;  %v13134_v32 = vld [vmem:[#allocation5 + $0x1af0] sm:$0xf] }
 0x1d0   : > { %8138 = vmatpush.bf16.msra.mxu0 %v12791_v47  ;;  %v16207_v47 = vadd.f32 %v7923_v27, %v7911_v26  ;;  %v330_v26 = vld [vmem:[%s16004_s23 + $0xc8] sm:$0xff]  ;;  %v7912_v27 = vpop.f32.mrf.mxu2 }
 0x1d1   : > { %8151 = vmatpush.bf16.msra.mxu1 %v12855_v43  ;;  %v12903_v43 = vor.u32 %v15165_v57, %v12902_v56  ;;  %v12950_v56 = vld [vmem:[#allocation5 + $0x1980] sm:$0xf]  ;;  %v15177_v57 = vld [vmem:[#allocation5 + $0x1984] sm:$0xf0]  ;;  %v1585_v36 = vunpack.c.l.b16 %v330_v26  ;;  %v13071_v27 = vor.u32 %v15207_v1, %v13070_v59  ;;  %v1586_v51 = vunpack.c.h.b16 %v330_v26  ;;  %v13054_v59 = vld [vmem:[#allocation5 + $0x1a50] sm:$0xf] }
 0x1d2   : > { %8164 = vmatpush.bf16.msra.mxu2 %v12919_v55  ;;  %v12766_v55 = vld [vmem:[#allocation5 + $0x1810] sm:$0xf]  ;;  %v12951_v60 = vor.u32 %v15177_v57, %v12950_v56  ;;  %v15203_v1 = vld [vmem:[#allocation5 + $0x1a54] sm:$0xf0] }
 0x1d3   : > { %8177 = vmatpush.bf16.msra.mxu3 %v12983_v58  ;;  %v15147_v58 = vld [vmem:[#allocation5 + $0x1894] sm:$0xf0]  ;;  %v12767_v62 = vor.u32 %v15131_v52, %v12766_v55  ;;  %v1583_v52 = vunpack.c.l.b16 %v329_v15  ;;  %v15253_v15 = vld [vmem:[#allocation5 + $0x1be4] sm:$0xf0] }
 0x1d4   : > { %8139 = vmatpush.bf16.msra.mxu0 %v12783_v3  ;;  %v15129_v3 = vld [vmem:[#allocation5 + $0x1804] sm:$0xf0]  ;;  %v12831_v8 = vor.u32 %v15147_v58, %v12830_v9  ;;  %v15223_v55 = vld [vmem:[#allocation5 + $0x1af4] sm:$0xf0] }
 0x1d5   : > { %8152 = vmatpush.bf16.msra.mxu1 %v12847_v2  ;;  %v12822_v2 = vld [vmem:[#allocation5 + $0x1880] sm:$0xf]  ;;  %v12759_v53 = vor.u32 %v15129_v3, %v12758_v63  ;;  %v13135_v50 = vor.u32 %v15223_v55, %v13134_v32  ;;  %v15205_v63 = vld [vmem:[#allocation5 + $0x1a64] sm:$0xf0]  ;;  %v16211_v54 = vpack.c.b16 %v1583_v52, %v1583_v52  ;;  %v13118_v32 = vld [vmem:[#allocation5 + $0x1ad0] sm:$0xf] }
 0x1d6   : > { %8165 = vmatpush.bf16.msra.mxu2 %v12911_v6  ;;  %v15145_v6 = vld [vmem:[#allocation5 + $0x1884] sm:$0xf0]  ;;  %v13126_v3 = vld [vmem:[#allocation5 + $0x1ae0] sm:$0xf]  ;;  %v15219_v55 = vld [vmem:[#allocation5 + $0x1ad4] sm:$0xf0] }
 0x1d7   : > { %8178 = vmatpush.bf16.msra.mxu3 %v12975_v0  ;;  %v15161_v0 = vld [vmem:[#allocation5 + $0x1904] sm:$0xf0]  ;;  %v12823_v9 = vor.u32 %v15145_v6, %v12822_v2  ;;  %16540 = vst [vmem:[#allocation36_spill] sm:$0xff] %v16211_v54  ;;  %v13190_v2 = vld [vmem:[#allocation5 + $0x1b60] sm:$0xf] }
 0x1d8   : > { %8140 = vmatpush.bf16.msra.mxu0 %v12775_v34  ;;  %v7925_v34 = vpop.f32.mrf.mxu3  ;;  %v12887_v58 = vor.u32 %v15161_v0, %v12886_v14  ;;  %v15237_v6 = vld [vmem:[#allocation5 + $0x1b64] sm:$0xf0]  ;;  %v16215_v14 = vpack.c.b16 %v1584_v61, %v1584_v61  ;;  %v13254_v0 = vld [vmem:[#allocation5 + $0x1be0] sm:$0xf]  ;;  %v15251_v52 = vld [vmem:[#allocation5 + $0x1bd4] sm:$0xf0] }
 0x1d9   : > { %8153 = vmatpush.bf16.msra.mxu1 %v12839_v39  ;;  %v13198_v39 = vld [vmem:[#allocation5 + $0x1b70] sm:$0xf]  ;;  %v13191_v26 = vor.u32 %v15237_v6, %v13190_v2  ;;  %v15217_v61 = vld [vmem:[#allocation5 + $0x1ac4] sm:$0xf0] }
 0x1da   : > { %8166 = vmatpush.bf16.msra.mxu2 %v12903_v43  ;;  %v15239_v43 = vld [vmem:[#allocation5 + $0x1b74] sm:$0xf0]  ;;  %16542 = vst [vmem:[#allocation38_spill] sm:$0xff] %v16215_v14 }
 0x1db   : > { %8179 = vmatpush.bf16.msra.mxu3 %v12967_v24  ;;  %v13262_v24 = vld [vmem:[#allocation5 + $0x1bf0] sm:$0xf]  ;;  %v13199_v34 = vor.u32 %v15239_v43, %v13198_v39  ;;  %v15235_v43 = vld [vmem:[#allocation5 + $0x1b54] sm:$0xf0] }
 0x1dc   : > { %8141 = vmatpush.bf16.msra.mxu0 %v12767_v62  ;;  %v13062_v62 = vld [vmem:[#allocation5 + $0x1a60] sm:$0xf]  ;;  %v13263_v40 = vor.u32 %v15255_v48, %v13262_v24  ;;  %v13182_v39 = vld [vmem:[#allocation5 + $0x1b50] sm:$0xf]  ;;  %v15201_v24 = vld [vmem:[#allocation5 + $0x1a44] sm:$0xf0] }
 0x1dd   : > { %8154 = vmatpush.bf16.msra.mxu1 %v12831_v8  ;;  %v15221_v8 = vld [vmem:[#allocation5 + $0x1ae4] sm:$0xf0]  ;;  %v13063_v56 = vor.u32 %v15205_v63, %v13062_v62  ;;  %v13110_v48 = vld [vmem:[#allocation5 + $0x1ac0] sm:$0xf] }
 0x1de   : > { %8167 = vmatpush.bf16.msra.mxu2 %v12895_v4  ;;  %v16213_v4 = vpack.c.b16 %v1585_v36, %v1585_v36  ;;  %v13127_v57 = vor.u32 %v15221_v8, %v13126_v3  ;;  %v13238_v62 = vld [vmem:[#allocation5 + $0x1bc0] sm:$0xf]  ;;  %v15249_v63 = vld [vmem:[#allocation5 + $0x1bc4] sm:$0xf0]  ;;  %v13111_v6 = vor.u32 %v15217_v61, %v13110_v48 }
 0x1df   : > { %8180 = vmatpush.bf16.msra.mxu3 %v12959_v21  ;;  %v16217_v21 = vpack.c.b16 %v1586_v51, %v1586_v51  ;;  %v13246_v51 = vld [vmem:[#allocation5 + $0x1bd0] sm:$0xf]  ;;  %v13158_v48 = vld [vmem:[#allocation5 + $0x1b20] sm:$0xf] }
 0x1e0   : > { %8142 = vmatpush.bf16.msra.mxu0 %v12759_v53  ;;  %16541 = vst [vmem:[#allocation37_spill] sm:$0xff] %v16213_v4  ;;  %v13255_v53 = vor.u32 %v15253_v15, %v13254_v0  ;;  %v13247_v36 = vor.u32 %v15251_v52, %v13246_v51  ;;  %v13038_v15 = vld [vmem:[#allocation5 + $0x1a30] sm:$0xf]  ;;  %v13030_v52 = vld [vmem:[#allocation5 + $0x1a20] sm:$0xf] }
 0x1e1   : > { %8155 = vmatpush.bf16.msra.mxu1 %v12823_v9  ;;  %16543 = vst [vmem:[#allocation39_spill] sm:$0xff] %v16217_v21  ;;  %v13119_v9 = vor.u32 %v15219_v55, %v13118_v32  ;;  %v7949_v2 = vpop.f32.mrf.mxu1  ;;  %v13166_v32 = vld [vmem:[#allocation5 + $0x1b30] sm:$0xf] }
 0x1e2   : > { %8168 = vmatpush.bf16.msra.mxu2 %v12887_v58  ;;  %v13046_v58 = vld [vmem:[#allocation5 + $0x1a40] sm:$0xf]  ;;  %v13230_v55 = vld [vmem:[#allocation5 + $0x1bb0] sm:$0xf] }
 0x1e3   : > { %8181 = vmatpush.bf16.msra.mxu3 %v12951_v60  ;;  %8143 = vmatmul.bf16.vlgmr.msra.gmra.mxu0 %v16211_v54  ;;  %v13174_v60 = vld [vmem:[#allocation5 + $0x1b40] sm:$0xf]  ;;  %v13047_v8 = vor.u32 %v15201_v24, %v13046_v58  ;;  %v15213_v24 = vld [vmem:[#allocation5 + $0x1aa4] sm:$0xf0] }
 0x1e4   : > { %8187 = vmatpush.bf16.msrb.mxu0 %v13071_v27  ;;  %8156 = vmatmul.bf16.vlgmr.msra.gmra.mxu1 %v16215_v14  ;;  %v15233_v27 = vld [vmem:[#allocation5 + $0x1b44] sm:$0xf0] }
 0x1e5   : > { %8200 = vmatpush.bf16.msrb.mxu1 %v13135_v50  ;;  %8169 = vmatmul.bf16.vlgmr.msra.gmra.mxu2 %v16213_v4  ;;  %v13055_v50 = vor.u32 %v15203_v1, %v13054_v59  ;;  %v13175_v0 = vor.u32 %v15233_v27, %v13174_v60  ;;  %v15215_v1 = vld [vmem:[#allocation5 + $0x1ab4] sm:$0xf0]  ;;  %v13222_v27 = vld [vmem:[#allocation5 + $0x1ba0] sm:$0xf] }
 0x1e6   : > { %8213 = vmatpush.bf16.msrb.mxu2 %v13199_v34  ;;  %8182 = vmatmul.bf16.vlgmr.msra.gmra.mxu3 %v16217_v21  ;;  %v7936_v34 = vpop.f32.mrf.mxu0 }
 0x1e7   : > { %8226 = vmatpush.bf16.msrb.mxu3 %v13263_v40  ;;  %v13183_v40 = vor.u32 %v15235_v43, %v13182_v39  ;;  %v7937_v3 = vadd.f32 %v7936_v34, %v16207_v47  ;;  %v15247_v39 = vld [vmem:[#allocation5 + $0x1bb4] sm:$0xf0]  ;;  %v15245_v34 = vld [vmem:[#allocation5 + $0x1ba4] sm:$0xf0] }
 0x1e8   : > { %8188 = vmatpush.bf16.msrb.mxu0 %v13063_v56  ;;  %v15199_v56 = vld [vmem:[#allocation5 + $0x1a34] sm:$0xf0]  ;;  %v7962_v58 = vpop.f32.mrf.mxu2 }
 0x1e9   : > { %8201 = vmatpush.bf16.msrb.mxu1 %v13127_v57  ;;  %v13102_v57 = vld [vmem:[#allocation5 + $0x1ab0] sm:$0xf]  ;;  %v7950_v59 = vadd.f32 %v7949_v2, %v7937_v3  ;;  %v13039_v43 = vor.u32 %v15199_v56, %v13038_v15  ;;  %v7975_v60 = vpop.f32.mrf.mxu3  ;;  %v7951_v3 = vpop.f32.mrf.mxu1  ;;  %v15195_v15 = vld [vmem:[#allocation5 + $0x1a14] sm:$0xf0] }
 0x1ea   : > { %8214 = vmatpush.bf16.msrb.mxu2 %v13191_v26  ;;  %v13239_v26 = vor.u32 %v15249_v63, %v13238_v62  ;;  %v13103_v47 = vor.u32 %v15215_v1, %v13102_v57  ;;  %v13086_v56 = vld [vmem:[#allocation5 + $0x1a90] sm:$0xf]  ;;  %v13223_v57 = vor.u32 %v15245_v34, %v13222_v27  ;;  %v15227_v1 = vld [vmem:[#allocation5 + $0x1b14] sm:$0xf0] }
 0x1eb   : > { %8227 = vmatpush.bf16.msrb.mxu3 %v13255_v53  ;;  %v15231_v53 = vld [vmem:[#allocation5 + $0x1b34] sm:$0xf0]  ;;  %v7963_v61 = vadd.f32 %v7962_v58, %v7950_v59  ;;  %v13150_v59 = vld [vmem:[#allocation5 + $0x1b10] sm:$0xf] }
 0x1ec   : > { %8189 = vmatpush.bf16.msrb.mxu0 %v13055_v50  ;;  %v13167_v51 = vor.u32 %v15231_v53, %v13166_v32  ;;  %v15197_v50 = vld [vmem:[#allocation5 + $0x1a24] sm:$0xf0]  ;;  %v13214_v32 = vld [vmem:[#allocation5 + $0x1b90] sm:$0xf]  ;;  %v15243_v53 = vld [vmem:[#allocation5 + $0x1b94] sm:$0xf0] }
 0x1ed   : > { %8202 = vmatpush.bf16.msrb.mxu1 %v13119_v9  ;;  %v13094_v9 = vld [vmem:[#allocation5 + $0x1aa0] sm:$0xf]  ;;  %v13031_v63 = vor.u32 %v15197_v50, %v13030_v52  ;;  %v13151_v50 = vor.u32 %v15227_v1, %v13150_v59  ;;  %v331_v58 = vld [vmem:[%s16004_s23 + $0xd0] sm:$0xff]  ;;  %v15271_v34 = vld [vmem:[#allocation5 + $0x1c74] sm:$0xf0] }
 0x1ee   : > { %8215 = vmatpush.bf16.msrb.mxu2 %v13183_v40  ;;  %v13231_v40 = vor.u32 %v15247_v39, %v13230_v55  ;;  %v7938_v62 = vpop.f32.mrf.mxu0  ;;  %v13095_v2 = vor.u32 %v15213_v24, %v13094_v9  ;;  %v13014_v55 = vld [vmem:[#allocation5 + $0x1a00] sm:$0xf]  ;;  %v13215_v24 = vor.u32 %v15243_v53, %v13214_v32  ;;  %v13326_v27 = vld [vmem:[#allocation5 + $0x1c70] sm:$0xf]  ;;  %v15319_v59 = vld [vmem:[#allocation5 + $0x1df4] sm:$0xf0]  ;;  %v1588_v32 = vunpack.c.h.b16 %v331_v58 }
 0x1ef   : > { %8228 = vmatpush.bf16.msrb.mxu3 %v13247_v36  ;;  %v15229_v36 = vld [vmem:[#allocation5 + $0x1b24] sm:$0xf0]  ;;  %v13142_v9 = vld [vmem:[#allocation5 + $0x1b00] sm:$0xf]  ;;  %v13390_v62 = vld [vmem:[#allocation5 + $0x1cf0] sm:$0xf] }
 0x1f0   : > { %8190 = vmatpush.bf16.msrb.mxu0 %v13047_v8  ;;  %v16224_v8 = vadd.f32 %v7975_v60, %v7963_v61  ;;  %v332_v61 = vld [vmem:[%s16004_s23 + $0xd8] sm:$0xff]  ;;  %v7964_v60 = vpop.f32.mrf.mxu2 }
 0x1f1   : > { %8203 = vmatpush.bf16.msrb.mxu1 %v13111_v6  ;;  %v13159_v6 = vor.u32 %v15229_v36, %v13158_v48  ;;  %v13206_v48 = vld [vmem:[#allocation5 + $0x1b80] sm:$0xf]  ;;  %v15241_v36 = vld [vmem:[#allocation5 + $0x1b84] sm:$0xf0]  ;;  %v1589_v1 = vunpack.c.l.b16 %v332_v61  ;;  %v13327_v60 = vor.u32 %v15271_v34, %v13326_v27  ;;  %v1590_v21 = vunpack.c.h.b16 %v332_v61  ;;  %v13310_v27 = vld [vmem:[#allocation5 + $0x1c50] sm:$0xf] }
 0x1f2   : > { %8216 = vmatpush.bf16.msrb.mxu2 %v13175_v0  ;;  %v13022_v0 = vld [vmem:[#allocation5 + $0x1a10] sm:$0xf]  ;;  %v13207_v53 = vor.u32 %v15241_v36, %v13206_v48  ;;  %v15267_v34 = vld [vmem:[#allocation5 + $0x1c54] sm:$0xf0] }
 0x1f3   : > { %8229 = vmatpush.bf16.msrb.mxu3 %v13239_v26  ;;  %v15211_v26 = vld [vmem:[#allocation5 + $0x1a94] sm:$0xf0]  ;;  %v13023_v39 = vor.u32 %v15195_v15, %v13022_v0  ;;  %v1587_v15 = vunpack.c.l.b16 %v331_v58  ;;  %v15317_v58 = vld [vmem:[#allocation5 + $0x1de4] sm:$0xf0] }
 0x1f4   : > { %8191 = vmatpush.bf16.msrb.mxu0 %v13039_v43  ;;  %v15193_v43 = vld [vmem:[#allocation5 + $0x1a04] sm:$0xf0]  ;;  %v13087_v52 = vor.u32 %v15211_v26, %v13086_v56  ;;  %v15287_v0 = vld [vmem:[#allocation5 + $0x1cf4] sm:$0xf0] }
 0x1f5   : > { %8204 = vmatpush.bf16.msrb.mxu1 %v13103_v47  ;;  %v13078_v47 = vld [vmem:[#allocation5 + $0x1a80] sm:$0xf]  ;;  %v13015_v3 = vor.u32 %v15193_v43, %v13014_v55  ;;  %v13391_v14 = vor.u32 %v15287_v0, %v13390_v62  ;;  %v15269_v55 = vld [vmem:[#allocation5 + $0x1c64] sm:$0xf0]  ;;  %v16228_v54 = vpack.c.b16 %v1587_v15, %v1587_v15  ;;  %v13374_v62 = vld [vmem:[#allocation5 + $0x1cd0] sm:$0xf] }
 0x1f6   : > { %8217 = vmatpush.bf16.msrb.mxu2 %v13167_v51  ;;  %v15209_v51 = vld [vmem:[#allocation5 + $0x1a84] sm:$0xf0]  ;;  %v13382_v43 = vld [vmem:[#allocation5 + $0x1ce0] sm:$0xf]  ;;  %v15283_v0 = vld [vmem:[#allocation5 + $0x1cd4] sm:$0xf0] }
 0x1f7   : > { %8230 = vmatpush.bf16.msrb.mxu3 %v13231_v40  ;;  %v15225_v40 = vld [vmem:[#allocation5 + $0x1b04] sm:$0xf0]  ;;  %v13079_v56 = vor.u32 %v15209_v51, %v13078_v47  ;;  %16544 = vst [vmem:[#allocation40_spill] sm:$0xff] %v16228_v54  ;;  %v13446_v47 = vld [vmem:[#allocation5 + $0x1d60] sm:$0xf] }
 0x1f8   : > { %8192 = vmatpush.bf16.msrb.mxu0 %v13031_v63  ;;  %v7977_v63 = vpop.f32.mrf.mxu3  ;;  %v13143_v26 = vor.u32 %v15225_v40, %v13142_v9  ;;  %v15301_v51 = vld [vmem:[#allocation5 + $0x1d64] sm:$0xf0]  ;;  %v16232_v9 = vpack.c.b16 %v1588_v32, %v1588_v32  ;;  %v13510_v40 = vld [vmem:[#allocation5 + $0x1de0] sm:$0xf]  ;;  %v15315_v15 = vld [vmem:[#allocation5 + $0x1dd4] sm:$0xf0] }
 0x1f9   : > { %8205 = vmatpush.bf16.msrb.mxu1 %v13095_v2  ;;  %v13454_v2 = vld [vmem:[#allocation5 + $0x1d70] sm:$0xf]  ;;  %v13447_v61 = vor.u32 %v15301_v51, %v13446_v47  ;;  %v15281_v32 = vld [vmem:[#allocation5 + $0x1cc4] sm:$0xf0] }
 0x1fa   : > { %8218 = vmatpush.bf16.msrb.mxu2 %v13159_v6  ;;  %v15303_v6 = vld [vmem:[#allocation5 + $0x1d74] sm:$0xf0]  ;;  %16546 = vst [vmem:[#allocation42_spill] sm:$0xff] %v16232_v9 }
 0x1fb   : > { %8231 = vmatpush.bf16.msrb.mxu3 %v13223_v57  ;;  %v13518_v57 = vld [vmem:[#allocation5 + $0x1df0] sm:$0xf]  ;;  %v13455_v63 = vor.u32 %v15303_v6, %v13454_v2  ;;  %v15299_v6 = vld [vmem:[#allocation5 + $0x1d54] sm:$0xf0] }
 0x1fc   : > { %8193 = vmatpush.bf16.msrb.mxu0 %v13023_v39  ;;  %v13318_v39 = vld [vmem:[#allocation5 + $0x1c60] sm:$0xf]  ;;  %v13519_v4 = vor.u32 %v15319_v59, %v13518_v57  ;;  %v13438_v2 = vld [vmem:[#allocation5 + $0x1d50] sm:$0xf]  ;;  %v15265_v57 = vld [vmem:[#allocation5 + $0x1c44] sm:$0xf0] }
 0x1fd   : > { %8206 = vmatpush.bf16.msrb.mxu1 %v13087_v52  ;;  %v15285_v52 = vld [vmem:[#allocation5 + $0x1ce4] sm:$0xf0]  ;;  %v13319_v48 = vor.u32 %v15269_v55, %v13318_v39  ;;  %v13366_v59 = vld [vmem:[#allocation5 + $0x1cc0] sm:$0xf] }
 0x1fe   : > { %8219 = vmatpush.bf16.msrb.mxu2 %v13151_v50  ;;  %v16230_v50 = vpack.c.b16 %v1589_v1, %v1589_v1  ;;  %v13383_v36 = vor.u32 %v15285_v52, %v13382_v43  ;;  %v13494_v39 = vld [vmem:[#allocation5 + $0x1dc0] sm:$0xf]  ;;  %v15313_v55 = vld [vmem:[#allocation5 + $0x1dc4] sm:$0xf0]  ;;  %v13367_v51 = vor.u32 %v15281_v32, %v13366_v59 }
 0x1ff   : > { %8232 = vmatpush.bf16.msrb.mxu3 %v13215_v24  ;;  %v16234_v24 = vpack.c.b16 %v1590_v21, %v1590_v21  ;;  %v13502_v21 = vld [vmem:[#allocation5 + $0x1dd0] sm:$0xf]  ;;  %v13414_v59 = vld [vmem:[#allocation5 + $0x1d20] sm:$0xf] }
 0x200   : > { %8194 = vmatpush.bf16.msrb.mxu0 %v13015_v3  ;;  %16545 = vst [vmem:[#allocation41_spill] sm:$0xff] %v16230_v50  ;;  %v13511_v3 = vor.u32 %v15317_v58, %v13510_v40  ;;  %v13503_v1 = vor.u32 %v15315_v15, %v13502_v21  ;;  %v13294_v58 = vld [vmem:[#allocation5 + $0x1c30] sm:$0xf]  ;;  %v13286_v15 = vld [vmem:[#allocation5 + $0x1c20] sm:$0xf] }
 0x201   : > { %8207 = vmatpush.bf16.msrb.mxu1 %v13079_v56  ;;  %16547 = vst [vmem:[#allocation43_spill] sm:$0xff] %v16234_v24  ;;  %v13375_v56 = vor.u32 %v15283_v0, %v13374_v62  ;;  %v8001_v47 = vpop.f32.mrf.mxu1  ;;  %v13422_v62 = vld [vmem:[#allocation5 + $0x1d30] sm:$0xf] }
 0x202   : > { %8220 = vmatpush.bf16.msrb.mxu2 %v13143_v26  ;;  %v13302_v26 = vld [vmem:[#allocation5 + $0x1c40] sm:$0xf]  ;;  %v13486_v0 = vld [vmem:[#allocation5 + $0x1db0] sm:$0xf] }
 0x203   : > { %8233 = vmatpush.bf16.msrb.mxu3 %v13207_v53  ;;  %8195 = vmatmul.bf16.vlgmr.msrb.gmra.mxu0 %v16228_v54  ;;  %v13430_v53 = vld [vmem:[#allocation5 + $0x1d40] sm:$0xf]  ;;  %v13303_v52 = vor.u32 %v15265_v57, %v13302_v26  ;;  %v15277_v57 = vld [vmem:[#allocation5 + $0x1ca4] sm:$0xf0] }
 0x204   : > { %8239 = vmatpush.bf16.msra.mxu0 %v13327_v60  ;;  %8208 = vmatmul.bf16.vlgmr.msrb.gmra.mxu1 %v16232_v9  ;;  %v15297_v60 = vld [vmem:[#allocation5 + $0x1d44] sm:$0xf0] }
 0x205   : > { %8252 = vmatpush.bf16.msra.mxu1 %v13391_v14  ;;  %8221 = vmatmul.bf16.vlgmr.msrb.gmra.mxu2 %v16230_v50  ;;  %v13311_v14 = vor.u32 %v15267_v34, %v13310_v27  ;;  %v13431_v40 = vor.u32 %v15297_v60, %v13430_v53  ;;  %v15279_v34 = vld [vmem:[#allocation5 + $0x1cb4] sm:$0xf0]  ;;  %v13478_v60 = vld [vmem:[#allocation5 + $0x1da0] sm:$0xf] }
 0x206   : > { %8265 = vmatpush.bf16.msra.mxu2 %v13455_v63  ;;  %8234 = vmatmul.bf16.vlgmr.msrb.gmra.mxu3 %v16234_v24  ;;  %v7988_v63 = vpop.f32.mrf.mxu0 }
 0x207   : > { %8278 = vmatpush.bf16.msra.mxu3 %v13519_v4  ;;  %v13439_v4 = vor.u32 %v15299_v6, %v13438_v2  ;;  %v7989_v43 = vadd.f32 %v7988_v63, %v16224_v8  ;;  %v15311_v2 = vld [vmem:[#allocation5 + $0x1db4] sm:$0xf0]  ;;  %v15309_v63 = vld [vmem:[#allocation5 + $0x1da4] sm:$0xf0] }
 0x208   : > { %8240 = vmatpush.bf16.msra.mxu0 %v13319_v48  ;;  %v15263_v48 = vld [vmem:[#allocation5 + $0x1c34] sm:$0xf0]  ;;  %v8014_v26 = vpop.f32.mrf.mxu2 }
 0x209   : > { %8253 = vmatpush.bf16.msra.mxu1 %v13383_v36  ;;  %v13358_v36 = vld [vmem:[#allocation5 + $0x1cb0] sm:$0xf]  ;;  %v8002_v27 = vadd.f32 %v8001_v47, %v7989_v43  ;;  %v13295_v6 = vor.u32 %v15263_v48, %v13294_v58  ;;  %v8027_v53 = vpop.f32.mrf.mxu3  ;;  %v8003_v43 = vpop.f32.mrf.mxu1  ;;  %v15259_v58 = vld [vmem:[#allocation5 + $0x1c14] sm:$0xf0] }
 0x20a   : > { %8266 = vmatpush.bf16.msra.mxu2 %v13447_v61  ;;  %v13495_v61 = vor.u32 %v15313_v55, %v13494_v39  ;;  %v13359_v8 = vor.u32 %v15279_v34, %v13358_v36  ;;  %v13342_v48 = vld [vmem:[#allocation5 + $0x1c90] sm:$0xf]  ;;  %v13479_v36 = vor.u32 %v15309_v63, %v13478_v60  ;;  %v15291_v34 = vld [vmem:[#allocation5 + $0x1d14] sm:$0xf0] }
 0x20b   : > { %8279 = vmatpush.bf16.msra.mxu3 %v13511_v3  ;;  %v15295_v3 = vld [vmem:[#allocation5 + $0x1d34] sm:$0xf0]  ;;  %v8015_v32 = vadd.f32 %v8014_v26, %v8002_v27  ;;  %v13406_v27 = vld [vmem:[#allocation5 + $0x1d10] sm:$0xf]  ;;  %v333_v26 = vld [vmem:[%s16004_s23 + $0xe0] sm:$0xff] }
 0x20c   : > { %8241 = vmatpush.bf16.msra.mxu0 %v13311_v14  ;;  %v13423_v21 = vor.u32 %v15295_v3, %v13422_v62  ;;  %v15261_v14 = vld [vmem:[#allocation5 + $0x1c24] sm:$0xf0]  ;;  %v13470_v62 = vld [vmem:[#allocation5 + $0x1d90] sm:$0xf]  ;;  %v15307_v3 = vld [vmem:[#allocation5 + $0x1d94] sm:$0xf0] }
 0x20d   : > { %8254 = vmatpush.bf16.msra.mxu1 %v13375_v56  ;;  %v13350_v56 = vld [vmem:[#allocation5 + $0x1ca0] sm:$0xf]  ;;  %v13287_v55 = vor.u32 %v15261_v14, %v13286_v15  ;;  %v13407_v14 = vor.u32 %v15291_v34, %v13406_v27  ;;  %v13582_v60 = vld [vmem:[#allocation5 + $0x1e70] sm:$0xf]  ;;  %v15335_v63 = vld [vmem:[#allocation5 + $0x1e74] sm:$0xf0] }
 0x20e   : > { %8267 = vmatpush.bf16.msra.mxu2 %v13439_v4  ;;  %v13487_v4 = vor.u32 %v15311_v2, %v13486_v0  ;;  %v7990_v39 = vpop.f32.mrf.mxu0  ;;  %v13351_v47 = vor.u32 %v15277_v57, %v13350_v56  ;;  %v13270_v0 = vld [vmem:[#allocation5 + $0x1c00] sm:$0xf]  ;;  %v13471_v57 = vor.u32 %v15307_v3, %v13470_v62  ;;  %v15383_v27 = vld [vmem:[#allocation5 + $0x1ff4] sm:$0xf0]  ;;  %v1592_v62 = vunpack.c.h.b16 %v333_v26 }
 0x20f   : > { %8280 = vmatpush.bf16.msra.mxu3 %v13503_v1  ;;  %v15293_v1 = vld [vmem:[#allocation5 + $0x1d24] sm:$0xf0]  ;;  %v13398_v56 = vld [vmem:[#allocation5 + $0x1d00] sm:$0xf]  ;;  %v13646_v39 = vld [vmem:[#allocation5 + $0x1ef0] sm:$0xf] }
 0x210   : > { %8242 = vmatpush.bf16.msra.mxu0 %v13303_v52  ;;  %v16241_v52 = vadd.f32 %v8027_v53, %v8015_v32  ;;  %v334_v32 = vld [vmem:[%s16004_s23 + $0xe8] sm:$0xff]  ;;  %v8016_v53 = vpop.f32.mrf.mxu2 }
 0x211   : > { %8255 = vmatpush.bf16.msra.mxu1 %v13367_v51  ;;  %v13415_v51 = vor.u32 %v15293_v1, %v13414_v59  ;;  %v13462_v59 = vld [vmem:[#allocation5 + $0x1d80] sm:$0xf]  ;;  %v15305_v1 = vld [vmem:[#allocation5 + $0x1d84] sm:$0xf0]  ;;  %v1593_v34 = vunpack.c.l.b16 %v334_v32  ;;  %v13583_v53 = vor.u32 %v15335_v63, %v13582_v60  ;;  %v1594_v24 = vunpack.c.h.b16 %v334_v32  ;;  %v13566_v60 = vld [vmem:[#allocation5 + $0x1e50] sm:$0xf] }
 0x212   : > { %8268 = vmatpush.bf16.msra.mxu2 %v13431_v40  ;;  %v13278_v40 = vld [vmem:[#allocation5 + $0x1c10] sm:$0xf]  ;;  %v13463_v3 = vor.u32 %v15305_v1, %v13462_v59  ;;  %v15331_v63 = vld [vmem:[#allocation5 + $0x1e54] sm:$0xf0] }
 0x213   : > { %8281 = vmatpush.bf16.msra.mxu3 %v13495_v61  ;;  %v15275_v61 = vld [vmem:[#allocation5 + $0x1c94] sm:$0xf0]  ;;  %v13279_v2 = vor.u32 %v15259_v58, %v13278_v40  ;;  %v1591_v58 = vunpack.c.l.b16 %v333_v26  ;;  %v15381_v26 = vld [vmem:[#allocation5 + $0x1fe4] sm:$0xf0] }
 0x214   : > { %8243 = vmatpush.bf16.msra.mxu0 %v13295_v6  ;;  %v15257_v6 = vld [vmem:[#allocation5 + $0x1c04] sm:$0xf0]  ;;  %v13343_v15 = vor.u32 %v15275_v61, %v13342_v48  ;;  %v15351_v40 = vld [vmem:[#allocation5 + $0x1ef4] sm:$0xf0] }
 0x215   : > { %8256 = vmatpush.bf16.msra.mxu1 %v13359_v8  ;;  %v13334_v8 = vld [vmem:[#allocation5 + $0x1c80] sm:$0xf]  ;;  %v13271_v43 = vor.u32 %v15257_v6, %v13270_v0  ;;  %v13647_v9 = vor.u32 %v15351_v40, %v13646_v39  ;;  %v15333_v0 = vld [vmem:[#allocation5 + $0x1e64] sm:$0xf0]  ;;  %v16245_v54 = vpack.c.b16 %v1591_v58, %v1591_v58  ;;  %v13630_v39 = vld [vmem:[#allocation5 + $0x1ed0] sm:$0xf] }
 0x216   : > { %8269 = vmatpush.bf16.msra.mxu2 %v13423_v21  ;;  %v15273_v21 = vld [vmem:[#allocation5 + $0x1c84] sm:$0xf0]  ;;  %v13638_v6 = vld [vmem:[#allocation5 + $0x1ee0] sm:$0xf]  ;;  %v15347_v40 = vld [vmem:[#allocation5 + $0x1ed4] sm:$0xf0] }
 0x217   : > { %8282 = vmatpush.bf16.msra.mxu3 %v13487_v4  ;;  %v15289_v4 = vld [vmem:[#allocation5 + $0x1d04] sm:$0xf0]  ;;  %v13335_v48 = vor.u32 %v15273_v21, %v13334_v8  ;;  %16548 = vst [vmem:[#allocation44_spill] sm:$0xff] %v16245_v54  ;;  %v13702_v8 = vld [vmem:[#allocation5 + $0x1f60] sm:$0xf] }
 0x218   : > { %8244 = vmatpush.bf16.msra.mxu0 %v13287_v55  ;;  %v8029_v55 = vpop.f32.mrf.mxu3  ;;  %v13399_v61 = vor.u32 %v15289_v4, %v13398_v56  ;;  %v15365_v21 = vld [vmem:[#allocation5 + $0x1f64] sm:$0xf0]  ;;  %v16249_v56 = vpack.c.b16 %v1592_v62, %v1592_v62  ;;  %v13766_v4 = vld [vmem:[#allocation5 + $0x1fe0] sm:$0xf]  ;;  %v15379_v58 = vld [vmem:[#allocation5 + $0x1fd4] sm:$0xf0] }
 0x219   : > { %8257 = vmatpush.bf16.msra.mxu1 %v13351_v47  ;;  %v13710_v47 = vld [vmem:[#allocation5 + $0x1f70] sm:$0xf]  ;;  %v13703_v32 = vor.u32 %v15365_v21, %v13702_v8  ;;  %v15345_v62 = vld [vmem:[#allocation5 + $0x1ec4] sm:$0xf0] }
 0x21a   : > { %8270 = vmatpush.bf16.msra.mxu2 %v13415_v51  ;;  %v15367_v51 = vld [vmem:[#allocation5 + $0x1f74] sm:$0xf0]  ;;  %16550 = vst [vmem:[#allocation46_spill] sm:$0xff] %v16249_v56 }
 0x21b   : > { %8283 = vmatpush.bf16.msra.mxu3 %v13479_v36  ;;  %v13774_v36 = vld [vmem:[#allocation5 + $0x1ff0] sm:$0xf]  ;;  %v13711_v55 = vor.u32 %v15367_v51, %v13710_v47  ;;  %v15363_v51 = vld [vmem:[#allocation5 + $0x1f54] sm:$0xf0] }
 0x21c   : > { %8245 = vmatpush.bf16.msra.mxu0 %v13279_v2  ;;  %v13574_v2 = vld [vmem:[#allocation5 + $0x1e60] sm:$0xf]  ;;  %v13775_v50 = vor.u32 %v15383_v27, %v13774_v36  ;;  %v13694_v47 = vld [vmem:[#allocation5 + $0x1f50] sm:$0xf]  ;;  %v15329_v36 = vld [vmem:[#allocation5 + $0x1e44] sm:$0xf0] }
 0x21d   : > { %8258 = vmatpush.bf16.msra.mxu1 %v13343_v15  ;;  %v15349_v15 = vld [vmem:[#allocation5 + $0x1ee4] sm:$0xf0]  ;;  %v13575_v59 = vor.u32 %v15333_v0, %v13574_v2  ;;  %v13622_v27 = vld [vmem:[#allocation5 + $0x1ec0] sm:$0xf] }
 0x21e   : > { %8271 = vmatpush.bf16.msra.mxu2 %v13407_v14  ;;  %v16247_v14 = vpack.c.b16 %v1593_v34, %v1593_v34  ;;  %v13639_v1 = vor.u32 %v15349_v15, %v13638_v6  ;;  %v13750_v2 = vld [vmem:[#allocation5 + $0x1fc0] sm:$0xf]  ;;  %v15377_v0 = vld [vmem:[#allocation5 + $0x1fc4] sm:$0xf0]  ;;  %v13623_v21 = vor.u32 %v15345_v62, %v13622_v27 }
 0x21f   : > { %8284 = vmatpush.bf16.msra.mxu3 %v13471_v57  ;;  %v16251_v57 = vpack.c.b16 %v1594_v24, %v1594_v24  ;;  %v13758_v24 = vld [vmem:[#allocation5 + $0x1fd0] sm:$0xf]  ;;  %v13670_v27 = vld [vmem:[#allocation5 + $0x1f20] sm:$0xf] }
 0x220   : > { %8246 = vmatpush.bf16.msra.mxu0 %v13271_v43  ;;  %16549 = vst [vmem:[#allocation45_spill] sm:$0xff] %v16247_v14  ;;  %v13767_v43 = vor.u32 %v15381_v26, %v13766_v4  ;;  %v13759_v34 = vor.u32 %v15379_v58, %v13758_v24  ;;  %v13550_v26 = vld [vmem:[#allocation5 + $0x1e30] sm:$0xf]  ;;  %v13542_v58 = vld [vmem:[#allocation5 + $0x1e20] sm:$0xf] }
 0x221   : > { %8259 = vmatpush.bf16.msra.mxu1 %v13335_v48  ;;  %16551 = vst [vmem:[#allocation47_spill] sm:$0xff] %v16251_v57  ;;  %v13631_v48 = vor.u32 %v15347_v40, %v13630_v39  ;;  %v8053_v8 = vpop.f32.mrf.mxu1  ;;  %v13678_v39 = vld [vmem:[#allocation5 + $0x1f30] sm:$0xf] }
 0x222   : > { %8272 = vmatpush.bf16.msra.mxu2 %v13399_v61  ;;  %v13558_v61 = vld [vmem:[#allocation5 + $0x1e40] sm:$0xf]  ;;  %v13742_v40 = vld [vmem:[#allocation5 + $0x1fb0] sm:$0xf] }
 0x223   : > { %8285 = vmatpush.bf16.msra.mxu3 %v13463_v3  ;;  %8247 = vmatmul.bf16.vlgmr.msra.gmra.mxu0 %v16245_v54  ;;  %v13686_v3 = vld [vmem:[#allocation5 + $0x1f40] sm:$0xf]  ;;  %v13559_v15 = vor.u32 %v15329_v36, %v13558_v61  ;;  %v15341_v36 = vld [vmem:[#allocation5 + $0x1ea4] sm:$0xf0] }
 0x224   : > { %8291 = vmatpush.bf16.msrb.mxu0 %v13583_v53  ;;  %8260 = vmatmul.bf16.vlgmr.msra.gmra.mxu1 %v16249_v56  ;;  %v15361_v53 = vld [vmem:[#allocation5 + $0x1f44] sm:$0xf0] }
 0x225   : > { %8304 = vmatpush.bf16.msrb.mxu1 %v13647_v9  ;;  %8273 = vmatmul.bf16.vlgmr.msra.gmra.mxu2 %v16247_v14  ;;  %v13567_v9 = vor.u32 %v15331_v63, %v13566_v60  ;;  %v13687_v4 = vor.u32 %v15361_v53, %v13686_v3  ;;  %v15343_v63 = vld [vmem:[#allocation5 + $0x1eb4] sm:$0xf0]  ;;  %v13734_v53 = vld [vmem:[#allocation5 + $0x1fa0] sm:$0xf] }
 0x226   : > { %8317 = vmatpush.bf16.msrb.mxu2 %v13711_v55  ;;  %8286 = vmatmul.bf16.vlgmr.msra.gmra.mxu3 %v16251_v57  ;;  %v8040_v55 = vpop.f32.mrf.mxu0 }
 0x227   : > { %8330 = vmatpush.bf16.msrb.mxu3 %v13775_v50  ;;  %v13695_v50 = vor.u32 %v15363_v51, %v13694_v47  ;;  %v8041_v6 = vadd.f32 %v8040_v55, %v16241_v52  ;;  %v15375_v47 = vld [vmem:[#allocation5 + $0x1fb4] sm:$0xf0]  ;;  %v15373_v55 = vld [vmem:[#allocation5 + $0x1fa4] sm:$0xf0] }
 0x228   : > { %8292 = vmatpush.bf16.msrb.mxu0 %v13575_v59  ;;  %v15327_v59 = vld [vmem:[#allocation5 + $0x1e34] sm:$0xf0]  ;;  %v8066_v61 = vpop.f32.mrf.mxu2 }
 0x229   : > { %8305 = vmatpush.bf16.msrb.mxu1 %v13639_v1  ;;  %v13614_v1 = vld [vmem:[#allocation5 + $0x1eb0] sm:$0xf]  ;;  %v8054_v60 = vadd.f32 %v8053_v8, %v8041_v6  ;;  %v13551_v51 = vor.u32 %v15327_v59, %v13550_v26  ;;  %v8079_v3 = vpop.f32.mrf.mxu3  ;;  %v8055_v6 = vpop.f32.mrf.mxu1  ;;  %v15323_v26 = vld [vmem:[#allocation5 + $0x1e14] sm:$0xf0] }
 0x22a   : > { %8318 = vmatpush.bf16.msrb.mxu2 %v13703_v32  ;;  %v13751_v32 = vor.u32 %v15377_v0, %v13750_v2  ;;  %v13615_v52 = vor.u32 %v15343_v63, %v13614_v1  ;;  %v13598_v59 = vld [vmem:[#allocation5 + $0x1e90] sm:$0xf]  ;;  %v13735_v1 = vor.u32 %v15373_v55, %v13734_v53  ;;  %v15355_v63 = vld [vmem:[#allocation5 + $0x1f14] sm:$0xf0] }
 0x22b   : > { %8331 = vmatpush.bf16.msrb.mxu3 %v13767_v43  ;;  %v15359_v43 = vld [vmem:[#allocation5 + $0x1f34] sm:$0xf0]  ;;  %v8067_v62 = vadd.f32 %v8066_v61, %v8054_v60  ;;  %v13662_v60 = vld [vmem:[#allocation5 + $0x1f10] sm:$0xf] }
 0x22c   : > { %8293 = vmatpush.bf16.msrb.mxu0 %v13567_v9  ;;  %v13679_v24 = vor.u32 %v15359_v43, %v13678_v39  ;;  %v15325_v9 = vld [vmem:[#allocation5 + $0x1e24] sm:$0xf0]  ;;  %v13726_v39 = vld [vmem:[#allocation5 + $0x1f90] sm:$0xf]  ;;  %v15371_v43 = vld [vmem:[#allocation5 + $0x1f94] sm:$0xf0] }
 0x22d   : > { %8306 = vmatpush.bf16.msrb.mxu1 %v13631_v48  ;;  %v13606_v48 = vld [vmem:[#allocation5 + $0x1ea0] sm:$0xf]  ;;  %v13543_v0 = vor.u32 %v15325_v9, %v13542_v58  ;;  %v13663_v9 = vor.u32 %v15355_v63, %v13662_v60  ;;  %v335_v61 = vld [vmem:[%s16004_s23 + $0xf0] sm:$0xff]  ;;  %v15399_v55 = vld [vmem:[#allocation5 + $0x2074] sm:$0xf0] }
 0x22e   : > { %8319 = vmatpush.bf16.msrb.mxu2 %v13695_v50  ;;  %v13743_v50 = vor.u32 %v15375_v47, %v13742_v40  ;;  %v8042_v2 = vpop.f32.mrf.mxu0  ;;  %v13607_v8 = vor.u32 %v15341_v36, %v13606_v48  ;;  %v13526_v40 = vld [vmem:[#allocation5 + $0x1e00] sm:$0xf]  ;;  %v13727_v36 = vor.u32 %v15371_v43, %v13726_v39  ;;  %v13838_v53 = vld [vmem:[#allocation5 + $0x2070] sm:$0xf]  ;;  %v15447_v60 = vld [vmem:[#allocation5 + $0x21f4] sm:$0xf0]  ;;  %v1596_v39 = vunpack.c.h.b16 %v335_v61 }
 0x22f   : > { %8332 = vmatpush.bf16.msrb.mxu3 %v13759_v34  ;;  %v15357_v34 = vld [vmem:[#allocation5 + $0x1f24] sm:$0xf0]  ;;  %v13654_v48 = vld [vmem:[#allocation5 + $0x1f00] sm:$0xf]  ;;  %v13902_v2 = vld [vmem:[#allocation5 + $0x20f0] sm:$0xf] }
 0x230   : > { %8294 = vmatpush.bf16.msrb.mxu0 %v13559_v15  ;;  %v16258_v15 = vadd.f32 %v8079_v3, %v8067_v62  ;;  %v336_v62 = vld [vmem:[%s16004_s23 + $0xf8] sm:$0xff]  ;;  %v8068_v3 = vpop.f32.mrf.mxu2 }
 0x231   : > { %8307 = vmatpush.bf16.msrb.mxu1 %v13623_v21  ;;  %v13671_v21 = vor.u32 %v15357_v34, %v13670_v27  ;;  %v13718_v27 = vld [vmem:[#allocation5 + $0x1f80] sm:$0xf]  ;;  %v15369_v34 = vld [vmem:[#allocation5 + $0x1f84] sm:$0xf0]  ;;  %v1597_v63 = vunpack.c.l.b16 %v336_v62  ;;  %v13839_v3 = vor.u32 %v15399_v55, %v13838_v53  ;;  %v1598_v57 = vunpack.c.h.b16 %v336_v62  ;;  %v13822_v53 = vld [vmem:[#allocation5 + $0x2050] sm:$0xf] }
 0x232   : > { %8320 = vmatpush.bf16.msrb.mxu2 %v13687_v4  ;;  %v13534_v4 = vld [vmem:[#allocation5 + $0x1e10] sm:$0xf]  ;;  %v13719_v43 = vor.u32 %v15369_v34, %v13718_v27  ;;  %v15395_v55 = vld [vmem:[#allocation5 + $0x2054] sm:$0xf0] }
 0x233   : > { %8333 = vmatpush.bf16.msrb.mxu3 %v13751_v32  ;;  %v15339_v32 = vld [vmem:[#allocation5 + $0x1e94] sm:$0xf0]  ;;  %v13535_v47 = vor.u32 %v15323_v26, %v13534_v4  ;;  %v1595_v26 = vunpack.c.l.b16 %v335_v61  ;;  %v15445_v61 = vld [vmem:[#allocation5 + $0x21e4] sm:$0xf0] }
 0x234   : > { %8295 = vmatpush.bf16.msrb.mxu0 %v13551_v51  ;;  %v15321_v51 = vld [vmem:[#allocation5 + $0x1e04] sm:$0xf0]  ;;  %v13599_v58 = vor.u32 %v15339_v32, %v13598_v59  ;;  %v15415_v4 = vld [vmem:[#allocation5 + $0x20f4] sm:$0xf0] }
 0x235   : > { %8308 = vmatpush.bf16.msrb.mxu1 %v13615_v52  ;;  %v13590_v52 = vld [vmem:[#allocation5 + $0x1e80] sm:$0xf]  ;;  %v13527_v6 = vor.u32 %v15321_v51, %v13526_v40  ;;  %v13903_v56 = vor.u32 %v15415_v4, %v13902_v2  ;;  %v15397_v40 = vld [vmem:[#allocation5 + $0x2064] sm:$0xf0]  ;;  %v16262_v54 = vpack.c.b16 %v1595_v26, %v1595_v26  ;;  %v13886_v2 = vld [vmem:[#allocation5 + $0x20d0] sm:$0xf] }
 0x236   : > { %8321 = vmatpush.bf16.msrb.mxu2 %v13679_v24  ;;  %v15337_v24 = vld [vmem:[#allocation5 + $0x1e84] sm:$0xf0]  ;;  %v13894_v51 = vld [vmem:[#allocation5 + $0x20e0] sm:$0xf]  ;;  %v15411_v4 = vld [vmem:[#allocation5 + $0x20d4] sm:$0xf0] }
 0x237   : > { %8334 = vmatpush.bf16.msrb.mxu3 %v13743_v50  ;;  %v15353_v50 = vld [vmem:[#allocation5 + $0x1f04] sm:$0xf0]  ;;  %v13591_v59 = vor.u32 %v15337_v24, %v13590_v52  ;;  %16552 = vst [vmem:[#allocation48_spill] sm:$0xff] %v16262_v54  ;;  %v13958_v52 = vld [vmem:[#allocation5 + $0x2160] sm:$0xf] }
 0x238   : > { %8296 = vmatpush.bf16.msrb.mxu0 %v13543_v0  ;;  %v8081_v0 = vpop.f32.mrf.mxu3  ;;  %v13655_v32 = vor.u32 %v15353_v50, %v13654_v48  ;;  %v15429_v24 = vld [vmem:[#allocation5 + $0x2164] sm:$0xf0]  ;;  %v16266_v48 = vpack.c.b16 %v1596_v39, %v1596_v39  ;;  %v14022_v50 = vld [vmem:[#allocation5 + $0x21e0] sm:$0xf]  ;;  %v15443_v26 = vld [vmem:[#allocation5 + $0x21d4] sm:$0xf0] }
 0x239   : > { %8309 = vmatpush.bf16.msrb.mxu1 %v13607_v8  ;;  %v13966_v8 = vld [vmem:[#allocation5 + $0x2170] sm:$0xf]  ;;  %v13959_v62 = vor.u32 %v15429_v24, %v13958_v52  ;;  %v15409_v39 = vld [vmem:[#allocation5 + $0x20c4] sm:$0xf0] }
 0x23a   : > { %8322 = vmatpush.bf16.msrb.mxu2 %v13671_v21  ;;  %v15431_v21 = vld [vmem:[#allocation5 + $0x2174] sm:$0xf0]  ;;  %16554 = vst [vmem:[#allocation50_spill] sm:$0xff] %v16266_v48 }
 0x23b   : > { %8335 = vmatpush.bf16.msrb.mxu3 %v13735_v1  ;;  %v14030_v1 = vld [vmem:[#allocation5 + $0x21f0] sm:$0xf]  ;;  %v13967_v0 = vor.u32 %v15431_v21, %v13966_v8  ;;  %v15427_v21 = vld [vmem:[#allocation5 + $0x2154] sm:$0xf0] }
 0x23c   : > { %8297 = vmatpush.bf16.msrb.mxu0 %v13535_v47  ;;  %v13830_v47 = vld [vmem:[#allocation5 + $0x2060] sm:$0xf]  ;;  %v14031_v14 = vor.u32 %v15447_v60, %v14030_v1  ;;  %v13950_v8 = vld [vmem:[#allocation5 + $0x2150] sm:$0xf]  ;;  %v15393_v1 = vld [vmem:[#allocation5 + $0x2044] sm:$0xf0] }
 0x23d   : > { %8310 = vmatpush.bf16.msrb.mxu1 %v13599_v58  ;;  %v15413_v58 = vld [vmem:[#allocation5 + $0x20e4] sm:$0xf0]  ;;  %v13831_v27 = vor.u32 %v15397_v40, %v13830_v47  ;;  %v13878_v60 = vld [vmem:[#allocation5 + $0x20c0] sm:$0xf] }
 0x23e   : > { %8323 = vmatpush.bf16.msrb.mxu2 %v13663_v9  ;;  %v16264_v9 = vpack.c.b16 %v1597_v63, %v1597_v63  ;;  %v13895_v34 = vor.u32 %v15413_v58, %v13894_v51  ;;  %v14006_v47 = vld [vmem:[#allocation5 + $0x21c0] sm:$0xf]  ;;  %v15441_v40 = vld [vmem:[#allocation5 + $0x21c4] sm:$0xf0]  ;;  %v13879_v24 = vor.u32 %v15409_v39, %v13878_v60 }
 0x23f   : > { %8336 = vmatpush.bf16.msrb.mxu3 %v13727_v36  ;;  %v16268_v36 = vpack.c.b16 %v1598_v57, %v1598_v57  ;;  %v14014_v57 = vld [vmem:[#allocation5 + $0x21d0] sm:$0xf]  ;;  %v13926_v60 = vld [vmem:[#allocation5 + $0x2120] sm:$0xf] }
 0x240   : > { %8298 = vmatpush.bf16.msrb.mxu0 %v13527_v6  ;;  %16553 = vst [vmem:[#allocation49_spill] sm:$0xff] %v16264_v9  ;;  %v14023_v6 = vor.u32 %v15445_v61, %v14022_v50  ;;  %v14015_v63 = vor.u32 %v15443_v26, %v14014_v57  ;;  %v13806_v61 = vld [vmem:[#allocation5 + $0x2030] sm:$0xf]  ;;  %v13798_v26 = vld [vmem:[#allocation5 + $0x2020] sm:$0xf] }
 0x241   : > { %8311 = vmatpush.bf16.msrb.mxu1 %v13591_v59  ;;  %16555 = vst [vmem:[#allocation51_spill] sm:$0xff] %v16268_v36  ;;  %v13887_v59 = vor.u32 %v15411_v4, %v13886_v2  ;;  %v8105_v52 = vpop.f32.mrf.mxu1  ;;  %v13934_v2 = vld [vmem:[#allocation5 + $0x2130] sm:$0xf] }
 0x242   : > { %8324 = vmatpush.bf16.msrb.mxu2 %v13655_v32  ;;  %v13814_v32 = vld [vmem:[#allocation5 + $0x2040] sm:$0xf]  ;;  %v13998_v4 = vld [vmem:[#allocation5 + $0x21b0] sm:$0xf] }
 0x243   : > { %8337 = vmatpush.bf16.msrb.mxu3 %v13719_v43  ;;  %8299 = vmatmul.bf16.vlgmr.msrb.gmra.mxu0 %v16262_v54  ;;  %v13942_v43 = vld [vmem:[#allocation5 + $0x2140] sm:$0xf]  ;;  %v13815_v58 = vor.u32 %v15393_v1, %v13814_v32  ;;  %v15405_v1 = vld [vmem:[#allocation5 + $0x20a4] sm:$0xf0] }
 0x244   : > { %8343 = vmatpush.bf16.msra.mxu0 %v13839_v3  ;;  %8312 = vmatmul.bf16.vlgmr.msrb.gmra.mxu1 %v16266_v48  ;;  %v15425_v3 = vld [vmem:[#allocation5 + $0x2144] sm:$0xf0] }
 0x245   : > { %8356 = vmatpush.bf16.msra.mxu1 %v13903_v56  ;;  %8325 = vmatmul.bf16.vlgmr.msrb.gmra.mxu2 %v16264_v9  ;;  %v13823_v56 = vor.u32 %v15395_v55, %v13822_v53  ;;  %v13943_v50 = vor.u32 %v15425_v3, %v13942_v43  ;;  %v15407_v55 = vld [vmem:[#allocation5 + $0x20b4] sm:$0xf0]  ;;  %v13990_v3 = vld [vmem:[#allocation5 + $0x21a0] sm:$0xf] }
 0x246   : > { %8369 = vmatpush.bf16.msra.mxu2 %v13967_v0  ;;  %8338 = vmatmul.bf16.vlgmr.msrb.gmra.mxu3 %v16268_v36  ;;  %v8092_v0 = vpop.f32.mrf.mxu0 }
 0x247   : > { %8382 = vmatpush.bf16.msra.mxu3 %v14031_v14  ;;  %v13951_v14 = vor.u32 %v15427_v21, %v13950_v8  ;;  %v8093_v51 = vadd.f32 %v8092_v0, %v16258_v15  ;;  %v15439_v8 = vld [vmem:[#allocation5 + $0x21b4] sm:$0xf0]  ;;  %v15437_v0 = vld [vmem:[#allocation5 + $0x21a4] sm:$0xf0] }
 0x248   : > { %8344 = vmatpush.bf16.msra.mxu0 %v13831_v27  ;;  %v15391_v27 = vld [vmem:[#allocation5 + $0x2034] sm:$0xf0]  ;;  %v8118_v32 = vpop.f32.mrf.mxu2 }
 0x249   : > { %8357 = vmatpush.bf16.msra.mxu1 %v13895_v34  ;;  %v13870_v34 = vld [vmem:[#allocation5 + $0x20b0] sm:$0xf]  ;;  %v8106_v53 = vadd.f32 %v8105_v52, %v8093_v51  ;;  %v13807_v21 = vor.u32 %v15391_v27, %v13806_v61  ;;  %v8131_v43 = vpop.f32.mrf.mxu3  ;;  %v8107_v51 = vpop.f32.mrf.mxu1  ;;  %v15387_v61 = vld [vmem:[#allocation5 + $0x2014] sm:$0xf0] }
 0x24a   : > { %8370 = vmatpush.bf16.msra.mxu2 %v13959_v62  ;;  %v14007_v62 = vor.u32 %v15441_v40, %v14006_v47  ;;  %v13871_v15 = vor.u32 %v15407_v55, %v13870_v34  ;;  %v13854_v27 = vld [vmem:[#allocation5 + $0x2090] sm:$0xf]  ;;  %v13991_v34 = vor.u32 %v15437_v0, %v13990_v3  ;;  %v15419_v55 = vld [vmem:[#allocation5 + $0x2114] sm:$0xf0] }
 0x24b   : > { %8383 = vmatpush.bf16.msra.mxu3 %v14023_v6  ;;  %v15423_v6 = vld [vmem:[#allocation5 + $0x2134] sm:$0xf0]  ;;  %v8119_v39 = vadd.f32 %v8118_v32, %v8106_v53  ;;  %v13918_v53 = vld [vmem:[#allocation5 + $0x2110] sm:$0xf]  ;;  %v337_v32 = vld [vmem:[%s16004_s23 + $0x100] sm:$0xff] }
 0x24c   : > { %8345 = vmatpush.bf16.msra.mxu0 %v13823_v56  ;;  %v13935_v57 = vor.u32 %v15423_v6, %v13934_v2  ;;  %v15389_v56 = vld [vmem:[#allocation5 + $0x2024] sm:$0xf0]  ;;  %v13982_v2 = vld [vmem:[#allocation5 + $0x2190] sm:$0xf]  ;;  %v15435_v6 = vld [vmem:[#allocation5 + $0x2194] sm:$0xf0] }
 0x24d   : > { %8358 = vmatpush.bf16.msra.mxu1 %v13887_v59  ;;  %v13862_v59 = vld [vmem:[#allocation5 + $0x20a0] sm:$0xf]  ;;  %v13799_v40 = vor.u32 %v15389_v56, %v13798_v26  ;;  %v13919_v56 = vor.u32 %v15419_v55, %v13918_v53  ;;  %v14094_v3 = vld [vmem:[#allocation5 + $0x2270] sm:$0xf]  ;;  %v15463_v0 = vld [vmem:[#allocation5 + $0x2274] sm:$0xf0] }
 0x24e   : > { %8371 = vmatpush.bf16.msra.mxu2 %v13951_v14  ;;  %v13999_v14 = vor.u32 %v15439_v8, %v13998_v4  ;;  %v8094_v47 = vpop.f32.mrf.mxu0  ;;  %v13863_v52 = vor.u32 %v15405_v1, %v13862_v59  ;;  %v13782_v4 = vld [vmem:[#allocation5 + $0x2000] sm:$0xf]  ;;  %v13983_v1 = vor.u32 %v15435_v6, %v13982_v2  ;;  %v15511_v53 = vld [vmem:[#allocation5 + $0x23f4] sm:$0xf0]  ;;  %v1600_v2 = vunpack.c.h.b16 %v337_v32 }
 0x24f   : > { %8384 = vmatpush.bf16.msra.mxu3 %v14015_v63  ;;  %v15421_v63 = vld [vmem:[#allocation5 + $0x2124] sm:$0xf0]  ;;  %v13910_v59 = vld [vmem:[#allocation5 + $0x2100] sm:$0xf]  ;;  %v14158_v47 = vld [vmem:[#allocation5 + $0x22f0] sm:$0xf] }
 0x250   : > { %8346 = vmatpush.bf16.msra.mxu0 %v13815_v58  ;;  %v16275_v58 = vadd.f32 %v8131_v43, %v8119_v39  ;;  %v338_v39 = vld [vmem:[%s16004_s23 + $0x108] sm:$0xff]  ;;  %v8120_v43 = vpop.f32.mrf.mxu2 }
 0x251   : > { %8359 = vmatpush.bf16.msra.mxu1 %v13879_v24  ;;  %v13927_v24 = vor.u32 %v15421_v63, %v13926_v60  ;;  %v13974_v60 = vld [vmem:[#allocation5 + $0x2180] sm:$0xf]  ;;  %v15433_v63 = vld [vmem:[#allocation5 + $0x2184] sm:$0xf0]  ;;  %v1601_v55 = vunpack.c.l.b16 %v338_v39  ;;  %v14095_v43 = vor.u32 %v15463_v0, %v14094_v3  ;;  %v1602_v36 = vunpack.c.h.b16 %v338_v39  ;;  %v14078_v3 = vld [vmem:[#allocation5 + $0x2250] sm:$0xf] }
 0x252   : > { %8372 = vmatpush.bf16.msra.mxu2 %v13943_v50  ;;  %v13790_v50 = vld [vmem:[#allocation5 + $0x2010] sm:$0xf]  ;;  %v13975_v6 = vor.u32 %v15433_v63, %v13974_v60  ;;  %v15459_v0 = vld [vmem:[#allocation5 + $0x2254] sm:$0xf0] }
 0x253   : > { %8385 = vmatpush.bf16.msra.mxu3 %v14007_v62  ;;  %v15403_v62 = vld [vmem:[#allocation5 + $0x2094] sm:$0xf0]  ;;  %v13791_v8 = vor.u32 %v15387_v61, %v13790_v50  ;;  %v1599_v61 = vunpack.c.l.b16 %v337_v32  ;;  %v15509_v32 = vld [vmem:[#allocation5 + $0x23e4] sm:$0xf0] }
 0x254   : > { %8347 = vmatpush.bf16.msra.mxu0 %v13807_v21  ;;  %v15385_v21 = vld [vmem:[#allocation5 + $0x2004] sm:$0xf0]  ;;  %v13855_v26 = vor.u32 %v15403_v62, %v13854_v27  ;;  %v15479_v50 = vld [vmem:[#allocation5 + $0x22f4] sm:$0xf0] }
 0x255   : > { %8360 = vmatpush.bf16.msra.mxu1 %v13871_v15  ;;  %v13846_v15 = vld [vmem:[#allocation5 + $0x2080] sm:$0xf]  ;;  %v13783_v51 = vor.u32 %v15385_v21, %v13782_v4  ;;  %v14159_v48 = vor.u32 %v15479_v50, %v14158_v47  ;;  %v15461_v4 = vld [vmem:[#allocation5 + $0x2264] sm:$0xf0]  ;;  %v16279_v54 = vpack.c.b16 %v1599_v61, %v1599_v61  ;;  %v14142_v47 = vld [vmem:[#allocation5 + $0x22d0] sm:$0xf] }
 0x256   : > { %8373 = vmatpush.bf16.msra.mxu2 %v13935_v57  ;;  %v15401_v57 = vld [vmem:[#allocation5 + $0x2084] sm:$0xf0]  ;;  %v14150_v21 = vld [vmem:[#allocation5 + $0x22e0] sm:$0xf]  ;;  %v15475_v50 = vld [vmem:[#allocation5 + $0x22d4] sm:$0xf0] }
 0x257   : > { %8386 = vmatpush.bf16.msra.mxu3 %v13999_v14  ;;  %v15417_v14 = vld [vmem:[#allocation5 + $0x2104] sm:$0xf0]  ;;  %v13847_v27 = vor.u32 %v15401_v57, %v13846_v15  ;;  %16556 = vst [vmem:[#allocation52_spill] sm:$0xff] %v16279_v54  ;;  %v14214_v15 = vld [vmem:[#allocation5 + $0x2360] sm:$0xf] }
 0x258   : > { %8348 = vmatpush.bf16.msra.mxu0 %v13799_v40  ;;  %v8133_v40 = vpop.f32.mrf.mxu3  ;;  %v13911_v62 = vor.u32 %v15417_v14, %v13910_v59  ;;  %v15493_v57 = vld [vmem:[#allocation5 + $0x2364] sm:$0xf0]  ;;  %v16283_v59 = vpack.c.b16 %v1600_v2, %v1600_v2  ;;  %v14278_v14 = vld [vmem:[#allocation5 + $0x23e0] sm:$0xf]  ;;  %v15507_v61 = vld [vmem:[#allocation5 + $0x23d4] sm:$0xf0] }
 0x259   : > { %8361 = vmatpush.bf16.msra.mxu1 %v13863_v52  ;;  %v14222_v52 = vld [vmem:[#allocation5 + $0x2370] sm:$0xf]  ;;  %v14215_v39 = vor.u32 %v15493_v57, %v14214_v15  ;;  %v15473_v2 = vld [vmem:[#allocation5 + $0x22c4] sm:$0xf0] }
 0x25a   : > { %8374 = vmatpush.bf16.msra.mxu2 %v13927_v24  ;;  %v15495_v24 = vld [vmem:[#allocation5 + $0x2374] sm:$0xf0]  ;;  %16558 = vst [vmem:[#allocation54_spill] sm:$0xff] %v16283_v59 }
 0x25b   : > { %8387 = vmatpush.bf16.msra.mxu3 %v13991_v34  ;;  %v14286_v34 = vld [vmem:[#allocation5 + $0x23f0] sm:$0xf]  ;;  %v14223_v40 = vor.u32 %v15495_v24, %v14222_v52  ;;  %v15491_v24 = vld [vmem:[#allocation5 + $0x2354] sm:$0xf0] }
 0x25c   : > { %8349 = vmatpush.bf16.msra.mxu0 %v13791_v8  ;;  %v14086_v8 = vld [vmem:[#allocation5 + $0x2260] sm:$0xf]  ;;  %v14287_v9 = vor.u32 %v15511_v53, %v14286_v34  ;;  %v14206_v52 = vld [vmem:[#allocation5 + $0x2350] sm:$0xf]  ;;  %v15457_v34 = vld [vmem:[#allocation5 + $0x2244] sm:$0xf0] }
 0x25d   : > { %8362 = vmatpush.bf16.msra.mxu1 %v13855_v26  ;;  %v15477_v26 = vld [vmem:[#allocation5 + $0x22e4] sm:$0xf0]  ;;  %v14087_v60 = vor.u32 %v15461_v4, %v14086_v8  ;;  %v14134_v53 = vld [vmem:[#allocation5 + $0x22c0] sm:$0xf] }
 0x25e   : > { %8375 = vmatpush.bf16.msra.mxu2 %v13919_v56  ;;  %v16281_v56 = vpack.c.b16 %v1601_v55, %v1601_v55  ;;  %v14151_v63 = vor.u32 %v15477_v26, %v14150_v21  ;;  %v14262_v8 = vld [vmem:[#allocation5 + $0x23c0] sm:$0xf]  ;;  %v15505_v4 = vld [vmem:[#allocation5 + $0x23c4] sm:$0xf0]  ;;  %v14135_v57 = vor.u32 %v15473_v2, %v14134_v53 }
 0x25f   : > { %8388 = vmatpush.bf16.msra.mxu3 %v13983_v1  ;;  %v16285_v1 = vpack.c.b16 %v1602_v36, %v1602_v36  ;;  %v14270_v36 = vld [vmem:[#allocation5 + $0x23d0] sm:$0xf]  ;;  %v14182_v53 = vld [vmem:[#allocation5 + $0x2320] sm:$0xf] }
 0x260   : > { %8350 = vmatpush.bf16.msra.mxu0 %v13783_v51  ;;  %16557 = vst [vmem:[#allocation53_spill] sm:$0xff] %v16281_v56  ;;  %v14279_v51 = vor.u32 %v15509_v32, %v14278_v14  ;;  %v14271_v55 = vor.u32 %v15507_v61, %v14270_v36  ;;  %v14062_v32 = vld [vmem:[#allocation5 + $0x2230] sm:$0xf]  ;;  %v14054_v61 = vld [vmem:[#allocation5 + $0x2220] sm:$0xf] }
 0x261   : > { %8363 = vmatpush.bf16.msra.mxu1 %v13847_v27  ;;  %16559 = vst [vmem:[#allocation55_spill] sm:$0xff] %v16285_v1  ;;  %v14143_v27 = vor.u32 %v15475_v50, %v14142_v47  ;;  %v8157_v15 = vpop.f32.mrf.mxu1  ;;  %v14190_v47 = vld [vmem:[#allocation5 + $0x2330] sm:$0xf] }
 0x262   : > { %8376 = vmatpush.bf16.msra.mxu2 %v13911_v62  ;;  %v14070_v62 = vld [vmem:[#allocation5 + $0x2240] sm:$0xf]  ;;  %v14254_v50 = vld [vmem:[#allocation5 + $0x23b0] sm:$0xf] }
 0x263   : > { %8389 = vmatpush.bf16.msra.mxu3 %v13975_v6  ;;  %8351 = vmatmul.bf16.vlgmr.msra.gmra.mxu0 %v16279_v54  ;;  %v14198_v6 = vld [vmem:[#allocation5 + $0x2340] sm:$0xf]  ;;  %v14071_v26 = vor.u32 %v15457_v34, %v14070_v62  ;;  %v15469_v34 = vld [vmem:[#allocation5 + $0x22a4] sm:$0xf0] }
 0x264   : > { %8395 = vmatpush.bf16.msrb.mxu0 %v14095_v43  ;;  %8364 = vmatmul.bf16.vlgmr.msra.gmra.mxu1 %v16283_v59  ;;  %v15489_v43 = vld [vmem:[#allocation5 + $0x2344] sm:$0xf0] }
 0x265   : > { %8408 = vmatpush.bf16.msrb.mxu1 %v14159_v48  ;;  %8377 = vmatmul.bf16.vlgmr.msra.gmra.mxu2 %v16281_v56  ;;  %v14079_v48 = vor.u32 %v15459_v0, %v14078_v3  ;;  %v14199_v14 = vor.u32 %v15489_v43, %v14198_v6  ;;  %v15471_v0 = vld [vmem:[#allocation5 + $0x22b4] sm:$0xf0]  ;;  %v14246_v43 = vld [vmem:[#allocation5 + $0x23a0] sm:$0xf] }
 0x266   : > { %8421 = vmatpush.bf16.msrb.mxu2 %v14223_v40  ;;  %8390 = vmatmul.bf16.vlgmr.msra.gmra.mxu3 %v16285_v1  ;;  %v8144_v40 = vpop.f32.mrf.mxu0 }
 0x267   : > { %8434 = vmatpush.bf16.msrb.mxu3 %v14287_v9  ;;  %v14207_v9 = vor.u32 %v15491_v24, %v14206_v52  ;;  %v8145_v21 = vadd.f32 %v8144_v40, %v16275_v58  ;;  %v15503_v52 = vld [vmem:[#allocation5 + $0x23b4] sm:$0xf0]  ;;  %v15501_v40 = vld [vmem:[#allocation5 + $0x23a4] sm:$0xf0] }
 0x268   : > { %8396 = vmatpush.bf16.msrb.mxu0 %v14087_v60  ;;  %v15455_v60 = vld [vmem:[#allocation5 + $0x2234] sm:$0xf0]  ;;  %v8170_v62 = vpop.f32.mrf.mxu2 }
 0x269   : > { %8409 = vmatpush.bf16.msrb.mxu1 %v14151_v63  ;;  %v14126_v63 = vld [vmem:[#allocation5 + $0x22b0] sm:$0xf]  ;;  %v8158_v3 = vadd.f32 %v8157_v15, %v8145_v21  ;;  %v14063_v24 = vor.u32 %v15455_v60, %v14062_v32  ;;  %v8183_v6 = vpop.f32.mrf.mxu3  ;;  %v8159_v21 = vpop.f32.mrf.mxu1  ;;  %v15451_v32 = vld [vmem:[#allocation5 + $0x2214] sm:$0xf0] }
 0x26a   : > { %8422 = vmatpush.bf16.msrb.mxu2 %v14215_v39  ;;  %v14263_v39 = vor.u32 %v15505_v4, %v14262_v8  ;;  %v14127_v58 = vor.u32 %v15471_v0, %v14126_v63  ;;  %v14110_v60 = vld [vmem:[#allocation5 + $0x2290] sm:$0xf]  ;;  %v14247_v63 = vor.u32 %v15501_v40, %v14246_v43  ;;  %v15483_v0 = vld [vmem:[#allocation5 + $0x2314] sm:$0xf0]  ;;  %v14374_v43 = vld [vmem:[#allocation5 + $0x74] sm:$0xf] }
 0x26b   : > { %8435 = vmatpush.bf16.msrb.mxu3 %v14279_v51  ;;  %v15487_v51 = vld [vmem:[#allocation5 + $0x2334] sm:$0xf0]  ;;  %v8171_v2 = vadd.f32 %v8170_v62, %v8158_v3  ;;  %v14174_v3 = vld [vmem:[#allocation5 + $0x2310] sm:$0xf]  ;;  %v9744_v40 = vld [vmem:[#allocation5 + $0x78] sm:$0xf0] }
 0x26c   : > { %8397 = vmatpush.bf16.msrb.mxu0 %v14079_v48  ;;  %v14191_v36 = vor.u32 %v15487_v51, %v14190_v47  ;;  %v15453_v48 = vld [vmem:[#allocation5 + $0x2224] sm:$0xf0]  ;;  %v14238_v47 = vld [vmem:[#allocation5 + $0x2390] sm:$0xf]  ;;  %v15499_v51 = vld [vmem:[#allocation5 + $0x2394] sm:$0xf0] }
 0x26d   : > { %8410 = vmatpush.bf16.msrb.mxu1 %v14143_v27  ;;  %v14118_v27 = vld [vmem:[#allocation5 + $0x22a0] sm:$0xf]  ;;  %v14055_v4 = vor.u32 %v15453_v48, %v14054_v61  ;;  %v14175_v48 = vor.u32 %v15483_v0, %v14174_v3  ;;  %v339_v62 = vld [vmem:[%s16004_s23 + $0x110] sm:$0xff]  ;;  %v9936_v3 = vld [vmem:[#allocation5 + $0x1f8] sm:$0xf0] }
 0x26e   : > { %8423 = vmatpush.bf16.msrb.mxu2 %v14207_v9  ;;  %v14255_v9 = vor.u32 %v15503_v52, %v14254_v50  ;;  %v8146_v8 = vpop.f32.mrf.mxu0  ;;  %v14119_v15 = vor.u32 %v15469_v34, %v14118_v27  ;;  %v14038_v50 = vld [vmem:[#allocation5 + $0x2200] sm:$0xf]  ;;  %v14239_v34 = vor.u32 %v15499_v51, %v14238_v47  ;;  %v1604_v47 = vunpack.c.h.b16 %v339_v62 }
 0x26f   : > { %8436 = vmatpush.bf16.msrb.mxu3 %v14271_v55  ;;  %v15485_v55 = vld [vmem:[#allocation5 + $0x2324] sm:$0xf0]  ;;  %v14166_v27 = vld [vmem:[#allocation5 + $0x2300] sm:$0xf]  ;;  %v14390_v8 = vld [vmem:[#allocation5 + $0xf4] sm:$0xf] }
 0x270   : > { %8398 = vmatpush.bf16.msrb.mxu0 %v14071_v26  ;;  %v16292_v26 = vadd.f32 %v8183_v6, %v8171_v2  ;;  %v340_v2 = vld [vmem:[%s16004_s23 + $0x118] sm:$0xff]  ;;  %v8172_v6 = vpop.f32.mrf.mxu2 }
 0x271   : > { %8411 = vmatpush.bf16.msrb.mxu1 %v14135_v57  ;;  %v14183_v57 = vor.u32 %v15485_v55, %v14182_v53  ;;  %v14230_v53 = vld [vmem:[#allocation5 + $0x2380] sm:$0xf]  ;;  %v15497_v55 = vld [vmem:[#allocation5 + $0x2384] sm:$0xf0]  ;;  %v1605_v0 = vunpack.c.l.b16 %v340_v2  ;;  %v9747_v6 = vor.u32 %v14374_v43, %v9744_v40  ;;  %v1606_v1 = vunpack.c.h.b16 %v340_v2  ;;  %v14370_v43 = vld [vmem:[#allocation5 + $0x54] sm:$0xf] }
 0x272   : > { %8424 = vmatpush.bf16.msrb.mxu2 %v14199_v14  ;;  %v14046_v14 = vld [vmem:[#allocation5 + $0x2210] sm:$0xf]  ;;  %v14231_v51 = vor.u32 %v15497_v55, %v14230_v53  ;;  %v9728_v40 = vld [vmem:[#allocation5 + $0x58] sm:$0xf0] }
 0x273   : > { %8437 = vmatpush.bf16.msrb.mxu3 %v14263_v39  ;;  %v15467_v39 = vld [vmem:[#allocation5 + $0x2294] sm:$0xf0]  ;;  %v14047_v52 = vor.u32 %v15451_v32, %v14046_v14  ;;  %v9808_v14 = vld [vmem:[#allocation5 + $0xf8] sm:$0xf0]  ;;  %v1603_v32 = vunpack.c.l.b16 %v339_v62  ;;  %v9928_v62 = vld [vmem:[#allocation5 + $0x1e8] sm:$0xf0] }
 0x274   : > { %8399 = vmatpush.bf16.msrb.mxu0 %v14063_v24  ;;  %v15449_v24 = vld [vmem:[#allocation5 + $0x2204] sm:$0xf0]  ;;  %v14111_v61 = vor.u32 %v15467_v39, %v14110_v60  ;;  %v9811_v59 = vor.u32 %v14390_v8, %v9808_v14  ;;  %v14386_v8 = vld [vmem:[#allocation5 + $0xd4] sm:$0xf]  ;;  %v9792_v14 = vld [vmem:[#allocation5 + $0xd8] sm:$0xf0] }
 0x275   : > { %8412 = vmatpush.bf16.msrb.mxu1 %v14127_v58  ;;  %v14102_v58 = vld [vmem:[#allocation5 + $0x2280] sm:$0xf]  ;;  %v14039_v21 = vor.u32 %v15449_v24, %v14038_v50  ;;  %v9736_v50 = vld [vmem:[#allocation5 + $0x68] sm:$0xf0]  ;;  %v14388_v24 = vld [vmem:[#allocation5 + $0xe4] sm:$0xf]  ;;  %v16296_v54 = vpack.c.b16 %v1603_v32, %v1603_v32 }
 0x276   : > { %8425 = vmatpush.bf16.msrb.mxu2 %v14191_v36  ;;  %v15465_v36 = vld [vmem:[#allocation5 + $0x2284] sm:$0xf0]  ;;  %v9920_v32 = vld [vmem:[#allocation5 + $0x1d8] sm:$0xf0] }
 0x277   : > { %8438 = vmatpush.bf16.msrb.mxu3 %v14255_v9  ;;  %v15481_v9 = vld [vmem:[#allocation5 + $0x2304] sm:$0xf0]  ;;  %v14103_v60 = vor.u32 %v15465_v36, %v14102_v58  ;;  %v14404_v58 = vld [vmem:[#allocation5 + $0x164] sm:$0xf]  ;;  %v9864_v36 = vld [vmem:[#allocation5 + $0x168] sm:$0xf0] }
 0x278   : > { %8400 = vmatpush.bf16.msrb.mxu0 %v14055_v4  ;;  %v8185_v4 = vpop.f32.mrf.mxu3  ;;  %v14167_v39 = vor.u32 %v15481_v9, %v14166_v27  ;;  %v16300_v27 = vpack.c.b16 %v1604_v47, %v1604_v47  ;;  %v14420_v9 = vld [vmem:[#allocation5 + $0x1e4] sm:$0xf]  ;;  %v9867_v2 = vor.u32 %v14404_v58, %v9864_v36  ;;  %v9784_v47 = vld [vmem:[#allocation5 + $0xc8] sm:$0xf0] }
 0x279   : > { %8413 = vmatpush.bf16.msrb.mxu1 %v14119_v15  ;;  %v14406_v15 = vld [vmem:[#allocation5 + $0x174] sm:$0xf] }
 0x27a   : > { %8426 = vmatpush.bf16.msrb.mxu2 %v14183_v57  ;;  %v9872_v57 = vld [vmem:[#allocation5 + $0x178] sm:$0xf0] }
 0x27b   : > { %8439 = vmatpush.bf16.msrb.mxu3 %v14247_v63  ;;  %v14422_v63 = vld [vmem:[#allocation5 + $0x1f4] sm:$0xf]  ;;  %v9875_v4 = vor.u32 %v14406_v15, %v9872_v57  ;;  %v9856_v57 = vld [vmem:[#allocation5 + $0x158] sm:$0xf0] }
 0x27c   : > { %8401 = vmatpush.bf16.msrb.mxu0 %v14047_v52  ;;  %v14372_v52 = vld [vmem:[#allocation5 + $0x64] sm:$0xf]  ;;  %v9939_v56 = vor.u32 %v14422_v63, %v9936_v3  ;;  %v14402_v15 = vld [vmem:[#allocation5 + $0x154] sm:$0xf]  ;;  %v9720_v63 = vld [vmem:[#allocation5 + $0x48] sm:$0xf0] }
 0x27d   : > { %8414 = vmatpush.bf16.msrb.mxu1 %v14111_v61  ;;  %v9800_v61 = vld [vmem:[#allocation5 + $0xe8] sm:$0xf0]  ;;  %v9739_v53 = vor.u32 %v14372_v52, %v9736_v50  ;;  %v14384_v3 = vld [vmem:[#allocation5 + $0xc4] sm:$0xf] }
 0x27e   : > { %8427 = vmatpush.bf16.msrb.mxu2 %v14175_v48  ;;  %v16298_v48 = vpack.c.b16 %v1605_v0, %v1605_v0  ;;  %v9803_v55 = vor.u32 %v14388_v24, %v9800_v61  ;;  %v14416_v52 = vld [vmem:[#allocation5 + $0x1c4] sm:$0xf]  ;;  %v9912_v50 = vld [vmem:[#allocation5 + $0x1c8] sm:$0xf0]  ;;  %v9787_v36 = vor.u32 %v14384_v3, %v9784_v47 }
 0x27f   : > { %8440 = vmatpush.bf16.msrb.mxu3 %v14239_v34  ;;  %v16302_v34 = vpack.c.b16 %v1606_v1, %v1606_v1  ;;  %v14418_v1 = vld [vmem:[#allocation5 + $0x1d4] sm:$0xf]  ;;  %v14396_v3 = vld [vmem:[#allocation5 + $0x124] sm:$0xf] }
 0x280   : > { %8402 = vmatpush.bf16.msrb.mxu0 %v14039_v21  ;;  %v9931_v21 = vor.u32 %v14420_v9, %v9928_v62  ;;  %v9923_v0 = vor.u32 %v14418_v1, %v9920_v32  ;;  %v14366_v62 = vld [vmem:[#allocation5 + $0x34] sm:$0xf]  ;;  %v14364_v32 = vld [vmem:[#allocation5 + $0x24] sm:$0xf] }
 0x281   : > { %8415 = vmatpush.bf16.msrb.mxu1 %v14103_v60  ;;  %v9795_v60 = vor.u32 %v14386_v8, %v9792_v14  ;;  %v8209_v58 = vpop.f32.mrf.mxu1  ;;  %v14398_v8 = vld [vmem:[#allocation5 + $0x134] sm:$0xf] }
 0x282   : > { %8428 = vmatpush.bf16.msrb.mxu2 %v14167_v39  ;;  %v14368_v39 = vld [vmem:[#allocation5 + $0x44] sm:$0xf]  ;;  %v14414_v14 = vld [vmem:[#allocation5 + $0x1b4] sm:$0xf] }
 0x283   : > { %8441 = vmatpush.bf16.msrb.mxu3 %v14231_v51  ;;  %8403 = vmatmul.bf16.vlgmr.msrb.gmra.mxu0 %v16296_v54  ;;  %v14400_v51 = vld [vmem:[#allocation5 + $0x144] sm:$0xf]  ;;  %v9723_v61 = vor.u32 %v14368_v39, %v9720_v63  ;;  %v9768_v63 = vld [vmem:[#allocation5 + $0xa8] sm:$0xf0] }
 0x284   : > { %8447 = vmatpush.bf16.msra.mxu0 %v9747_v6  ;;  %8416 = vmatmul.bf16.vlgmr.msrb.gmra.mxu1 %v16300_v27  ;;  %v9848_v6 = vld [vmem:[#allocation5 + $0x148] sm:$0xf0] }
 0x285   : > { %8460 = vmatpush.bf16.msra.mxu1 %v9811_v59  ;;  %8429 = vmatmul.bf16.vlgmr.msrb.gmra.mxu2 %v16298_v48  ;;  %v9731_v59 = vor.u32 %v14370_v43, %v9728_v40  ;;  %v9851_v9 = vor.u32 %v14400_v51, %v9848_v6  ;;  %v9776_v40 = vld [vmem:[#allocation5 + $0xb8] sm:$0xf0]  ;;  %v14412_v6 = vld [vmem:[#allocation5 + $0x1a4] sm:$0xf] }
 0x286   : > { %8473 = vmatpush.bf16.msra.mxu2 %v9875_v4  ;;  %8442 = vmatmul.bf16.vlgmr.msrb.gmra.mxu3 %v16302_v34  ;;  %v8196_v4 = vpop.f32.mrf.mxu0 }
 0x287   : > { %8486 = vmatpush.bf16.msra.mxu3 %v9939_v56  ;;  %v9859_v56 = vor.u32 %v14402_v15, %v9856_v57  ;;  %v8197_v24 = vadd.f32 %v8196_v4, %v16292_v26  ;;  %v9904_v15 = vld [vmem:[#allocation5 + $0x1b8] sm:$0xf0]  ;;  %v9896_v4 = vld [vmem:[#allocation5 + $0x1a8] sm:$0xf0] }
 0x288   : > { %8448 = vmatpush.bf16.msra.mxu0 %v9739_v53  ;;  %v9712_v53 = vld [vmem:[#allocation5 + $0x38] sm:$0xf0]  ;;  %v8222_v39 = vpop.f32.mrf.mxu2 }
 0x289   : > { %8461 = vmatpush.bf16.msra.mxu1 %v9803_v55  ;;  %v14382_v55 = vld [vmem:[#allocation5 + $0xb4] sm:$0xf]  ;;  %v8210_v43 = vadd.f32 %v8209_v58, %v8197_v24  ;;  %v9715_v57 = vor.u32 %v14366_v62, %v9712_v53  ;;  %v8235_v51 = vpop.f32.mrf.mxu3  ;;  %v8211_v24 = vpop.f32.mrf.mxu1  ;;  %v9696_v62 = vld [vmem:[#allocation5 + $0x18] sm:$0xf0] }
 0x28a   : > { %8474 = vmatpush.bf16.msra.mxu2 %v9867_v2  ;;  %v9915_v2 = vor.u32 %v14416_v52, %v9912_v50  ;;  %v9779_v26 = vor.u32 %v14382_v55, %v9776_v40  ;;  %v14378_v53 = vld [vmem:[#allocation5 + $0x94] sm:$0xf]  ;;  %v9899_v55 = vor.u32 %v14412_v6, %v9896_v4  ;;  %v9824_v40 = vld [vmem:[#allocation5 + $0x118] sm:$0xf0] }
 0x28b   : > { %8487 = vmatpush.bf16.msra.mxu3 %v9931_v21  ;;  %v9840_v21 = vld [vmem:[#allocation5 + $0x138] sm:$0xf0]  ;;  %v8223_v47 = vadd.f32 %v8222_v39, %v8210_v43  ;;  %v14394_v43 = vld [vmem:[#allocation5 + $0x114] sm:$0xf] }
 0x28c   : > { %8449 = vmatpush.bf16.msra.mxu0 %v9731_v59  ;;  %v9843_v1 = vor.u32 %v14398_v8, %v9840_v21  ;;  %v9704_v59 = vld [vmem:[#allocation5 + $0x28] sm:$0xf0]  ;;  %v14410_v8 = vld [vmem:[#allocation5 + $0x194] sm:$0xf]  ;;  %v9888_v21 = vld [vmem:[#allocation5 + $0x198] sm:$0xf0] }
 0x28d   : > { %8462 = vmatpush.bf16.msra.mxu1 %v9795_v60  ;;  %v14380_v60 = vld [vmem:[#allocation5 + $0xa4] sm:$0xf]  ;;  %v9707_v50 = vor.u32 %v14364_v32, %v9704_v59  ;;  %v9752_v59 = vld [vmem:[#allocation5 + $0x88] sm:$0xf0]  ;;  %v9891_v39 = vor.u32 %v14410_v8, %v9888_v21  ;;  %v14454_v6 = vld [vmem:[#allocation5 + $0x2f4] sm:$0xf] }
 0x28e   : > { %8475 = vmatpush.bf16.msra.mxu2 %v9859_v56  ;;  %v9907_v56 = vor.u32 %v14414_v14, %v9904_v15  ;;  %v8198_v52 = vpop.f32.mrf.mxu0  ;;  %v9771_v58 = vor.u32 %v14380_v60, %v9768_v63  ;;  %v14360_v15 = vld [vmem:[#allocation5 + $0x4] sm:$0xf]  ;;  %v14470_v24 = vld [vmem:[#allocation5 + $0x374] sm:$0xf]  ;;  %v9992_v21 = vld [vmem:[#allocation5 + $0x268] sm:$0xf0] }
 0x28f   : > { %8488 = vmatpush.bf16.msra.mxu3 %v9923_v0  ;;  %v9832_v0 = vld [vmem:[#allocation5 + $0x128] sm:$0xf0]  ;;  %v14376_v32 = vld [vmem:[#allocation5 + $0x84] sm:$0xf] }
 0x290   : > { %8450 = vmatpush.bf16.msra.mxu0 %v9723_v61  ;;  %v16309_v61 = vadd.f32 %v8235_v51, %v8223_v47  ;;  %v14392_v60 = vld [vmem:[#allocation5 + $0x104] sm:$0xf]  ;;  %v14438_v47 = vld [vmem:[#allocation5 + $0x274] sm:$0xf]  ;;  %v10000_v51 = vld [vmem:[#allocation5 + $0x278] sm:$0xf0] }
 0x291   : > { %8463 = vmatpush.bf16.msra.mxu1 %v9787_v36  ;;  %v9835_v36 = vor.u32 %v14396_v3, %v9832_v0  ;;  %v14408_v63 = vld [vmem:[#allocation5 + $0x184] sm:$0xf]  ;;  %v9880_v3 = vld [vmem:[#allocation5 + $0x188] sm:$0xf0]  ;;  %v8224_v0 = vpop.f32.mrf.mxu2  ;;  %v8237_v4 = vpop.f32.mrf.mxu3 }
 0x292   : > { %8476 = vmatpush.bf16.msra.mxu2 %v9851_v9  ;;  %v14362_v9 = vld [vmem:[#allocation5 + $0x14] sm:$0xf]  ;;  %v14436_v8 = vld [vmem:[#allocation5 + $0x264] sm:$0xf]  ;;  %v10120_v4 = vld [vmem:[#allocation5 + $0x368] sm:$0xf0] }
 0x293   : > { %8489 = vmatpush.bf16.msra.mxu3 %v9915_v2  ;;  %v9760_v2 = vld [vmem:[#allocation5 + $0x98] sm:$0xf0]  ;;  %v9699_v14 = vor.u32 %v14362_v9, %v9696_v62  ;;  %v14486_v62 = vld [vmem:[#allocation5 + $0x3f4] sm:$0xf]  ;;  %v14452_v0 = vld [vmem:[#allocation5 + $0x2e4] sm:$0xf] }
 0x294   : > { %8451 = vmatpush.bf16.msra.mxu0 %v9715_v57  ;;  %v9688_v57 = vld [vmem:[#allocation5 + $0x8] sm:$0xf0] }
 0x295   : > { %8464 = vmatpush.bf16.msra.mxu1 %v9779_v26  ;;  %v9763_v26 = vor.u32 %v14378_v53, %v9760_v2  ;;  %v9691_v52 = vor.u32 %v14360_v15, %v9688_v57  ;;  %v10192_v53 = vld [vmem:[#allocation5 + $0x3f8] sm:$0xf0]  ;;  %v10003_v2 = vor.u32 %v14438_v47, %v10000_v51  ;;  %v10056_v15 = vld [vmem:[#allocation5 + $0x2e8] sm:$0xf0]  ;;  %v14468_v57 = vld [vmem:[#allocation5 + $0x364] sm:$0xf] }
 0x296   : > { %8477 = vmatpush.bf16.msra.mxu2 %v9843_v1  ;;  %v9827_v1 = vor.u32 %v14394_v43, %v9824_v40  ;;  %v10048_v47 = vld [vmem:[#allocation5 + $0x2d8] sm:$0xf0]  ;;  %v14466_v51 = vld [vmem:[#allocation5 + $0x354] sm:$0xf] }
 0x297   : > { %8490 = vmatpush.bf16.msra.mxu3 %v9907_v56  ;;  %v9816_v56 = vld [vmem:[#allocation5 + $0x108] sm:$0xf0] }
 0x298   : > { %8452 = vmatpush.bf16.msra.mxu0 %v9707_v50  ;;  %v10064_v50 = vld [vmem:[#allocation5 + $0x2f8] sm:$0xf0]  ;;  %v9819_v9 = vor.u32 %v14392_v60, %v9816_v56  ;;  %v10123_v60 = vor.u32 %v14468_v57, %v10120_v4  ;;  %v14446_v4 = vld [vmem:[#allocation5 + $0x2b4] sm:$0xf] }
 0x299   : > { %8465 = vmatpush.bf16.msra.mxu1 %v9771_v58  ;;  %v10128_v58 = vld [vmem:[#allocation5 + $0x378] sm:$0xf0]  ;;  %v10067_v43 = vor.u32 %v14454_v6, %v10064_v50 }
 0x29a   : > { %8478 = vmatpush.bf16.msra.mxu2 %v9835_v36  ;;  %v9755_v36 = vor.u32 %v14376_v32, %v9752_v59  ;;  %v10131_v40 = vor.u32 %v14470_v24, %v10128_v58  ;;  %v9995_v32 = vor.u32 %v14436_v8, %v9992_v21  ;;  %v10059_v59 = vor.u32 %v14452_v0, %v10056_v15  ;;  %v9984_v56 = vld [vmem:[#allocation5 + $0x258] sm:$0xf0]  ;;  %v10168_v8 = vld [vmem:[#allocation5 + $0x3c8] sm:$0xf0]  ;;  %v14430_v15 = vld [vmem:[#allocation5 + $0x234] sm:$0xf] }
 0x29b   : > { %8491 = vmatpush.bf16.msra.mxu3 %v9899_v55  ;;  %v9883_v55 = vor.u32 %v14408_v63, %v9880_v3  ;;  %v14450_v63 = vld [vmem:[#allocation5 + $0x2d4] sm:$0xf]  ;;  %v10112_v6 = vld [vmem:[#allocation5 + $0x358] sm:$0xf0] }
 0x29c   : > { %8453 = vmatpush.bf16.msra.mxu0 %v9699_v14  ;;  %v10195_v14 = vor.u32 %v14486_v62, %v10192_v53  ;;  %v10176_v50 = vld [vmem:[#allocation5 + $0x3d8] sm:$0xf0]  ;;  %v10051_v58 = vor.u32 %v14450_v63, %v10048_v47  ;;  %v9976_v62 = vld [vmem:[#allocation5 + $0x248] sm:$0xf0]  ;;  %v14448_v53 = vld [vmem:[#allocation5 + $0x2c4] sm:$0xf] }
 0x29d   : > { %8466 = vmatpush.bf16.msra.mxu1 %v9763_v26  ;;  %v14484_v26 = vld [vmem:[#allocation5 + $0x3e4] sm:$0xf]  ;;  %v9968_v57 = vld [vmem:[#allocation5 + $0x238] sm:$0xf0] }
 0x29e   : > { %8479 = vmatpush.bf16.msra.mxu2 %v9827_v1  ;;  %v10184_v1 = vld [vmem:[#allocation5 + $0x3e8] sm:$0xf0]  ;;  %v9971_v63 = vor.u32 %v14430_v15, %v9968_v57  ;;  %v14428_v47 = vld [vmem:[#allocation5 + $0x224] sm:$0xf]  ;;  %v14458_v15 = vld [vmem:[#allocation5 + $0x314] sm:$0xf] }
 0x29f   : > { %8492 = vmatpush.bf16.msra.mxu3 %v9891_v39  ;;  %v14434_v39 = vld [vmem:[#allocation5 + $0x254] sm:$0xf]  ;;  %v10187_v3 = vor.u32 %v14484_v26, %v10184_v1  ;;  %v10080_v57 = vld [vmem:[#allocation5 + $0x318] sm:$0xf0] }
 0x2a0   : > { %8454 = vmatpush.bf16.msra.mxu0 %v9691_v52  ;;  %v14482_v52 = vld [vmem:[#allocation5 + $0x3d4] sm:$0xf]  ;;  %v9987_v24 = vor.u32 %v14434_v39, %v9984_v56  ;;  %v10160_v56 = vld [vmem:[#allocation5 + $0x3b8] sm:$0xf0] }
 0x2a1   : > { %8467 = vmatpush.bf16.msra.mxu1 %v9755_v36  ;;  %v10115_v36 = vor.u32 %v14466_v51, %v10112_v6  ;;  %v14478_v39 = vld [vmem:[#allocation5 + $0x3b4] sm:$0xf]  ;;  %v9960_v51 = vld [vmem:[#allocation5 + $0x228] sm:$0xf0]  ;;  %v14444_v6 = vld [vmem:[#allocation5 + $0x2a4] sm:$0xf] }
 0x2a2   : > { %8480 = vmatpush.bf16.msra.mxu2 %v9819_v9  ;;  %v14432_v9 = vld [vmem:[#allocation5 + $0x244] sm:$0xf] }
 0x2a3   : > { %8493 = vmatpush.bf16.msra.mxu3 %v9883_v55  ;;  %8455 = vmatmul.bf16.vlgmr.msra.gmra.mxu0 %v16022_v19  ;;  %v10179_v55 = vor.u32 %v14482_v52, %v10176_v50  ;;  %v14480_v19 = vld [vmem:[#allocation5 + $0x3c4] sm:$0xf]  ;;  %v9979_v21 = vor.u32 %v14432_v9, %v9976_v62  ;;  %v10163_v52 = vor.u32 %v14478_v39, %v10160_v56 }
 0x2a4   : > { %8499 = vmatpush.bf16.msrb.mxu0 %v10003_v2  ;;  %8468 = vmatmul.bf16.vlgmr.msra.gmra.mxu1 %v16026_v22  ;;  %v14464_v2 = vld [vmem:[#allocation5 + $0x344] sm:$0xf]  ;;  %v8261_v22 = vpop.f32.mrf.mxu1  ;;  %v10171_v26 = vor.u32 %v14480_v19, %v10168_v8  ;;  %v10083_v39 = vor.u32 %v14458_v15, %v10080_v57 }
 0x2a5   : > { %8512 = vmatpush.bf16.msrb.mxu1 %v10067_v43  ;;  %8481 = vmatmul.bf16.vlgmr.msra.gmra.mxu2 %v16020_v18  ;;  %v10040_v18 = vld [vmem:[#allocation5 + $0x2c8] sm:$0xf0]  ;;  %v14440_v56 = vld [vmem:[#allocation5 + $0x284] sm:$0xf] }
 0x2a6   : > { %8525 = vmatpush.bf16.msrb.mxu2 %v10131_v40  ;;  %8494 = vmatmul.bf16.vlgmr.msra.gmra.mxu3 %v16024_v20  ;;  %v10104_v43 = vld [vmem:[#allocation5 + $0x348] sm:$0xf0]  ;;  %v8248_v40 = vpop.f32.mrf.mxu0  ;;  %v10043_v0 = vor.u32 %v14448_v53, %v10040_v18  ;;  %v14476_v53 = vld [vmem:[#allocation5 + $0x3a4] sm:$0xf] }
 0x2a7   : > { %8538 = vmatpush.bf16.msrb.mxu3 %v10195_v14  ;;  %v8249_v20 = vadd.f32 %v8248_v40, %v16309_v61  ;;  %v10107_v14 = vor.u32 %v14464_v2, %v10104_v43  ;;  %v9963_v2 = vor.u32 %v14428_v47, %v9960_v51  ;;  %v10072_v47 = vld [vmem:[#allocation5 + $0x308] sm:$0xf0]  ;;  %v14472_v51 = vld [vmem:[#allocation5 + $0x384] sm:$0xf] }
 0x2a8   : > { %8500 = vmatpush.bf16.msrb.mxu0 %v9995_v32  ;;  %v10032_v32 = vld [vmem:[#allocation5 + $0x2b8] sm:$0xf0]  ;;  %v8274_v50 = vpop.f32.mrf.mxu2  ;;  %v14516_v15 = vld [vmem:[#allocation5 + $0x4e4] sm:$0xf] }
 0x2a9   : > { %8513 = vmatpush.bf16.msrb.mxu1 %v10059_v59  ;;  %v8262_v1 = vadd.f32 %v8261_v22, %v8249_v20  ;;  %v14462_v59 = vld [vmem:[#allocation5 + $0x334] sm:$0xf]  ;;  %v10035_v61 = vor.u32 %v14446_v4, %v10032_v32  ;;  %v8287_v62 = vpop.f32.mrf.mxu3  ;;  %v14424_v32 = vld [vmem:[#allocation5 + $0x204] sm:$0xf] }
 0x2aa   : > { %8526 = vmatpush.bf16.msrb.mxu2 %v10123_v60  ;;  %v10096_v60 = vld [vmem:[#allocation5 + $0x338] sm:$0xf0]  ;;  %v14426_v20 = vld [vmem:[#allocation5 + $0x214] sm:$0xf] }
 0x2ab   : > { %8539 = vmatpush.bf16.msrb.mxu3 %v10187_v3  ;;  %v10099_v3 = vor.u32 %v14462_v59, %v10096_v60  ;;  %v8275_v9 = vadd.f32 %v8274_v50, %v8262_v1  ;;  %v14442_v22 = vld [vmem:[#allocation5 + $0x294] sm:$0xf]  ;;  %v9944_v59 = vld [vmem:[#allocation5 + $0x208] sm:$0xf0] }
 0x2ac   : > { %8501 = vmatpush.bf16.msrb.mxu0 %v9987_v24  ;;  %v10024_v24 = vld [vmem:[#allocation5 + $0x2a8] sm:$0xf0]  ;;  %v8263_v43 = vpop.f32.mrf.mxu1  ;;  %v14474_v4 = vld [vmem:[#allocation5 + $0x394] sm:$0xf] }
 0x2ad   : > { %8514 = vmatpush.bf16.msrb.mxu1 %v10051_v58  ;;  %v14460_v58 = vld [vmem:[#allocation5 + $0x324] sm:$0xf]  ;;  %v16316_v40 = vadd.f32 %v8287_v62, %v8275_v9  ;;  %v10027_v19 = vor.u32 %v14444_v6, %v10024_v24  ;;  %v10136_v6 = vld [vmem:[#allocation5 + $0x388] sm:$0xf0]  ;;  %v14502_v50 = vld [vmem:[#allocation5 + $0x474] sm:$0xf]  ;;  %v9947_v9 = vor.u32 %v14424_v32, %v9944_v59 }
 0x2ae   : > { %8527 = vmatpush.bf16.msrb.mxu2 %v10115_v36  ;;  %v10088_v36 = vld [vmem:[#allocation5 + $0x328] sm:$0xf0]  ;;  %v8250_v18 = vpop.f32.mrf.mxu0  ;;  %v10256_v24 = vld [vmem:[#allocation5 + $0x478] sm:$0xf0]  ;;  %v14550_v43 = vld [vmem:[#allocation5 + $0x5f4] sm:$0xf] }
 0x2af   : > { %8540 = vmatpush.bf16.msrb.mxu3 %v10179_v55  ;;  %v10152_v55 = vld [vmem:[#allocation5 + $0x3a8] sm:$0xf0]  ;;  %v10091_v8 = vor.u32 %v14460_v58, %v10088_v36  ;;  %v14518_v58 = vld [vmem:[#allocation5 + $0x4f4] sm:$0xf]  ;;  %v10320_v62 = vld [vmem:[#allocation5 + $0x4f8] sm:$0xf0] }
 0x2b0   : > { %8502 = vmatpush.bf16.msrb.mxu0 %v9979_v21  ;;  %v9952_v21 = vld [vmem:[#allocation5 + $0x218] sm:$0xf0]  ;;  %v14548_v32 = vld [vmem:[#allocation5 + $0x5e4] sm:$0xf]  ;;  %v10440_v59 = vld [vmem:[#allocation5 + $0x5e8] sm:$0xf0] }
 0x2b1   : > { %8515 = vmatpush.bf16.msrb.mxu1 %v10043_v0  ;;  %v10155_v0 = vor.u32 %v14476_v53, %v10152_v55  ;;  %v9955_v1 = vor.u32 %v14426_v20, %v9952_v21  ;;  %v8289_v36 = vpop.f32.mrf.mxu3  ;;  %v14534_v53 = vld [vmem:[#allocation5 + $0x574] sm:$0xf]  ;;  %v10384_v55 = vld [vmem:[#allocation5 + $0x578] sm:$0xf0]  ;;  %v10259_v20 = vor.u32 %v14502_v50, %v10256_v24  ;;  %v10323_v21 = vor.u32 %v14518_v58, %v10320_v62  ;;  %v14496_v62 = vld [vmem:[#allocation5 + $0x444] sm:$0xf] }
 0x2b2   : > { %8528 = vmatpush.bf16.msrb.mxu2 %v10107_v14  ;;  %v10016_v14 = vld [vmem:[#allocation5 + $0x298] sm:$0xf0]  ;;  %v14546_v50 = vld [vmem:[#allocation5 + $0x5d4] sm:$0xf] }
 0x2b3   : > { %8541 = vmatpush.bf16.msrb.mxu3 %v10171_v26  ;;  %v10144_v26 = vld [vmem:[#allocation5 + $0x398] sm:$0xf0]  ;;  %v10019_v60 = vor.u32 %v14442_v22, %v10016_v14  ;;  %v10387_v22 = vor.u32 %v14534_v53, %v10384_v55  ;;  %v10248_v14 = vld [vmem:[#allocation5 + $0x468] sm:$0xf0] }
 0x2b4   : > { %8503 = vmatpush.bf16.msrb.mxu0 %v9971_v63  ;;  %v10008_v63 = vld [vmem:[#allocation5 + $0x288] sm:$0xf0]  ;;  %v10432_v24 = vld [vmem:[#allocation5 + $0x5d8] sm:$0xf0] }
 0x2b5   : > { %8516 = vmatpush.bf16.msrb.mxu1 %v10035_v61  ;;  %v14456_v61 = vld [vmem:[#allocation5 + $0x304] sm:$0xf]  ;;  %v10011_v18 = vor.u32 %v14440_v56, %v10008_v63  ;;  %v14498_v63 = vld [vmem:[#allocation5 + $0x454] sm:$0xf]  ;;  %v10232_v53 = vld [vmem:[#allocation5 + $0x448] sm:$0xf0]  ;;  %v10435_v55 = vor.u32 %v14546_v50, %v10432_v24 }
 0x2b6   : > { %8529 = vmatpush.bf16.msrb.mxu2 %v10099_v3  ;;  %v10147_v3 = vor.u32 %v14474_v4, %v10144_v26  ;;  %v10312_v4 = vld [vmem:[#allocation5 + $0x4e8] sm:$0xf0]  ;;  %v14532_v26 = vld [vmem:[#allocation5 + $0x564] sm:$0xf] }
 0x2b7   : > { %8542 = vmatpush.bf16.msrb.mxu3 %v10163_v52  ;;  %v8276_v52 = vpop.f32.mrf.mxu2  ;;  %v10344_v50 = vld [vmem:[#allocation5 + $0x528] sm:$0xf0] }
 0x2b8   : > { %8504 = vmatpush.bf16.msrb.mxu0 %v9963_v2  ;;  %v10075_v2 = vor.u32 %v14456_v61, %v10072_v47  ;;  %v10240_v61 = vld [vmem:[#allocation5 + $0x458] sm:$0xf0]  ;;  %v10443_v47 = vor.u32 %v14548_v32, %v10440_v59  ;;  %v14542_v59 = vld [vmem:[#allocation5 + $0x5b4] sm:$0xf] }
 0x2b9   : > { %8517 = vmatpush.bf16.msrb.mxu1 %v10027_v19  ;;  %v10448_v19 = vld [vmem:[#allocation5 + $0x5f8] sm:$0xf0]  ;;  %v10243_v58 = vor.u32 %v14498_v63, %v10240_v61  ;;  %v14492_v63 = vld [vmem:[#allocation5 + $0x424] sm:$0xf]  ;;  %v10216_v61 = vld [vmem:[#allocation5 + $0x428] sm:$0xf0] }
 0x2ba   : > { %8530 = vmatpush.bf16.msrb.mxu2 %v10091_v8  ;;  %v10139_v8 = vor.u32 %v14472_v51, %v10136_v6  ;;  %v10451_v57 = vor.u32 %v14550_v43, %v10448_v19  ;;  %v10304_v51 = vld [vmem:[#allocation5 + $0x4d8] sm:$0xf0]  ;;  %v14530_v6 = vld [vmem:[#allocation5 + $0x554] sm:$0xf]  ;;  %v10360_v43 = vld [vmem:[#allocation5 + $0x548] sm:$0xf0] }
 0x2bb   : > { %8543 = vmatpush.bf16.msrb.mxu3 %v10155_v0  ;;  %v14500_v0 = vld [vmem:[#allocation5 + $0x464] sm:$0xf]  ;;  %v10368_v52 = vld [vmem:[#allocation5 + $0x558] sm:$0xf0] }
 0x2bc   : > { %8505 = vmatpush.bf16.msrb.mxu0 %v9955_v1  ;;  %v10376_v1 = vld [vmem:[#allocation5 + $0x568] sm:$0xf0]  ;;  %v10352_v32 = vld [vmem:[#allocation5 + $0x538] sm:$0xf0] }
 0x2bd   : > { %8518 = vmatpush.bf16.msrb.mxu1 %v10019_v60  ;;  %v10251_v60 = vor.u32 %v14500_v0, %v10248_v14  ;;  %v10379_v56 = vor.u32 %v14532_v26, %v10376_v1  ;;  %v14494_v0 = vld [vmem:[#allocation5 + $0x434] sm:$0xf]  ;;  %v10224_v14 = vld [vmem:[#allocation5 + $0x438] sm:$0xf0] }
 0x2be   : > { %8531 = vmatpush.bf16.msrb.mxu2 %v10083_v39  ;;  %v10315_v39 = vor.u32 %v14516_v15, %v10312_v4  ;;  %v14510_v15 = vld [vmem:[#allocation5 + $0x4b4] sm:$0xf]  ;;  %v10288_v26 = vld [vmem:[#allocation5 + $0x4b8] sm:$0xf0] }
 0x2bf   : > { %8544 = vmatpush.bf16.msrb.mxu3 %v10147_v3  ;;  %v14514_v3 = vld [vmem:[#allocation5 + $0x4d4] sm:$0xf] }
 0x2c0   : > { %8506 = vmatpush.bf16.msrb.mxu0 %v9947_v9  ;;  %v10307_v36 = vor.u32 %v14514_v3, %v10304_v51  ;;  %v10371_v9 = vor.u32 %v14530_v6, %v10368_v52  ;;  %v8300_v19 = vpop.f32.mrf.mxu0  ;;  %v14526_v1 = vld [vmem:[#allocation5 + $0x534] sm:$0xf]  ;;  %v14508_v3 = vld [vmem:[#allocation5 + $0x4a4] sm:$0xf]  ;;  %v10280_v6 = vld [vmem:[#allocation5 + $0x4a8] sm:$0xf0] }
 0x2c1   : > { %8519 = vmatpush.bf16.msrb.mxu1 %v10011_v18  ;;  %v10296_v18 = vld [vmem:[#allocation5 + $0x4c8] sm:$0xf0]  ;;  %v14524_v52 = vld [vmem:[#allocation5 + $0x524] sm:$0xf] }
 0x2c2   : > { %8532 = vmatpush.bf16.msrb.mxu2 %v10075_v2  ;;  %v14528_v2 = vld [vmem:[#allocation5 + $0x544] sm:$0xf] }
 0x2c3   : > { %8545 = vmatpush.bf16.msrb.mxu3 %v10139_v8  ;;  %8507 = vmatmul.bf16.vlgmr.msrb.gmra.mxu0 %v16036_v41  ;;  %v14544_v41 = vld [vmem:[#allocation5 + $0x5c4] sm:$0xf]  ;;  %v10424_v8 = vld [vmem:[#allocation5 + $0x5c8] sm:$0xf0] }
 0x2c4   : > { %8551 = vmatpush.bf16.msra.mxu0 %v10259_v20  ;;  %8520 = vmatmul.bf16.vlgmr.msrb.gmra.mxu1 %v16040_v44  ;;  %v10235_v20 = vor.u32 %v14496_v62, %v10232_v53  ;;  %v8313_v44 = vpop.f32.mrf.mxu1  ;;  %v10219_v53 = vor.u32 %v14492_v63, %v10216_v61  ;;  %v14566_v63 = vld [vmem:[#allocation5 + $0x674] sm:$0xf]  ;;  %v10512_v61 = vld [vmem:[#allocation5 + $0x678] sm:$0xf0] }
 0x2c5   : > { %8564 = vmatpush.bf16.msra.mxu1 %v10323_v21  ;;  %8533 = vmatmul.bf16.vlgmr.msrb.gmra.mxu2 %v16034_v38  ;;  %v14512_v38 = vld [vmem:[#allocation5 + $0x4c4] sm:$0xf] }
 0x2c6   : > { %8577 = vmatpush.bf16.msra.mxu2 %v10387_v22  ;;  %8546 = vmatmul.bf16.vlgmr.msrb.gmra.mxu3 %v16038_v42  ;;  %v8301_v42 = vadd.f32 %v8300_v19, %v16316_v40  ;;  %v10299_v21 = vor.u32 %v14512_v38, %v10296_v18  ;;  %v10363_v22 = vor.u32 %v14528_v2, %v10360_v43  ;;  %v14490_v43 = vld [vmem:[#allocation5 + $0x414] sm:$0xf]  ;;  %v10208_v19 = vld [vmem:[#allocation5 + $0x418] sm:$0xf0] }
 0x2c7   : > { %8590 = vmatpush.bf16.msra.mxu3 %v10451_v57  ;;  %v10427_v57 = vor.u32 %v14544_v41, %v10424_v8  ;;  %v10291_v40 = vor.u32 %v14510_v15, %v10288_v26  ;;  %v10283_v18 = vor.u32 %v14508_v3, %v10280_v6  ;;  %v10347_v2 = vor.u32 %v14524_v52, %v10344_v50  ;;  %v14506_v41 = vld [vmem:[#allocation5 + $0x494] sm:$0xf]  ;;  %v10200_v15 = vld [vmem:[#allocation5 + $0x408] sm:$0xf0]  ;;  %v14504_v26 = vld [vmem:[#allocation5 + $0x484] sm:$0xf] }
 0x2c8   : > { %8552 = vmatpush.bf16.msra.mxu0 %v10251_v60  ;;  %v8314_v4 = vadd.f32 %v8313_v44, %v8301_v42  ;;  %v10416_v60 = vld [vmem:[#allocation5 + $0x5b8] sm:$0xf0]  ;;  %v8326_v51 = vpop.f32.mrf.mxu2  ;;  %v8302_v62 = vpop.f32.mrf.mxu0  ;;  %v14582_v3 = vld [vmem:[#allocation5 + $0x6f4] sm:$0xf] }
 0x2c9   : > { %8565 = vmatpush.bf16.msra.mxu1 %v10315_v39  ;;  %v10227_v39 = vor.u32 %v14494_v0, %v10224_v14  ;;  %v10272_v42 = vld [vmem:[#allocation5 + $0x498] sm:$0xf0]  ;;  %v10211_v0 = vor.u32 %v14490_v43, %v10208_v19  ;;  %v14488_v14 = vld [vmem:[#allocation5 + $0x404] sm:$0xf]  ;;  %v14598_v52 = vld [vmem:[#allocation5 + $0x774] sm:$0xf] }
 0x2ca   : > { %8578 = vmatpush.bf16.msra.mxu2 %v10379_v56  ;;  %v10355_v56 = vor.u32 %v14526_v1, %v10352_v32  ;;  %v8327_v24 = vadd.f32 %v8326_v51, %v8314_v4  ;;  %v10336_v44 = vld [vmem:[#allocation5 + $0x518] sm:$0xf0]  ;;  %v10264_v1 = vld [vmem:[#allocation5 + $0x488] sm:$0xf0]  ;;  %v14520_v32 = vld [vmem:[#allocation5 + $0x504] sm:$0xf]  ;;  %v10203_v51 = vor.u32 %v14488_v14, %v10200_v15 }
 0x2cb   : > { %8591 = vmatpush.bf16.msra.mxu3 %v10443_v47  ;;  %v10419_v47 = vor.u32 %v14542_v59, %v10416_v60  ;;  %v10328_v60 = vld [vmem:[#allocation5 + $0x508] sm:$0xf0]  ;;  %v10576_v6 = vld [vmem:[#allocation5 + $0x6f8] sm:$0xf0]  ;;  %v14580_v19 = vld [vmem:[#allocation5 + $0x6e4] sm:$0xf] }
 0x2cc   : > { %8553 = vmatpush.bf16.msra.mxu0 %v10243_v58  ;;  %v8339_v58 = vpop.f32.mrf.mxu3  ;;  %v8315_v38 = vpop.f32.mrf.mxu1  ;;  %v10640_v50 = vld [vmem:[#allocation5 + $0x778] sm:$0xf0]  ;;  %v10504_v43 = vld [vmem:[#allocation5 + $0x668] sm:$0xf0]  ;;  %v14562_v15 = vld [vmem:[#allocation5 + $0x654] sm:$0xf] }
 0x2cd   : > { %8566 = vmatpush.bf16.msra.mxu1 %v10307_v36  ;;  %v14540_v36 = vld [vmem:[#allocation5 + $0x5a4] sm:$0xf]  ;;  %v10579_v38 = vor.u32 %v14582_v3, %v10576_v6 }
 0x2ce   : > { %8579 = vmatpush.bf16.msra.mxu2 %v10371_v9  ;;  %v10408_v9 = vld [vmem:[#allocation5 + $0x5a8] sm:$0xf0]  ;;  %v14576_v3 = vld [vmem:[#allocation5 + $0x6c4] sm:$0xf] }
 0x2cf   : > { %8592 = vmatpush.bf16.msra.mxu3 %v10435_v55  ;;  %v16323_v55 = vadd.f32 %v8339_v58, %v8327_v24  ;;  %v10411_v8 = vor.u32 %v14540_v36, %v10408_v9  ;;  %v10267_v24 = vor.u32 %v14504_v26, %v10264_v1  ;;  %v10331_v58 = vor.u32 %v14520_v32, %v10328_v60  ;;  %v14614_v36 = vld [vmem:[#allocation5 + $0x7f4] sm:$0xf]  ;;  %v10704_v9 = vld [vmem:[#allocation5 + $0x7f8] sm:$0xf0]  ;;  %v14592_v6 = vld [vmem:[#allocation5 + $0x744] sm:$0xf] }
 0x2d0   : > { %8554 = vmatpush.bf16.msra.mxu0 %v10235_v20  ;;  %v14522_v20 = vld [vmem:[#allocation5 + $0x514] sm:$0xf]  ;;  %v10560_v1 = vld [vmem:[#allocation5 + $0x6d8] sm:$0xf0] }
 0x2d1   : > { %8567 = vmatpush.bf16.msra.mxu1 %v10299_v21  ;;  %v14538_v21 = vld [vmem:[#allocation5 + $0x594] sm:$0xf]  ;;  %v10339_v4 = vor.u32 %v14522_v20, %v10336_v44  ;;  %v10632_v20 = vld [vmem:[#allocation5 + $0x768] sm:$0xf0]  ;;  %v14612_v44 = vld [vmem:[#allocation5 + $0x7e4] sm:$0xf] }
 0x2d2   : > { %8580 = vmatpush.bf16.msra.mxu2 %v10363_v22  ;;  %v10400_v22 = vld [vmem:[#allocation5 + $0x598] sm:$0xf0]  ;;  %v14594_v32 = vld [vmem:[#allocation5 + $0x754] sm:$0xf] }
 0x2d3   : > { %8593 = vmatpush.bf16.msra.mxu3 %v10427_v57  ;;  %v10275_v57 = vor.u32 %v14506_v41, %v10272_v42  ;;  %v10403_v59 = vor.u32 %v14538_v21, %v10400_v22  ;;  %v10707_v41 = vor.u32 %v14614_v36, %v10704_v9  ;;  %v14596_v42 = vld [vmem:[#allocation5 + $0x764] sm:$0xf]  ;;  %v10696_v21 = vld [vmem:[#allocation5 + $0x7e8] sm:$0xf0]  ;;  %v14610_v60 = vld [vmem:[#allocation5 + $0x7d4] sm:$0xf] }
 0x2d4   : > { %8555 = vmatpush.bf16.msra.mxu0 %v10227_v39  ;;  %v14536_v39 = vld [vmem:[#allocation5 + $0x584] sm:$0xf]  ;;  %v10635_v14 = vor.u32 %v14596_v42, %v10632_v20  ;;  %v10699_v26 = vor.u32 %v14612_v44, %v10696_v21  ;;  %v10672_v42 = vld [vmem:[#allocation5 + $0x7b8] sm:$0xf0] }
 0x2d5   : > { %8568 = vmatpush.bf16.msra.mxu1 %v10291_v40  ;;  %v10392_v40 = vld [vmem:[#allocation5 + $0x588] sm:$0xf0]  ;;  %v14556_v21 = vld [vmem:[#allocation5 + $0x624] sm:$0xf] }
 0x2d6   : > { %8581 = vmatpush.bf16.msra.mxu2 %v10355_v56  ;;  %v8328_v56 = vpop.f32.mrf.mxu2  ;;  %v10395_v62 = vor.u32 %v14536_v39, %v10392_v40  ;;  %v10688_v39 = vld [vmem:[#allocation5 + $0x7d8] sm:$0xf0] }
 0x2d7   : > { %8594 = vmatpush.bf16.msra.mxu3 %v10419_v47  ;;  %v8341_v47 = vpop.f32.mrf.mxu3 }
 0x2d8   : > { %8556 = vmatpush.bf16.msra.mxu0 %v10219_v53  ;;  %v10515_v53 = vor.u32 %v14566_v63, %v10512_v61  ;;  %v14560_v61 = vld [vmem:[#allocation5 + $0x644] sm:$0xf]  ;;  %v10691_v47 = vor.u32 %v14610_v60, %v10688_v39  ;;  %v10664_v60 = vld [vmem:[#allocation5 + $0x7a8] sm:$0xf0] }
 0x2d9   : > { %8569 = vmatpush.bf16.msra.mxu1 %v10283_v18  ;;  %v10643_v18 = vor.u32 %v14598_v52, %v10640_v50  ;;  %v10680_v50 = vld [vmem:[#allocation5 + $0x7c8] sm:$0xf0] }
 0x2da   : > { %8582 = vmatpush.bf16.msra.mxu2 %v10347_v2  ;;  %v14564_v2 = vld [vmem:[#allocation5 + $0x664] sm:$0xf] }
 0x2db   : > { %8595 = vmatpush.bf16.msra.mxu3 %v10411_v8  ;;  %v10568_v8 = vld [vmem:[#allocation5 + $0x6e8] sm:$0xf0]  ;;  %v10507_v22 = vor.u32 %v14564_v2, %v10504_v43  ;;  %v10544_v43 = vld [vmem:[#allocation5 + $0x6b8] sm:$0xf0] }
 0x2dc   : > { %8557 = vmatpush.bf16.msra.mxu0 %v10211_v0  ;;  %v10571_v0 = vor.u32 %v14580_v19, %v10568_v8  ;;  %v14590_v19 = vld [vmem:[#allocation5 + $0x734] sm:$0xf] }
 0x2dd   : > { %8570 = vmatpush.bf16.msra.mxu1 %v10275_v57  ;;  %v10496_v57 = vld [vmem:[#allocation5 + $0x658] sm:$0xf0]  ;;  %v14606_v8 = vld [vmem:[#allocation5 + $0x7b4] sm:$0xf] }
 0x2de   : > { %8583 = vmatpush.bf16.msra.mxu2 %v10339_v4  ;;  %v14578_v4 = vld [vmem:[#allocation5 + $0x6d4] sm:$0xf]  ;;  %v10499_v40 = vor.u32 %v14562_v15, %v10496_v57  ;;  %v10536_v57 = vld [vmem:[#allocation5 + $0x6a8] sm:$0xf0] }
 0x2df   : > { %8596 = vmatpush.bf16.msra.mxu3 %v10403_v59  ;;  %v10624_v59 = vld [vmem:[#allocation5 + $0x758] sm:$0xf0]  ;;  %v10563_v56 = vor.u32 %v14578_v4, %v10560_v1  ;;  %v14588_v4 = vld [vmem:[#allocation5 + $0x724] sm:$0xf] }
 0x2e0   : > { %8558 = vmatpush.bf16.msra.mxu0 %v10203_v51  ;;  %v10627_v63 = vor.u32 %v14594_v32, %v10624_v59  ;;  %v10552_v51 = vld [vmem:[#allocation5 + $0x6c8] sm:$0xf0]  ;;  %v8352_v52 = vpop.f32.mrf.mxu0  ;;  %v14604_v59 = vld [vmem:[#allocation5 + $0x7a4] sm:$0xf] }
 0x2e1   : > { %8571 = vmatpush.bf16.msra.mxu1 %v10267_v24  ;;  %v10555_v36 = vor.u32 %v14576_v3, %v10552_v51  ;;  %v14554_v3 = vld [vmem:[#allocation5 + $0x614] sm:$0xf] }
 0x2e2   : > { %8584 = vmatpush.bf16.msra.mxu2 %v10331_v58  ;;  %v8365_v58 = vpop.f32.mrf.mxu1  ;;  %v14570_v51 = vld [vmem:[#allocation5 + $0x694] sm:$0xf] }
 0x2e3   : > { %8597 = vmatpush.bf16.msra.mxu3 %v10395_v62  ;;  %8559 = vmatmul.bf16.vlgmr.msra.gmra.mxu0 %v16048_v25  ;;  %v10488_v25 = vld [vmem:[#allocation5 + $0x648] sm:$0xf0]  ;;  %v14558_v62 = vld [vmem:[#allocation5 + $0x634] sm:$0xf] }
 0x2e4   : > { %8603 = vmatpush.bf16.msrb.mxu0 %v10515_v53  ;;  %8572 = vmatmul.bf16.vlgmr.msra.gmra.mxu1 %v16052_v30  ;;  %v14608_v30 = vld [vmem:[#allocation5 + $0x7c4] sm:$0xf]  ;;  %v10491_v24 = vor.u32 %v14560_v61, %v10488_v25  ;;  %v10480_v53 = vld [vmem:[#allocation5 + $0x638] sm:$0xf0] }
 0x2e5   : > { %8616 = vmatpush.bf16.msrb.mxu1 %v10579_v38  ;;  %8585 = vmatmul.bf16.vlgmr.msra.gmra.mxu2 %v16050_v29  ;;  %v10616_v29 = vld [vmem:[#allocation5 + $0x748] sm:$0xf0]  ;;  %v14574_v38 = vld [vmem:[#allocation5 + $0x6b4] sm:$0xf]  ;;  %v10483_v20 = vor.u32 %v14558_v62, %v10480_v53  ;;  %v14568_v53 = vld [vmem:[#allocation5 + $0x684] sm:$0xf] }
 0x2e6   : > { %8629 = vmatpush.bf16.msrb.mxu2 %v10643_v18  ;;  %8598 = vmatmul.bf16.vlgmr.msra.gmra.mxu3 %v16054_v33  ;;  %v8353_v33 = vadd.f32 %v8352_v52, %v16323_v55  ;;  %v10619_v9 = vor.u32 %v14592_v6, %v10616_v29  ;;  %v10683_v18 = vor.u32 %v14608_v30, %v10680_v50  ;;  %v10528_v29 = vld [vmem:[#allocation5 + $0x698] sm:$0xf0]  ;;  %v14586_v52 = vld [vmem:[#allocation5 + $0x714] sm:$0xf] }
 0x2e7   : > { %8642 = vmatpush.bf16.msrb.mxu3 %v10707_v41  ;;  %v10608_v41 = vld [vmem:[#allocation5 + $0x738] sm:$0xf0]  ;;  %v10547_v55 = vor.u32 %v14574_v38, %v10544_v43  ;;  %v10667_v6 = vor.u32 %v14604_v59, %v10664_v60  ;;  %v14602_v50 = vld [vmem:[#allocation5 + $0x794] sm:$0xf]  ;;  %v10520_v38 = vld [vmem:[#allocation5 + $0x688] sm:$0xf0] }
 0x2e8   : > { %8604 = vmatpush.bf16.msrb.mxu0 %v10507_v22  ;;  %v8366_v2 = vadd.f32 %v8365_v58, %v8353_v33  ;;  %v10611_v44 = vor.u32 %v14590_v19, %v10608_v41  ;;  %v10472_v22 = vld [vmem:[#allocation5 + $0x628] sm:$0xf0]  ;;  %v8378_v15 = vpop.f32.mrf.mxu2  ;;  %v8354_v39 = vpop.f32.mrf.mxu0  ;;  %v10592_v30 = vld [vmem:[#allocation5 + $0x718] sm:$0xf0]  ;;  %v14552_v58 = vld [vmem:[#allocation5 + $0x604] sm:$0xf] }
 0x2e9   : > { %8617 = vmatpush.bf16.msrb.mxu1 %v10571_v0  ;;  %v14572_v0 = vld [vmem:[#allocation5 + $0x6a4] sm:$0xf]  ;;  %v8391_v32 = vpop.f32.mrf.mxu3  ;;  %v10656_v33 = vld [vmem:[#allocation5 + $0x798] sm:$0xf0]  ;;  %v10595_v62 = vor.u32 %v14586_v52, %v10592_v30  ;;  %v10584_v43 = vld [vmem:[#allocation5 + $0x708] sm:$0xf0] }
 0x2ea   : > { %8630 = vmatpush.bf16.msrb.mxu2 %v10635_v14  ;;  %v10675_v14 = vor.u32 %v14606_v8, %v10672_v42  ;;  %v8379_v1 = vadd.f32 %v8378_v15, %v8366_v2  ;;  %v10539_v61 = vor.u32 %v14572_v0, %v10536_v57  ;;  %v10659_v2 = vor.u32 %v14602_v50, %v10656_v33  ;;  %v14600_v19 = vld [vmem:[#allocation5 + $0x784] sm:$0xf]  ;;  %v10648_v41 = vld [vmem:[#allocation5 + $0x788] sm:$0xf0]  ;;  %v14630_v42 = vld [vmem:[#allocation5 + $0x874] sm:$0xf] }
 0x2eb   : > { %8643 = vmatpush.bf16.msrb.mxu3 %v10699_v26  ;;  %v10600_v26 = vld [vmem:[#allocation5 + $0x728] sm:$0xf0]  ;;  %v14662_v0 = vld [vmem:[#allocation5 + $0x974] sm:$0xf]  ;;  %v10523_v15 = vor.u32 %v14568_v53, %v10520_v38  ;;  %v14628_v39 = vld [vmem:[#allocation5 + $0x864] sm:$0xf] }
 0x2ec   : > { %8605 = vmatpush.bf16.msrb.mxu0 %v10499_v40  ;;  %v10475_v40 = vor.u32 %v14556_v21, %v10472_v22  ;;  %v10603_v25 = vor.u32 %v14588_v4, %v10600_v26  ;;  %v10832_v22 = vld [vmem:[#allocation5 + $0x8f8] sm:$0xf0]  ;;  %v14678_v4 = vld [vmem:[#allocation5 + $0x9f4] sm:$0xf] }
 0x2ed   : > { %8618 = vmatpush.bf16.msrb.mxu1 %v10563_v56  ;;  %v8367_v56 = vpop.f32.mrf.mxu1  ;;  %v10960_v26 = vld [vmem:[#allocation5 + $0x9f8] sm:$0xf0]  ;;  %v14626_v50 = vld [vmem:[#allocation5 + $0x854] sm:$0xf] }
 0x2ee   : > { %8631 = vmatpush.bf16.msrb.mxu2 %v10627_v63  ;;  %v16330_v63 = vadd.f32 %v8391_v32, %v8379_v1  ;;  %v10651_v1 = vor.u32 %v14600_v19, %v10648_v41  ;;  %v14644_v56 = vld [vmem:[#allocation5 + $0x8e4] sm:$0xf]  ;;  %v10752_v33 = vld [vmem:[#allocation5 + $0x858] sm:$0xf0]  ;;  %v14674_v53 = vld [vmem:[#allocation5 + $0x9d4] sm:$0xf] }
 0x2ef   : > { %8644 = vmatpush.bf16.msrb.mxu3 %v10691_v47  ;;  %v10464_v47 = vld [vmem:[#allocation5 + $0x618] sm:$0xf0]  ;;  %v14624_v19 = vld [vmem:[#allocation5 + $0x844] sm:$0xf] }
 0x2f0   : > { %8606 = vmatpush.bf16.msrb.mxu0 %v10491_v24  ;;  %v10467_v24 = vor.u32 %v14554_v3, %v10464_v47  ;;  %v8380_v8 = vpop.f32.mrf.mxu2  ;;  %v14660_v3 = vld [vmem:[#allocation5 + $0x964] sm:$0xf]  ;;  %v10888_v47 = vld [vmem:[#allocation5 + $0x968] sm:$0xf0]  ;;  %v10944_v38 = vld [vmem:[#allocation5 + $0x9d8] sm:$0xf0] }
 0x2f1   : > { %8619 = vmatpush.bf16.msrb.mxu1 %v10555_v36  ;;  %v10456_v36 = vld [vmem:[#allocation5 + $0x608] sm:$0xf0]  ;;  %v10891_v30 = vor.u32 %v14660_v3, %v10888_v47  ;;  %v14640_v41 = vld [vmem:[#allocation5 + $0x8c4] sm:$0xf]  ;;  %v10947_v8 = vor.u32 %v14674_v53, %v10944_v38 }
 0x2f2   : > { %8632 = vmatpush.bf16.msrb.mxu2 %v10619_v9  ;;  %v10531_v9 = vor.u32 %v14570_v51, %v10528_v29  ;;  %v10459_v21 = vor.u32 %v14552_v58, %v10456_v36  ;;  %v14676_v51 = vld [vmem:[#allocation5 + $0x9e4] sm:$0xf]  ;;  %v10816_v36 = vld [vmem:[#allocation5 + $0x8d8] sm:$0xf0]  ;;  %v10728_v3 = vld [vmem:[#allocation5 + $0x828] sm:$0xf0] }
 0x2f3   : > { %8645 = vmatpush.bf16.msrb.mxu3 %v10683_v18  ;;  %v14584_v18 = vld [vmem:[#allocation5 + $0x704] sm:$0xf] }
 0x2f4   : > { %8607 = vmatpush.bf16.msrb.mxu0 %v10483_v20  ;;  %v10768_v20 = vld [vmem:[#allocation5 + $0x878] sm:$0xf0]  ;;  %v10587_v57 = vor.u32 %v14584_v18, %v10584_v43  ;;  %v10755_v18 = vor.u32 %v14626_v50, %v10752_v33  ;;  %v14636_v47 = vld [vmem:[#allocation5 + $0x8a4] sm:$0xf] }
 0x2f5   : > { %8620 = vmatpush.bf16.msrb.mxu1 %v10547_v55  ;;  %v14646_v55 = vld [vmem:[#allocation5 + $0x8f4] sm:$0xf]  ;;  %v10771_v32 = vor.u32 %v14630_v42, %v10768_v20  ;;  %v10808_v42 = vld [vmem:[#allocation5 + $0x8c8] sm:$0xf0]  ;;  %v14656_v20 = vld [vmem:[#allocation5 + $0x944] sm:$0xf] }
 0x2f6   : > { %8633 = vmatpush.bf16.msrb.mxu2 %v10611_v44  ;;  %v8393_v44 = vpop.f32.mrf.mxu3  ;;  %v10835_v59 = vor.u32 %v14646_v55, %v10832_v22 }
 0x2f7   : > { %8646 = vmatpush.bf16.msrb.mxu3 %v10675_v14  ;;  %v10896_v14 = vld [vmem:[#allocation5 + $0x978] sm:$0xf0]  ;;  %v10936_v44 = vld [vmem:[#allocation5 + $0x9c8] sm:$0xf0] }
 0x2f8   : > { %8608 = vmatpush.bf16.msrb.mxu0 %v10475_v40  ;;  %v10899_v60 = vor.u32 %v14662_v0, %v10896_v14  ;;  %v10760_v40 = vld [vmem:[#allocation5 + $0x868] sm:$0xf0]  ;;  %v10811_v0 = vor.u32 %v14640_v41, %v10808_v42  ;;  %v10784_v41 = vld [vmem:[#allocation5 + $0x898] sm:$0xf0] }
 0x2f9   : > { %8621 = vmatpush.bf16.msrb.mxu1 %v10539_v61  ;;  %v10963_v61 = vor.u32 %v14678_v4, %v10960_v26  ;;  %v10763_v29 = vor.u32 %v14628_v39, %v10760_v40  ;;  %v14638_v4 = vld [vmem:[#allocation5 + $0x8b4] sm:$0xf]  ;;  %v10928_v40 = vld [vmem:[#allocation5 + $0x9b8] sm:$0xf0] }
 0x2fa   : > { %8634 = vmatpush.bf16.msrb.mxu2 %v10603_v25  ;;  %v10824_v25 = vld [vmem:[#allocation5 + $0x8e8] sm:$0xf0]  ;;  %v14670_v39 = vld [vmem:[#allocation5 + $0x9b4] sm:$0xf]  ;;  %v10848_v42 = vld [vmem:[#allocation5 + $0x918] sm:$0xf0] }
 0x2fb   : > { %8647 = vmatpush.bf16.msrb.mxu3 %v10667_v6  ;;  %v10952_v6 = vld [vmem:[#allocation5 + $0x9e8] sm:$0xf0]  ;;  %v10827_v52 = vor.u32 %v14644_v56, %v10824_v25  ;;  %v14620_v25 = vld [vmem:[#allocation5 + $0x824] sm:$0xf] }
 0x2fc   : > { %8609 = vmatpush.bf16.msrb.mxu0 %v10467_v24  ;;  %v14642_v24 = vld [vmem:[#allocation5 + $0x8d4] sm:$0xf]  ;;  %v10955_v58 = vor.u32 %v14676_v51, %v10952_v6  ;;  %v10931_v51 = vor.u32 %v14670_v39, %v10928_v40 }
 0x2fd   : > { %8622 = vmatpush.bf16.msrb.mxu1 %v10531_v9  ;;  %v14658_v9 = vld [vmem:[#allocation5 + $0x954] sm:$0xf] }
 0x2fe   : > { %8635 = vmatpush.bf16.msrb.mxu2 %v10595_v62  ;;  %v10880_v62 = vld [vmem:[#allocation5 + $0x958] sm:$0xf0] }
 0x2ff   : > { %8648 = vmatpush.bf16.msrb.mxu3 %v10659_v2  ;;  %v10819_v2 = vor.u32 %v14642_v24, %v10816_v36  ;;  %v10883_v43 = vor.u32 %v14658_v9, %v10880_v62  ;;  %v14668_v24 = vld [vmem:[#allocation5 + $0x9a4] sm:$0xf]  ;;  %v10731_v9 = vor.u32 %v14620_v25, %v10728_v3 }
 0x300   : > { %8610 = vmatpush.bf16.msrb.mxu0 %v10459_v21  ;;  %v8404_v55 = vpop.f32.mrf.mxu0 }
 0x301   : > { %8623 = vmatpush.bf16.msrb.mxu1 %v10523_v15  ;;  %v8417_v22 = vpop.f32.mrf.mxu1  ;;  %v14622_v15 = vld [vmem:[#allocation5 + $0x834] sm:$0xf] }
 0x302   : > { %8636 = vmatpush.bf16.msrb.mxu2 %v10587_v57  ;;  %v10736_v57 = vld [vmem:[#allocation5 + $0x838] sm:$0xf0] }
 0x303   : > { %8649 = vmatpush.bf16.msrb.mxu3 %v10651_v1  ;;  %8611 = vmatmul.bf16.vlgmr.msrb.gmra.mxu0 %v16062_v23  ;;  %v10744_v23 = vld [vmem:[#allocation5 + $0x848] sm:$0xf0]  ;;  %v10739_v56 = vor.u32 %v14622_v15, %v10736_v57 }
 0x304   : > { %8655 = vmatpush.bf16.msra.mxu0 %v10771_v32  ;;  %8624 = vmatmul.bf16.vlgmr.msrb.gmra.mxu1 %v16066_v31  ;;  %v14672_v31 = vld [vmem:[#allocation5 + $0x9c4] sm:$0xf]  ;;  %v10747_v21 = vor.u32 %v14624_v19, %v10744_v23  ;;  %v10800_v32 = vld [vmem:[#allocation5 + $0x8b8] sm:$0xf0]  ;;  %v14634_v19 = vld [vmem:[#allocation5 + $0x894] sm:$0xf] }
 0x305   : > { %8668 = vmatpush.bf16.msra.mxu1 %v10835_v59  ;;  %8637 = vmatmul.bf16.vlgmr.msrb.gmra.mxu2 %v16064_v28  ;;  %v10872_v28 = vld [vmem:[#allocation5 + $0x948] sm:$0xf0]  ;;  %v10939_v26 = vor.u32 %v14672_v31, %v10936_v44  ;;  %v14654_v59 = vld [vmem:[#allocation5 + $0x934] sm:$0xf]  ;;  %v14616_v31 = vld [vmem:[#allocation5 + $0x804] sm:$0xf] }
 0x306   : > { %8681 = vmatpush.bf16.msra.mxu2 %v10899_v60  ;;  %8650 = vmatmul.bf16.vlgmr.msrb.gmra.mxu3 %v16068_v35  ;;  %v8405_v35 = vadd.f32 %v8404_v55, %v16330_v63  ;;  %v10875_v14 = vor.u32 %v14656_v20, %v10872_v28  ;;  %v10864_v60 = vld [vmem:[#allocation5 + $0x938] sm:$0xf0]  ;;  %v10803_v63 = vor.u32 %v14638_v4, %v10800_v32  ;;  %v14666_v20 = vld [vmem:[#allocation5 + $0x994] sm:$0xf]  ;;  %v10712_v44 = vld [vmem:[#allocation5 + $0x808] sm:$0xf0] }
 0x307   : > { %8694 = vmatpush.bf16.msra.mxu3 %v10963_v61  ;;  %v10867_v61 = vor.u32 %v14654_v59, %v10864_v60  ;;  %v10912_v28 = vld [vmem:[#allocation5 + $0x998] sm:$0xf0]  ;;  %v10840_v57 = vld [vmem:[#allocation5 + $0x908] sm:$0xf0]  ;;  %v14664_v4 = vld [vmem:[#allocation5 + $0x984] sm:$0xf]  ;;  %v10715_v40 = vor.u32 %v14616_v31, %v10712_v44 }
 0x308   : > { %8656 = vmatpush.bf16.msra.mxu0 %v10763_v29  ;;  %v8418_v1 = vadd.f32 %v8417_v22, %v8405_v35  ;;  %v8430_v6 = vpop.f32.mrf.mxu2  ;;  %v10792_v29 = vld [vmem:[#allocation5 + $0x8a8] sm:$0xf0]  ;;  %v8406_v36 = vpop.f32.mrf.mxu0  ;;  %v10787_v35 = vor.u32 %v14634_v19, %v10784_v41  ;;  %v14632_v22 = vld [vmem:[#allocation5 + $0x884] sm:$0xf]  ;;  %v10915_v15 = vor.u32 %v14666_v20, %v10912_v28  ;;  %v14694_v32 = vld [vmem:[#allocation5 + $0xa74] sm:$0xf] }
 0x309   : > { %8669 = vmatpush.bf16.msra.mxu1 %v10827_v52  ;;  %v14652_v52 = vld [vmem:[#allocation5 + $0x924] sm:$0xf]  ;;  %v8443_v33 = vpop.f32.mrf.mxu3  ;;  %v8419_v62 = vpop.f32.mrf.mxu1  ;;  %v10795_v38 = vor.u32 %v14636_v47, %v10792_v29  ;;  %v11024_v59 = vld [vmem:[#allocation5 + $0xa78] sm:$0xf0]  ;;  %v14710_v60 = vld [vmem:[#allocation5 + $0xaf4] sm:$0xf] }
 0x30a   : > { %8682 = vmatpush.bf16.msra.mxu2 %v10891_v30  ;;  %v10856_v30 = vld [vmem:[#allocation5 + $0x928] sm:$0xf0]  ;;  %v8431_v50 = vadd.f32 %v8430_v6, %v8418_v1  ;;  %v14742_v47 = vld [vmem:[#allocation5 + $0xbf4] sm:$0xf]  ;;  %v11027_v29 = vor.u32 %v14694_v32, %v11024_v59  ;;  %v11008_v41 = vld [vmem:[#allocation5 + $0xa58] sm:$0xf0] }
 0x30b   : > { %8695 = vmatpush.bf16.msra.mxu3 %v10955_v58  ;;  %v10920_v58 = vld [vmem:[#allocation5 + $0x9a8] sm:$0xf0]  ;;  %v11072_v20 = vld [vmem:[#allocation5 + $0xad8] sm:$0xf0]  ;;  %v14722_v28 = vld [vmem:[#allocation5 + $0xb54] sm:$0xf] }
 0x30c   : > { %8657 = vmatpush.bf16.msra.mxu0 %v10755_v18  ;;  %v16337_v53 = vadd.f32 %v8443_v33, %v8431_v50  ;;  %v10859_v18 = vor.u32 %v14652_v52, %v10856_v30  ;;  %v10923_v23 = vor.u32 %v14668_v24, %v10920_v58  ;;  %v14692_v50 = vld [vmem:[#allocation5 + $0xa64] sm:$0xf]  ;;  %v11016_v33 = vld [vmem:[#allocation5 + $0xa68] sm:$0xf0]  ;;  %v14738_v31 = vld [vmem:[#allocation5 + $0xbd4] sm:$0xf] }
 0x30d   : > { %8670 = vmatpush.bf16.msra.mxu1 %v10819_v2  ;;  %v14618_v2 = vld [vmem:[#allocation5 + $0x814] sm:$0xf]  ;;  %v14708_v24 = vld [vmem:[#allocation5 + $0xae4] sm:$0xf]  ;;  %v11080_v36 = vld [vmem:[#allocation5 + $0xae8] sm:$0xf0] }
 0x30e   : > { %8683 = vmatpush.bf16.msra.mxu2 %v10883_v43  ;;  %v10720_v43 = vld [vmem:[#allocation5 + $0x818] sm:$0xf0]  ;;  %v11144_v62 = vld [vmem:[#allocation5 + $0xb68] sm:$0xf0] }
 0x30f   : > { %8696 = vmatpush.bf16.msra.mxu3 %v10947_v8  ;;  %v14650_v8 = vld [vmem:[#allocation5 + $0x914] sm:$0xf]  ;;  %v10723_v55 = vor.u32 %v14618_v2, %v10720_v43  ;;  %v11019_v2 = vor.u32 %v14692_v50, %v11016_v33  ;;  %v11083_v43 = vor.u32 %v14708_v24, %v11080_v36  ;;  %v11200_v44 = vld [vmem:[#allocation5 + $0xbd8] sm:$0xf0]  ;;  %v11192_v32 = vld [vmem:[#allocation5 + $0xbc8] sm:$0xf0] }
 0x310   : > { %8658 = vmatpush.bf16.msra.mxu0 %v10747_v21  ;;  %v10851_v21 = vor.u32 %v14650_v8, %v10848_v42  ;;  %v8432_v1 = vpop.f32.mrf.mxu2  ;;  %v14706_v8 = vld [vmem:[#allocation5 + $0xad4] sm:$0xf]  ;;  %v10984_v36 = vld [vmem:[#allocation5 + $0xa28] sm:$0xf0] }
 0x311   : > { %8671 = vmatpush.bf16.msra.mxu1 %v10811_v0  ;;  %v10776_v0 = vld [vmem:[#allocation5 + $0x888] sm:$0xf0]  ;;  %v8445_v39 = vpop.f32.mrf.mxu3  ;;  %v14736_v1 = vld [vmem:[#allocation5 + $0xbc4] sm:$0xf] }
 0x312   : > { %8684 = vmatpush.bf16.msra.mxu2 %v10875_v14  ;;  %v14648_v14 = vld [vmem:[#allocation5 + $0x904] sm:$0xf]  ;;  %v10779_v25 = vor.u32 %v14632_v22, %v10776_v0  ;;  %v11075_v22 = vor.u32 %v14706_v8, %v11072_v20  ;;  %v11176_v8 = vld [vmem:[#allocation5 + $0xba8] sm:$0xf0] }
 0x313   : > { %8697 = vmatpush.bf16.msra.mxu3 %v10939_v26  ;;  %v10904_v26 = vld [vmem:[#allocation5 + $0x988] sm:$0xf0]  ;;  %v10843_v3 = vor.u32 %v14648_v14, %v10840_v57  ;;  %v14704_v14 = vld [vmem:[#allocation5 + $0xac4] sm:$0xf] }
 0x314   : > { %8659 = vmatpush.bf16.msra.mxu0 %v10739_v56  ;;  %v11088_v56 = vld [vmem:[#allocation5 + $0xaf8] sm:$0xf0]  ;;  %v10907_v6 = vor.u32 %v14664_v4, %v10904_v26  ;;  %v11203_v4 = vor.u32 %v14738_v31, %v11200_v44  ;;  %v14720_v26 = vld [vmem:[#allocation5 + $0xb44] sm:$0xf]  ;;  %v14682_v44 = vld [vmem:[#allocation5 + $0xa14] sm:$0xf] }
 0x315   : > { %8672 = vmatpush.bf16.msra.mxu1 %v10803_v63  ;;  %v14726_v63 = vld [vmem:[#allocation5 + $0xb74] sm:$0xf]  ;;  %v11091_v52 = vor.u32 %v14710_v60, %v11088_v56  ;;  %v10992_v56 = vld [vmem:[#allocation5 + $0xa38] sm:$0xf0] }
 0x316   : > { %8685 = vmatpush.bf16.msra.mxu2 %v10867_v61  ;;  %v11152_v61 = vld [vmem:[#allocation5 + $0xb78] sm:$0xf0] }
 0x317   : > { %8698 = vmatpush.bf16.msra.mxu3 %v10931_v51  ;;  %v11216_v51 = vld [vmem:[#allocation5 + $0xbf8] sm:$0xf0]  ;;  %v11155_v30 = vor.u32 %v14726_v63, %v11152_v61  ;;  %v14702_v63 = vld [vmem:[#allocation5 + $0xab4] sm:$0xf] }
 0x318   : > { %8660 = vmatpush.bf16.msra.mxu0 %v10731_v9  ;;  %v11219_v58 = vor.u32 %v14742_v47, %v11216_v51  ;;  %v14724_v9 = vld [vmem:[#allocation5 + $0xb64] sm:$0xf]  ;;  %v11056_v47 = vld [vmem:[#allocation5 + $0xab8] sm:$0xf0]  ;;  %v14718_v51 = vld [vmem:[#allocation5 + $0xb34] sm:$0xf] }
 0x319   : > { %8673 = vmatpush.bf16.msra.mxu1 %v10795_v38  ;;  %v14740_v38 = vld [vmem:[#allocation5 + $0xbe4] sm:$0xf]  ;;  %v11147_v19 = vor.u32 %v14724_v9, %v11144_v62  ;;  %v11059_v33 = vor.u32 %v14702_v63, %v11056_v47  ;;  %v11280_v47 = vld [vmem:[#allocation5 + $0xc78] sm:$0xf0] }
 0x31a   : > { %8686 = vmatpush.bf16.msra.mxu2 %v10859_v18  ;;  %v11208_v18 = vld [vmem:[#allocation5 + $0xbe8] sm:$0xf0]  ;;  %v14700_v9 = vld [vmem:[#allocation5 + $0xaa4] sm:$0xf] }
 0x31b   : > { %8699 = vmatpush.bf16.msra.mxu3 %v10923_v23  ;;  %v14690_v23 = vld [vmem:[#allocation5 + $0xa54] sm:$0xf]  ;;  %v11211_v42 = vor.u32 %v14740_v38, %v11208_v18  ;;  %v11048_v18 = vld [vmem:[#allocation5 + $0xaa8] sm:$0xf0]  ;;  %v14728_v63 = vld [vmem:[#allocation5 + $0xb84] sm:$0xf] }
 0x31c   : > { %8661 = vmatpush.bf16.msra.mxu0 %v10723_v55  ;;  %v11136_v55 = vld [vmem:[#allocation5 + $0xb58] sm:$0xf0] }
 0x31d   : > { %8674 = vmatpush.bf16.msra.mxu1 %v10787_v35  ;;  %v11011_v35 = vor.u32 %v14690_v23, %v11008_v41  ;;  %v11139_v0 = vor.u32 %v14722_v28, %v11136_v55  ;;  %v14732_v41 = vld [vmem:[#allocation5 + $0xba4] sm:$0xf]  ;;  %v11051_v55 = vor.u32 %v14700_v9, %v11048_v18 }
 0x31e   : > { %8687 = vmatpush.bf16.msra.mxu2 %v10851_v21  ;;  %v14688_v21 = vld [vmem:[#allocation5 + $0xa44] sm:$0xf] }
 0x31f   : > { %8700 = vmatpush.bf16.msra.mxu3 %v10915_v15  ;;  %v15623_v15 = vld [vmem:[#allocation7] sm:$0x3]  ;;  %v14756_v18 = vld [vmem:[#allocation5 + $0xc64] sm:$0xf] }
 0x320   : > { %8662 = vmatpush.bf16.msra.mxu0 %v10715_v40  ;;  %v1496_v57 = vperm.slane %v15623_v15, 1  ;;  %v8456_v59 = vpop.f32.mrf.mxu0  ;;  %v14686_v40 = vld [vmem:[#allocation5 + $0xa34] sm:$0xf]  ;;  %v11104_v15 = vld [vmem:[#allocation5 + $0xb18] sm:$0xf0] }
 0x321   : > { %8675 = vmatpush.bf16.msra.mxu1 %v10779_v25  ;;  %v8469_v25 = vpop.f32.mrf.mxu1  ;;  %v10995_v50 = vor.u32 %v14686_v40, %v10992_v56  ;;  %v11096_v56 = vld [vmem:[#allocation5 + $0xb08] sm:$0xf0] }
 0x322   : > { %8688 = vmatpush.bf16.msra.mxu2 %v10843_v3  ;;  %v8457_v61 = vadd.f32 %v8456_v59, %v1496_v57  ;;  %v11195_v3 = vor.u32 %v14736_v1, %v11192_v32  ;;  %v14730_v57 = vld [vmem:[#allocation5 + $0xb94] sm:$0xf]  ;;  %v11032_v59 = vld [vmem:[#allocation5 + $0xa88] sm:$0xf0] }
 0x323   : > { %8701 = vmatpush.bf16.msra.mxu3 %v10907_v6  ;;  %8663 = vmatmul.bf16.vlgmr.msra.gmra.mxu0 %v16076_v37  ;;  %v11000_v37 = vld [vmem:[#allocation5 + $0xa48] sm:$0xf0]  ;;  %v11120_v6 = vld [vmem:[#allocation5 + $0xb38] sm:$0xf0] }
 0x324   : > { %8707 = vmatpush.bf16.msrb.mxu0 %v11027_v29  ;;  %8676 = vmatmul.bf16.vlgmr.msra.gmra.mxu1 %v16080_v46  ;;  %v11128_v46 = vld [vmem:[#allocation5 + $0xb48] sm:$0xf0]  ;;  %v14734_v29 = vld [vmem:[#allocation5 + $0xbb4] sm:$0xf]  ;;  %v11123_v24 = vor.u32 %v14718_v51, %v11120_v6 }
 0x325   : > { %8720 = vmatpush.bf16.msrb.mxu1 %v11091_v52  ;;  %8689 = vmatmul.bf16.vlgmr.msra.gmra.mxu2 %v16078_v45  ;;  %v11064_v45 = vld [vmem:[#allocation5 + $0xac8] sm:$0xf0]  ;;  %v11131_v39 = vor.u32 %v14720_v26, %v11128_v46  ;;  %v11184_v52 = vld [vmem:[#allocation5 + $0xbb8] sm:$0xf0]  ;;  %v14680_v26 = vld [vmem:[#allocation5 + $0xa04] sm:$0xf] }
 0x326   : > { %8733 = vmatpush.bf16.msrb.mxu2 %v11155_v30  ;;  %8702 = vmatmul.bf16.vlgmr.msra.gmra.mxu3 %v16082_v49  ;;  %v11003_v49 = vor.u32 %v14688_v21, %v11000_v37  ;;  %v11067_v60 = vor.u32 %v14704_v14, %v11064_v45  ;;  %v8470_v30 = vadd.f32 %v8469_v25, %v8457_v61  ;;  %v14698_v21 = vld [vmem:[#allocation5 + $0xa94] sm:$0xf]  ;;  %v11040_v37 = vld [vmem:[#allocation5 + $0xa98] sm:$0xf0]  ;;  %v10968_v46 = vld [vmem:[#allocation5 + $0xa08] sm:$0xf0] }
 0x327   : > { %8746 = vmatpush.bf16.msrb.mxu3 %v11219_v58  ;;  %v14684_v58 = vld [vmem:[#allocation5 + $0xa24] sm:$0xf]  ;;  %v11187_v38 = vor.u32 %v14734_v29, %v11184_v52  ;;  %v14714_v14 = vld [vmem:[#allocation5 + $0xb14] sm:$0xf]  ;;  %v11043_v1 = vor.u32 %v14698_v21, %v11040_v37  ;;  %v11160_v61 = vld [vmem:[#allocation5 + $0xb88] sm:$0xf0]  ;;  %v10971_v6 = vor.u32 %v14680_v26, %v10968_v46 }
 0x328   : > { %8708 = vmatpush.bf16.msrb.mxu0 %v11019_v2  ;;  %v8482_v62 = vpop.f32.mrf.mxu2  ;;  %v14716_v2 = vld [vmem:[#allocation5 + $0xb24] sm:$0xf]  ;;  %v8458_v28 = vpop.f32.mrf.mxu0  ;;  %v11107_v32 = vor.u32 %v14714_v14, %v11104_v15  ;;  %v14774_v51 = vld [vmem:[#allocation5 + $0xcf4] sm:$0xf]  ;;  %v11344_v29 = vld [vmem:[#allocation5 + $0xcf8] sm:$0xf0] }
 0x329   : > { %8721 = vmatpush.bf16.msrb.mxu1 %v11083_v43  ;;  %v11112_v43 = vld [vmem:[#allocation5 + $0xb28] sm:$0xf0]  ;;  %v8495_v23 = vpop.f32.mrf.mxu3  ;;  %v14790_v52 = vld [vmem:[#allocation5 + $0xd74] sm:$0xf]  ;;  %v11264_v21 = vld [vmem:[#allocation5 + $0xc58] sm:$0xf0] }
 0x32a   : > { %8734 = vmatpush.bf16.msrb.mxu2 %v11147_v19  ;;  %v8483_v19 = vadd.f32 %v8482_v62, %v8470_v30  ;;  %v11115_v31 = vor.u32 %v14716_v2, %v11112_v43  ;;  %v11408_v30 = vld [vmem:[#allocation5 + $0xd78] sm:$0xf0]  ;;  %v11347_v62 = vor.u32 %v14774_v51, %v11344_v29  ;;  %v11272_v2 = vld [vmem:[#allocation5 + $0xc68] sm:$0xf0]  ;;  %v14772_v43 = vld [vmem:[#allocation5 + $0xce4] sm:$0xf] }
 0x32b   : > { %8747 = vmatpush.bf16.msrb.mxu3 %v11211_v42  ;;  %v10987_v42 = vor.u32 %v14684_v58, %v10984_v36  ;;  %v11472_v58 = vld [vmem:[#allocation5 + $0xdf8] sm:$0xf0]  ;;  %v11163_v36 = vor.u32 %v14728_v63, %v11160_v61  ;;  %v11464_v28 = vld [vmem:[#allocation5 + $0xde8] sm:$0xf0]  ;;  %v14786_v14 = vld [vmem:[#allocation5 + $0xd54] sm:$0xf] }
 0x32c   : > { %8709 = vmatpush.bf16.msrb.mxu0 %v11011_v35  ;;  %v16343_v20 = vadd.f32 %v8495_v23, %v8483_v19  ;;  %v10976_v35 = vld [vmem:[#allocation5 + $0xa18] sm:$0xf0]  ;;  %v11336_v23 = vld [vmem:[#allocation5 + $0xce8] sm:$0xf0]  ;;  %v14750_v61 = vld [vmem:[#allocation5 + $0xc34] sm:$0xf] }
 0x32d   : > { %8722 = vmatpush.bf16.msrb.mxu1 %v11075_v22  ;;  %v8471_v22 = vpop.f32.mrf.mxu1  ;;  %v10979_v45 = vor.u32 %v14682_v44, %v10976_v35  ;;  %v14754_v35 = vld [vmem:[#allocation5 + $0xc54] sm:$0xf]  ;;  %v11328_v37 = vld [vmem:[#allocation5 + $0xcd8] sm:$0xf0] }
 0x32e   : > { %8735 = vmatpush.bf16.msrb.mxu2 %v11139_v0  ;;  %v11179_v0 = vor.u32 %v14732_v41, %v11176_v8  ;;  %v14788_v41 = vld [vmem:[#allocation5 + $0xd64] sm:$0xf]  ;;  %v11400_v8 = vld [vmem:[#allocation5 + $0xd68] sm:$0xf0]  ;;  %v14770_v22 = vld [vmem:[#allocation5 + $0xcd4] sm:$0xf] }
 0x32f   : > { %8748 = vmatpush.bf16.msrb.mxu3 %v11203_v4  ;;  %v11168_v4 = vld [vmem:[#allocation5 + $0xb98] sm:$0xf0]  ;;  %v11403_v44 = vor.u32 %v14788_v41, %v11400_v8  ;;  %v11331_v26 = vor.u32 %v14770_v22, %v11328_v37  ;;  %v14746_v22 = vld [vmem:[#allocation5 + $0xc14] sm:$0xf] }
 0x330   : > { %8710 = vmatpush.bf16.msrb.mxu0 %v11003_v49  ;;  %v14696_v49 = vld [vmem:[#allocation5 + $0xa84] sm:$0xf]  ;;  %v11171_v40 = vor.u32 %v14730_v57, %v11168_v4  ;;  %v11392_v15 = vld [vmem:[#allocation5 + $0xd58] sm:$0xf0]  ;;  %v14802_v57 = vld [vmem:[#allocation5 + $0xdd4] sm:$0xf] }
 0x331   : > { %8723 = vmatpush.bf16.msrb.mxu1 %v11067_v60  ;;  %v14712_v60 = vld [vmem:[#allocation5 + $0xb04] sm:$0xf]  ;;  %v8497_v25 = vpop.f32.mrf.mxu3  ;;  %v11456_v4 = vld [vmem:[#allocation5 + $0xdd8] sm:$0xf0]  ;;  %v11395_v46 = vor.u32 %v14786_v14, %v11392_v15  ;;  %v14762_v37 = vld [vmem:[#allocation5 + $0xc94] sm:$0xf] }
 0x332   : > { %8736 = vmatpush.bf16.msrb.mxu2 %v11131_v39  ;;  %v8484_v39 = vpop.f32.mrf.mxu2  ;;  %v11248_v25 = vld [vmem:[#allocation5 + $0xc38] sm:$0xf0] }
 0x333   : > { %8749 = vmatpush.bf16.msrb.mxu3 %v11195_v3  ;;  %v14758_v3 = vld [vmem:[#allocation5 + $0xc74] sm:$0xf]  ;;  %v14800_v39 = vld [vmem:[#allocation5 + $0xdc4] sm:$0xf]  ;;  %v11312_v29 = vld [vmem:[#allocation5 + $0xcb8] sm:$0xf0] }
 0x334   : > { %8711 = vmatpush.bf16.msrb.mxu0 %v10995_v50  ;;  %v11035_v50 = vor.u32 %v14696_v49, %v11032_v59  ;;  %v11283_v9 = vor.u32 %v14758_v3, %v11280_v47  ;;  %v11459_v49 = vor.u32 %v14802_v57, %v11456_v4  ;;  %v11320_v59 = vld [vmem:[#allocation5 + $0xcc8] sm:$0xf0]  ;;  %v14766_v3 = vld [vmem:[#allocation5 + $0xcb4] sm:$0xf]  ;;  %v11296_v57 = vld [vmem:[#allocation5 + $0xc98] sm:$0xf0] }
 0x335   : > { %8724 = vmatpush.bf16.msrb.mxu1 %v11059_v33  ;;  %v11099_v33 = vor.u32 %v14712_v60, %v11096_v56  ;;  %v14784_v60 = vld [vmem:[#allocation5 + $0xd44] sm:$0xf]  ;;  %v14778_v4 = vld [vmem:[#allocation5 + $0xd14] sm:$0xf] }
 0x336   : > { %8737 = vmatpush.bf16.msrb.mxu2 %v11123_v24  ;;  %v14806_v24 = vld [vmem:[#allocation5 + $0xdf4] sm:$0xf] }
 0x337   : > { %8750 = vmatpush.bf16.msrb.mxu3 %v11187_v38  ;;  %v11411_v38 = vor.u32 %v14790_v52, %v11408_v30  ;;  %v11475_v19 = vor.u32 %v14806_v24, %v11472_v58  ;;  %v14782_v52 = vld [vmem:[#allocation5 + $0xd34] sm:$0xf]  ;;  %v11376_v30 = vld [vmem:[#allocation5 + $0xd38] sm:$0xf0]  ;;  %v11251_v58 = vor.u32 %v14750_v61, %v11248_v25 }
 0x338   : > { %8712 = vmatpush.bf16.msrb.mxu0 %v10987_v42  ;;  %v14804_v42 = vld [vmem:[#allocation5 + $0xde4] sm:$0xf]  ;;  %v14822_v25 = vld [vmem:[#allocation5 + $0xe74] sm:$0xf] }
 0x339   : > { %8725 = vmatpush.bf16.msrb.mxu1 %v11051_v55  ;;  %v11275_v55 = vor.u32 %v14756_v18, %v11272_v2  ;;  %v14764_v18 = vld [vmem:[#allocation5 + $0xca4] sm:$0xf] }
 0x33a   : > { %8738 = vmatpush.bf16.msrb.mxu2 %v11115_v31  ;;  %v11339_v31 = vor.u32 %v14772_v43, %v11336_v23  ;;  %v11304_v43 = vld [vmem:[#allocation5 + $0xca8] sm:$0xf0] }
 0x33b   : > { %8751 = vmatpush.bf16.msrb.mxu3 %v11179_v0  ;;  %v11467_v0 = vor.u32 %v14804_v42, %v11464_v28  ;;  %v11368_v23 = vld [vmem:[#allocation5 + $0xd28] sm:$0xf0]  ;;  %v14796_v42 = vld [vmem:[#allocation5 + $0xda4] sm:$0xf] }
 0x33c   : > { %8713 = vmatpush.bf16.msrb.mxu0 %v10979_v45  ;;  %v11267_v45 = vor.u32 %v14754_v35, %v11264_v21  ;;  %v11432_v28 = vld [vmem:[#allocation5 + $0xda8] sm:$0xf0]  ;;  %v11307_v35 = vor.u32 %v14764_v18, %v11304_v43 }
 0x33d   : > { %8726 = vmatpush.bf16.msrb.mxu1 %v11043_v1  ;;  %v14752_v1 = vld [vmem:[#allocation5 + $0xc44] sm:$0xf]  ;;  %v11435_v15 = vor.u32 %v14796_v42, %v11432_v28  ;;  %v11528_v18 = vld [vmem:[#allocation5 + $0xe68] sm:$0xf0] }
 0x33e   : > { %8739 = vmatpush.bf16.msrb.mxu2 %v11107_v32  ;;  %v14768_v32 = vld [vmem:[#allocation5 + $0xcc4] sm:$0xf]  ;;  %v11592_v43 = vld [vmem:[#allocation5 + $0xee8] sm:$0xf0] }
 0x33f   : > { %8752 = vmatpush.bf16.msrb.mxu3 %v11171_v40 }
 0x340   : > { %8714 = vmatpush.bf16.msrb.mxu0 %v10971_v6  ;;  %v8508_v56 = vpop.f32.mrf.mxu0 }
 0x341   : > { %8727 = vmatpush.bf16.msrb.mxu1 %v11035_v50  ;;  %v8509_v47 = vadd.f32 %v8508_v56, %v16343_v20  ;;  %v8521_v51 = vpop.f32.mrf.mxu1  ;;  %v14798_v50 = vld [vmem:[#allocation5 + $0xdb4] sm:$0xf]  ;;  %v11352_v56 = vld [vmem:[#allocation5 + $0xd08] sm:$0xf0] }
 0x342   : > { %8740 = vmatpush.bf16.msrb.mxu2 %v11099_v33  ;;  %v11440_v33 = vld [vmem:[#allocation5 + $0xdb8] sm:$0xf0] }
 0x343   : > { %8753 = vmatpush.bf16.msrb.mxu3 %v11163_v36  ;;  %8715 = vmatmul.bf16.vlgmr.msrb.gmra.mxu0 %v16092_v7  ;;  %v11256_v7 = vld [vmem:[#allocation5 + $0xc48] sm:$0xf0]  ;;  %v8522_v24 = vadd.f32 %v8521_v51, %v8509_v47  ;;  %v11315_v36 = vor.u32 %v14766_v3, %v11312_v29  ;;  %v11443_v20 = vor.u32 %v14798_v50, %v11440_v33  ;;  %v11536_v3 = vld [vmem:[#allocation5 + $0xe78] sm:$0xf0]  ;;  %v14838_v47 = vld [vmem:[#allocation5 + $0xef4] sm:$0xf] }
 0x344   : > { %8759 = vmatpush.bf16.msra.mxu0 %v11283_v9  ;;  %8728 = vmatmul.bf16.vlgmr.msrb.gmra.mxu1 %v16096_v12  ;;  %v11448_v12 = vld [vmem:[#allocation5 + $0xdc8] sm:$0xf0]  ;;  %v11259_v40 = vor.u32 %v14752_v1, %v11256_v7  ;;  %v11379_v9 = vor.u32 %v14782_v52, %v11376_v30  ;;  %v14744_v7 = vld [vmem:[#allocation5 + $0xc04] sm:$0xf]  ;;  %v14854_v29 = vld [vmem:[#allocation5 + $0xf74] sm:$0xf] }
 0x345   : > { %8772 = vmatpush.bf16.msra.mxu1 %v11347_v62  ;;  %8741 = vmatmul.bf16.vlgmr.msrb.gmra.mxu2 %v16094_v11  ;;  %v11384_v11 = vld [vmem:[#allocation5 + $0xd48] sm:$0xf0]  ;;  %v11451_v6 = vor.u32 %v14800_v39, %v11448_v12  ;;  %v14748_v62 = vld [vmem:[#allocation5 + $0xc24] sm:$0xf]  ;;  %v11664_v52 = vld [vmem:[#allocation5 + $0xf78] sm:$0xf0] }
 0x346   : > { %8785 = vmatpush.bf16.msra.mxu2 %v11411_v38  ;;  %8754 = vmatmul.bf16.vlgmr.msrb.gmra.mxu3 %v16098_v16  ;;  %v11323_v16 = vor.u32 %v14768_v32, %v11320_v59  ;;  %v11387_v63 = vor.u32 %v14784_v60, %v11384_v11  ;;  %v11240_v38 = vld [vmem:[#allocation5 + $0xc28] sm:$0xf0]  ;;  %v14760_v60 = vld [vmem:[#allocation5 + $0xc84] sm:$0xf]  ;;  %v14870_v33 = vld [vmem:[#allocation5 + $0xff4] sm:$0xf] }
 0x347   : > { %8798 = vmatpush.bf16.msra.mxu3 %v11475_v19  ;;  %v14780_v19 = vld [vmem:[#allocation5 + $0xd24] sm:$0xf]  ;;  %v11224_v32 = vld [vmem:[#allocation5 + $0xc08] sm:$0xf0] }
 0x348   : > { %8760 = vmatpush.bf16.msra.mxu0 %v11275_v55  ;;  %v8534_v2 = vpop.f32.mrf.mxu2  ;;  %v11243_v55 = vor.u32 %v14748_v62, %v11240_v38  ;;  %v11371_v21 = vor.u32 %v14780_v19, %v11368_v23  ;;  %v11288_v11 = vld [vmem:[#allocation5 + $0xc88] sm:$0xf0]  ;;  %v14776_v39 = vld [vmem:[#allocation5 + $0xd04] sm:$0xf]  ;;  %v11227_v51 = vor.u32 %v14744_v7, %v11224_v32  ;;  %v11667_v62 = vor.u32 %v14854_v29, %v11664_v52  ;;  %v11696_v29 = vld [vmem:[#allocation5 + $0xfb8] sm:$0xf0] }
 0x349   : > { %8773 = vmatpush.bf16.msra.mxu1 %v11339_v31  ;;  %v8535_v41 = vadd.f32 %v8534_v2, %v8522_v24  ;;  %v8547_v8 = vpop.f32.mrf.mxu3  ;;  %v8523_v14 = vpop.f32.mrf.mxu1  ;;  %v11291_v30 = vor.u32 %v14760_v60, %v11288_v11  ;;  %v11355_v50 = vor.u32 %v14776_v39, %v11352_v56  ;;  %v11728_v24 = vld [vmem:[#allocation5 + $0xff8] sm:$0xf0]  ;;  %v14820_v38 = vld [vmem:[#allocation5 + $0xe64] sm:$0xf]  ;;  %v11656_v23 = vld [vmem:[#allocation5 + $0xf68] sm:$0xf0] }
 0x34a   : > { %8786 = vmatpush.bf16.msra.mxu2 %v11403_v44  ;;  %v8510_v44 = vpop.f32.mrf.mxu0  ;;  %v14836_v2 = vld [vmem:[#allocation5 + $0xee4] sm:$0xf]  ;;  %v11531_v42 = vor.u32 %v14820_v38, %v11528_v18  ;;  %v11648_v14 = vld [vmem:[#allocation5 + $0xf58] sm:$0xf0]  ;;  %v11576_v32 = vld [vmem:[#allocation5 + $0xec8] sm:$0xf0] }
 0x34b   : > { %8799 = vmatpush.bf16.msra.mxu3 %v11467_v0  ;;  %v16350_v31 = vadd.f32 %v8547_v8, %v8535_v41  ;;  %v11232_v0 = vld [vmem:[#allocation5 + $0xc18] sm:$0xf0]  ;;  %v14852_v19 = vld [vmem:[#allocation5 + $0xf64] sm:$0xf]  ;;  %v11720_v8 = vld [vmem:[#allocation5 + $0xfe8] sm:$0xf0]  ;;  %v11595_v28 = vor.u32 %v14836_v2, %v11592_v43 }
 0x34c   : > { %8761 = vmatpush.bf16.msra.mxu0 %v11267_v45  ;;  %v11360_v45 = vld [vmem:[#allocation5 + $0xd18] sm:$0xf0]  ;;  %v11235_v1 = vor.u32 %v14746_v22, %v11232_v0  ;;  %v14868_v41 = vld [vmem:[#allocation5 + $0xfe4] sm:$0xf]  ;;  %v14818_v44 = vld [vmem:[#allocation5 + $0xe54] sm:$0xf] }
 0x34d   : > { %8774 = vmatpush.bf16.msra.mxu1 %v11331_v26  ;;  %v14794_v26 = vld [vmem:[#allocation5 + $0xd94] sm:$0xf]  ;;  %v11363_v59 = vor.u32 %v14778_v4, %v11360_v45  ;;  %v11723_v22 = vor.u32 %v14868_v41, %v11720_v8  ;;  %v11584_v0 = vld [vmem:[#allocation5 + $0xed8] sm:$0xf0]  ;;  %v11704_v60 = vld [vmem:[#allocation5 + $0xfc8] sm:$0xf0] }
 0x34e   : > { %8787 = vmatpush.bf16.msra.mxu2 %v11395_v46  ;;  %v11424_v46 = vld [vmem:[#allocation5 + $0xd98] sm:$0xf0]  ;;  %v14814_v56 = vld [vmem:[#allocation5 + $0xe34] sm:$0xf]  ;;  %v11624_v38 = vld [vmem:[#allocation5 + $0xf28] sm:$0xf0] }
 0x34f   : > { %8800 = vmatpush.bf16.msra.mxu3 %v11459_v49  ;;  %v11299_v49 = vor.u32 %v14762_v37, %v11296_v57  ;;  %v14850_v37 = vld [vmem:[#allocation5 + $0xf54] sm:$0xf]  ;;  %v11712_v57 = vld [vmem:[#allocation5 + $0xfd8] sm:$0xf0]  ;;  %v11688_v43 = vld [vmem:[#allocation5 + $0xfa8] sm:$0xf0] }
 0x350   : > { %8762 = vmatpush.bf16.msra.mxu0 %v11259_v40  ;;  %v8536_v12 = vpop.f32.mrf.mxu2  ;;  %v11427_v40 = vor.u32 %v14794_v26, %v11424_v46  ;;  %v11651_v26 = vor.u32 %v14850_v37, %v11648_v14  ;;  %v14816_v46 = vld [vmem:[#allocation5 + $0xe44] sm:$0xf]  ;;  %v11616_v37 = vld [vmem:[#allocation5 + $0xf18] sm:$0xf0]  ;;  %v14858_v14 = vld [vmem:[#allocation5 + $0xf94] sm:$0xf] }
 0x351   : > { %8775 = vmatpush.bf16.msra.mxu1 %v11323_v16  ;;  %v14792_v16 = vld [vmem:[#allocation5 + $0xd84] sm:$0xf]  ;;  %v8549_v61 = vpop.f32.mrf.mxu3 }
 0x352   : > { %8788 = vmatpush.bf16.msra.mxu2 %v11387_v63  ;;  %v11416_v63 = vld [vmem:[#allocation5 + $0xd88] sm:$0xf0] }
 0x353   : > { %8801 = vmatpush.bf16.msra.mxu3 %v11451_v6  ;;  %v11600_v6 = vld [vmem:[#allocation5 + $0xef8] sm:$0xf0] }
 0x354   : > { %8763 = vmatpush.bf16.msra.mxu0 %v11251_v58  ;;  %v11419_v58 = vor.u32 %v14792_v16, %v11416_v63  ;;  %v11504_v16 = vld [vmem:[#allocation5 + $0xe38] sm:$0xf0]  ;;  %v14830_v63 = vld [vmem:[#allocation5 + $0xeb4] sm:$0xf] }
 0x355   : > { %8776 = vmatpush.bf16.msra.mxu1 %v11315_v36  ;;  %v11539_v36 = vor.u32 %v14822_v25, %v11536_v3  ;;  %v11568_v3 = vld [vmem:[#allocation5 + $0xeb8] sm:$0xf0]  ;;  %v11507_v52 = vor.u32 %v14814_v56, %v11504_v16  ;;  %v14918_v56 = vld [vmem:[#allocation5 + $0x1174] sm:$0xf] }
 0x356   : > { %8789 = vmatpush.bf16.msra.mxu2 %v11379_v9  ;;  %v11603_v9 = vor.u32 %v14838_v47, %v11600_v6  ;;  %v14846_v47 = vld [vmem:[#allocation5 + $0xf34] sm:$0xf]  ;;  %v11920_v16 = vld [vmem:[#allocation5 + $0x1178] sm:$0xf0] }
 0x357   : > { %8802 = vmatpush.bf16.msra.mxu3 %v11443_v20  ;;  %v11731_v20 = vor.u32 %v14870_v33, %v11728_v24  ;;  %v14862_v6 = vld [vmem:[#allocation5 + $0xfb4] sm:$0xf]  ;;  %v11496_v33 = vld [vmem:[#allocation5 + $0xe28] sm:$0xf0]  ;;  %v14828_v24 = vld [vmem:[#allocation5 + $0xea4] sm:$0xf] }
 0x358   : > { %8764 = vmatpush.bf16.msra.mxu0 %v11243_v55  ;;  %v11659_v55 = vor.u32 %v14852_v19, %v11656_v23 }
 0x359   : > { %8777 = vmatpush.bf16.msra.mxu1 %v11307_v35  ;;  %v11520_v35 = vld [vmem:[#allocation5 + $0xe58] sm:$0xf0] }
 0x35a   : > { %8790 = vmatpush.bf16.msra.mxu2 %v11371_v21  ;;  %v14834_v21 = vld [vmem:[#allocation5 + $0xed4] sm:$0xf]  ;;  %v11523_v4 = vor.u32 %v14818_v44, %v11520_v35  ;;  %v11488_v44 = vld [vmem:[#allocation5 + $0xe18] sm:$0xf0] }
 0x35b   : > { %8803 = vmatpush.bf16.msra.mxu3 %v11435_v15  ;;  %v14866_v15 = vld [vmem:[#allocation5 + $0xfd4] sm:$0xf]  ;;  %v11587_v45 = vor.u32 %v14834_v21, %v11584_v0 }
 0x35c   : > { %8765 = vmatpush.bf16.msra.mxu0 %v11235_v1  ;;  %v14832_v1 = vld [vmem:[#allocation5 + $0xec4] sm:$0xf]  ;;  %v11715_v7 = vor.u32 %v14866_v15, %v11712_v57  ;;  %v14826_v35 = vld [vmem:[#allocation5 + $0xe94] sm:$0xf]  ;;  %v11680_v15 = vld [vmem:[#allocation5 + $0xf98] sm:$0xf0] }
 0x35d   : > { %8778 = vmatpush.bf16.msra.mxu1 %v11299_v49  ;;  %v14848_v49 = vld [vmem:[#allocation5 + $0xf44] sm:$0xf]  ;;  %v11579_v12 = vor.u32 %v14832_v1, %v11576_v32  ;;  %v14842_v0 = vld [vmem:[#allocation5 + $0xf14] sm:$0xf]  ;;  %v11544_v1 = vld [vmem:[#allocation5 + $0xe88] sm:$0xf0]  ;;  %v11683_v32 = vor.u32 %v14858_v14, %v11680_v15 }
 0x35e   : > { %8791 = vmatpush.bf16.msra.mxu2 %v11363_v59  ;;  %v14880_v15 = vld [vmem:[#allocation5 + $0x1044] sm:$0xf] }
 0x35f   : > { %8804 = vmatpush.bf16.msra.mxu3 %v11427_v40 }
 0x360   : > { %8766 = vmatpush.bf16.msra.mxu0 %v11227_v51  ;;  %v8560_v59 = vpop.f32.mrf.mxu0  ;;  %v11632_v51 = vld [vmem:[#allocation5 + $0xf38] sm:$0xf0] }
 0x361   : > { %8779 = vmatpush.bf16.msra.mxu1 %v11291_v30  ;;  %v8573_v39 = vpop.f32.mrf.mxu1  ;;  %v11635_v30 = vor.u32 %v14846_v47, %v11632_v51 }
 0x362   : > { %8792 = vmatpush.bf16.msra.mxu2 %v11355_v50  ;;  %v14812_v50 = vld [vmem:[#allocation5 + $0xe24] sm:$0xf] }
 0x363   : > { %8805 = vmatpush.bf16.msra.mxu3 %v11419_v58  ;;  %8767 = vmatmul.bf16.vlgmr.msra.gmra.mxu0 %v16109_v5  ;;  %v11512_v5 = vld [vmem:[#allocation5 + $0xe48] sm:$0xf0]  ;;  %v11699_v58 = vor.u32 %v14862_v6, %v11696_v29  ;;  %v11499_v23 = vor.u32 %v14812_v50, %v11496_v33  ;;  %v11923_v29 = vor.u32 %v14918_v56, %v11920_v16  ;;  %v11824_v56 = vld [vmem:[#allocation5 + $0x10b8] sm:$0xf0]  ;;  %v14910_v16 = vld [vmem:[#allocation5 + $0x1134] sm:$0xf] }
 0x364   : > { %8811 = vmatpush.bf16.msrb.mxu0 %v11539_v36  ;;  %8780 = vmatmul.bf16.vlgmr.msra.gmra.mxu1 %v16113_v13  ;;  %v14864_v13 = vld [vmem:[#allocation5 + $0xfc4] sm:$0xf]  ;;  %v11515_v11 = vor.u32 %v14816_v46, %v11512_v5  ;;  %v11619_v46 = vor.u32 %v14842_v0, %v11616_v37  ;;  %v11848_v33 = vld [vmem:[#allocation5 + $0x10e8] sm:$0xf0] }
 0x365   : > { %8824 = vmatpush.bf16.msrb.mxu1 %v11603_v9  ;;  %8793 = vmatmul.bf16.vlgmr.msra.gmra.mxu2 %v16111_v10  ;;  %v11640_v10 = vld [vmem:[#allocation5 + $0xf48] sm:$0xf0]  ;;  %v11707_v61 = vor.u32 %v14864_v13, %v11704_v60  ;;  %v14824_v5 = vld [vmem:[#allocation5 + $0xe84] sm:$0xf]  ;;  %v14886_v60 = vld [vmem:[#allocation5 + $0x1074] sm:$0xf] }
 0x366   : > { %8837 = vmatpush.bf16.msrb.mxu2 %v11667_v62  ;;  %8806 = vmatmul.bf16.vlgmr.msra.gmra.mxu3 %v16115_v17  ;;  %v8561_v17 = vadd.f32 %v8560_v59, %v16350_v31  ;;  %v11643_v40 = vor.u32 %v14848_v49, %v11640_v10  ;;  %v11571_v31 = vor.u32 %v14830_v63, %v11568_v3  ;;  %v11560_v9 = vld [vmem:[#allocation5 + $0xea8] sm:$0xf0]  ;;  %v14844_v62 = vld [vmem:[#allocation5 + $0xf24] sm:$0xf]  ;;  %v11984_v3 = vld [vmem:[#allocation5 + $0x11f8] sm:$0xf0] }
 0x367   : > { %8850 = vmatpush.bf16.msrb.mxu3 %v11731_v20  ;;  %v14860_v20 = vld [vmem:[#allocation5 + $0xfa4] sm:$0xf]  ;;  %v11608_v49 = vld [vmem:[#allocation5 + $0xf08] sm:$0xf0]  ;;  %v11547_v63 = vor.u32 %v14824_v5, %v11544_v1 }
 0x368   : > { %8812 = vmatpush.bf16.msrb.mxu0 %v11531_v42  ;;  %v8574_v25 = vadd.f32 %v8573_v39, %v8561_v17  ;;  %v8586_v36 = vpop.f32.mrf.mxu2  ;;  %v8562_v19 = vpop.f32.mrf.mxu0  ;;  %v11563_v42 = vor.u32 %v14828_v24, %v11560_v9  ;;  %v11691_v21 = vor.u32 %v14860_v20, %v11688_v43  ;;  %v14856_v10 = vld [vmem:[#allocation5 + $0xf84] sm:$0xf]  ;;  %v11672_v59 = vld [vmem:[#allocation5 + $0xf88] sm:$0xf0]  ;;  %v11792_v17 = vld [vmem:[#allocation5 + $0x1078] sm:$0xf0] }
 0x369   : > { %8825 = vmatpush.bf16.msrb.mxu1 %v11595_v28  ;;  %v8599_v2 = vpop.f32.mrf.mxu3  ;;  %v8575_v41 = vpop.f32.mrf.mxu1  ;;  %v11627_v28 = vor.u32 %v14844_v62, %v11624_v38  ;;  %v11675_v47 = vor.u32 %v14856_v10, %v11672_v59  ;;  %v11795_v51 = vor.u32 %v14886_v60, %v11792_v17  ;;  %v14916_v24 = vld [vmem:[#allocation5 + $0x1164] sm:$0xf]  ;;  %v11976_v9 = vld [vmem:[#allocation5 + $0x11e8] sm:$0xf0]  ;;  %v11776_v20 = vld [vmem:[#allocation5 + $0x1058] sm:$0xf0] }
 0x36a   : > { %8838 = vmatpush.bf16.msrb.mxu2 %v11659_v55  ;;  %v8587_v18 = vadd.f32 %v8586_v36, %v8574_v25  ;;  %v14810_v55 = vld [vmem:[#allocation5 + $0xe14] sm:$0xf]  ;;  %v14932_v36 = vld [vmem:[#allocation5 + $0x11e4] sm:$0xf]  ;;  %v11840_v41 = vld [vmem:[#allocation5 + $0x10d8] sm:$0xf0] }
 0x36b   : > { %8851 = vmatpush.bf16.msrb.mxu3 %v11723_v22  ;;  %v11552_v22 = vld [vmem:[#allocation5 + $0xe98] sm:$0xf0]  ;;  %v11491_v57 = vor.u32 %v14810_v55, %v11488_v44  ;;  %v14934_v25 = vld [vmem:[#allocation5 + $0x11f4] sm:$0xf]  ;;  %v16562_v44 = vld [vmem:[#allocation18_spill] sm:$0xff] }
 0x36c   : > { %8813 = vmatpush.bf16.msrb.mxu0 %v11523_v4  ;;  %v16357_v8 = vadd.f32 %v8599_v2, %v8587_v18  ;;  %v14808_v4 = vld [vmem:[#allocation5 + $0xe04] sm:$0xf]  ;;  %v11987_v50 = vor.u32 %v14934_v25, %v11984_v3  ;;  %v14882_v2 = vld [vmem:[#allocation5 + $0x1054] sm:$0xf]  ;;  %v16561_v55 = vld [vmem:[#allocation17_spill] sm:$0xff] }
 0x36d   : > { %8826 = vmatpush.bf16.msrb.mxu1 %v11587_v45  ;;  %v11480_v45 = vld [vmem:[#allocation5 + $0xe08] sm:$0xf0]  ;;  %v14898_v43 = vld [vmem:[#allocation5 + $0x10d4] sm:$0xf]  ;;  %v11779_v0 = vor.u32 %v14882_v2, %v11776_v20  ;;  %v11952_v25 = vld [vmem:[#allocation5 + $0x11b8] sm:$0xf0] }
 0x36e   : > { %8839 = vmatpush.bf16.msrb.mxu2 %v11651_v26  ;;  %v11555_v26 = vor.u32 %v14826_v35, %v11552_v22  ;;  %v16560_v19 = vld [vmem:[#allocation16_spill] sm:$0xff]  ;;  %v16563_v22 = vld [vmem:[#allocation19_spill] sm:$0xff]  ;;  %v11843_v37 = vor.u32 %v14898_v43, %v11840_v41 }
 0x36f   : > { %8852 = vmatpush.bf16.msrb.mxu3 %v11715_v7  ;;  %v14840_v7 = vld [vmem:[#allocation5 + $0xf04] sm:$0xf]  ;;  %v14930_v35 = vld [vmem:[#allocation5 + $0x11d4] sm:$0xf]  ;;  %v11896_v5 = vld [vmem:[#allocation5 + $0x1148] sm:$0xf0] }
 0x370   : > { %8814 = vmatpush.bf16.msrb.mxu0 %v11515_v11  ;;  %v8588_v13 = vpop.f32.mrf.mxu2  ;;  %v14902_v11 = vld [vmem:[#allocation5 + $0x10f4] sm:$0xf] }
 0x371   : > { %8827 = vmatpush.bf16.msrb.mxu1 %v11579_v12  ;;  %v8601_v39 = vpop.f32.mrf.mxu3  ;;  %v11483_v12 = vor.u32 %v14808_v4, %v11480_v45  ;;  %v14896_v4 = vld [vmem:[#allocation5 + $0x10c4] sm:$0xf]  ;;  %v14878_v17 = vld [vmem:[#allocation5 + $0x1034] sm:$0xf] }
 0x372   : > { %8840 = vmatpush.bf16.msrb.mxu2 %v11643_v40  ;;  %v11856_v40 = vld [vmem:[#allocation5 + $0x10f8] sm:$0xf0]  ;;  %v14894_v39 = vld [vmem:[#allocation5 + $0x10b4] sm:$0xf] }
 0x373   : > { %8853 = vmatpush.bf16.msrb.mxu3 %v11707_v61  ;;  %v11611_v61 = vor.u32 %v14840_v7, %v11608_v49  ;;  %v11859_v6 = vor.u32 %v14902_v11, %v11856_v40  ;;  %v14928_v7 = vld [vmem:[#allocation5 + $0x11c4] sm:$0xf]  ;;  %v11760_v11 = vld [vmem:[#allocation5 + $0x1038] sm:$0xf0]  ;;  %v14890_v41 = vld [vmem:[#allocation5 + $0x1094] sm:$0xf] }
 0x374   : > { %8815 = vmatpush.bf16.msrb.mxu0 %v11507_v52  ;;  %v14884_v52 = vld [vmem:[#allocation5 + $0x1064] sm:$0xf]  ;;  %v11763_v3 = vor.u32 %v14878_v17, %v11760_v11  ;;  %v14982_v17 = vld [vmem:[#allocation5 + $0x1374] sm:$0xf]  ;;  %v12176_v11 = vld [vmem:[#allocation5 + $0x1378] sm:$0xf0] }
 0x375   : > { %8828 = vmatpush.bf16.msrb.mxu1 %v11571_v31  ;;  %v11784_v31 = vld [vmem:[#allocation5 + $0x1068] sm:$0xf0] }
 0x376   : > { %8841 = vmatpush.bf16.msrb.mxu2 %v11635_v30  ;;  %v14900_v30 = vld [vmem:[#allocation5 + $0x10e4] sm:$0xf]  ;;  %v11787_v62 = vor.u32 %v14884_v52, %v11784_v31 }
 0x377   : > { %8854 = vmatpush.bf16.msrb.mxu3 %v11699_v58  ;;  %v11912_v58 = vld [vmem:[#allocation5 + $0x1168] sm:$0xf0]  ;;  %v11851_v38 = vor.u32 %v14900_v30, %v11848_v33 }
 0x378   : > { %8816 = vmatpush.bf16.msrb.mxu0 %v11499_v23  ;;  %v11915_v18 = vor.u32 %v14916_v24, %v11912_v58  ;;  %v11979_v23 = vor.u32 %v14932_v36, %v11976_v9  ;;  %v11816_v30 = vld [vmem:[#allocation5 + $0x10a8] sm:$0xf0]  ;;  %v14924_v36 = vld [vmem:[#allocation5 + $0x11a4] sm:$0xf] }
 0x379   : > { %8829 = vmatpush.bf16.msrb.mxu1 %v11563_v42  ;;  %v14914_v42 = vld [vmem:[#allocation5 + $0x1154] sm:$0xf]  ;;  %v11880_v33 = vld [vmem:[#allocation5 + $0x1128] sm:$0xf0] }
 0x37a   : > { %8842 = vmatpush.bf16.msrb.mxu2 %v11627_v28  ;;  %v11904_v28 = vld [vmem:[#allocation5 + $0x1158] sm:$0xf0]  ;;  %v11944_v9 = vld [vmem:[#allocation5 + $0x11a8] sm:$0xf0] }
 0x37b   : > { %8855 = vmatpush.bf16.msrb.mxu3 %v11691_v21  ;;  %v11968_v21 = vld [vmem:[#allocation5 + $0x11d8] sm:$0xf0]  ;;  %v11907_v14 = vor.u32 %v14914_v42, %v11904_v28  ;;  %v11947_v42 = vor.u32 %v14924_v36, %v11944_v9  ;;  %v14962_v9 = vld [vmem:[#allocation5 + $0x12d4] sm:$0xf] }
 0x37c   : > { %8817 = vmatpush.bf16.msrb.mxu0 %v11491_v57  ;;  %v11768_v57 = vld [vmem:[#allocation5 + $0x1048] sm:$0xf0]  ;;  %v11971_v45 = vor.u32 %v14930_v35, %v11968_v21  ;;  %v11808_v28 = vld [vmem:[#allocation5 + $0x1098] sm:$0xf0]  ;;  %v14922_v35 = vld [vmem:[#allocation5 + $0x1194] sm:$0xf] }
 0x37d   : > { %8830 = vmatpush.bf16.msrb.mxu1 %v11555_v26  ;;  %v11832_v26 = vld [vmem:[#allocation5 + $0x10c8] sm:$0xf0]  ;;  %v11771_v10 = vor.u32 %v14880_v15, %v11768_v57  ;;  %v11936_v21 = vld [vmem:[#allocation5 + $0x1198] sm:$0xf0]  ;;  %v14888_v57 = vld [vmem:[#allocation5 + $0x1084] sm:$0xf] }
 0x37e   : > { %8843 = vmatpush.bf16.msrb.mxu2 %v11619_v46  ;;  %v14912_v46 = vld [vmem:[#allocation5 + $0x1144] sm:$0xf]  ;;  %v11835_v13 = vor.u32 %v14896_v4, %v11832_v26  ;;  %v11800_v4 = vld [vmem:[#allocation5 + $0x1088] sm:$0xf0]  ;;  %v11939_v26 = vor.u32 %v14922_v35, %v11936_v21  ;;  %v12032_v36 = vld [vmem:[#allocation5 + $0x1258] sm:$0xf0] }
 0x37f   : > { %8856 = vmatpush.bf16.msrb.mxu3 %v11683_v32  ;;  %v11960_v32 = vld [vmem:[#allocation5 + $0x11c8] sm:$0xf0]  ;;  %v11899_v60 = vor.u32 %v14912_v46, %v11896_v5  ;;  %v14920_v5 = vld [vmem:[#allocation5 + $0x1184] sm:$0xf] }
 0x380   : > { %8818 = vmatpush.bf16.msrb.mxu0 %v11483_v12  ;;  %v8612_v1 = vpop.f32.mrf.mxu0  ;;  %v11963_v12 = vor.u32 %v14928_v7, %v11960_v32  ;;  %v11864_v46 = vld [vmem:[#allocation5 + $0x1108] sm:$0xf0]  ;;  %v14950_v32 = vld [vmem:[#allocation5 + $0x1274] sm:$0xf]  ;;  %v14944_v21 = vld [vmem:[#allocation5 + $0x1244] sm:$0xf] }
 0x381   : > { %8831 = vmatpush.bf16.msrb.mxu1 %v11547_v63  ;;  %v8613_v49 = vadd.f32 %v8612_v1, %v16357_v8  ;;  %v8625_v59 = vpop.f32.mrf.mxu1  ;;  %v11888_v63 = vld [vmem:[#allocation5 + $0x1138] sm:$0xf0]  ;;  %v11827_v8 = vor.u32 %v14894_v39, %v11824_v56  ;;  %v11928_v1 = vld [vmem:[#allocation5 + $0x1188] sm:$0xf0]  ;;  %v11803_v39 = vor.u32 %v14888_v57, %v11800_v4 }
 0x382   : > { %8844 = vmatpush.bf16.msrb.mxu2 %v11611_v61  ;;  %v14926_v61 = vld [vmem:[#allocation5 + $0x11b4] sm:$0xf]  ;;  %v12240_v56 = vld [vmem:[#allocation5 + $0x13f8] sm:$0xf0]  ;;  %v12152_v57 = vld [vmem:[#allocation5 + $0x1348] sm:$0xf0] }
 0x383   : > { %8857 = vmatpush.bf16.msrb.mxu3 %v11675_v47  ;;  %8819 = vmatmul.bf16.vlgmr.msrb.gmra.mxu0 %v16560_v19  ;;  %v8626_v40 = vadd.f32 %v8625_v59, %v8613_v49  ;;  %v11891_v47 = vor.u32 %v14910_v16, %v11888_v63  ;;  %v11955_v52 = vor.u32 %v14926_v61, %v11952_v25  ;;  %v14874_v19 = vld [vmem:[#allocation5 + $0x1014] sm:$0xf]  ;;  %v12048_v49 = vld [vmem:[#allocation5 + $0x1278] sm:$0xf0] }
 0x384   : > { %8863 = vmatpush.bf16.msra.mxu0 %v11795_v51  ;;  %8832 = vmatmul.bf16.vlgmr.msrb.gmra.mxu1 %v16562_v44  ;;  %v14876_v51 = vld [vmem:[#allocation5 + $0x1024] sm:$0xf]  ;;  %v11872_v44 = vld [vmem:[#allocation5 + $0x1118] sm:$0xf0]  ;;  %v11931_v16 = vor.u32 %v14920_v5, %v11928_v1  ;;  %v12051_v63 = vor.u32 %v14950_v32, %v12048_v49  ;;  %v12179_v25 = vor.u32 %v14982_v17, %v12176_v11  ;;  %v14942_v49 = vld [vmem:[#allocation5 + $0x1234] sm:$0xf] }
 0x385   : > { %8876 = vmatpush.bf16.msra.mxu1 %v11859_v6  ;;  %8845 = vmatmul.bf16.vlgmr.msrb.gmra.mxu2 %v16561_v55  ;;  %v11752_v6 = vld [vmem:[#allocation5 + $0x1028] sm:$0xf0]  ;;  %v14906_v55 = vld [vmem:[#allocation5 + $0x1114] sm:$0xf]  ;;  %v12080_v17 = vld [vmem:[#allocation5 + $0x12b8] sm:$0xf0] }
 0x386   : > { %8889 = vmatpush.bf16.msra.mxu2 %v11923_v29  ;;  %8858 = vmatmul.bf16.vlgmr.msrb.gmra.mxu3 %v16563_v22  ;;  %v14892_v29 = vld [vmem:[#allocation5 + $0x10a4] sm:$0xf]  ;;  %v11875_v15 = vor.u32 %v14906_v55, %v11872_v44  ;;  %v14974_v11 = vld [vmem:[#allocation5 + $0x1334] sm:$0xf] }
 0x387   : > { %8902 = vmatpush.bf16.msra.mxu3 %v11987_v50  ;;  %v14908_v50 = vld [vmem:[#allocation5 + $0x1124] sm:$0xf]  ;;  %v11819_v20 = vor.u32 %v14892_v29, %v11816_v30  ;;  %v12232_v30 = vld [vmem:[#allocation5 + $0x13e8] sm:$0xf0] }
 0x388   : > { %8864 = vmatpush.bf16.msra.mxu0 %v11787_v62  ;;  %v8638_v31 = vpop.f32.mrf.mxu2  ;;  %v8614_v62 = vpop.f32.mrf.mxu0  ;;  %v11883_v43 = vor.u32 %v14908_v50, %v11880_v33  ;;  %v14980_v29 = vld [vmem:[#allocation5 + $0x1364] sm:$0xf] }
 0x389   : > { %8877 = vmatpush.bf16.msra.mxu1 %v11851_v38  ;;  %v8639_v24 = vadd.f32 %v8638_v31, %v8626_v40  ;;  %v8651_v58 = vpop.f32.mrf.mxu3  ;;  %v11755_v38 = vor.u32 %v14876_v51, %v11752_v6  ;;  %v14998_v40 = vld [vmem:[#allocation5 + $0x13f4] sm:$0xf]  ;;  %v12104_v6 = vld [vmem:[#allocation5 + $0x12e8] sm:$0xf0]  ;;  %v14996_v31 = vld [vmem:[#allocation5 + $0x13e4] sm:$0xf] }
 0x38a   : > { %8890 = vmatpush.bf16.msra.mxu2 %v11915_v18  ;;  %v8627_v18 = vpop.f32.mrf.mxu1  ;;  %v12243_v51 = vor.u32 %v14998_v40, %v12240_v56  ;;  %v16564_v62 = vld [vmem:[#allocation20_spill] sm:$0xff]  ;;  %v12208_v40 = vld [vmem:[#allocation5 + $0x13b8] sm:$0xf0] }
 0x38b   : > { %8903 = vmatpush.bf16.msra.mxu3 %v11979_v23  ;;  %v16364_v2 = vadd.f32 %v8651_v58, %v8639_v24  ;;  %v11744_v23 = vld [vmem:[#allocation5 + $0x1018] sm:$0xf0]  ;;  %v14946_v58 = vld [vmem:[#allocation5 + $0x1254] sm:$0xf] }
 0x38c   : > { %8865 = vmatpush.bf16.msra.mxu0 %v11779_v0  ;;  %v11747_v22 = vor.u32 %v14874_v19, %v11744_v23  ;;  %v14872_v0 = vld [vmem:[#allocation5 + $0x1004] sm:$0xf]  ;;  %v12096_v18 = vld [vmem:[#allocation5 + $0x12d8] sm:$0xf0]  ;;  %v12035_v55 = vor.u32 %v14946_v58, %v12032_v36 }
 0x38d   : > { %8878 = vmatpush.bf16.msra.mxu1 %v11843_v37  ;;  %v11736_v37 = vld [vmem:[#allocation5 + $0x1008] sm:$0xf0]  ;;  %v16565_v19 = vld [vmem:[#allocation21_spill] sm:$0xff]  ;;  %v16566_v23 = vld [vmem:[#allocation22_spill] sm:$0xff]  ;;  %v12099_v44 = vor.u32 %v14962_v9, %v12096_v18 }
 0x38e   : > { %8891 = vmatpush.bf16.msra.mxu2 %v11907_v14  ;;  %v11811_v14 = vor.u32 %v14890_v41, %v11808_v28  ;;  %v14994_v41 = vld [vmem:[#allocation5 + $0x13d4] sm:$0xf]  ;;  %v16567_v28 = vld [vmem:[#allocation23_spill] sm:$0xff] }
 0x38f   : > { %8904 = vmatpush.bf16.msra.mxu3 %v11971_v45  ;;  %v14904_v45 = vld [vmem:[#allocation5 + $0x1104] sm:$0xf]  ;;  %v14954_v18 = vld [vmem:[#allocation5 + $0x1294] sm:$0xf] }
 0x390   : > { %8866 = vmatpush.bf16.msra.mxu0 %v11771_v10  ;;  %v8640_v7 = vpop.f32.mrf.mxu2  ;;  %v14966_v10 = vld [vmem:[#allocation5 + $0x12f4] sm:$0xf] }
 0x391   : > { %8879 = vmatpush.bf16.msra.mxu1 %v11835_v13  ;;  %v8653_v59 = vpop.f32.mrf.mxu3  ;;  %v11739_v13 = vor.u32 %v14872_v0, %v11736_v37  ;;  %v14960_v0 = vld [vmem:[#allocation5 + $0x12c4] sm:$0xf] }
 0x392   : > { %8892 = vmatpush.bf16.msra.mxu2 %v11899_v60  ;;  %v12112_v60 = vld [vmem:[#allocation5 + $0x12f8] sm:$0xf0]  ;;  %v14958_v59 = vld [vmem:[#allocation5 + $0x12b4] sm:$0xf] }
 0x393   : > { %8905 = vmatpush.bf16.msra.mxu3 %v11963_v12  ;;  %v11867_v12 = vor.u32 %v14904_v45, %v11864_v46  ;;  %v12115_v61 = vor.u32 %v14966_v10, %v12112_v60  ;;  %v14992_v45 = vld [vmem:[#allocation5 + $0x13c4] sm:$0xf]  ;;  %v12016_v10 = vld [vmem:[#allocation5 + $0x1238] sm:$0xf0] }
 0x394   : > { %8867 = vmatpush.bf16.msra.mxu0 %v11763_v3  ;;  %v14948_v3 = vld [vmem:[#allocation5 + $0x1264] sm:$0xf]  ;;  %v12019_v56 = vor.u32 %v14942_v49, %v12016_v10  ;;  %v15046_v49 = vld [vmem:[#allocation5 + $0x1574] sm:$0xf]  ;;  %v12432_v10 = vld [vmem:[#allocation5 + $0x1578] sm:$0xf0] }
 0x395   : > { %8880 = vmatpush.bf16.msra.mxu1 %v11827_v8  ;;  %v12040_v8 = vld [vmem:[#allocation5 + $0x1268] sm:$0xf0] }
 0x396   : > { %8893 = vmatpush.bf16.msra.mxu2 %v11891_v47  ;;  %v14964_v47 = vld [vmem:[#allocation5 + $0x12e4] sm:$0xf]  ;;  %v12043_v50 = vor.u32 %v14948_v3, %v12040_v8 }
 0x397   : > { %8906 = vmatpush.bf16.msra.mxu3 %v11955_v52  ;;  %v12168_v52 = vld [vmem:[#allocation5 + $0x1368] sm:$0xf0]  ;;  %v12107_v33 = vor.u32 %v14964_v47, %v12104_v6 }
 0x398   : > { %8868 = vmatpush.bf16.msra.mxu0 %v11755_v38  ;;  %v12171_v24 = vor.u32 %v14980_v29, %v12168_v52  ;;  %v12235_v38 = vor.u32 %v14996_v31, %v12232_v30  ;;  %v12072_v47 = vld [vmem:[#allocation5 + $0x12a8] sm:$0xf0]  ;;  %v14988_v31 = vld [vmem:[#allocation5 + $0x13a4] sm:$0xf] }
 0x399   : > { %8881 = vmatpush.bf16.msra.mxu1 %v11819_v20  ;;  %v14978_v20 = vld [vmem:[#allocation5 + $0x1354] sm:$0xf]  ;;  %v12136_v6 = vld [vmem:[#allocation5 + $0x1328] sm:$0xf0] }
 0x39a   : > { %8894 = vmatpush.bf16.msra.mxu2 %v11883_v43  ;;  %v12160_v43 = vld [vmem:[#allocation5 + $0x1358] sm:$0xf0]  ;;  %v12200_v30 = vld [vmem:[#allocation5 + $0x13a8] sm:$0xf0] }
 0x39b   : > { %8907 = vmatpush.bf16.msra.mxu3 %v11947_v42  ;;  %v12224_v42 = vld [vmem:[#allocation5 + $0x13d8] sm:$0xf0]  ;;  %v12163_v35 = vor.u32 %v14978_v20, %v12160_v43  ;;  %v12203_v20 = vor.u32 %v14988_v31, %v12200_v30  ;;  %v15026_v30 = vld [vmem:[#allocation5 + $0x14d4] sm:$0xf] }
 0x39c   : > { %8869 = vmatpush.bf16.msra.mxu0 %v11747_v22  ;;  %v12024_v22 = vld [vmem:[#allocation5 + $0x1248] sm:$0xf0]  ;;  %v12227_v37 = vor.u32 %v14994_v41, %v12224_v42  ;;  %v12064_v43 = vld [vmem:[#allocation5 + $0x1298] sm:$0xf0]  ;;  %v14986_v41 = vld [vmem:[#allocation5 + $0x1394] sm:$0xf] }
 0x39d   : > { %8882 = vmatpush.bf16.msra.mxu1 %v11811_v14  ;;  %v12088_v14 = vld [vmem:[#allocation5 + $0x12c8] sm:$0xf0]  ;;  %v12027_v5 = vor.u32 %v14944_v21, %v12024_v22  ;;  %v12192_v42 = vld [vmem:[#allocation5 + $0x1398] sm:$0xf0]  ;;  %v14952_v22 = vld [vmem:[#allocation5 + $0x1284] sm:$0xf] }
 0x39e   : > { %8895 = vmatpush.bf16.msra.mxu2 %v11875_v15  ;;  %v14976_v15 = vld [vmem:[#allocation5 + $0x1344] sm:$0xf]  ;;  %v12091_v7 = vor.u32 %v14960_v0, %v12088_v14  ;;  %v12056_v0 = vld [vmem:[#allocation5 + $0x1288] sm:$0xf0]  ;;  %v12195_v14 = vor.u32 %v14986_v41, %v12192_v42  ;;  %v12288_v31 = vld [vmem:[#allocation5 + $0x1458] sm:$0xf0] }
 0x39f   : > { %8908 = vmatpush.bf16.msra.mxu3 %v11939_v26  ;;  %v12216_v26 = vld [vmem:[#allocation5 + $0x13c8] sm:$0xf0]  ;;  %v12155_v32 = vor.u32 %v14976_v15, %v12152_v57  ;;  %v14984_v57 = vld [vmem:[#allocation5 + $0x1384] sm:$0xf] }
 0x3a0   : > { %8870 = vmatpush.bf16.msra.mxu0 %v11739_v13  ;;  %v8664_v4 = vpop.f32.mrf.mxu0  ;;  %v12219_v13 = vor.u32 %v14992_v45, %v12216_v26  ;;  %v12120_v15 = vld [vmem:[#allocation5 + $0x1308] sm:$0xf0]  ;;  %v15014_v26 = vld [vmem:[#allocation5 + $0x1474] sm:$0xf]  ;;  %v15008_v42 = vld [vmem:[#allocation5 + $0x1444] sm:$0xf] }
 0x3a1   : > { %8883 = vmatpush.bf16.msra.mxu1 %v11803_v39  ;;  %v8665_v46 = vadd.f32 %v8664_v4, %v16364_v2  ;;  %v8677_v1 = vpop.f32.mrf.mxu1  ;;  %v12144_v39 = vld [vmem:[#allocation5 + $0x1338] sm:$0xf0]  ;;  %v12083_v2 = vor.u32 %v14958_v59, %v12080_v17  ;;  %v12184_v4 = vld [vmem:[#allocation5 + $0x1388] sm:$0xf0]  ;;  %v12059_v59 = vor.u32 %v14952_v22, %v12056_v0 }
 0x3a2   : > { %8896 = vmatpush.bf16.msra.mxu2 %v11867_v12  ;;  %v14990_v12 = vld [vmem:[#allocation5 + $0x13b4] sm:$0xf]  ;;  %v12496_v17 = vld [vmem:[#allocation5 + $0x15f8] sm:$0xf0]  ;;  %v12408_v22 = vld [vmem:[#allocation5 + $0x1548] sm:$0xf0] }
 0x3a3   : > { %8909 = vmatpush.bf16.msra.mxu3 %v11931_v16  ;;  %8871 = vmatmul.bf16.vlgmr.msra.gmra.mxu0 %v16564_v62  ;;  %v8678_v60 = vadd.f32 %v8677_v1, %v8665_v46  ;;  %v12147_v16 = vor.u32 %v14974_v11, %v12144_v39  ;;  %v12211_v3 = vor.u32 %v14990_v12, %v12208_v40  ;;  %v14938_v62 = vld [vmem:[#allocation5 + $0x1214] sm:$0xf]  ;;  %v12304_v46 = vld [vmem:[#allocation5 + $0x1478] sm:$0xf0] }
 0x3a4   : > { %8915 = vmatpush.bf16.msrb.mxu0 %v12051_v63  ;;  %8884 = vmatmul.bf16.vlgmr.msra.gmra.mxu1 %v16566_v23  ;;  %v14940_v63 = vld [vmem:[#allocation5 + $0x1224] sm:$0xf]  ;;  %v12128_v23 = vld [vmem:[#allocation5 + $0x1318] sm:$0xf0]  ;;  %v12187_v11 = vor.u32 %v14984_v57, %v12184_v4  ;;  %v12307_v39 = vor.u32 %v15014_v26, %v12304_v46  ;;  %v12435_v40 = vor.u32 %v15046_v49, %v12432_v10  ;;  %v15006_v46 = vld [vmem:[#allocation5 + $0x1434] sm:$0xf] }
 0x3a5   : > { %8928 = vmatpush.bf16.msrb.mxu1 %v12115_v61  ;;  %8897 = vmatmul.bf16.vlgmr.msra.gmra.mxu2 %v16565_v19  ;;  %v12008_v61 = vld [vmem:[#allocation5 + $0x1228] sm:$0xf0]  ;;  %v14970_v19 = vld [vmem:[#allocation5 + $0x1314] sm:$0xf]  ;;  %v12336_v49 = vld [vmem:[#allocation5 + $0x14b8] sm:$0xf0] }
 0x3a6   : > { %8941 = vmatpush.bf16.msrb.mxu2 %v12179_v25  ;;  %8910 = vmatmul.bf16.vlgmr.msra.gmra.mxu3 %v16567_v28  ;;  %v14956_v25 = vld [vmem:[#allocation5 + $0x12a4] sm:$0xf]  ;;  %v12131_v21 = vor.u32 %v14970_v19, %v12128_v23  ;;  %v15038_v10 = vld [vmem:[#allocation5 + $0x1534] sm:$0xf] }
 0x3a7   : > { %8954 = vmatpush.bf16.msrb.mxu3 %v12243_v51  ;;  %v14972_v51 = vld [vmem:[#allocation5 + $0x1324] sm:$0xf]  ;;  %v12075_v36 = vor.u32 %v14956_v25, %v12072_v47  ;;  %v12488_v47 = vld [vmem:[#allocation5 + $0x15e8] sm:$0xf0] }
 0x3a8   : > { %8916 = vmatpush.bf16.msrb.mxu0 %v12043_v50  ;;  %v8690_v8 = vpop.f32.mrf.mxu2  ;;  %v8666_v50 = vpop.f32.mrf.mxu0  ;;  %v12139_v9 = vor.u32 %v14972_v51, %v12136_v6  ;;  %v15044_v25 = vld [vmem:[#allocation5 + $0x1564] sm:$0xf] }
 0x3a9   : > { %8929 = vmatpush.bf16.msrb.mxu1 %v12107_v33  ;;  %v8691_v29 = vadd.f32 %v8690_v8, %v8678_v60  ;;  %v8703_v52 = vpop.f32.mrf.mxu3  ;;  %v12011_v33 = vor.u32 %v14940_v63, %v12008_v61  ;;  %v15062_v60 = vld [vmem:[#allocation5 + $0x15f4] sm:$0xf]  ;;  %v12360_v61 = vld [vmem:[#allocation5 + $0x14e8] sm:$0xf0]  ;;  %v15060_v8 = vld [vmem:[#allocation5 + $0x15e4] sm:$0xf] }
 0x3aa   : > { %8942 = vmatpush.bf16.msrb.mxu2 %v12171_v24  ;;  %v8679_v24 = vpop.f32.mrf.mxu1  ;;  %v12499_v63 = vor.u32 %v15062_v60, %v12496_v17  ;;  %v16568_v50 = vld [vmem:[#allocation24_spill] sm:$0xff]  ;;  %v12464_v60 = vld [vmem:[#allocation5 + $0x15b8] sm:$0xf0] }
 0x3ab   : > { %8955 = vmatpush.bf16.msrb.mxu3 %v12235_v38  ;;  %v16371_v58 = vadd.f32 %v8703_v52, %v8691_v29  ;;  %v12000_v38 = vld [vmem:[#allocation5 + $0x1218] sm:$0xf0]  ;;  %v15010_v52 = vld [vmem:[#allocation5 + $0x1454] sm:$0xf] }
 0x3ac   : > { %8917 = vmatpush.bf16.msrb.mxu0 %v12035_v55  ;;  %v12003_v28 = vor.u32 %v14938_v62, %v12000_v38  ;;  %v14936_v55 = vld [vmem:[#allocation5 + $0x1204] sm:$0xf]  ;;  %v12352_v24 = vld [vmem:[#allocation5 + $0x14d8] sm:$0xf0]  ;;  %v12291_v19 = vor.u32 %v15010_v52, %v12288_v31 }
 0x3ad   : > { %8930 = vmatpush.bf16.msrb.mxu1 %v12099_v44  ;;  %v11992_v44 = vld [vmem:[#allocation5 + $0x1208] sm:$0xf0]  ;;  %v16569_v62 = vld [vmem:[#allocation25_spill] sm:$0xff]  ;;  %v16570_v38 = vld [vmem:[#allocation26_spill] sm:$0xff]  ;;  %v12355_v23 = vor.u32 %v15026_v30, %v12352_v24 }
 0x3ae   : > { %8943 = vmatpush.bf16.msrb.mxu2 %v12163_v35  ;;  %v12067_v35 = vor.u32 %v14954_v18, %v12064_v43  ;;  %v15058_v18 = vld [vmem:[#allocation5 + $0x15d4] sm:$0xf]  ;;  %v16571_v43 = vld [vmem:[#allocation27_spill] sm:$0xff] }
 0x3af   : > { %8956 = vmatpush.bf16.msrb.mxu3 %v12227_v37  ;;  %v14968_v37 = vld [vmem:[#allocation5 + $0x1304] sm:$0xf]  ;;  %v15018_v24 = vld [vmem:[#allocation5 + $0x1494] sm:$0xf] }
 0x3b0   : > { %8918 = vmatpush.bf16.msrb.mxu0 %v12027_v5  ;;  %v8692_v45 = vpop.f32.mrf.mxu2  ;;  %v15030_v5 = vld [vmem:[#allocation5 + $0x14f4] sm:$0xf] }
 0x3b1   : > { %8931 = vmatpush.bf16.msrb.mxu1 %v12091_v7  ;;  %v8705_v1 = vpop.f32.mrf.mxu3  ;;  %v11995_v7 = vor.u32 %v14936_v55, %v11992_v44  ;;  %v15024_v55 = vld [vmem:[#allocation5 + $0x14c4] sm:$0xf] }
 0x3b2   : > { %8944 = vmatpush.bf16.msrb.mxu2 %v12155_v32  ;;  %v12368_v32 = vld [vmem:[#allocation5 + $0x14f8] sm:$0xf0]  ;;  %v15022_v1 = vld [vmem:[#allocation5 + $0x14b4] sm:$0xf] }
 0x3b3   : > { %8957 = vmatpush.bf16.msrb.mxu3 %v12219_v13  ;;  %v12123_v13 = vor.u32 %v14968_v37, %v12120_v15  ;;  %v12371_v12 = vor.u32 %v15030_v5, %v12368_v32  ;;  %v15056_v37 = vld [vmem:[#allocation5 + $0x15c4] sm:$0xf]  ;;  %v12272_v5 = vld [vmem:[#allocation5 + $0x1438] sm:$0xf0] }
 0x3b4   : > { %8919 = vmatpush.bf16.msrb.mxu0 %v12019_v56  ;;  %v15012_v56 = vld [vmem:[#allocation5 + $0x1464] sm:$0xf]  ;;  %v12275_v17 = vor.u32 %v15006_v46, %v12272_v5  ;;  %v15110_v46 = vld [vmem:[#allocation5 + $0x1774] sm:$0xf]  ;;  %v12688_v5 = vld [vmem:[#allocation5 + $0x1778] sm:$0xf0] }
 0x3b5   : > { %8932 = vmatpush.bf16.msrb.mxu1 %v12083_v2  ;;  %v12296_v2 = vld [vmem:[#allocation5 + $0x1468] sm:$0xf0] }
 0x3b6   : > { %8945 = vmatpush.bf16.msrb.mxu2 %v12147_v16  ;;  %v15028_v16 = vld [vmem:[#allocation5 + $0x14e4] sm:$0xf]  ;;  %v12299_v51 = vor.u32 %v15012_v56, %v12296_v2 }
 0x3b7   : > { %8958 = vmatpush.bf16.msrb.mxu3 %v12211_v3  ;;  %v12424_v3 = vld [vmem:[#allocation5 + $0x1568] sm:$0xf0]  ;;  %v12363_v6 = vor.u32 %v15028_v16, %v12360_v61 }
 0x3b8   : > { %8920 = vmatpush.bf16.msrb.mxu0 %v12011_v33  ;;  %v12427_v29 = vor.u32 %v15044_v25, %v12424_v3  ;;  %v12491_v33 = vor.u32 %v15060_v8, %v12488_v47  ;;  %v12328_v16 = vld [vmem:[#allocation5 + $0x14a8] sm:$0xf0]  ;;  %v15052_v8 = vld [vmem:[#allocation5 + $0x15a4] sm:$0xf] }
 0x3b9   : > { %8933 = vmatpush.bf16.msrb.mxu1 %v12075_v36  ;;  %v15042_v36 = vld [vmem:[#allocation5 + $0x1554] sm:$0xf]  ;;  %v12392_v61 = vld [vmem:[#allocation5 + $0x1528] sm:$0xf0] }
 0x3ba   : > { %8946 = vmatpush.bf16.msrb.mxu2 %v12139_v9  ;;  %v12416_v9 = vld [vmem:[#allocation5 + $0x1558] sm:$0xf0]  ;;  %v12456_v47 = vld [vmem:[#allocation5 + $0x15a8] sm:$0xf0] }
 0x3bb   : > { %8959 = vmatpush.bf16.msrb.mxu3 %v12203_v20  ;;  %v12480_v20 = vld [vmem:[#allocation5 + $0x15d8] sm:$0xf0]  ;;  %v12419_v41 = vor.u32 %v15042_v36, %v12416_v9  ;;  %v12459_v36 = vor.u32 %v15052_v8, %v12456_v47  ;;  %v15090_v47 = vld [vmem:[#allocation5 + $0x16d4] sm:$0xf] }
 0x3bc   : > { %8921 = vmatpush.bf16.msrb.mxu0 %v12003_v28  ;;  %v12280_v28 = vld [vmem:[#allocation5 + $0x1448] sm:$0xf0]  ;;  %v12483_v44 = vor.u32 %v15058_v18, %v12480_v20  ;;  %v12320_v9 = vld [vmem:[#allocation5 + $0x1498] sm:$0xf0]  ;;  %v15050_v18 = vld [vmem:[#allocation5 + $0x1594] sm:$0xf] }
 0x3bd   : > { %8934 = vmatpush.bf16.msrb.mxu1 %v12067_v35  ;;  %v12344_v35 = vld [vmem:[#allocation5 + $0x14c8] sm:$0xf0]  ;;  %v12283_v57 = vor.u32 %v15008_v42, %v12280_v28  ;;  %v12448_v20 = vld [vmem:[#allocation5 + $0x1598] sm:$0xf0]  ;;  %v15016_v28 = vld [vmem:[#allocation5 + $0x1484] sm:$0xf] }
 0x3be   : > { %8947 = vmatpush.bf16.msrb.mxu2 %v12131_v21  ;;  %v15040_v21 = vld [vmem:[#allocation5 + $0x1544] sm:$0xf]  ;;  %v12347_v45 = vor.u32 %v15024_v55, %v12344_v35  ;;  %v12312_v55 = vld [vmem:[#allocation5 + $0x1488] sm:$0xf0]  ;;  %v12451_v35 = vor.u32 %v15050_v18, %v12448_v20  ;;  %v12544_v8 = vld [vmem:[#allocation5 + $0x1658] sm:$0xf0] }
 0x3bf   : > { %8960 = vmatpush.bf16.msrb.mxu3 %v12195_v14  ;;  %v12472_v14 = vld [vmem:[#allocation5 + $0x15c8] sm:$0xf0]  ;;  %v12411_v26 = vor.u32 %v15040_v21, %v12408_v22  ;;  %v15048_v22 = vld [vmem:[#allocation5 + $0x1584] sm:$0xf] }
 0x3c0   : > { %8922 = vmatpush.bf16.msrb.mxu0 %v11995_v7  ;;  %v8716_v0 = vpop.f32.mrf.mxu0  ;;  %v12475_v7 = vor.u32 %v15056_v37, %v12472_v14  ;;  %v12376_v21 = vld [vmem:[#allocation5 + $0x1508] sm:$0xf0]  ;;  %v15078_v14 = vld [vmem:[#allocation5 + $0x1674] sm:$0xf]  ;;  %v15072_v20 = vld [vmem:[#allocation5 + $0x1644] sm:$0xf] }
 0x3c1   : > { %8935 = vmatpush.bf16.msrb.mxu1 %v12059_v59  ;;  %v8717_v15 = vadd.f32 %v8716_v0, %v16371_v58  ;;  %v8729_v4 = vpop.f32.mrf.mxu1  ;;  %v12400_v59 = vld [vmem:[#allocation5 + $0x1538] sm:$0xf0]  ;;  %v12339_v58 = vor.u32 %v15022_v1, %v12336_v49  ;;  %v12440_v0 = vld [vmem:[#allocation5 + $0x1588] sm:$0xf0]  ;;  %v12315_v1 = vor.u32 %v15016_v28, %v12312_v55 }
 0x3c2   : > { %8948 = vmatpush.bf16.msrb.mxu2 %v12123_v13  ;;  %v15054_v13 = vld [vmem:[#allocation5 + $0x15b4] sm:$0xf]  ;;  %v12752_v49 = vld [vmem:[#allocation5 + $0x17f8] sm:$0xf0]  ;;  %v12664_v28 = vld [vmem:[#allocation5 + $0x1748] sm:$0xf0] }
 0x3c3   : > { %8961 = vmatpush.bf16.msrb.mxu3 %v12187_v11  ;;  %8923 = vmatmul.bf16.vlgmr.msrb.gmra.mxu0 %v16568_v50  ;;  %v8730_v32 = vadd.f32 %v8729_v4, %v8717_v15  ;;  %v12403_v11 = vor.u32 %v15038_v10, %v12400_v59  ;;  %v12467_v56 = vor.u32 %v15054_v13, %v12464_v60  ;;  %v15002_v50 = vld [vmem:[#allocation5 + $0x1414] sm:$0xf]  ;;  %v12560_v15 = vld [vmem:[#allocation5 + $0x1678] sm:$0xf0] }
 0x3c4   : > { %8967 = vmatpush.bf16.msra.mxu0 %v12307_v39  ;;  %8936 = vmatmul.bf16.vlgmr.msrb.gmra.mxu1 %v16570_v38  ;;  %v15004_v39 = vld [vmem:[#allocation5 + $0x1424] sm:$0xf]  ;;  %v12384_v38 = vld [vmem:[#allocation5 + $0x1518] sm:$0xf0]  ;;  %v12443_v10 = vor.u32 %v15048_v22, %v12440_v0  ;;  %v12563_v59 = vor.u32 %v15078_v14, %v12560_v15  ;;  %v12691_v60 = vor.u32 %v15110_v46, %v12688_v5  ;;  %v15070_v15 = vld [vmem:[#allocation5 + $0x1634] sm:$0xf] }
 0x3c5   : > { %8980 = vmatpush.bf16.msra.mxu1 %v12371_v12  ;;  %8949 = vmatmul.bf16.vlgmr.msrb.gmra.mxu2 %v16569_v62  ;;  %v12264_v12 = vld [vmem:[#allocation5 + $0x1428] sm:$0xf0]  ;;  %v15034_v62 = vld [vmem:[#allocation5 + $0x1514] sm:$0xf]  ;;  %v12592_v46 = vld [vmem:[#allocation5 + $0x16b8] sm:$0xf0] }
 0x3c6   : > { %8993 = vmatpush.bf16.msra.mxu2 %v12435_v40  ;;  %8962 = vmatmul.bf16.vlgmr.msrb.gmra.mxu3 %v16571_v43  ;;  %v15020_v40 = vld [vmem:[#allocation5 + $0x14a4] sm:$0xf]  ;;  %v12387_v42 = vor.u32 %v15034_v62, %v12384_v38  ;;  %v15102_v5 = vld [vmem:[#allocation5 + $0x1734] sm:$0xf] }
 0x3c7   : > { %9006 = vmatpush.bf16.msra.mxu3 %v12499_v63  ;;  %v15036_v63 = vld [vmem:[#allocation5 + $0x1524] sm:$0xf]  ;;  %v12331_v31 = vor.u32 %v15020_v40, %v12328_v16  ;;  %v12744_v16 = vld [vmem:[#allocation5 + $0x17e8] sm:$0xf0] }
 0x3c8   : > { %8968 = vmatpush.bf16.msra.mxu0 %v12299_v51  ;;  %v8742_v2 = vpop.f32.mrf.mxu2  ;;  %v8718_v51 = vpop.f32.mrf.mxu0  ;;  %v12395_v30 = vor.u32 %v15036_v63, %v12392_v61  ;;  %v15108_v40 = vld [vmem:[#allocation5 + $0x1764] sm:$0xf] }
 0x3c9   : > { %8981 = vmatpush.bf16.msra.mxu1 %v12363_v6  ;;  %v8743_v25 = vadd.f32 %v8742_v2, %v8730_v32  ;;  %v8755_v3 = vpop.f32.mrf.mxu3  ;;  %v12267_v6 = vor.u32 %v15004_v39, %v12264_v12  ;;  %v15126_v32 = vld [vmem:[#allocation5 + $0x17f4] sm:$0xf]  ;;  %v12616_v12 = vld [vmem:[#allocation5 + $0x16e8] sm:$0xf0]  ;;  %v15124_v2 = vld [vmem:[#allocation5 + $0x17e4] sm:$0xf] }
 0x3ca   : > { %8994 = vmatpush.bf16.msra.mxu2 %v12427_v29  ;;  %v8731_v29 = vpop.f32.mrf.mxu1  ;;  %v12755_v39 = vor.u32 %v15126_v32, %v12752_v49  ;;  %v16572_v51 = vld [vmem:[#allocation28_spill] sm:$0xff]  ;;  %v12720_v32 = vld [vmem:[#allocation5 + $0x17b8] sm:$0xf0] }
 0x3cb   : > { %9007 = vmatpush.bf16.msra.mxu3 %v12491_v33  ;;  %v16378_v52 = vadd.f32 %v8755_v3, %v8743_v25  ;;  %v12256_v33 = vld [vmem:[#allocation5 + $0x1418] sm:$0xf0]  ;;  %v15074_v3 = vld [vmem:[#allocation5 + $0x1654] sm:$0xf] }
 0x3cc   : > { %8969 = vmatpush.bf16.msra.mxu0 %v12291_v19  ;;  %v12259_v43 = vor.u32 %v15002_v50, %v12256_v33  ;;  %v15000_v19 = vld [vmem:[#allocation5 + $0x1404] sm:$0xf]  ;;  %v12608_v29 = vld [vmem:[#allocation5 + $0x16d8] sm:$0xf0]  ;;  %v12547_v62 = vor.u32 %v15074_v3, %v12544_v8 }
 0x3cd   : > { %8982 = vmatpush.bf16.msra.mxu1 %v12355_v23  ;;  %v12248_v23 = vld [vmem:[#allocation5 + $0x1408] sm:$0xf0]  ;;  %v16573_v50 = vld [vmem:[#allocation29_spill] sm:$0xff]  ;;  %v16574_v33 = vld [vmem:[#allocation30_spill] sm:$0xff]  ;;  %v12611_v38 = vor.u32 %v15090_v47, %v12608_v29 }
 0x3ce   : > { %8995 = vmatpush.bf16.msra.mxu2 %v12419_v41  ;;  %v12323_v41 = vor.u32 %v15018_v24, %v12320_v9  ;;  %v15122_v24 = vld [vmem:[#allocation5 + $0x17d4] sm:$0xf]  ;;  %v16575_v9 = vld [vmem:[#allocation31_spill] sm:$0xff] }
 0x3cf   : > { %9008 = vmatpush.bf16.msra.mxu3 %v12483_v44  ;;  %v15032_v44 = vld [vmem:[#allocation5 + $0x1504] sm:$0xf]  ;;  %v15082_v29 = vld [vmem:[#allocation5 + $0x1694] sm:$0xf] }
 0x3d0   : > { %8970 = vmatpush.bf16.msra.mxu0 %v12283_v57  ;;  %v8744_v37 = vpop.f32.mrf.mxu2  ;;  %v15094_v57 = vld [vmem:[#allocation5 + $0x16f4] sm:$0xf] }
 0x3d1   : > { %8983 = vmatpush.bf16.msra.mxu1 %v12347_v45  ;;  %v8757_v4 = vpop.f32.mrf.mxu3  ;;  %v12251_v45 = vor.u32 %v15000_v19, %v12248_v23  ;;  %v15088_v19 = vld [vmem:[#allocation5 + $0x16c4] sm:$0xf] }
 0x3d2   : > { %8996 = vmatpush.bf16.msra.mxu2 %v12411_v26  ;;  %v12624_v26 = vld [vmem:[#allocation5 + $0x16f8] sm:$0xf0]  ;;  %v15086_v4 = vld [vmem:[#allocation5 + $0x16b4] sm:$0xf] }
 0x3d3   : > { %9009 = vmatpush.bf16.msra.mxu3 %v12475_v7  ;;  %v12379_v7 = vor.u32 %v15032_v44, %v12376_v21  ;;  %v12627_v13 = vor.u32 %v15094_v57, %v12624_v26  ;;  %v15120_v44 = vld [vmem:[#allocation5 + $0x17c4] sm:$0xf]  ;;  %v12528_v57 = vld [vmem:[#allocation5 + $0x1638] sm:$0xf0] }
 0x3d4   : > { %8971 = vmatpush.bf16.msra.mxu0 %v12275_v17  ;;  %v15076_v17 = vld [vmem:[#allocation5 + $0x1664] sm:$0xf]  ;;  %v12531_v49 = vor.u32 %v15070_v15, %v12528_v57  ;;  %v15174_v15 = vld [vmem:[#allocation5 + $0x1974] sm:$0xf]  ;;  %v12944_v57 = vld [vmem:[#allocation5 + $0x1978] sm:$0xf0] }
 0x3d5   : > { %8984 = vmatpush.bf16.msra.mxu1 %v12339_v58  ;;  %v12552_v58 = vld [vmem:[#allocation5 + $0x1668] sm:$0xf0] }
 0x3d6   : > { %8997 = vmatpush.bf16.msra.mxu2 %v12403_v11  ;;  %v15092_v11 = vld [vmem:[#allocation5 + $0x16e4] sm:$0xf]  ;;  %v12555_v63 = vor.u32 %v15076_v17, %v12552_v58 }
 0x3d7   : > { %9010 = vmatpush.bf16.msra.mxu3 %v12467_v56  ;;  %v12680_v56 = vld [vmem:[#allocation5 + $0x1768] sm:$0xf0]  ;;  %v12619_v61 = vor.u32 %v15092_v11, %v12616_v12 }
 0x3d8   : > { %8972 = vmatpush.bf16.msra.mxu0 %v12267_v6  ;;  %v12683_v25 = vor.u32 %v15108_v40, %v12680_v56  ;;  %v12747_v6 = vor.u32 %v15124_v2, %v12744_v16  ;;  %v12584_v11 = vld [vmem:[#allocation5 + $0x16a8] sm:$0xf0]  ;;  %v15116_v2 = vld [vmem:[#allocation5 + $0x17a4] sm:$0xf] }
 0x3d9   : > { %8985 = vmatpush.bf16.msra.mxu1 %v12331_v31  ;;  %v15106_v31 = vld [vmem:[#allocation5 + $0x1754] sm:$0xf]  ;;  %v12648_v12 = vld [vmem:[#allocation5 + $0x1728] sm:$0xf0] }
 0x3da   : > { %8998 = vmatpush.bf16.msra.mxu2 %v12395_v30  ;;  %v12672_v30 = vld [vmem:[#allocation5 + $0x1758] sm:$0xf0]  ;;  %v12712_v16 = vld [vmem:[#allocation5 + $0x17a8] sm:$0xf0] }
 0x3db   : > { %9011 = vmatpush.bf16.msra.mxu3 %v12459_v36  ;;  %v12736_v36 = vld [vmem:[#allocation5 + $0x17d8] sm:$0xf0]  ;;  %v12675_v18 = vor.u32 %v15106_v31, %v12672_v30  ;;  %v12715_v31 = vor.u32 %v15116_v2, %v12712_v16  ;;  %v15154_v16 = vld [vmem:[#allocation5 + $0x18d4] sm:$0xf] }
 0x3dc   : > { %8973 = vmatpush.bf16.msra.mxu0 %v12259_v43  ;;  %v12536_v43 = vld [vmem:[#allocation5 + $0x1648] sm:$0xf0]  ;;  %v12739_v23 = vor.u32 %v15122_v24, %v12736_v36  ;;  %v12576_v30 = vld [vmem:[#allocation5 + $0x1698] sm:$0xf0]  ;;  %v15114_v24 = vld [vmem:[#allocation5 + $0x1794] sm:$0xf] }
 0x3dd   : > { %8986 = vmatpush.bf16.msra.mxu1 %v12323_v41  ;;  %v12600_v41 = vld [vmem:[#allocation5 + $0x16c8] sm:$0xf0]  ;;  %v12539_v22 = vor.u32 %v15072_v20, %v12536_v43  ;;  %v12704_v36 = vld [vmem:[#allocation5 + $0x1798] sm:$0xf0]  ;;  %v15080_v43 = vld [vmem:[#allocation5 + $0x1684] sm:$0xf] }
 0x3de   : > { %8999 = vmatpush.bf16.msra.mxu2 %v12387_v42  ;;  %v15104_v42 = vld [vmem:[#allocation5 + $0x1744] sm:$0xf]  ;;  %v12603_v37 = vor.u32 %v15088_v19, %v12600_v41  ;;  %v12568_v19 = vld [vmem:[#allocation5 + $0x1688] sm:$0xf0]  ;;  %v12707_v41 = vor.u32 %v15114_v24, %v12704_v36  ;;  %v12800_v2 = vld [vmem:[#allocation5 + $0x1858] sm:$0xf0] }
 0x3df   : > { %9012 = vmatpush.bf16.msra.mxu3 %v12451_v35  ;;  %v12728_v35 = vld [vmem:[#allocation5 + $0x17c8] sm:$0xf0]  ;;  %v12667_v14 = vor.u32 %v15104_v42, %v12664_v28  ;;  %v15112_v28 = vld [vmem:[#allocation5 + $0x1784] sm:$0xf] }
 0x3e0   : > { %8974 = vmatpush.bf16.msra.mxu0 %v12251_v45  ;;  %v8768_v55 = vpop.f32.mrf.mxu0  ;;  %v12731_v45 = vor.u32 %v15120_v44, %v12728_v35  ;;  %v12632_v42 = vld [vmem:[#allocation5 + $0x1708] sm:$0xf0]  ;;  %v15142_v35 = vld [vmem:[#allocation5 + $0x1874] sm:$0xf]  ;;  %v15136_v36 = vld [vmem:[#allocation5 + $0x1844] sm:$0xf] }
 0x3e1   : > { %8987 = vmatpush.bf16.msra.mxu1 %v12315_v1  ;;  %v8769_v21 = vadd.f32 %v8768_v55, %v16378_v52  ;;  %v8781_v0 = vpop.f32.mrf.mxu1  ;;  %v12656_v1 = vld [vmem:[#allocation5 + $0x1738] sm:$0xf0]  ;;  %v12595_v52 = vor.u32 %v15086_v4, %v12592_v46  ;;  %v12696_v55 = vld [vmem:[#allocation5 + $0x1788] sm:$0xf0]  ;;  %v12571_v4 = vor.u32 %v15080_v43, %v12568_v19 }
 0x3e2   : > { %9000 = vmatpush.bf16.msra.mxu2 %v12379_v7  ;;  %v15118_v7 = vld [vmem:[#allocation5 + $0x17b4] sm:$0xf]  ;;  %v13008_v46 = vld [vmem:[#allocation5 + $0x19f8] sm:$0xf0]  ;;  %v12920_v43 = vld [vmem:[#allocation5 + $0x1948] sm:$0xf0] }
 0x3e3   : > { %9013 = vmatpush.bf16.msra.mxu3 %v12443_v10  ;;  %8975 = vmatmul.bf16.vlgmr.msra.gmra.mxu0 %v16572_v51  ;;  %v8782_v26 = vadd.f32 %v8781_v0, %v8769_v21  ;;  %v12659_v10 = vor.u32 %v15102_v5, %v12656_v1  ;;  %v12723_v17 = vor.u32 %v15118_v7, %v12720_v32  ;;  %v15066_v51 = vld [vmem:[#allocation5 + $0x1614] sm:$0xf]  ;;  %v12816_v21 = vld [vmem:[#allocation5 + $0x1878] sm:$0xf0] }
 0x3e4   : > { %9019 = vmatpush.bf16.msrb.mxu0 %v12563_v59  ;;  %8988 = vmatmul.bf16.vlgmr.msra.gmra.mxu1 %v16574_v33  ;;  %v15068_v59 = vld [vmem:[#allocation5 + $0x1624] sm:$0xf]  ;;  %v12640_v33 = vld [vmem:[#allocation5 + $0x1718] sm:$0xf0]  ;;  %v12699_v5 = vor.u32 %v15112_v28, %v12696_v55  ;;  %v12819_v1 = vor.u32 %v15142_v35, %v12816_v21  ;;  %v12947_v32 = vor.u32 %v15174_v15, %v12944_v57  ;;  %v15134_v21 = vld [vmem:[#allocation5 + $0x1834] sm:$0xf] }
 0x3e5   : > { %9032 = vmatpush.bf16.msrb.mxu1 %v12627_v13  ;;  %9001 = vmatmul.bf16.vlgmr.msra.gmra.mxu2 %v16573_v50  ;;  %v12520_v13 = vld [vmem:[#allocation5 + $0x1628] sm:$0xf0]  ;;  %v15098_v50 = vld [vmem:[#allocation5 + $0x1714] sm:$0xf]  ;;  %v12848_v15 = vld [vmem:[#allocation5 + $0x18b8] sm:$0xf0] }
 0x3e6   : > { %9045 = vmatpush.bf16.msrb.mxu2 %v12691_v60  ;;  %9014 = vmatmul.bf16.vlgmr.msra.gmra.mxu3 %v16575_v9  ;;  %v15084_v60 = vld [vmem:[#allocation5 + $0x16a4] sm:$0xf]  ;;  %v12643_v20 = vor.u32 %v15098_v50, %v12640_v33  ;;  %v15166_v57 = vld [vmem:[#allocation5 + $0x1934] sm:$0xf] }
 0x3e7   : > { %9058 = vmatpush.bf16.msrb.mxu3 %v12755_v39  ;;  %v15100_v39 = vld [vmem:[#allocation5 + $0x1724] sm:$0xf]  ;;  %v12587_v8 = vor.u32 %v15084_v60, %v12584_v11  ;;  %v13000_v11 = vld [vmem:[#allocation5 + $0x19e8] sm:$0xf0] }
 0x3e8   : > { %9020 = vmatpush.bf16.msrb.mxu0 %v12555_v63  ;;  %v8794_v58 = vpop.f32.mrf.mxu2  ;;  %v8770_v63 = vpop.f32.mrf.mxu0  ;;  %v12651_v47 = vor.u32 %v15100_v39, %v12648_v12  ;;  %v15172_v60 = vld [vmem:[#allocation5 + $0x1964] sm:$0xf] }
 0x3e9   : > { %9033 = vmatpush.bf16.msrb.mxu1 %v12619_v61  ;;  %v8795_v40 = vadd.f32 %v8794_v58, %v8782_v26  ;;  %v8807_v56 = vpop.f32.mrf.mxu3  ;;  %v12523_v61 = vor.u32 %v15068_v59, %v12520_v13  ;;  %v15190_v26 = vld [vmem:[#allocation5 + $0x19f4] sm:$0xf]  ;;  %v12872_v13 = vld [vmem:[#allocation5 + $0x18e8] sm:$0xf0]  ;;  %v15188_v58 = vld [vmem:[#allocation5 + $0x19e4] sm:$0xf] }
 0x3ea   : > { %9046 = vmatpush.bf16.msrb.mxu2 %v12683_v25  ;;  %v8783_v25 = vpop.f32.mrf.mxu1  ;;  %v13011_v59 = vor.u32 %v15190_v26, %v13008_v46  ;;  %v16576_v63 = vld [vmem:[#allocation32_spill] sm:$0xff]  ;;  %v12976_v26 = vld [vmem:[#allocation5 + $0x19b8] sm:$0xf0] }
 0x3eb   : > { %9059 = vmatpush.bf16.msrb.mxu3 %v12747_v6  ;;  %v16385_v3 = vadd.f32 %v8807_v56, %v8795_v40  ;;  %v12512_v6 = vld [vmem:[#allocation5 + $0x1618] sm:$0xf0]  ;;  %v15138_v56 = vld [vmem:[#allocation5 + $0x1854] sm:$0xf] }
 0x3ec   : > { %9021 = vmatpush.bf16.msrb.mxu0 %v12547_v62  ;;  %v12515_v9 = vor.u32 %v15066_v51, %v12512_v6  ;;  %v15064_v62 = vld [vmem:[#allocation5 + $0x1604] sm:$0xf]  ;;  %v12864_v25 = vld [vmem:[#allocation5 + $0x18d8] sm:$0xf0]  ;;  %v12803_v50 = vor.u32 %v15138_v56, %v12800_v2 }
 0x3ed   : > { %9034 = vmatpush.bf16.msrb.mxu1 %v12611_v38  ;;  %v12504_v38 = vld [vmem:[#allocation5 + $0x1608] sm:$0xf0]  ;;  %v16577_v51 = vld [vmem:[#allocation33_spill] sm:$0xff]  ;;  %v16578_v6 = vld [vmem:[#allocation34_spill] sm:$0xff]  ;;  %v12867_v33 = vor.u32 %v15154_v16, %v12864_v25 }
 0x3ee   : > { %9047 = vmatpush.bf16.msrb.mxu2 %v12675_v18  ;;  %v12579_v18 = vor.u32 %v15082_v29, %v12576_v30  ;;  %v15186_v29 = vld [vmem:[#allocation5 + $0x19d4] sm:$0xf]  ;;  %v16579_v30 = vld [vmem:[#allocation35_spill] sm:$0xff] }
 0x3ef   : > { %9060 = vmatpush.bf16.msrb.mxu3 %v12739_v23  ;;  %v15096_v23 = vld [vmem:[#allocation5 + $0x1704] sm:$0xf]  ;;  %v15146_v25 = vld [vmem:[#allocation5 + $0x1894] sm:$0xf] }
 0x3f0   : > { %9022 = vmatpush.bf16.msrb.mxu0 %v12539_v22  ;;  %v8796_v44 = vpop.f32.mrf.mxu2  ;;  %v15158_v22 = vld [vmem:[#allocation5 + $0x18f4] sm:$0xf] }
 0x3f1   : > { %9035 = vmatpush.bf16.msrb.mxu1 %v12603_v37  ;;  %v8809_v0 = vpop.f32.mrf.mxu3  ;;  %v12507_v37 = vor.u32 %v15064_v62, %v12504_v38  ;;  %v15152_v62 = vld [vmem:[#allocation5 + $0x18c4] sm:$0xf] }
 0x3f2   : > { %9048 = vmatpush.bf16.msrb.mxu2 %v12667_v14  ;;  %v12880_v14 = vld [vmem:[#allocation5 + $0x18f8] sm:$0xf0]  ;;  %v15150_v0 = vld [vmem:[#allocation5 + $0x18b4] sm:$0xf] }
 0x3f3   : > { %9061 = vmatpush.bf16.msrb.mxu3 %v12731_v45  ;;  %v12635_v45 = vor.u32 %v15096_v23, %v12632_v42  ;;  %v12883_v7 = vor.u32 %v15158_v22, %v12880_v14  ;;  %v15184_v23 = vld [vmem:[#allocation5 + $0x19c4] sm:$0xf]  ;;  %v12784_v22 = vld [vmem:[#allocation5 + $0x1838] sm:$0xf0] }
 0x3f4   : > { %9023 = vmatpush.bf16.msrb.mxu0 %v12531_v49  ;;  %v15140_v49 = vld [vmem:[#allocation5 + $0x1864] sm:$0xf]  ;;  %v12787_v46 = vor.u32 %v15134_v21, %v12784_v22  ;;  %v15238_v21 = vld [vmem:[#allocation5 + $0x1b74] sm:$0xf]  ;;  %v13200_v22 = vld [vmem:[#allocation5 + $0x1b78] sm:$0xf0] }
 0x3f5   : > { %9036 = vmatpush.bf16.msrb.mxu1 %v12595_v52  ;;  %v12808_v52 = vld [vmem:[#allocation5 + $0x1868] sm:$0xf0] }
 0x3f6   : > { %9049 = vmatpush.bf16.msrb.mxu2 %v12659_v10  ;;  %v15156_v10 = vld [vmem:[#allocation5 + $0x18e4] sm:$0xf]  ;;  %v12811_v39 = vor.u32 %v15140_v49, %v12808_v52 }
 0x3f7   : > { %9062 = vmatpush.bf16.msrb.mxu3 %v12723_v17  ;;  %v12936_v17 = vld [vmem:[#allocation5 + $0x1968] sm:$0xf0]  ;;  %v12875_v12 = vor.u32 %v15156_v10, %v12872_v13 }
 0x3f8   : > { %9024 = vmatpush.bf16.msrb.mxu0 %v12523_v61  ;;  %v12939_v40 = vor.u32 %v15172_v60, %v12936_v17  ;;  %v13003_v61 = vor.u32 %v15188_v58, %v13000_v11  ;;  %v12840_v10 = vld [vmem:[#allocation5 + $0x18a8] sm:$0xf0]  ;;  %v15180_v58 = vld [vmem:[#allocation5 + $0x19a4] sm:$0xf] }
 0x3f9   : > { %9037 = vmatpush.bf16.msrb.mxu1 %v12587_v8  ;;  %v15170_v8 = vld [vmem:[#allocation5 + $0x1954] sm:$0xf]  ;;  %v12904_v13 = vld [vmem:[#allocation5 + $0x1928] sm:$0xf0] }
 0x3fa   : > { %9050 = vmatpush.bf16.msrb.mxu2 %v12651_v47  ;;  %v12928_v47 = vld [vmem:[#allocation5 + $0x1958] sm:$0xf0]  ;;  %v12968_v11 = vld [vmem:[#allocation5 + $0x19a8] sm:$0xf0] }
 0x3fb   : > { %9063 = vmatpush.bf16.msrb.mxu3 %v12715_v31  ;;  %v12992_v31 = vld [vmem:[#allocation5 + $0x19d8] sm:$0xf0]  ;;  %v12931_v24 = vor.u32 %v15170_v8, %v12928_v47  ;;  %v12971_v8 = vor.u32 %v15180_v58, %v12968_v11  ;;  %v15218_v11 = vld [vmem:[#allocation5 + $0x1ad4] sm:$0xf] }
 0x3fc   : > { %9025 = vmatpush.bf16.msrb.mxu0 %v12515_v9  ;;  %v12792_v9 = vld [vmem:[#allocation5 + $0x1848] sm:$0xf0]  ;;  %v12995_v38 = vor.u32 %v15186_v29, %v12992_v31  ;;  %v12832_v47 = vld [vmem:[#allocation5 + $0x1898] sm:$0xf0]  ;;  %v15178_v29 = vld [vmem:[#allocation5 + $0x1994] sm:$0xf] }
 0x3fd   : > { %9038 = vmatpush.bf16.msrb.mxu1 %v12579_v18  ;;  %v12856_v18 = vld [vmem:[#allocation5 + $0x18c8] sm:$0xf0]  ;;  %v12795_v28 = vor.u32 %v15136_v36, %v12792_v9  ;;  %v12960_v31 = vld [vmem:[#allocation5 + $0x1998] sm:$0xf0]  ;;  %v15144_v9 = vld [vmem:[#allocation5 + $0x1884] sm:$0xf] }
 0x3fe   : > { %9051 = vmatpush.bf16.msrb.mxu2 %v12643_v20  ;;  %v15168_v20 = vld [vmem:[#allocation5 + $0x1944] sm:$0xf]  ;;  %v12859_v44 = vor.u32 %v15152_v62, %v12856_v18  ;;  %v12824_v62 = vld [vmem:[#allocation5 + $0x1888] sm:$0xf0]  ;;  %v12963_v18 = vor.u32 %v15178_v29, %v12960_v31  ;;  %v13056_v58 = vld [vmem:[#allocation5 + $0x1a58] sm:$0xf0] }
 0x3ff   : > { %9064 = vmatpush.bf16.msrb.mxu3 %v12707_v41  ;;  %v12984_v41 = vld [vmem:[#allocation5 + $0x19c8] sm:$0xf0]  ;;  %v12923_v35 = vor.u32 %v15168_v20, %v12920_v43  ;;  %v15176_v43 = vld [vmem:[#allocation5 + $0x1984] sm:$0xf] }
 0x400   : > { %9026 = vmatpush.bf16.msrb.mxu0 %v12507_v37  ;;  %v8820_v19 = vpop.f32.mrf.mxu0  ;;  %v12987_v37 = vor.u32 %v15184_v23, %v12984_v41  ;;  %v12888_v20 = vld [vmem:[#allocation5 + $0x1908] sm:$0xf0]  ;;  %v15206_v41 = vld [vmem:[#allocation5 + $0x1a74] sm:$0xf]  ;;  %v15200_v31 = vld [vmem:[#allocation5 + $0x1a44] sm:$0xf] }
 0x401   : > { %9039 = vmatpush.bf16.msrb.mxu1 %v12571_v4  ;;  %v8821_v42 = vadd.f32 %v8820_v19, %v16385_v3  ;;  %v8833_v55 = vpop.f32.mrf.mxu1  ;;  %v12912_v4 = vld [vmem:[#allocation5 + $0x1938] sm:$0xf0]  ;;  %v12851_v3 = vor.u32 %v15150_v0, %v12848_v15  ;;  %v12952_v19 = vld [vmem:[#allocation5 + $0x1988] sm:$0xf0]  ;;  %v12827_v0 = vor.u32 %v15144_v9, %v12824_v62 }
 0x402   : > { %9052 = vmatpush.bf16.msrb.mxu2 %v12635_v45  ;;  %v15182_v45 = vld [vmem:[#allocation5 + $0x19b4] sm:$0xf]  ;;  %v13264_v15 = vld [vmem:[#allocation5 + $0x1bf8] sm:$0xf0]  ;;  %v13176_v9 = vld [vmem:[#allocation5 + $0x1b48] sm:$0xf0] }
 0x403   : > { %9065 = vmatpush.bf16.msrb.mxu3 %v12699_v5  ;;  %9027 = vmatmul.bf16.vlgmr.msrb.gmra.mxu0 %v16576_v63  ;;  %v8834_v14 = vadd.f32 %v8833_v55, %v8821_v42  ;;  %v12915_v5 = vor.u32 %v15166_v57, %v12912_v4  ;;  %v12979_v49 = vor.u32 %v15182_v45, %v12976_v26  ;;  %v15130_v63 = vld [vmem:[#allocation5 + $0x1814] sm:$0xf]  ;;  %v13072_v42 = vld [vmem:[#allocation5 + $0x1a78] sm:$0xf0] }
 0x404   : > { %9071 = vmatpush.bf16.msra.mxu0 %v12819_v1  ;;  %9040 = vmatmul.bf16.vlgmr.msrb.gmra.mxu1 %v16578_v6  ;;  %v15132_v1 = vld [vmem:[#allocation5 + $0x1824] sm:$0xf]  ;;  %v12896_v6 = vld [vmem:[#allocation5 + $0x1918] sm:$0xf0]  ;;  %v12955_v57 = vor.u32 %v15176_v43, %v12952_v19  ;;  %v13075_v4 = vor.u32 %v15206_v41, %v13072_v42  ;;  %v13203_v26 = vor.u32 %v15238_v21, %v13200_v22  ;;  %v15198_v42 = vld [vmem:[#allocation5 + $0x1a34] sm:$0xf] }
 0x405   : > { %9084 = vmatpush.bf16.msra.mxu1 %v12883_v7  ;;  %9053 = vmatmul.bf16.vlgmr.msrb.gmra.mxu2 %v16577_v51  ;;  %v12776_v7 = vld [vmem:[#allocation5 + $0x1828] sm:$0xf0]  ;;  %v15162_v51 = vld [vmem:[#allocation5 + $0x1914] sm:$0xf]  ;;  %v13104_v21 = vld [vmem:[#allocation5 + $0x1ab8] sm:$0xf0] }
 0x406   : > { %9097 = vmatpush.bf16.msra.mxu2 %v12947_v32  ;;  %9066 = vmatmul.bf16.vlgmr.msrb.gmra.mxu3 %v16579_v30  ;;  %v15148_v32 = vld [vmem:[#allocation5 + $0x18a4] sm:$0xf]  ;;  %v12899_v36 = vor.u32 %v15162_v51, %v12896_v6  ;;  %v15230_v22 = vld [vmem:[#allocation5 + $0x1b34] sm:$0xf] }
 0x407   : > { %9110 = vmatpush.bf16.msra.mxu3 %v13011_v59  ;;  %v15164_v59 = vld [vmem:[#allocation5 + $0x1924] sm:$0xf]  ;;  %v12843_v2 = vor.u32 %v15148_v32, %v12840_v10  ;;  %v13256_v10 = vld [vmem:[#allocation5 + $0x1be8] sm:$0xf0] }
 0x408   : > { %9072 = vmatpush.bf16.msra.mxu0 %v12811_v39  ;;  %v8846_v52 = vpop.f32.mrf.mxu2  ;;  %v8822_v39 = vpop.f32.mrf.mxu0  ;;  %v12907_v16 = vor.u32 %v15164_v59, %v12904_v13  ;;  %v15236_v32 = vld [vmem:[#allocation5 + $0x1b64] sm:$0xf] }
 0x409   : > { %9085 = vmatpush.bf16.msra.mxu1 %v12875_v12  ;;  %v8847_v60 = vadd.f32 %v8846_v52, %v8834_v14  ;;  %v8859_v17 = vpop.f32.mrf.mxu3  ;;  %v12779_v12 = vor.u32 %v15132_v1, %v12776_v7  ;;  %v15254_v14 = vld [vmem:[#allocation5 + $0x1bf4] sm:$0xf]  ;;  %v13128_v7 = vld [vmem:[#allocation5 + $0x1ae8] sm:$0xf0]  ;;  %v15252_v52 = vld [vmem:[#allocation5 + $0x1be4] sm:$0xf] }
 0x40a   : > { %9098 = vmatpush.bf16.msra.mxu2 %v12939_v40  ;;  %v8835_v40 = vpop.f32.mrf.mxu1  ;;  %v13267_v1 = vor.u32 %v15254_v14, %v13264_v15  ;;  %v16580_v39 = vld [vmem:[#allocation36_spill] sm:$0xff]  ;;  %v13232_v14 = vld [vmem:[#allocation5 + $0x1bb8] sm:$0xf0] }
 0x40b   : > { %9111 = vmatpush.bf16.msra.mxu3 %v13003_v61  ;;  %v16392_v56 = vadd.f32 %v8859_v17, %v8847_v60  ;;  %v12768_v61 = vld [vmem:[#allocation5 + $0x1818] sm:$0xf0]  ;;  %v15202_v17 = vld [vmem:[#allocation5 + $0x1a54] sm:$0xf] }
 0x40c   : > { %9073 = vmatpush.bf16.msra.mxu0 %v12803_v50  ;;  %v12771_v30 = vor.u32 %v15130_v63, %v12768_v61  ;;  %v15128_v50 = vld [vmem:[#allocation5 + $0x1804] sm:$0xf]  ;;  %v13120_v40 = vld [vmem:[#allocation5 + $0x1ad8] sm:$0xf0]  ;;  %v13059_v51 = vor.u32 %v15202_v17, %v13056_v58 }
 0x40d   : > { %9086 = vmatpush.bf16.msra.mxu1 %v12867_v33  ;;  %v12760_v33 = vld [vmem:[#allocation5 + $0x1808] sm:$0xf0]  ;;  %v16581_v63 = vld [vmem:[#allocation37_spill] sm:$0xff]  ;;  %v16582_v61 = vld [vmem:[#allocation38_spill] sm:$0xff]  ;;  %v13123_v6 = vor.u32 %v15218_v11, %v13120_v40 }
 0x40e   : > { %9099 = vmatpush.bf16.msra.mxu2 %v12931_v24  ;;  %v12835_v24 = vor.u32 %v15146_v25, %v12832_v47  ;;  %v15250_v25 = vld [vmem:[#allocation5 + $0x1bd4] sm:$0xf]  ;;  %v16583_v47 = vld [vmem:[#allocation39_spill] sm:$0xff] }
 0x40f   : > { %9112 = vmatpush.bf16.msra.mxu3 %v12995_v38  ;;  %v15160_v38 = vld [vmem:[#allocation5 + $0x1904] sm:$0xf]  ;;  %v15210_v40 = vld [vmem:[#allocation5 + $0x1a94] sm:$0xf] }
 0x410   : > { %9074 = vmatpush.bf16.msra.mxu0 %v12795_v28  ;;  %v8848_v23 = vpop.f32.mrf.mxu2  ;;  %v15222_v28 = vld [vmem:[#allocation5 + $0x1af4] sm:$0xf] }
 0x411   : > { %9087 = vmatpush.bf16.msra.mxu1 %v12859_v44  ;;  %v8861_v55 = vpop.f32.mrf.mxu3  ;;  %v12763_v44 = vor.u32 %v15128_v50, %v12760_v33  ;;  %v15216_v50 = vld [vmem:[#allocation5 + $0x1ac4] sm:$0xf] }
 0x412   : > { %9100 = vmatpush.bf16.msra.mxu2 %v12923_v35  ;;  %v13136_v35 = vld [vmem:[#allocation5 + $0x1af8] sm:$0xf0]  ;;  %v15214_v55 = vld [vmem:[#allocation5 + $0x1ab4] sm:$0xf] }
 0x413   : > { %9113 = vmatpush.bf16.msra.mxu3 %v12987_v37  ;;  %v12891_v37 = vor.u32 %v15160_v38, %v12888_v20  ;;  %v13139_v45 = vor.u32 %v15222_v28, %v13136_v35  ;;  %v15248_v38 = vld [vmem:[#allocation5 + $0x1bc4] sm:$0xf]  ;;  %v13040_v28 = vld [vmem:[#allocation5 + $0x1a38] sm:$0xf0] }
 0x414   : > { %9075 = vmatpush.bf16.msra.mxu0 %v12787_v46  ;;  %v15204_v46 = vld [vmem:[#allocation5 + $0x1a64] sm:$0xf]  ;;  %v13043_v15 = vor.u32 %v15198_v42, %v13040_v28  ;;  %v15302_v42 = vld [vmem:[#allocation5 + $0x1d74] sm:$0xf]  ;;  %v13456_v28 = vld [vmem:[#allocation5 + $0x1d78] sm:$0xf0] }
 0x415   : > { %9088 = vmatpush.bf16.msra.mxu1 %v12851_v3  ;;  %v13064_v3 = vld [vmem:[#allocation5 + $0x1a68] sm:$0xf0] }
 0x416   : > { %9101 = vmatpush.bf16.msra.mxu2 %v12915_v5  ;;  %v15220_v5 = vld [vmem:[#allocation5 + $0x1ae4] sm:$0xf]  ;;  %v13067_v59 = vor.u32 %v15204_v46, %v13064_v3 }
 0x417   : > { %9114 = vmatpush.bf16.msra.mxu3 %v12979_v49  ;;  %v13192_v49 = vld [vmem:[#allocation5 + $0x1b68] sm:$0xf0]  ;;  %v13131_v13 = vor.u32 %v15220_v5, %v13128_v7 }
 0x418   : > { %9076 = vmatpush.bf16.msra.mxu0 %v12779_v12  ;;  %v13195_v60 = vor.u32 %v15236_v32, %v13192_v49  ;;  %v13259_v12 = vor.u32 %v15252_v52, %v13256_v10  ;;  %v13096_v5 = vld [vmem:[#allocation5 + $0x1aa8] sm:$0xf0]  ;;  %v15244_v52 = vld [vmem:[#allocation5 + $0x1ba4] sm:$0xf] }
 0x419   : > { %9089 = vmatpush.bf16.msra.mxu1 %v12843_v2  ;;  %v15234_v2 = vld [vmem:[#allocation5 + $0x1b54] sm:$0xf]  ;;  %v13160_v7 = vld [vmem:[#allocation5 + $0x1b28] sm:$0xf0] }
 0x41a   : > { %9102 = vmatpush.bf16.msra.mxu2 %v12907_v16  ;;  %v13184_v16 = vld [vmem:[#allocation5 + $0x1b58] sm:$0xf0]  ;;  %v13224_v10 = vld [vmem:[#allocation5 + $0x1ba8] sm:$0xf0] }
 0x41b   : > { %9115 = vmatpush.bf16.msra.mxu3 %v12971_v8  ;;  %v13248_v8 = vld [vmem:[#allocation5 + $0x1bd8] sm:$0xf0]  ;;  %v13187_v29 = vor.u32 %v15234_v2, %v13184_v16  ;;  %v13227_v2 = vor.u32 %v15244_v52, %v13224_v10  ;;  %v15282_v10 = vld [vmem:[#allocation5 + $0x1cd4] sm:$0xf] }
 0x41c   : > { %9077 = vmatpush.bf16.msra.mxu0 %v12771_v30  ;;  %v13048_v30 = vld [vmem:[#allocation5 + $0x1a48] sm:$0xf0]  ;;  %v13251_v33 = vor.u32 %v15250_v25, %v13248_v8  ;;  %v13088_v16 = vld [vmem:[#allocation5 + $0x1a98] sm:$0xf0]  ;;  %v15242_v25 = vld [vmem:[#allocation5 + $0x1b94] sm:$0xf] }
 0x41d   : > { %9090 = vmatpush.bf16.msra.mxu1 %v12835_v24  ;;  %v13112_v24 = vld [vmem:[#allocation5 + $0x1ac8] sm:$0xf0]  ;;  %v13051_v43 = vor.u32 %v15200_v31, %v13048_v30  ;;  %v13216_v8 = vld [vmem:[#allocation5 + $0x1b98] sm:$0xf0]  ;;  %v15208_v30 = vld [vmem:[#allocation5 + $0x1a84] sm:$0xf] }
 0x41e   : > { %9103 = vmatpush.bf16.msra.mxu2 %v12899_v36  ;;  %v15232_v36 = vld [vmem:[#allocation5 + $0x1b44] sm:$0xf]  ;;  %v13115_v23 = vor.u32 %v15216_v50, %v13112_v24  ;;  %v13080_v50 = vld [vmem:[#allocation5 + $0x1a88] sm:$0xf0]  ;;  %v13219_v24 = vor.u32 %v15242_v25, %v13216_v8  ;;  %v13312_v52 = vld [vmem:[#allocation5 + $0x1c58] sm:$0xf0] }
 0x41f   : > { %9116 = vmatpush.bf16.msra.mxu3 %v12963_v18  ;;  %v13240_v18 = vld [vmem:[#allocation5 + $0x1bc8] sm:$0xf0]  ;;  %v13179_v41 = vor.u32 %v15232_v36, %v13176_v9  ;;  %v15240_v9 = vld [vmem:[#allocation5 + $0x1b84] sm:$0xf] }
 0x420   : > { %9078 = vmatpush.bf16.msra.mxu0 %v12763_v44  ;;  %v8872_v62 = vpop.f32.mrf.mxu0  ;;  %v13243_v44 = vor.u32 %v15248_v38, %v13240_v18  ;;  %v13144_v36 = vld [vmem:[#allocation5 + $0x1b08] sm:$0xf0]  ;;  %v15270_v18 = vld [vmem:[#allocation5 + $0x1c74] sm:$0xf]  ;;  %v15264_v8 = vld [vmem:[#allocation5 + $0x1c44] sm:$0xf] }
 0x421   : > { %9091 = vmatpush.bf16.msra.mxu1 %v12827_v0  ;;  %v8873_v20 = vadd.f32 %v8872_v62, %v16392_v56  ;;  %v8885_v19 = vpop.f32.mrf.mxu1  ;;  %v13168_v0 = vld [vmem:[#allocation5 + $0x1b38] sm:$0xf0]  ;;  %v13107_v56 = vor.u32 %v15214_v55, %v13104_v21  ;;  %v13208_v62 = vld [vmem:[#allocation5 + $0x1b88] sm:$0xf0]  ;;  %v13083_v55 = vor.u32 %v15208_v30, %v13080_v50 }
 0x422   : > { %9104 = vmatpush.bf16.msra.mxu2 %v12891_v37  ;;  %v15246_v37 = vld [vmem:[#allocation5 + $0x1bb4] sm:$0xf]  ;;  %v13520_v21 = vld [vmem:[#allocation5 + $0x1df8] sm:$0xf0]  ;;  %v13432_v30 = vld [vmem:[#allocation5 + $0x1d48] sm:$0xf0] }
 0x423   : > { %9117 = vmatpush.bf16.msra.mxu3 %v12955_v57  ;;  %9079 = vmatmul.bf16.vlgmr.msra.gmra.mxu0 %v16580_v39  ;;  %v8886_v35 = vadd.f32 %v8885_v19, %v8873_v20  ;;  %v13171_v57 = vor.u32 %v15230_v22, %v13168_v0  ;;  %v13235_v46 = vor.u32 %v15246_v37, %v13232_v14  ;;  %v15194_v39 = vld [vmem:[#allocation5 + $0x1a14] sm:$0xf]  ;;  %v13328_v20 = vld [vmem:[#allocation5 + $0x1c78] sm:$0xf0] }
 0x424   : > { %9123 = vmatpush.bf16.msrb.mxu0 %v13075_v4  ;;  %9092 = vmatmul.bf16.vlgmr.msra.gmra.mxu1 %v16582_v61  ;;  %v15196_v4 = vld [vmem:[#allocation5 + $0x1a24] sm:$0xf]  ;;  %v13152_v61 = vld [vmem:[#allocation5 + $0x1b18] sm:$0xf0]  ;;  %v13211_v22 = vor.u32 %v15240_v9, %v13208_v62  ;;  %v13331_v0 = vor.u32 %v15270_v18, %v13328_v20  ;;  %v13459_v14 = vor.u32 %v15302_v42, %v13456_v28  ;;  %v15262_v20 = vld [vmem:[#allocation5 + $0x1c34] sm:$0xf] }
 0x425   : > { %9136 = vmatpush.bf16.msrb.mxu1 %v13139_v45  ;;  %9105 = vmatmul.bf16.vlgmr.msra.gmra.mxu2 %v16581_v63  ;;  %v13032_v45 = vld [vmem:[#allocation5 + $0x1a28] sm:$0xf0]  ;;  %v15226_v63 = vld [vmem:[#allocation5 + $0x1b14] sm:$0xf]  ;;  %v13360_v42 = vld [vmem:[#allocation5 + $0x1cb8] sm:$0xf0] }
 0x426   : > { %9149 = vmatpush.bf16.msrb.mxu2 %v13203_v26  ;;  %9118 = vmatmul.bf16.vlgmr.msra.gmra.mxu3 %v16583_v47  ;;  %v15212_v26 = vld [vmem:[#allocation5 + $0x1aa4] sm:$0xf]  ;;  %v13155_v31 = vor.u32 %v15226_v63, %v13152_v61  ;;  %v15294_v28 = vld [vmem:[#allocation5 + $0x1d34] sm:$0xf] }
 0x427   : > { %9162 = vmatpush.bf16.msrb.mxu3 %v13267_v1  ;;  %v15228_v1 = vld [vmem:[#allocation5 + $0x1b24] sm:$0xf]  ;;  %v13099_v58 = vor.u32 %v15212_v26, %v13096_v5  ;;  %v13512_v5 = vld [vmem:[#allocation5 + $0x1de8] sm:$0xf0] }
 0x428   : > { %9124 = vmatpush.bf16.msrb.mxu0 %v13067_v59  ;;  %v8898_v3 = vpop.f32.mrf.mxu2  ;;  %v8874_v59 = vpop.f32.mrf.mxu0  ;;  %v13163_v11 = vor.u32 %v15228_v1, %v13160_v7  ;;  %v15300_v26 = vld [vmem:[#allocation5 + $0x1d64] sm:$0xf] }
 0x429   : > { %9137 = vmatpush.bf16.msrb.mxu1 %v13131_v13  ;;  %v8899_v32 = vadd.f32 %v8898_v3, %v8886_v35  ;;  %v8911_v49 = vpop.f32.mrf.mxu3  ;;  %v13035_v13 = vor.u32 %v15196_v4, %v13032_v45  ;;  %v15318_v35 = vld [vmem:[#allocation5 + $0x1df4] sm:$0xf]  ;;  %v13384_v45 = vld [vmem:[#allocation5 + $0x1ce8] sm:$0xf0]  ;;  %v15316_v3 = vld [vmem:[#allocation5 + $0x1de4] sm:$0xf] }
 0x42a   : > { %9150 = vmatpush.bf16.msrb.mxu2 %v13195_v60  ;;  %v8887_v60 = vpop.f32.mrf.mxu1  ;;  %v13523_v4 = vor.u32 %v15318_v35, %v13520_v21  ;;  %v16584_v59 = vld [vmem:[#allocation40_spill] sm:$0xff]  ;;  %v13488_v35 = vld [vmem:[#allocation5 + $0x1db8] sm:$0xf0] }
 0x42b   : > { %9163 = vmatpush.bf16.msrb.mxu3 %v13259_v12  ;;  %v16399_v17 = vadd.f32 %v8911_v49, %v8899_v32  ;;  %v13024_v12 = vld [vmem:[#allocation5 + $0x1a18] sm:$0xf0]  ;;  %v15266_v49 = vld [vmem:[#allocation5 + $0x1c54] sm:$0xf] }
 0x42c   : > { %9125 = vmatpush.bf16.msrb.mxu0 %v13059_v51  ;;  %v13027_v47 = vor.u32 %v15194_v39, %v13024_v12  ;;  %v15192_v51 = vld [vmem:[#allocation5 + $0x1a04] sm:$0xf]  ;;  %v13376_v60 = vld [vmem:[#allocation5 + $0x1cd8] sm:$0xf0]  ;;  %v13315_v63 = vor.u32 %v15266_v49, %v13312_v52 }
 0x42d   : > { %9138 = vmatpush.bf16.msrb.mxu1 %v13123_v6  ;;  %v13016_v6 = vld [vmem:[#allocation5 + $0x1a08] sm:$0xf0]  ;;  %v16585_v39 = vld [vmem:[#allocation41_spill] sm:$0xff]  ;;  %v16586_v12 = vld [vmem:[#allocation42_spill] sm:$0xff]  ;;  %v13379_v61 = vor.u32 %v15282_v10, %v13376_v60 }
 0x42e   : > { %9151 = vmatpush.bf16.msrb.mxu2 %v13187_v29  ;;  %v13091_v29 = vor.u32 %v15210_v40, %v13088_v16  ;;  %v15314_v40 = vld [vmem:[#allocation5 + $0x1dd4] sm:$0xf]  ;;  %v16587_v16 = vld [vmem:[#allocation43_spill] sm:$0xff] }
 0x42f   : > { %9164 = vmatpush.bf16.msrb.mxu3 %v13251_v33  ;;  %v15224_v33 = vld [vmem:[#allocation5 + $0x1b04] sm:$0xf]  ;;  %v15274_v60 = vld [vmem:[#allocation5 + $0x1c94] sm:$0xf] }
 0x430   : > { %9126 = vmatpush.bf16.msrb.mxu0 %v13051_v43  ;;  %v8900_v38 = vpop.f32.mrf.mxu2  ;;  %v15286_v43 = vld [vmem:[#allocation5 + $0x1cf4] sm:$0xf] }
 0x431   : > { %9139 = vmatpush.bf16.msrb.mxu1 %v13115_v23  ;;  %v8913_v19 = vpop.f32.mrf.mxu3  ;;  %v13019_v23 = vor.u32 %v15192_v51, %v13016_v6  ;;  %v15280_v51 = vld [vmem:[#allocation5 + $0x1cc4] sm:$0xf] }
 0x432   : > { %9152 = vmatpush.bf16.msrb.mxu2 %v13179_v41  ;;  %v13392_v41 = vld [vmem:[#allocation5 + $0x1cf8] sm:$0xf0]  ;;  %v15278_v19 = vld [vmem:[#allocation5 + $0x1cb4] sm:$0xf] }
 0x433   : > { %9165 = vmatpush.bf16.msrb.mxu3 %v13243_v44  ;;  %v13147_v44 = vor.u32 %v15224_v33, %v13144_v36  ;;  %v13395_v37 = vor.u32 %v15286_v43, %v13392_v41  ;;  %v15312_v33 = vld [vmem:[#allocation5 + $0x1dc4] sm:$0xf]  ;;  %v13296_v43 = vld [vmem:[#allocation5 + $0x1c38] sm:$0xf0] }
 0x434   : > { %9127 = vmatpush.bf16.msrb.mxu0 %v13043_v15  ;;  %v15268_v15 = vld [vmem:[#allocation5 + $0x1c64] sm:$0xf]  ;;  %v13299_v21 = vor.u32 %v15262_v20, %v13296_v43  ;;  %v15366_v20 = vld [vmem:[#allocation5 + $0x1f74] sm:$0xf]  ;;  %v13712_v43 = vld [vmem:[#allocation5 + $0x1f78] sm:$0xf0] }
 0x435   : > { %9140 = vmatpush.bf16.msrb.mxu1 %v13107_v56  ;;  %v13320_v56 = vld [vmem:[#allocation5 + $0x1c68] sm:$0xf0] }
 0x436   : > { %9153 = vmatpush.bf16.msrb.mxu2 %v13171_v57  ;;  %v15284_v57 = vld [vmem:[#allocation5 + $0x1ce4] sm:$0xf]  ;;  %v13323_v1 = vor.u32 %v15268_v15, %v13320_v56 }
 0x437   : > { %9166 = vmatpush.bf16.msrb.mxu3 %v13235_v46  ;;  %v13448_v46 = vld [vmem:[#allocation5 + $0x1d68] sm:$0xf0]  ;;  %v13387_v7 = vor.u32 %v15284_v57, %v13384_v45 }
 0x438   : > { %9128 = vmatpush.bf16.msrb.mxu0 %v13035_v13  ;;  %v13451_v32 = vor.u32 %v15300_v26, %v13448_v46  ;;  %v13515_v13 = vor.u32 %v15316_v3, %v13512_v5  ;;  %v13352_v57 = vld [vmem:[#allocation5 + $0x1ca8] sm:$0xf0]  ;;  %v15308_v3 = vld [vmem:[#allocation5 + $0x1da4] sm:$0xf] }
 0x439   : > { %9141 = vmatpush.bf16.msrb.mxu1 %v13099_v58  ;;  %v15298_v58 = vld [vmem:[#allocation5 + $0x1d54] sm:$0xf]  ;;  %v13416_v45 = vld [vmem:[#allocation5 + $0x1d28] sm:$0xf0] }
 0x43a   : > { %9154 = vmatpush.bf16.msrb.mxu2 %v13163_v11  ;;  %v13440_v11 = vld [vmem:[#allocation5 + $0x1d58] sm:$0xf0]  ;;  %v13480_v5 = vld [vmem:[#allocation5 + $0x1da8] sm:$0xf0] }
 0x43b   : > { %9167 = vmatpush.bf16.msrb.mxu3 %v13227_v2  ;;  %v13504_v2 = vld [vmem:[#allocation5 + $0x1dd8] sm:$0xf0]  ;;  %v13443_v25 = vor.u32 %v15298_v58, %v13440_v11  ;;  %v13483_v58 = vor.u32 %v15308_v3, %v13480_v5  ;;  %v15346_v5 = vld [vmem:[#allocation5 + $0x1ed4] sm:$0xf] }
 0x43c   : > { %9129 = vmatpush.bf16.msrb.mxu0 %v13027_v47  ;;  %v13304_v47 = vld [vmem:[#allocation5 + $0x1c48] sm:$0xf0]  ;;  %v13507_v6 = vor.u32 %v15314_v40, %v13504_v2  ;;  %v13344_v11 = vld [vmem:[#allocation5 + $0x1c98] sm:$0xf0]  ;;  %v15306_v40 = vld [vmem:[#allocation5 + $0x1d94] sm:$0xf] }
 0x43d   : > { %9142 = vmatpush.bf16.msrb.mxu1 %v13091_v29  ;;  %v13368_v29 = vld [vmem:[#allocation5 + $0x1cc8] sm:$0xf0]  ;;  %v13307_v9 = vor.u32 %v15264_v8, %v13304_v47  ;;  %v13472_v2 = vld [vmem:[#allocation5 + $0x1d98] sm:$0xf0]  ;;  %v15272_v47 = vld [vmem:[#allocation5 + $0x1c84] sm:$0xf] }
 0x43e   : > { %9155 = vmatpush.bf16.msrb.mxu2 %v13155_v31  ;;  %v15296_v31 = vld [vmem:[#allocation5 + $0x1d44] sm:$0xf]  ;;  %v13371_v38 = vor.u32 %v15280_v51, %v13368_v29  ;;  %v13336_v51 = vld [vmem:[#allocation5 + $0x1c88] sm:$0xf0]  ;;  %v13475_v29 = vor.u32 %v15306_v40, %v13472_v2  ;;  %v13568_v3 = vld [vmem:[#allocation5 + $0x1e58] sm:$0xf0] }
 0x43f   : > { %9168 = vmatpush.bf16.msrb.mxu3 %v13219_v24  ;;  %v13496_v24 = vld [vmem:[#allocation5 + $0x1dc8] sm:$0xf0]  ;;  %v13435_v18 = vor.u32 %v15296_v31, %v13432_v30  ;;  %v15304_v30 = vld [vmem:[#allocation5 + $0x1d84] sm:$0xf] }
 0x440   : > { %9130 = vmatpush.bf16.msrb.mxu0 %v13019_v23  ;;  %v8924_v50 = vpop.f32.mrf.mxu0  ;;  %v13499_v23 = vor.u32 %v15312_v33, %v13496_v24  ;;  %v13400_v31 = vld [vmem:[#allocation5 + $0x1d08] sm:$0xf0]  ;;  %v15334_v24 = vld [vmem:[#allocation5 + $0x1e74] sm:$0xf]  ;;  %v15328_v2 = vld [vmem:[#allocation5 + $0x1e44] sm:$0xf] }
 0x441   : > { %9143 = vmatpush.bf16.msrb.mxu1 %v13083_v55  ;;  %v8925_v36 = vadd.f32 %v8924_v50, %v16399_v17  ;;  %v8937_v62 = vpop.f32.mrf.mxu1  ;;  %v13424_v55 = vld [vmem:[#allocation5 + $0x1d38] sm:$0xf0]  ;;  %v13363_v17 = vor.u32 %v15278_v19, %v13360_v42  ;;  %v13464_v50 = vld [vmem:[#allocation5 + $0x1d88] sm:$0xf0]  ;;  %v13339_v19 = vor.u32 %v15272_v47, %v13336_v51 }
 0x442   : > { %9156 = vmatpush.bf16.msrb.mxu2 %v13147_v44  ;;  %v15310_v44 = vld [vmem:[#allocation5 + $0x1db4] sm:$0xf]  ;;  %v13776_v42 = vld [vmem:[#allocation5 + $0x1ff8] sm:$0xf0]  ;;  %v13688_v47 = vld [vmem:[#allocation5 + $0x1f48] sm:$0xf0] }
 0x443   : > { %9169 = vmatpush.bf16.msrb.mxu3 %v13211_v22  ;;  %9131 = vmatmul.bf16.vlgmr.msrb.gmra.mxu0 %v16584_v59  ;;  %v8938_v41 = vadd.f32 %v8937_v62, %v8925_v36  ;;  %v13427_v22 = vor.u32 %v15294_v28, %v13424_v55  ;;  %v13491_v15 = vor.u32 %v15310_v44, %v13488_v35  ;;  %v15258_v59 = vld [vmem:[#allocation5 + $0x1c14] sm:$0xf]  ;;  %v13584_v36 = vld [vmem:[#allocation5 + $0x1e78] sm:$0xf0] }
 0x444   : > { %9175 = vmatpush.bf16.msra.mxu0 %v13331_v0  ;;  %9144 = vmatmul.bf16.vlgmr.msrb.gmra.mxu1 %v16586_v12  ;;  %v15260_v0 = vld [vmem:[#allocation5 + $0x1c24] sm:$0xf]  ;;  %v13408_v12 = vld [vmem:[#allocation5 + $0x1d18] sm:$0xf0]  ;;  %v13467_v28 = vor.u32 %v15304_v30, %v13464_v50  ;;  %v13587_v55 = vor.u32 %v15334_v24, %v13584_v36  ;;  %v13715_v35 = vor.u32 %v15366_v20, %v13712_v43  ;;  %v15326_v36 = vld [vmem:[#allocation5 + $0x1e34] sm:$0xf] }
 0x445   : > { %9188 = vmatpush.bf16.msra.mxu1 %v13395_v37  ;;  %9157 = vmatmul.bf16.vlgmr.msrb.gmra.mxu2 %v16585_v39  ;;  %v13288_v37 = vld [vmem:[#allocation5 + $0x1c28] sm:$0xf0]  ;;  %v15290_v39 = vld [vmem:[#allocation5 + $0x1d14] sm:$0xf]  ;;  %v13616_v20 = vld [vmem:[#allocation5 + $0x1eb8] sm:$0xf0] }
 0x446   : > { %9201 = vmatpush.bf16.msra.mxu2 %v13459_v14  ;;  %9170 = vmatmul.bf16.vlgmr.msrb.gmra.mxu3 %v16587_v16  ;;  %v15276_v14 = vld [vmem:[#allocation5 + $0x1ca4] sm:$0xf]  ;;  %v13411_v8 = vor.u32 %v15290_v39, %v13408_v12  ;;  %v15358_v43 = vld [vmem:[#allocation5 + $0x1f34] sm:$0xf] }
 0x447   : > { %9214 = vmatpush.bf16.msra.mxu3 %v13523_v4  ;;  %v15292_v4 = vld [vmem:[#allocation5 + $0x1d24] sm:$0xf]  ;;  %v13355_v52 = vor.u32 %v15276_v14, %v13352_v57  ;;  %v13768_v57 = vld [vmem:[#allocation5 + $0x1fe8] sm:$0xf0] }
 0x448   : > { %9176 = vmatpush.bf16.msra.mxu0 %v13323_v1  ;;  %v8950_v56 = vpop.f32.mrf.mxu2  ;;  %v8926_v1 = vpop.f32.mrf.mxu0  ;;  %v13419_v10 = vor.u32 %v15292_v4, %v13416_v45  ;;  %v15364_v14 = vld [vmem:[#allocation5 + $0x1f64] sm:$0xf] }
 0x449   : > { %9189 = vmatpush.bf16.msra.mxu1 %v13387_v7  ;;  %v8951_v26 = vadd.f32 %v8950_v56, %v8938_v41  ;;  %v8963_v46 = vpop.f32.mrf.mxu3  ;;  %v13291_v7 = vor.u32 %v15260_v0, %v13288_v37  ;;  %v15382_v41 = vld [vmem:[#allocation5 + $0x1ff4] sm:$0xf]  ;;  %v13640_v37 = vld [vmem:[#allocation5 + $0x1ee8] sm:$0xf0]  ;;  %v15380_v56 = vld [vmem:[#allocation5 + $0x1fe4] sm:$0xf] }
 0x44a   : > { %9202 = vmatpush.bf16.msra.mxu2 %v13451_v32  ;;  %v8939_v32 = vpop.f32.mrf.mxu1  ;;  %v13779_v0 = vor.u32 %v15382_v41, %v13776_v42  ;;  %v16588_v1 = vld [vmem:[#allocation44_spill] sm:$0xff]  ;;  %v13744_v41 = vld [vmem:[#allocation5 + $0x1fb8] sm:$0xf0] }
 0x44b   : > { %9215 = vmatpush.bf16.msra.mxu3 %v13515_v13  ;;  %v16406_v49 = vadd.f32 %v8963_v46, %v8951_v26  ;;  %v13280_v13 = vld [vmem:[#allocation5 + $0x1c18] sm:$0xf0]  ;;  %v15330_v46 = vld [vmem:[#allocation5 + $0x1e54] sm:$0xf] }
 0x44c   : > { %9177 = vmatpush.bf16.msra.mxu0 %v13315_v63  ;;  %v13283_v16 = vor.u32 %v15258_v59, %v13280_v13  ;;  %v15256_v63 = vld [vmem:[#allocation5 + $0x1c04] sm:$0xf]  ;;  %v13632_v32 = vld [vmem:[#allocation5 + $0x1ed8] sm:$0xf0]  ;;  %v13571_v39 = vor.u32 %v15330_v46, %v13568_v3 }
 0x44d   : > { %9190 = vmatpush.bf16.msra.mxu1 %v13379_v61  ;;  %v13272_v61 = vld [vmem:[#allocation5 + $0x1c08] sm:$0xf0]  ;;  %v16589_v59 = vld [vmem:[#allocation45_spill] sm:$0xff]  ;;  %v16590_v13 = vld [vmem:[#allocation46_spill] sm:$0xff]  ;;  %v13635_v12 = vor.u32 %v15346_v5, %v13632_v32 }
 0x44e   : > { %9203 = vmatpush.bf16.msra.mxu2 %v13443_v25  ;;  %v13347_v25 = vor.u32 %v15274_v60, %v13344_v11  ;;  %v15378_v60 = vld [vmem:[#allocation5 + $0x1fd4] sm:$0xf]  ;;  %v16591_v11 = vld [vmem:[#allocation47_spill] sm:$0xff] }
 0x44f   : > { %9216 = vmatpush.bf16.msra.mxu3 %v13507_v6  ;;  %v15288_v6 = vld [vmem:[#allocation5 + $0x1d04] sm:$0xf]  ;;  %v15338_v32 = vld [vmem:[#allocation5 + $0x1e94] sm:$0xf] }
 0x450   : > { %9178 = vmatpush.bf16.msra.mxu0 %v13307_v9  ;;  %v8952_v33 = vpop.f32.mrf.mxu2  ;;  %v15350_v9 = vld [vmem:[#allocation5 + $0x1ef4] sm:$0xf] }
 0x451   : > { %9191 = vmatpush.bf16.msra.mxu1 %v13371_v38  ;;  %v8965_v62 = vpop.f32.mrf.mxu3  ;;  %v13275_v38 = vor.u32 %v15256_v63, %v13272_v61  ;;  %v15344_v63 = vld [vmem:[#allocation5 + $0x1ec4] sm:$0xf] }
 0x452   : > { %9204 = vmatpush.bf16.msra.mxu2 %v13435_v18  ;;  %v13648_v18 = vld [vmem:[#allocation5 + $0x1ef8] sm:$0xf0]  ;;  %v15342_v62 = vld [vmem:[#allocation5 + $0x1eb4] sm:$0xf] }
 0x453   : > { %9217 = vmatpush.bf16.msra.mxu3 %v13499_v23  ;;  %v13403_v23 = vor.u32 %v15288_v6, %v13400_v31  ;;  %v13651_v44 = vor.u32 %v15350_v9, %v13648_v18  ;;  %v15376_v6 = vld [vmem:[#allocation5 + $0x1fc4] sm:$0xf]  ;;  %v13552_v9 = vld [vmem:[#allocation5 + $0x1e38] sm:$0xf0] }
 0x454   : > { %9179 = vmatpush.bf16.msra.mxu0 %v13299_v21  ;;  %v15332_v21 = vld [vmem:[#allocation5 + $0x1e64] sm:$0xf]  ;;  %v13555_v42 = vor.u32 %v15326_v36, %v13552_v9  ;;  %v15430_v36 = vld [vmem:[#allocation5 + $0x2174] sm:$0xf]  ;;  %v13968_v9 = vld [vmem:[#allocation5 + $0x2178] sm:$0xf0] }
 0x455   : > { %9192 = vmatpush.bf16.msra.mxu1 %v13363_v17  ;;  %v13576_v17 = vld [vmem:[#allocation5 + $0x1e68] sm:$0xf0] }
 0x456   : > { %9205 = vmatpush.bf16.msra.mxu2 %v13427_v22  ;;  %v15348_v22 = vld [vmem:[#allocation5 + $0x1ee4] sm:$0xf]  ;;  %v13579_v4 = vor.u32 %v15332_v21, %v13576_v17 }
 0x457   : > { %9218 = vmatpush.bf16.msra.mxu3 %v13491_v15  ;;  %v13704_v15 = vld [vmem:[#allocation5 + $0x1f68] sm:$0xf0]  ;;  %v13643_v45 = vor.u32 %v15348_v22, %v13640_v37 }
 0x458   : > { %9180 = vmatpush.bf16.msra.mxu0 %v13291_v7  ;;  %v13707_v26 = vor.u32 %v15364_v14, %v13704_v15  ;;  %v13771_v7 = vor.u32 %v15380_v56, %v13768_v57  ;;  %v13608_v22 = vld [vmem:[#allocation5 + $0x1ea8] sm:$0xf0]  ;;  %v15372_v56 = vld [vmem:[#allocation5 + $0x1fa4] sm:$0xf] }
 0x459   : > { %9193 = vmatpush.bf16.msra.mxu1 %v13355_v52  ;;  %v15362_v52 = vld [vmem:[#allocation5 + $0x1f54] sm:$0xf]  ;;  %v13672_v37 = vld [vmem:[#allocation5 + $0x1f28] sm:$0xf0] }
 0x45a   : > { %9206 = vmatpush.bf16.msra.mxu2 %v13419_v10  ;;  %v13696_v10 = vld [vmem:[#allocation5 + $0x1f58] sm:$0xf0]  ;;  %v13736_v57 = vld [vmem:[#allocation5 + $0x1fa8] sm:$0xf0] }
 0x45b   : > { %9219 = vmatpush.bf16.msra.mxu3 %v13483_v58  ;;  %v13760_v58 = vld [vmem:[#allocation5 + $0x1fd8] sm:$0xf0]  ;;  %v13699_v40 = vor.u32 %v15362_v52, %v13696_v10  ;;  %v13739_v52 = vor.u32 %v15372_v56, %v13736_v57  ;;  %v15410_v57 = vld [vmem:[#allocation5 + $0x20d4] sm:$0xf] }
 0x45c   : > { %9181 = vmatpush.bf16.msra.mxu0 %v13283_v16  ;;  %v13560_v16 = vld [vmem:[#allocation5 + $0x1e48] sm:$0xf0]  ;;  %v13763_v61 = vor.u32 %v15378_v60, %v13760_v58  ;;  %v13600_v10 = vld [vmem:[#allocation5 + $0x1e98] sm:$0xf0]  ;;  %v15370_v60 = vld [vmem:[#allocation5 + $0x1f94] sm:$0xf] }
 0x45d   : > { %9194 = vmatpush.bf16.msra.mxu1 %v13347_v25  ;;  %v13624_v25 = vld [vmem:[#allocation5 + $0x1ec8] sm:$0xf0]  ;;  %v13563_v30 = vor.u32 %v15328_v2, %v13560_v16  ;;  %v13728_v58 = vld [vmem:[#allocation5 + $0x1f98] sm:$0xf0]  ;;  %v15336_v16 = vld [vmem:[#allocation5 + $0x1e84] sm:$0xf] }
 0x45e   : > { %9207 = vmatpush.bf16.msra.mxu2 %v13411_v8  ;;  %v15360_v8 = vld [vmem:[#allocation5 + $0x1f44] sm:$0xf]  ;;  %v13627_v33 = vor.u32 %v15344_v63, %v13624_v25  ;;  %v13592_v63 = vld [vmem:[#allocation5 + $0x1e88] sm:$0xf0]  ;;  %v13731_v25 = vor.u32 %v15370_v60, %v13728_v58  ;;  %v13824_v56 = vld [vmem:[#allocation5 + $0x2058] sm:$0xf0] }
 0x45f   : > { %9220 = vmatpush.bf16.msra.mxu3 %v13475_v29  ;;  %v13752_v29 = vld [vmem:[#allocation5 + $0x1fc8] sm:$0xf0]  ;;  %v13691_v24 = vor.u32 %v15360_v8, %v13688_v47  ;;  %v15368_v47 = vld [vmem:[#allocation5 + $0x1f84] sm:$0xf] }
 0x460   : > { %9182 = vmatpush.bf16.msra.mxu0 %v13275_v38  ;;  %v8976_v51 = vpop.f32.mrf.mxu0  ;;  %v13755_v38 = vor.u32 %v15376_v6, %v13752_v29  ;;  %v13656_v8 = vld [vmem:[#allocation5 + $0x1f08] sm:$0xf0]  ;;  %v15398_v29 = vld [vmem:[#allocation5 + $0x2074] sm:$0xf]  ;;  %v15392_v58 = vld [vmem:[#allocation5 + $0x2044] sm:$0xf] }
 0x461   : > { %9195 = vmatpush.bf16.msra.mxu1 %v13339_v19  ;;  %v8977_v31 = vadd.f32 %v8976_v51, %v16406_v49  ;;  %v8989_v50 = vpop.f32.mrf.mxu1  ;;  %v13680_v19 = vld [vmem:[#allocation5 + $0x1f38] sm:$0xf0]  ;;  %v13619_v49 = vor.u32 %v15342_v62, %v13616_v20  ;;  %v13720_v51 = vld [vmem:[#allocation5 + $0x1f88] sm:$0xf0]  ;;  %v13595_v62 = vor.u32 %v15336_v16, %v13592_v63 }
 0x462   : > { %9208 = vmatpush.bf16.msra.mxu2 %v13403_v23  ;;  %v15374_v23 = vld [vmem:[#allocation5 + $0x1fb4] sm:$0xf]  ;;  %v14032_v20 = vld [vmem:[#allocation5 + $0x21f8] sm:$0xf0]  ;;  %v13944_v16 = vld [vmem:[#allocation5 + $0x2148] sm:$0xf0] }
 0x463   : > { %9221 = vmatpush.bf16.msra.mxu3 %v13467_v28  ;;  %9183 = vmatmul.bf16.vlgmr.msra.gmra.mxu0 %v16588_v1  ;;  %v8990_v18 = vadd.f32 %v8989_v50, %v8977_v31  ;;  %v13683_v28 = vor.u32 %v15358_v43, %v13680_v19  ;;  %v13747_v21 = vor.u32 %v15374_v23, %v13744_v41  ;;  %v15322_v1 = vld [vmem:[#allocation5 + $0x1e14] sm:$0xf]  ;;  %v13840_v31 = vld [vmem:[#allocation5 + $0x2078] sm:$0xf0] }
 0x464   : > { %9227 = vmatpush.bf16.msrb.mxu0 %v13587_v55  ;;  %9196 = vmatmul.bf16.vlgmr.msra.gmra.mxu1 %v16590_v13  ;;  %v15324_v55 = vld [vmem:[#allocation5 + $0x1e24] sm:$0xf]  ;;  %v13664_v13 = vld [vmem:[#allocation5 + $0x1f18] sm:$0xf0]  ;;  %v13723_v43 = vor.u32 %v15368_v47, %v13720_v51  ;;  %v13843_v19 = vor.u32 %v15398_v29, %v13840_v31  ;;  %v13971_v41 = vor.u32 %v15430_v36, %v13968_v9  ;;  %v15390_v31 = vld [vmem:[#allocation5 + $0x2034] sm:$0xf] }
 0x465   : > { %9240 = vmatpush.bf16.msrb.mxu1 %v13651_v44  ;;  %9209 = vmatmul.bf16.vlgmr.msra.gmra.mxu2 %v16589_v59  ;;  %v13544_v44 = vld [vmem:[#allocation5 + $0x1e28] sm:$0xf0]  ;;  %v15354_v59 = vld [vmem:[#allocation5 + $0x1f14] sm:$0xf]  ;;  %v13872_v36 = vld [vmem:[#allocation5 + $0x20b8] sm:$0xf0] }
 0x466   : > { %9253 = vmatpush.bf16.msrb.mxu2 %v13715_v35  ;;  %9222 = vmatmul.bf16.vlgmr.msra.gmra.mxu3 %v16591_v11  ;;  %v15340_v35 = vld [vmem:[#allocation5 + $0x1ea4] sm:$0xf]  ;;  %v13667_v2 = vor.u32 %v15354_v59, %v13664_v13  ;;  %v15422_v9 = vld [vmem:[#allocation5 + $0x2134] sm:$0xf] }
 0x467   : > { %9266 = vmatpush.bf16.msrb.mxu3 %v13779_v0  ;;  %v15356_v0 = vld [vmem:[#allocation5 + $0x1f24] sm:$0xf]  ;;  %v13611_v3 = vor.u32 %v15340_v35, %v13608_v22  ;;  %v14024_v22 = vld [vmem:[#allocation5 + $0x21e8] sm:$0xf0] }
 0x468   : > { %9228 = vmatpush.bf16.msrb.mxu0 %v13579_v4  ;;  %v9002_v17 = vpop.f32.mrf.mxu2  ;;  %v8978_v4 = vpop.f32.mrf.mxu0  ;;  %v13675_v5 = vor.u32 %v15356_v0, %v13672_v37  ;;  %v15428_v35 = vld [vmem:[#allocation5 + $0x2164] sm:$0xf] }
 0x469   : > { %9241 = vmatpush.bf16.msrb.mxu1 %v13643_v45  ;;  %v9003_v14 = vadd.f32 %v9002_v17, %v8990_v18  ;;  %v9015_v15 = vpop.f32.mrf.mxu3  ;;  %v13547_v45 = vor.u32 %v15324_v55, %v13544_v44  ;;  %v15446_v18 = vld [vmem:[#allocation5 + $0x21f4] sm:$0xf]  ;;  %v13896_v44 = vld [vmem:[#allocation5 + $0x20e8] sm:$0xf0]  ;;  %v15444_v17 = vld [vmem:[#allocation5 + $0x21e4] sm:$0xf] }
 0x46a   : > { %9254 = vmatpush.bf16.msrb.mxu2 %v13707_v26  ;;  %v8991_v26 = vpop.f32.mrf.mxu1  ;;  %v14035_v55 = vor.u32 %v15446_v18, %v14032_v20  ;;  %v16592_v4 = vld [vmem:[#allocation48_spill] sm:$0xff]  ;;  %v14000_v18 = vld [vmem:[#allocation5 + $0x21b8] sm:$0xf0] }
 0x46b   : > { %9267 = vmatpush.bf16.msrb.mxu3 %v13771_v7  ;;  %v16413_v46 = vadd.f32 %v9015_v15, %v9003_v14  ;;  %v13536_v7 = vld [vmem:[#allocation5 + $0x1e18] sm:$0xf0]  ;;  %v15394_v15 = vld [vmem:[#allocation5 + $0x2054] sm:$0xf] }
 0x46c   : > { %9229 = vmatpush.bf16.msrb.mxu0 %v13571_v39  ;;  %v13539_v11 = vor.u32 %v15322_v1, %v13536_v7  ;;  %v15320_v39 = vld [vmem:[#allocation5 + $0x1e04] sm:$0xf]  ;;  %v13888_v26 = vld [vmem:[#allocation5 + $0x20d8] sm:$0xf0]  ;;  %v13827_v59 = vor.u32 %v15394_v15, %v13824_v56 }
 0x46d   : > { %9242 = vmatpush.bf16.msrb.mxu1 %v13635_v12  ;;  %v13528_v12 = vld [vmem:[#allocation5 + $0x1e08] sm:$0xf0]  ;;  %v16593_v1 = vld [vmem:[#allocation49_spill] sm:$0xff]  ;;  %v16594_v7 = vld [vmem:[#allocation50_spill] sm:$0xff]  ;;  %v13891_v13 = vor.u32 %v15410_v57, %v13888_v26 }
 0x46e   : > { %9255 = vmatpush.bf16.msrb.mxu2 %v13699_v40  ;;  %v13603_v40 = vor.u32 %v15338_v32, %v13600_v10  ;;  %v15442_v32 = vld [vmem:[#allocation5 + $0x21d4] sm:$0xf]  ;;  %v16595_v10 = vld [vmem:[#allocation51_spill] sm:$0xff] }
 0x46f   : > { %9268 = vmatpush.bf16.msrb.mxu3 %v13763_v61  ;;  %v15352_v61 = vld [vmem:[#allocation5 + $0x1f04] sm:$0xf]  ;;  %v15402_v26 = vld [vmem:[#allocation5 + $0x2094] sm:$0xf] }
 0x470   : > { %9230 = vmatpush.bf16.msrb.mxu0 %v13563_v30  ;;  %v9004_v6 = vpop.f32.mrf.mxu2  ;;  %v15414_v30 = vld [vmem:[#allocation5 + $0x20f4] sm:$0xf] }
 0x471   : > { %9243 = vmatpush.bf16.msrb.mxu1 %v13627_v33  ;;  %v9017_v50 = vpop.f32.mrf.mxu3  ;;  %v13531_v33 = vor.u32 %v15320_v39, %v13528_v12  ;;  %v15408_v39 = vld [vmem:[#allocation5 + $0x20c4] sm:$0xf] }
 0x472   : > { %9256 = vmatpush.bf16.msrb.mxu2 %v13691_v24  ;;  %v13904_v24 = vld [vmem:[#allocation5 + $0x20f8] sm:$0xf0]  ;;  %v15406_v50 = vld [vmem:[#allocation5 + $0x20b4] sm:$0xf] }
 0x473   : > { %9269 = vmatpush.bf16.msrb.mxu3 %v13755_v38  ;;  %v13659_v38 = vor.u32 %v15352_v61, %v13656_v8  ;;  %v13907_v23 = vor.u32 %v15414_v30, %v13904_v24  ;;  %v15440_v61 = vld [vmem:[#allocation5 + $0x21c4] sm:$0xf]  ;;  %v13808_v30 = vld [vmem:[#allocation5 + $0x2038] sm:$0xf0] }
 0x474   : > { %9231 = vmatpush.bf16.msrb.mxu0 %v13555_v42  ;;  %v15396_v42 = vld [vmem:[#allocation5 + $0x2064] sm:$0xf]  ;;  %v13811_v20 = vor.u32 %v15390_v31, %v13808_v30  ;;  %v15494_v31 = vld [vmem:[#allocation5 + $0x2374] sm:$0xf]  ;;  %v14224_v30 = vld [vmem:[#allocation5 + $0x2378] sm:$0xf0] }
 0x475   : > { %9244 = vmatpush.bf16.msrb.mxu1 %v13619_v49  ;;  %v13832_v49 = vld [vmem:[#allocation5 + $0x2068] sm:$0xf0] }
 0x476   : > { %9257 = vmatpush.bf16.msrb.mxu2 %v13683_v28  ;;  %v15412_v28 = vld [vmem:[#allocation5 + $0x20e4] sm:$0xf]  ;;  %v13835_v0 = vor.u32 %v15396_v42, %v13832_v49 }
 0x477   : > { %9270 = vmatpush.bf16.msrb.mxu3 %v13747_v21  ;;  %v13960_v21 = vld [vmem:[#allocation5 + $0x2168] sm:$0xf0]  ;;  %v13899_v37 = vor.u32 %v15412_v28, %v13896_v44 }
 0x478   : > { %9232 = vmatpush.bf16.msrb.mxu0 %v13547_v45  ;;  %v13963_v14 = vor.u32 %v15428_v35, %v13960_v21  ;;  %v14027_v45 = vor.u32 %v15444_v17, %v14024_v22  ;;  %v13864_v28 = vld [vmem:[#allocation5 + $0x20a8] sm:$0xf0]  ;;  %v15436_v17 = vld [vmem:[#allocation5 + $0x21a4] sm:$0xf] }
 0x479   : > { %9245 = vmatpush.bf16.msrb.mxu1 %v13611_v3  ;;  %v15426_v3 = vld [vmem:[#allocation5 + $0x2154] sm:$0xf]  ;;  %v13928_v44 = vld [vmem:[#allocation5 + $0x2128] sm:$0xf0] }
 0x47a   : > { %9258 = vmatpush.bf16.msrb.mxu2 %v13675_v5  ;;  %v13952_v5 = vld [vmem:[#allocation5 + $0x2158] sm:$0xf0]  ;;  %v13992_v22 = vld [vmem:[#allocation5 + $0x21a8] sm:$0xf0] }
 0x47b   : > { %9271 = vmatpush.bf16.msrb.mxu3 %v13739_v52  ;;  %v14016_v52 = vld [vmem:[#allocation5 + $0x21d8] sm:$0xf0]  ;;  %v13955_v60 = vor.u32 %v15426_v3, %v13952_v5  ;;  %v13995_v3 = vor.u32 %v15436_v17, %v13992_v22  ;;  %v15474_v22 = vld [vmem:[#allocation5 + $0x22d4] sm:$0xf] }
 0x47c   : > { %9233 = vmatpush.bf16.msrb.mxu0 %v13539_v11  ;;  %v13816_v11 = vld [vmem:[#allocation5 + $0x2048] sm:$0xf0]  ;;  %v14019_v12 = vor.u32 %v15442_v32, %v14016_v52  ;;  %v13856_v5 = vld [vmem:[#allocation5 + $0x2098] sm:$0xf0]  ;;  %v15434_v32 = vld [vmem:[#allocation5 + $0x2194] sm:$0xf] }
 0x47d   : > { %9246 = vmatpush.bf16.msrb.mxu1 %v13603_v40  ;;  %v13880_v40 = vld [vmem:[#allocation5 + $0x20c8] sm:$0xf0]  ;;  %v13819_v47 = vor.u32 %v15392_v58, %v13816_v11  ;;  %v13984_v52 = vld [vmem:[#allocation5 + $0x2198] sm:$0xf0]  ;;  %v15400_v11 = vld [vmem:[#allocation5 + $0x2084] sm:$0xf] }
 0x47e   : > { %9259 = vmatpush.bf16.msrb.mxu2 %v13667_v2  ;;  %v15424_v2 = vld [vmem:[#allocation5 + $0x2144] sm:$0xf]  ;;  %v13883_v6 = vor.u32 %v15408_v39, %v13880_v40  ;;  %v13848_v39 = vld [vmem:[#allocation5 + $0x2088] sm:$0xf0]  ;;  %v13987_v40 = vor.u32 %v15434_v32, %v13984_v52  ;;  %v14080_v17 = vld [vmem:[#allocation5 + $0x2258] sm:$0xf0] }
 0x47f   : > { %9272 = vmatpush.bf16.msrb.mxu3 %v13731_v25  ;;  %v14008_v25 = vld [vmem:[#allocation5 + $0x21c8] sm:$0xf0]  ;;  %v13947_v29 = vor.u32 %v15424_v2, %v13944_v16  ;;  %v15432_v16 = vld [vmem:[#allocation5 + $0x2184] sm:$0xf] }
 0x480   : > { %9234 = vmatpush.bf16.msrb.mxu0 %v13531_v33  ;;  %v9028_v63 = vpop.f32.mrf.mxu0  ;;  %v14011_v33 = vor.u32 %v15440_v61, %v14008_v25  ;;  %v13912_v2 = vld [vmem:[#allocation5 + $0x2108] sm:$0xf0]  ;;  %v15462_v25 = vld [vmem:[#allocation5 + $0x2274] sm:$0xf]  ;;  %v15456_v52 = vld [vmem:[#allocation5 + $0x2244] sm:$0xf] }
 0x481   : > { %9247 = vmatpush.bf16.msrb.mxu1 %v13595_v62  ;;  %v9029_v8 = vadd.f32 %v9028_v63, %v16413_v46  ;;  %v9041_v51 = vpop.f32.mrf.mxu1  ;;  %v13936_v62 = vld [vmem:[#allocation5 + $0x2138] sm:$0xf0]  ;;  %v13875_v46 = vor.u32 %v15406_v50, %v13872_v36  ;;  %v13976_v63 = vld [vmem:[#allocation5 + $0x2188] sm:$0xf0]  ;;  %v13851_v50 = vor.u32 %v15400_v11, %v13848_v39 }
 0x482   : > { %9260 = vmatpush.bf16.msrb.mxu2 %v13659_v38  ;;  %v15438_v38 = vld [vmem:[#allocation5 + $0x21b4] sm:$0xf]  ;;  %v14288_v36 = vld [vmem:[#allocation5 + $0x23f8] sm:$0xf0]  ;;  %v14200_v11 = vld [vmem:[#allocation5 + $0x2348] sm:$0xf0] }
 0x483   : > { %9273 = vmatpush.bf16.msrb.mxu3 %v13723_v43  ;;  %9235 = vmatmul.bf16.vlgmr.msrb.gmra.mxu0 %v16592_v4  ;;  %v9042_v24 = vadd.f32 %v9041_v51, %v9029_v8  ;;  %v13939_v43 = vor.u32 %v15422_v9, %v13936_v62  ;;  %v14003_v42 = vor.u32 %v15438_v38, %v14000_v18  ;;  %v15386_v4 = vld [vmem:[#allocation5 + $0x2014] sm:$0xf]  ;;  %v14096_v8 = vld [vmem:[#allocation5 + $0x2278] sm:$0xf0] }
 0x484   : > { %9279 = vmatpush.bf16.msra.mxu0 %v13843_v19  ;;  %9248 = vmatmul.bf16.vlgmr.msrb.gmra.mxu1 %v16594_v7  ;;  %v15388_v19 = vld [vmem:[#allocation5 + $0x2024] sm:$0xf]  ;;  %v13920_v7 = vld [vmem:[#allocation5 + $0x2118] sm:$0xf0]  ;;  %v13979_v9 = vor.u32 %v15432_v16, %v13976_v63  ;;  %v14099_v62 = vor.u32 %v15462_v25, %v14096_v8  ;;  %v14227_v18 = vor.u32 %v15494_v31, %v14224_v30  ;;  %v15454_v8 = vld [vmem:[#allocation5 + $0x2234] sm:$0xf] }
 0x485   : > { %9292 = vmatpush.bf16.msra.mxu1 %v13907_v23  ;;  %9261 = vmatmul.bf16.vlgmr.msrb.gmra.mxu2 %v16593_v1  ;;  %v13800_v23 = vld [vmem:[#allocation5 + $0x2028] sm:$0xf0]  ;;  %v15418_v1 = vld [vmem:[#allocation5 + $0x2114] sm:$0xf]  ;;  %v14128_v31 = vld [vmem:[#allocation5 + $0x22b8] sm:$0xf0] }
 0x486   : > { %9305 = vmatpush.bf16.msra.mxu2 %v13971_v41  ;;  %9274 = vmatmul.bf16.vlgmr.msrb.gmra.mxu3 %v16595_v10  ;;  %v15404_v41 = vld [vmem:[#allocation5 + $0x20a4] sm:$0xf]  ;;  %v13923_v58 = vor.u32 %v15418_v1, %v13920_v7  ;;  %v15486_v30 = vld [vmem:[#allocation5 + $0x2334] sm:$0xf] }
 0x487   : > { %9318 = vmatpush.bf16.msra.mxu3 %v14035_v55  ;;  %v15420_v55 = vld [vmem:[#allocation5 + $0x2124] sm:$0xf]  ;;  %v13867_v56 = vor.u32 %v15404_v41, %v13864_v28  ;;  %v14280_v28 = vld [vmem:[#allocation5 + $0x23e8] sm:$0xf0] }
 0x488   : > { %9280 = vmatpush.bf16.msra.mxu0 %v13835_v0  ;;  %v9054_v49 = vpop.f32.mrf.mxu2  ;;  %v9030_v0 = vpop.f32.mrf.mxu0  ;;  %v13931_v57 = vor.u32 %v15420_v55, %v13928_v44  ;;  %v15492_v41 = vld [vmem:[#allocation5 + $0x2364] sm:$0xf] }
 0x489   : > { %9293 = vmatpush.bf16.msra.mxu1 %v13899_v37  ;;  %v9055_v35 = vadd.f32 %v9054_v49, %v9042_v24  ;;  %v9067_v21 = vpop.f32.mrf.mxu3  ;;  %v13803_v37 = vor.u32 %v15388_v19, %v13800_v23  ;;  %v15510_v24 = vld [vmem:[#allocation5 + $0x23f4] sm:$0xf]  ;;  %v14152_v23 = vld [vmem:[#allocation5 + $0x22e8] sm:$0xf0]  ;;  %v15508_v49 = vld [vmem:[#allocation5 + $0x23e4] sm:$0xf] }
 0x48a   : > { %9306 = vmatpush.bf16.msra.mxu2 %v13963_v14  ;;  %v9043_v14 = vpop.f32.mrf.mxu1  ;;  %v14291_v19 = vor.u32 %v15510_v24, %v14288_v36  ;;  %v16596_v0 = vld [vmem:[#allocation52_spill] sm:$0xff]  ;;  %v14256_v24 = vld [vmem:[#allocation5 + $0x23b8] sm:$0xf0] }
 0x48b   : > { %9319 = vmatpush.bf16.msra.mxu3 %v14027_v45  ;;  %v16420_v15 = vadd.f32 %v9067_v21, %v9055_v35  ;;  %v13792_v45 = vld [vmem:[#allocation5 + $0x2018] sm:$0xf0]  ;;  %v15458_v21 = vld [vmem:[#allocation5 + $0x2254] sm:$0xf] }
 0x48c   : > { %9281 = vmatpush.bf16.msra.mxu0 %v13827_v59  ;;  %v13795_v10 = vor.u32 %v15386_v4, %v13792_v45  ;;  %v15384_v59 = vld [vmem:[#allocation5 + $0x2004] sm:$0xf]  ;;  %v14144_v14 = vld [vmem:[#allocation5 + $0x22d8] sm:$0xf0]  ;;  %v14083_v1 = vor.u32 %v15458_v21, %v14080_v17 }
 0x48d   : > { %9294 = vmatpush.bf16.msra.mxu1 %v13891_v13  ;;  %v13784_v13 = vld [vmem:[#allocation5 + $0x2008] sm:$0xf0]  ;;  %v16597_v4 = vld [vmem:[#allocation53_spill] sm:$0xff]  ;;  %v16598_v45 = vld [vmem:[#allocation54_spill] sm:$0xff]  ;;  %v14147_v7 = vor.u32 %v15474_v22, %v14144_v14 }
 0x48e   : > { %9307 = vmatpush.bf16.msra.mxu2 %v13955_v60  ;;  %v13859_v60 = vor.u32 %v15402_v26, %v13856_v5  ;;  %v15506_v26 = vld [vmem:[#allocation5 + $0x23d4] sm:$0xf]  ;;  %v16599_v5 = vld [vmem:[#allocation55_spill] sm:$0xff] }
 0x48f   : > { %9320 = vmatpush.bf16.msra.mxu3 %v14019_v12  ;;  %v15416_v12 = vld [vmem:[#allocation5 + $0x2104] sm:$0xf]  ;;  %v15466_v14 = vld [vmem:[#allocation5 + $0x2294] sm:$0xf] }
 0x490   : > { %9282 = vmatpush.bf16.msra.mxu0 %v13819_v47  ;;  %v9056_v61 = vpop.f32.mrf.mxu2  ;;  %v15478_v47 = vld [vmem:[#allocation5 + $0x22f4] sm:$0xf] }
 0x491   : > { %9295 = vmatpush.bf16.msra.mxu1 %v13883_v6  ;;  %v9069_v51 = vpop.f32.mrf.mxu3  ;;  %v13787_v6 = vor.u32 %v15384_v59, %v13784_v13  ;;  %v15472_v59 = vld [vmem:[#allocation5 + $0x22c4] sm:$0xf] }
 0x492   : > { %9308 = vmatpush.bf16.msra.mxu2 %v13947_v29  ;;  %v14160_v29 = vld [vmem:[#allocation5 + $0x22f8] sm:$0xf0]  ;;  %v15470_v51 = vld [vmem:[#allocation5 + $0x22b4] sm:$0xf] }
 0x493   : > { %9321 = vmatpush.bf16.msra.mxu3 %v14011_v33  ;;  %v13915_v33 = vor.u32 %v15416_v12, %v13912_v2  ;;  %v14163_v38 = vor.u32 %v15478_v47, %v14160_v29  ;;  %v15504_v12 = vld [vmem:[#allocation5 + $0x23c4] sm:$0xf]  ;;  %v14064_v47 = vld [vmem:[#allocation5 + $0x2238] sm:$0xf0] }
 0x494   : > { %9283 = vmatpush.bf16.msra.mxu0 %v13811_v20  ;;  %v15460_v20 = vld [vmem:[#allocation5 + $0x2264] sm:$0xf]  ;;  %v14067_v36 = vor.u32 %v15454_v8, %v14064_v47  ;;  %v15518_v8 = vld [vmem:[#allocation8 + $0x30] sm:$0xff]  ;;  %v15517_v47 = vld [vmem:[#allocation8 + $0x28] sm:$0xff] }
 0x495   : > { %9296 = vmatpush.bf16.msra.mxu1 %v13875_v46  ;;  %v14088_v46 = vld [vmem:[#allocation5 + $0x2268] sm:$0xf0] }
 0x496   : > { %9309 = vmatpush.bf16.msra.mxu2 %v13939_v43  ;;  %v15476_v43 = vld [vmem:[#allocation5 + $0x22e4] sm:$0xf]  ;;  %v14091_v55 = vor.u32 %v15460_v20, %v14088_v46 }
 0x497   : > { %9322 = vmatpush.bf16.msra.mxu3 %v14003_v42  ;;  %v14216_v42 = vld [vmem:[#allocation5 + $0x2368] sm:$0xf0]  ;;  %v14155_v44 = vor.u32 %v15476_v43, %v14152_v23 }
 0x498   : > { %9284 = vmatpush.bf16.msra.mxu0 %v13803_v37  ;;  %v14219_v35 = vor.u32 %v15492_v41, %v14216_v42  ;;  %v14283_v37 = vor.u32 %v15508_v49, %v14280_v28  ;;  %v14120_v43 = vld [vmem:[#allocation5 + $0x22a8] sm:$0xf0]  ;;  %v15500_v49 = vld [vmem:[#allocation5 + $0x23a4] sm:$0xf] }
 0x499   : > { %9297 = vmatpush.bf16.msra.mxu1 %v13867_v56  ;;  %v15490_v56 = vld [vmem:[#allocation5 + $0x2354] sm:$0xf]  ;;  %v14184_v23 = vld [vmem:[#allocation5 + $0x2328] sm:$0xf0] }
 0x49a   : > { %9310 = vmatpush.bf16.msra.mxu2 %v13931_v57  ;;  %v14208_v57 = vld [vmem:[#allocation5 + $0x2358] sm:$0xf0]  ;;  %v14248_v28 = vld [vmem:[#allocation5 + $0x23a8] sm:$0xf0] }
 0x49b   : > { %9323 = vmatpush.bf16.msra.mxu3 %v13995_v3  ;;  %v14272_v3 = vld [vmem:[#allocation5 + $0x23d8] sm:$0xf0]  ;;  %v14211_v32 = vor.u32 %v15490_v56, %v14208_v57  ;;  %v14251_v56 = vor.u32 %v15500_v49, %v14248_v28 }
 0x49c   : > { %9285 = vmatpush.bf16.msra.mxu0 %v13795_v10  ;;  %v14072_v10 = vld [vmem:[#allocation5 + $0x2248] sm:$0xf0]  ;;  %v14275_v13 = vor.u32 %v15506_v26, %v14272_v3  ;;  %v14112_v57 = vld [vmem:[#allocation5 + $0x2298] sm:$0xf0]  ;;  %v15498_v26 = vld [vmem:[#allocation5 + $0x2394] sm:$0xf] }
 0x49d   : > { %9298 = vmatpush.bf16.msra.mxu1 %v13859_v60  ;;  %v14136_v60 = vld [vmem:[#allocation5 + $0x22c8] sm:$0xf0]  ;;  %v14075_v16 = vor.u32 %v15456_v52, %v14072_v10  ;;  %v14240_v3 = vld [vmem:[#allocation5 + $0x2398] sm:$0xf0]  ;;  %v15464_v10 = vld [vmem:[#allocation5 + $0x2284] sm:$0xf] }
 0x49e   : > { %9311 = vmatpush.bf16.msra.mxu2 %v13923_v58  ;;  %v15488_v58 = vld [vmem:[#allocation5 + $0x2344] sm:$0xf]  ;;  %v14139_v61 = vor.u32 %v15472_v59, %v14136_v60  ;;  %v14040_v52 = vld [vmem:[#allocation5 + $0x2208] sm:$0xf0]  ;;  %v14243_v59 = vor.u32 %v15498_v26, %v14240_v3 }
 0x49f   : > { %9324 = vmatpush.bf16.msra.mxu3 %v13987_v40  ;;  %v14264_v40 = vld [vmem:[#allocation5 + $0x23c8] sm:$0xf0]  ;;  %v14203_v25 = vor.u32 %v15488_v58, %v14200_v11  ;;  %v15480_v60 = vld [vmem:[#allocation5 + $0x2304] sm:$0xf] }
 0x4a0   : > { %9286 = vmatpush.bf16.msra.mxu0 %v13787_v6  ;;  %v9080_v39 = vpop.f32.mrf.mxu0  ;;  %v14267_v6 = vor.u32 %v15504_v12, %v14264_v40  ;;  %v14168_v58 = vld [vmem:[#allocation5 + $0x2308] sm:$0xf0]  ;;  %v15524_v3 = vld [vmem:[#allocation8 + $0x60] sm:$0xff] }
 0x4a1   : > { %9299 = vmatpush.bf16.msra.mxu1 %v13851_v50  ;;  %v9081_v2 = vadd.f32 %v9080_v39, %v16420_v15  ;;  %v9093_v63 = vpop.f32.mrf.mxu1  ;;  %v14192_v50 = vld [vmem:[#allocation5 + $0x2338] sm:$0xf0]  ;;  %v14131_v15 = vor.u32 %v15470_v51, %v14128_v31  ;;  %v15496_v39 = vld [vmem:[#allocation5 + $0x2384] sm:$0xf]  ;;  %v14232_v12 = vld [vmem:[#allocation5 + $0x2388] sm:$0xf0] }
 0x4a2   : > { %9312 = vmatpush.bf16.msra.mxu2 %v13915_v33  ;;  %v15502_v33 = vld [vmem:[#allocation5 + $0x23b4] sm:$0xf] }
 0x4a3   : > { %9325 = vmatpush.bf16.msra.mxu3 %v13979_v9  ;;  %9287 = vmatmul.bf16.vlgmr.msra.gmra.mxu0 %v16596_v0  ;;  %v9094_v29 = vadd.f32 %v9093_v63, %v9081_v2  ;;  %v14195_v9 = vor.u32 %v15486_v30, %v14192_v50  ;;  %v14259_v20 = vor.u32 %v15502_v33, %v14256_v24  ;;  %v15450_v0 = vld [vmem:[#allocation5 + $0x2214] sm:$0xf]  ;;  %v15515_v50 = vld [vmem:[#allocation8 + $0x18] sm:$0xff] }
 0x4a4   : > { %9331 = vmatpush.bf16.msrb.mxu0 %v14099_v62  ;;  %9300 = vmatmul.bf16.vlgmr.msra.gmra.mxu1 %v16598_v45  ;;  %v15452_v62 = vld [vmem:[#allocation5 + $0x2224] sm:$0xf]  ;;  %v14176_v45 = vld [vmem:[#allocation5 + $0x2318] sm:$0xf0]  ;;  %v14171_v63 = vor.u32 %v15480_v60, %v14168_v58 }
 0x4a5   : > { %9344 = vmatpush.bf16.msrb.mxu1 %v14163_v38  ;;  %9313 = vmatmul.bf16.vlgmr.msra.gmra.mxu2 %v16597_v4  ;;  %v14056_v38 = vld [vmem:[#allocation5 + $0x2228] sm:$0xf0]  ;;  %v15482_v4 = vld [vmem:[#allocation5 + $0x2314] sm:$0xf] }
 0x4a6   : > { %9357 = vmatpush.bf16.msrb.mxu2 %v14227_v18  ;;  %9326 = vmatmul.bf16.vlgmr.msra.gmra.mxu3 %v16599_v5  ;;  %v15468_v18 = vld [vmem:[#allocation5 + $0x22a4] sm:$0xf] }
 0x4a7   : > { %9370 = vmatpush.bf16.msrb.mxu3 %v14291_v19  ;;  %v15484_v19 = vld [vmem:[#allocation5 + $0x2324] sm:$0xf]  ;;  %v14123_v17 = vor.u32 %v15468_v18, %v14120_v43  ;;  %v9383_v18 = vmax.f32 %v16337_v53, 0.0 }
 0x4a8   : > { %9332 = vmatpush.bf16.msrb.mxu0 %v14091_v55  ;;  %v9106_v46 = vpop.f32.mrf.mxu2  ;;  %v9082_v55 = vpop.f32.mrf.mxu0  ;;  %v14187_v22 = vor.u32 %v15484_v19, %v14184_v23 }
 0x4a9   : > { %9345 = vmatpush.bf16.msrb.mxu1 %v14155_v44  ;;  %v9107_v41 = vadd.f32 %v9106_v46, %v9094_v29  ;;  %v9119_v42 = vpop.f32.mrf.mxu3  ;;  %v14059_v44 = vor.u32 %v15452_v62, %v14056_v38  ;;  %v15516_v29 = vld [vmem:[#allocation8 + $0x20] sm:$0xff] }
 0x4aa   : > { %9358 = vmatpush.bf16.msrb.mxu2 %v14219_v35  ;;  %v9095_v35 = vpop.f32.mrf.mxu1  ;;  %v15512_v38 = vld [vmem:[#allocation8] sm:$0xff] }
 0x4ab   : > { %9371 = vmatpush.bf16.msrb.mxu3 %v14283_v37  ;;  %v9120_v21 = vadd.f32 %v9119_v42, %v9107_v41  ;;  %v14048_v37 = vld [vmem:[#allocation5 + $0x2218] sm:$0xf0] }
 0x4ac   : > { %9333 = vmatpush.bf16.msrb.mxu0 %v14083_v1  ;;  %v14051_v5 = vor.u32 %v15450_v0, %v14048_v37  ;;  %v14115_v1 = vor.u32 %v15466_v14, %v14112_v57  ;;  %v15527_v14 = vld [vmem:[#allocation8 + $0x78] sm:$0xff]  ;;  %v15526_v57 = vld [vmem:[#allocation8 + $0x70] sm:$0xff] }
 0x4ad   : > { %9346 = vmatpush.bf16.msrb.mxu1 %v14147_v7  ;;  %v14179_v7 = vor.u32 %v15482_v4, %v14176_v45  ;;  %v15525_v4 = vld [vmem:[#allocation8 + $0x68] sm:$0xff] }
 0x4ae   : > { %9359 = vmatpush.bf16.msrb.mxu2 %v14211_v32  ;;  %v15448_v32 = vld [vmem:[#allocation5 + $0x2204] sm:$0xf] }
 0x4af   : > { %9372 = vmatpush.bf16.msrb.mxu3 %v14275_v13  ;;  %v14104_v13 = vld [vmem:[#allocation5 + $0x2288] sm:$0xf0]  ;;  %v14043_v2 = vor.u32 %v15448_v32, %v14040_v52 }
 0x4b0   : > { %9334 = vmatpush.bf16.msrb.mxu0 %v14075_v16  ;;  %v9108_v11 = vpop.f32.mrf.mxu2  ;;  %v14107_v16 = vor.u32 %v15464_v10, %v14104_v13  ;;  %v15521_v52 = vld [vmem:[#allocation8 + $0x48] sm:$0xff] }
 0x4b1   : > { %9347 = vmatpush.bf16.msrb.mxu1 %v14139_v61  ;;  %v9121_v40 = vpop.f32.mrf.mxu3  ;;  %v14235_v61 = vor.u32 %v15496_v39, %v14232_v12  ;;  %v15520_v11 = vld [vmem:[#allocation8 + $0x40] sm:$0xff] }
 0x4b2   : > { %9360 = vmatpush.bf16.msrb.mxu2 %v14203_v25  ;;  %v15519_v25 = vld [vmem:[#allocation8 + $0x38] sm:$0xff] }
 0x4b3   : > { %9373 = vmatpush.bf16.msrb.mxu3 %v14267_v6 }
 0x4b4   : > { %9335 = vmatpush.bf16.msrb.mxu0 %v14067_v36 }
 0x4b5   : > { %9348 = vmatpush.bf16.msrb.mxu1 %v14131_v15 }
 0x4b6   : > { %9361 = vmatpush.bf16.msrb.mxu2 %v14195_v9 }
 0x4b7   : > { %9374 = vmatpush.bf16.msrb.mxu3 %v14259_v20  ;;  %v9385_v20 = vpack.c.bf16 %v9383_v18, %v9383_v18 }
 0x4b8   : > { %9336 = vmatpush.bf16.msrb.mxu0 %v14059_v44 }
 0x4b9   : > { %9349 = vmatpush.bf16.msrb.mxu1 %v14123_v17 }
 0x4ba   : > { %9362 = vmatpush.bf16.msrb.mxu2 %v14187_v22 }
 0x4bb   : > { %9375 = vmatpush.bf16.msrb.mxu3 %v14251_v56 }
 0x4bc   : > { %9337 = vmatpush.bf16.msrb.mxu0 %v14051_v5  ;;  %v15523_v5 = vld [vmem:[#allocation8 + $0x58] sm:$0xff] }
 0x4bd   : > { %9350 = vmatpush.bf16.msrb.mxu1 %v14115_v1 }
 0x4be   : > { %9363 = vmatpush.bf16.msrb.mxu2 %v14179_v7  ;;  %v15522_v7 = vld [vmem:[#allocation8 + $0x50] sm:$0xff] }
 0x4bf   : > { %9376 = vmatpush.bf16.msrb.mxu3 %v14243_v59 }
 0x4c0   : > { %9338 = vmatpush.bf16.msrb.mxu0 %v14043_v2  ;;  %v9132_v51 = vpop.f32.mrf.mxu0 }
 0x4c1   : > { %9351 = vmatpush.bf16.msrb.mxu1 %v14107_v16  ;;  %v9133_v6 = vadd.f32 %v9132_v51, %v9120_v21  ;;  %v9145_v31 = vpop.f32.mrf.mxu1 }
 0x4c2   : > { %9364 = vmatpush.bf16.msrb.mxu2 %v14171_v63 }
 0x4c3   : > { %9377 = vmatpush.bf16.msrb.mxu3 %v14235_v61  ;;  %9339 = vmatmul.bf16.vlgmr.msrb.gmra.mxu0 %v16296_v54  ;;  %v9146_v30 = vadd.f32 %v9145_v31, %v9133_v6 }
 0x4c4   : > { %9519 = vmatpush.bf16.msra.mxu0 %v15519_v25  ;;  %9352 = vmatmul.bf16.vlgmr.msrb.gmra.mxu1 %v16300_v27  ;;  %v15514_v27 = vld [vmem:[#allocation8 + $0x10] sm:$0xff] }
 0x4c5   : > { %9365 = vmatmul.bf16.vlgmr.msrb.gmra.mxu2 %v16298_v48  ;;  %9532 = vmatpush.bf16.msra.mxu1 %v15527_v14 }
 0x4c6   : > { %9378 = vmatmul.bf16.vlgmr.msrb.gmra.mxu3 %v16302_v34  ;;  %v15513_v34 = vld [vmem:[#allocation8 + $0x8] sm:$0xff] }
 0x4c8   : > { %9520 = vmatpush.bf16.msra.mxu0 %v15518_v8  ;;  %v9158_v33 = vpop.f32.mrf.mxu2  ;;  %v9134_v54 = vpop.f32.mrf.mxu0 }
 0x4c9   : > { %v9159_v24 = vadd.f32 %v9158_v33, %v9146_v30  ;;  %v9171_v36 = vpop.f32.mrf.mxu3  ;;  %v9147_v15 = vpop.f32.mrf.mxu1  ;;  %9533 = vmatpush.bf16.msra.mxu1 %v15526_v57 }
 0x4cb   : > { %v9172_v48 = vadd.f32 %v9171_v36, %v9159_v24 }
 0x4cc   : > { %9521 = vmatpush.bf16.msra.mxu0 %v15517_v47 }
 0x4cd   : > { %9534 = vmatpush.bf16.msra.mxu1 %v15525_v4 }
 0x4d0   : > { %9522 = vmatpush.bf16.msra.mxu0 %v15516_v29  ;;  %v9160_v9 = vpop.f32.mrf.mxu2 }
 0x4d1   : > { %v9173_v62 = vpop.f32.mrf.mxu3  ;;  %9535 = vmatpush.bf16.msra.mxu1 %v15524_v3 }
 0x4d2   : > { %v15622_v62 = vld [vmem:[#allocation10] ss:$0 sm:$0xff] }
 0x4d4   : > { %9523 = vmatpush.bf16.msra.mxu0 %v15515_v50 }
 0x4d5   : > { %9536 = vmatpush.bf16.msra.mxu1 %v15523_v5 }
 0x4d8   : > { %9524 = vmatpush.bf16.msra.mxu0 %v15514_v27 }
 0x4d9   : > { %9537 = vmatpush.bf16.msra.mxu1 %v15522_v7 }
 0x4dc   : > { %9525 = vmatpush.bf16.msra.mxu0 %v15513_v34 }
 0x4dd   : > { %9538 = vmatpush.bf16.msra.mxu1 %v15521_v52 }
 0x4e0   : > { %9526 = vmatpush.bf16.msra.mxu0 %v15512_v38  ;;  %v9184_v46 = vpop.f32.mrf.mxu0 }
 0x4e1   : > { %v9185_v43 = vadd.f32 %v9184_v46, %v9172_v48  ;;  %v9197_v19 = vpop.f32.mrf.mxu1  ;;  %9539 = vmatpush.bf16.msra.mxu1 %v15520_v11 }
 0x4e3   : > { %9527 = vmatmul.bf16.vlgmr.msra.gmra.mxu0 %v9385_v20  ;;  %v9198_v23 = vadd.f32 %v9197_v19, %v9185_v43 }
 0x4e8   : > { %v9210_v41 = vpop.f32.mrf.mxu2  ;;  %v9186_v28 = vpop.f32.mrf.mxu0 }
 0x4e9   : > { %v9211_v42 = vadd.f32 %v9210_v41, %v9198_v23  ;;  %v9223_v49 = vpop.f32.mrf.mxu3  ;;  %v9199_v55 = vpop.f32.mrf.mxu1 }
 0x4eb   : > { %v9224_v44 = vadd.f32 %v9223_v49, %v9211_v42 }
 0x4f0   : > { %v9212_v35 = vpop.f32.mrf.mxu2 }
 0x4f1   : > { %v9225_v21 = vpop.f32.mrf.mxu3 }
 0x500   : > { %v9236_v17 = vpop.f32.mrf.mxu0 }
 0x501   : > { %v9249_v22 = vpop.f32.mrf.mxu1  ;;  %v9237_v10 = vadd.f32 %v9236_v17, %v9224_v44 }
 0x503   : > { %v9250_v39 = vadd.f32 %v9249_v22, %v9237_v10 }
 0x508   : > { %v9262_v0 = vpop.f32.mrf.mxu2  ;;  %v9238_v53 = vpop.f32.mrf.mxu0 }
 0x509   : > { %v9275_v37 = vpop.f32.mrf.mxu3  ;;  %v9251_v56 = vpop.f32.mrf.mxu1  ;;  %v9263_v12 = vadd.f32 %v9262_v0, %v9250_v39 }
 0x50b   : > { %v9276_v16 = vadd.f32 %v9275_v37, %v9263_v12 }
 0x510   : > { %v9264_v45 = vpop.f32.mrf.mxu2 }
 0x511   : > { %v9277_v26 = vpop.f32.mrf.mxu3 }
 0x520   : > { %v9288_v1 = vpop.f32.mrf.mxu0 }
 0x521   : > { %v9301_v32 = vpop.f32.mrf.mxu1  ;;  %v9289_v63 = vadd.f32 %v9288_v1, %v9276_v16 }
 0x523   : > { %v9302_v61 = vadd.f32 %v9301_v32, %v9289_v63 }
 0x528   : > { %v9314_v59 = vpop.f32.mrf.mxu2  ;;  %v9290_v60 = vpop.f32.mrf.mxu0 }
 0x529   : > { %v9327_v13 = vpop.f32.mrf.mxu3  ;;  %v9303_v58 = vpop.f32.mrf.mxu1  ;;  %v9315_v25 = vadd.f32 %v9314_v59, %v9302_v61 }
 0x52b   : > { %v9328_v8 = vadd.f32 %v9327_v13, %v9315_v25 }
 0x530   : > { %v9316_v40 = vpop.f32.mrf.mxu2 }
 0x531   : > { %v9329_v2 = vpop.f32.mrf.mxu3 }
 0x540   : > { %v9340_v47 = vpop.f32.mrf.mxu0 }
 0x541   : > { %v9353_v51 = vpop.f32.mrf.mxu1  ;;  %v9341_v6 = vadd.f32 %v9340_v47, %v9328_v8 }
 0x543   : > { %v9354_v29 = vadd.f32 %v9353_v51, %v9341_v6 }
 0x548   : > { %v9366_v31 = vpop.f32.mrf.mxu2  ;;  %v9342_v33 = vpop.f32.mrf.mxu0 }
 0x549   : > { %v9367_v30 = vadd.f32 %v9366_v31, %v9354_v29  ;;  %v9379_v50 = vpop.f32.mrf.mxu3  ;;  %v9355_v24 = vpop.f32.mrf.mxu1 }
 0x54b   : > { %v9380_v36 = vadd.f32 %v9379_v50, %v9367_v30 }
 0x54d   : > { %v9384_v54 = vmax.f32 %v9380_v36, 0.0 }
 0x54f   : > { %v9386_v27 = vpack.c.bf16 %v9384_v54, %v9384_v54 }
 0x550   : > { %v9368_v15 = vpop.f32.mrf.mxu2 }
 0x551   : > { %v9381_v48 = vpop.f32.mrf.mxu3  ;;  %9540 = vmatmul.bf16.vlgmr.msra.gmra.mxu1 %v9386_v27 }
 0x560   : > { %v9528_v34 = vpop.f32.mrf.mxu0 }
 0x561   : > { %v9529_v38 = vadd.f32 %v15622_v62, %v9528_v34 }
 0x568   : > { %v9530_v9 = vpop.f32.mrf.mxu0 }
 0x5ce   : > { %v9541_v18 = vpop.f32.mrf.mxu1 }
 0x5cf   : > { %v9542_v20 = vadd.f32 %v9541_v18, %v9529_v38 }
 0x5d1   : > { %9545 = vst [vmem:[%s304_s28] sm:$0xff] %v9542_v20 }
 0x5d2   : > { %15801 = shalt.err (!%p15798_p9)
}
 0x5d3   : > { %15549 = dma.vmem_to_hbm [thread:$0]  (%p15971_p4), %s9560_s29, 128, %s9562_s30, %s9547_s8  }
 0x5d6   : > { %v9543_v46 = vpop.f32.mrf.mxu1 }
 0x5d7 PF: > { %s9573_s7 = sand.u32 1, %s15836_s18   ;;  %p16600_p10 = scmp.ge.s32.totalorder %s15848_s21, 2 }
 0x5d8   : > { %s9574_s23 = scalar_lea.sflag [#allocation4], %s9573_s7 }
 0x5d9   : > { %p15569_p11 = pnand %p16600_p10, %p15975_p6 }
 0x5db   : > { %p15570_p13 = pneg %p15569_p11 }
 0x5dd   : > { %15831 = dma.done.wait (%p15570_p13), %s9574_s23, 128  }
 0x5de   : > { %15833 = vsyncadd (%p15570_p13), %s9574_s23, 4294967168  ;;  %p20_p0 = scmp.ge.s32.totalorder %s15949_s6, 4   ;;  %s16601_s18 = smov %s15840_s19 }
 0x5df   : > { %s16602_s19 = smov %s15844_s20  ;;  %s16603_s20 = smov %s15960_s10 }
 0x5e0   : > { %s16604_s21 = smov %s15949_s6  ;;  %22 = sbr.rel (!%p20_p0) target bundleno = 9 (0x9), region = 101 }
 0x5e5   :  { %9580 = vsyncpa [#allocation3], 1 }
 0x5e6   :  { %9582 = vsyncpa [#allocation3 + $0x1], 1 }
 0x5e7   :  { %9583 = vsyncpa [#allocation6], 1 }
 0x5e8   :  { %9584 = vsyncpa [#allocation9], 1 }
 0x5e9   :  { %9585 = vsyncpa [#allocation4], 1 }
 0x5ea   :  { %9587 = vsyncpa [#allocation4 + $0x1], 1 }

</bundles_post_ra>
